<compile_context>
chip_gen: v7x
topology: tpu7x:2x2x1
jax: 0.10.0
libtpu: 0.0.40
codegen_flags: <defaults>
</compile_context>

<pallas_src>
import jax
import jax.numpy as jnp
from jax.experimental import pallas as pl
from jax.experimental.pallas import tpu as pltpu

EPS = 1e-5            # nn.BatchNorm2d default eps
NEG_SLOPE = 0.2       # NonLinear(None) -> LeakyReLU(negative_slope=0.2)
VMEM_LIMIT = 32 * 1024 * 1024
ROW_TILE_TARGET = 8   # output rows per grid step (keeps v7x VMEM happy)


# --------------------------------------------------------------------------
# helpers
# --------------------------------------------------------------------------
def _pick_row_tile(h, target=ROW_TILE_TARGET):
    """Largest divisor of h that is <= target (static)."""
    for t in range(min(h, target), 0, -1):
        if h % t == 0:
            return t
    return 1


def _build_row_windows(xp, th):
    """(N, H+2, Wp, C) padded input -> (N, GH, th+2, Wp, C) overlapping
    row windows so each grid step gets its halo via a plain Blocked spec."""
    h = xp.shape[1] - 2
    gh = h // th
    rows = jnp.arange(gh)[:, None] * th + jnp.arange(th + 2)[None, :]
    return xp[:, rows]


# --------------------------------------------------------------------------
# kernel 1: conv (k=1 or k=3, stride 1) + bias + per-tile BN partial stats
# --------------------------------------------------------------------------
def _make_conv_kernel(th, w_img, cin, cout, k):
    kdim = k * k * cin

    def kernel(x_ref, w_ref, b_ref, y_ref, stats_ref):
        if k == 3:
            xw = x_ref[0, 0].astype(jnp.float32)            # (th+2, w+2, cin)
            taps = [xw[dy:dy + th, dx:dx + w_img, :]
                    for dy in range(3) for dx in range(3)]
            patches = jnp.concatenate(taps, axis=-1)         # (th, w, 9*cin)
        else:                                                # 1x1 conv
            patches = x_ref[0].astype(jnp.float32)           # (th, w, cin)

        patches = patches.reshape(th * w_img, kdim)          # im2col
        acc = jnp.dot(patches, w_ref[...].astype(jnp.float32),
                      preferred_element_type=jnp.float32)    # one MXU matmul
        acc = acc + b_ref[...].astype(jnp.float32)           # (th*w, cout)

        y_ref[...] = acc.reshape(1, th, w_img, cout).astype(y_ref.dtype)

        # per-tile per-channel partial sums for the two-pass BatchNorm
        ssum = jnp.sum(acc, axis=0, keepdims=True)           # (1, cout)
        ssq = jnp.sum(acc * acc, axis=0, keepdims=True)      # (1, cout)
        stats_ref[...] = jnp.concatenate([ssum, ssq], axis=0).reshape(
            1, 1, 2, cout)

    return kernel


def conv2d_pallas(x, w_hwio, b, *, k, prepadded=False):
    """x: (N, H, W, Cin) NHWC (if prepadded and k==3: (N, Hout+2, Wout+2, Cin)).
    Returns (conv+bias output (N, H, W, Cout), per-tile stats (N, GH, 2, Cout))."""
    n, cin = x.shape[0], x.shape[-1]
    cout = w_hwio.shape[-1]

    if k == 3:
        xp = x if prepadded else jnp.pad(
            x, ((0, 0), (1, 1), (1, 1), (0, 0)), mode="reflect")
        hp, wp = xp.shape[1], xp.shape[2]
        h, w_img = hp - 2, wp - 2
        th = _pick_row_tile(h)
        gh = h // th
        conv_in = _build_row_windows(xp, th)        # (n, gh, th+2, wp, cin)
        kdim = 9 * cin
        in_specs = [
            pl.BlockSpec((1, 1, th + 2, wp, cin), lambda i, j: (i, j, 0, 0, 0)),
            pl.BlockSpec((kdim, cout), lambda i, j: (0, 0)),
            pl.BlockSpec((1, cout), lambda i, j: (0, 0)),
        ]
    else:  # k == 1
        h, w_img = x.shape[1], x.shape[2]
        th = _pick_row_tile(h)
        gh = h // th
        conv_in = x
        kdim = cin
        in_specs = [
            pl.BlockSpec((1, th, w_img, cin), lambda i, j: (i, j, 0, 0)),
            pl.BlockSpec((kdim, cout), lambda i, j: (0, 0)),
            pl.BlockSpec((1, cout), lambda i, j: (0, 0)),
        ]

    w2d = w_hwio.reshape(kdim, cout).astype(jnp.float32)
    b2d = b.reshape(1, cout).astype(jnp.float32)

    flops = 2 * n * h * w_img * kdim * cout
    bytes_accessed = 4 * int(conv_in.size + w2d.size + b2d.size
                             + n * h * w_img * cout + n * gh * 2 * cout)

    y, stats = pl.pallas_call(
        _make_conv_kernel(th, w_img, cin, cout, k),
        grid=(n, gh),
        in_specs=in_specs,
        out_specs=(
            pl.BlockSpec((1, th, w_img, cout), lambda i, j: (i, j, 0, 0)),
            pl.BlockSpec((1, 1, 2, cout), lambda i, j: (i, j, 0, 0)),
        ),
        out_shape=(
            jax.ShapeDtypeStruct((n, h, w_img, cout), x.dtype),
            jax.ShapeDtypeStruct((n, gh, 2, cout), jnp.float32),
        ),
        compiler_params=pltpu.CompilerParams(
            dimension_semantics=("parallel", "parallel"),
            vmem_limit_bytes=VMEM_LIMIT),
        cost_estimate=pl.CostEstimate(flops=flops, transcendentals=0,
                                      bytes_accessed=bytes_accessed),
    )(conv_in, w2d, b2d)
    return y, stats


# --------------------------------------------------------------------------
# kernel 2: BatchNorm (precomputed scale/shift) + LeakyReLU, elementwise
# --------------------------------------------------------------------------
def _make_bn_act_kernel(c):
    def kernel(y_ref, s_ref, t_ref, o_ref):
        y = y_ref[...].astype(jnp.float32)
        s = s_ref[...].astype(jnp.float32).reshape(1, 1, 1, c)
        t = t_ref[...].astype(jnp.float32).reshape(1, 1, 1, c)
        z = y * s + t
        o_ref[...] = jnp.where(z > 0, z, NEG_SLOPE * z).astype(o_ref.dtype)
    return kernel


def bn_lrelu_pallas(y, scale, shift):
    n, h, w_img, c = y.shape
    th = _pick_row_tile(h)
    gh = h // th
    return pl.pallas_call(
        _make_bn_act_kernel(c),
        grid=(n, gh),
        in_specs=[
            pl.BlockSpec((1, th, w_img, c), lambda i, j: (i, j, 0, 0)),
            pl.BlockSpec((1, c), lambda i, j: (0, 0)),
            pl.BlockSpec((1, c), lambda i, j: (0, 0)),
        ],
        out_specs=pl.BlockSpec((1, th, w_img, c), lambda i, j: (i, j, 0, 0)),
        out_shape=jax.ShapeDtypeStruct((n, h, w_img, c), y.dtype),
        compiler_params=pltpu.CompilerParams(
            dimension_semantics=("parallel", "parallel"),
            vmem_limit_bytes=VMEM_LIMIT),
    )(y, scale.reshape(1, c).astype(jnp.float32),
      shift.reshape(1, c).astype(jnp.float32))


# --------------------------------------------------------------------------
# layer wrappers
# --------------------------------------------------------------------------
def conv_bn_lrelu(x, w_hwio, b, gamma, beta, *, k):
    """reflpad(k==3) + conv + BatchNorm2d(train) + LeakyReLU(0.2)."""
    y, stats = conv2d_pallas(x, w_hwio, b, k=k)
    n, h, w_img, _ = y.shape
    count = n * h * w_img
    ssum = jnp.sum(stats[:, :, 0, :], axis=(0, 1))
    ssq = jnp.sum(stats[:, :, 1, :], axis=(0, 1))
    mean = ssum / count
    var = jnp.maximum(ssq / count - mean * mean, 0.0)   # biased var (train BN)
    inv = jax.lax.rsqrt(var + EPS)
    scale = gamma * inv
    shift = beta - mean * scale
    return bn_lrelu_pallas(y, scale, shift)


def deconv_weight_as_conv(w_iohw):
    """ConvTranspose2d weight (Cin, Cout, kh, kw) -> equivalent correlation
    weight (kh, kw, Cin, Cout): flip spatially, swap in/out channel roles."""
    return jnp.transpose(jnp.flip(w_iohw, axis=(2, 3)), (2, 3, 0, 1))


def conv_transpose_2x(x, w_iohw, b):
    """ConvTranspose2d(k=3, stride=2, padding=1, output_padding=1) ==
    zero-dilate by 2 (pad 1 top/left, 2 bottom/right) + valid 3x3 correlation
    with the flipped kernel; reuses the fused conv kernel."""
    n, h, w_img, c = x.shape
    ho, wo = 2 * h, 2 * w_img
    xd = jnp.zeros((n, ho + 2, wo + 2, c), x.dtype)
    xd = xd.at[:, 1:2 * h:2, 1:2 * w_img:2, :].set(x)
    y, _ = conv2d_pallas(xd, deconv_weight_as_conv(w_iohw), b,
                         k=3, prepadded=True)
    return y


# --------------------------------------------------------------------------
# full SkipConnectionBlock forward (NCHW in / NCHW out)
# --------------------------------------------------------------------------
def skip_connection_block(x_nchw, params):
    x = jnp.transpose(x_nchw, (0, 2, 3, 1))                 # NCHW -> NHWC

    # ---- deeper branch: SkipDown -> SkipUp ----
    h = x
    for (w, b, g, be) in params["down_conv"]:               # MultiConvBlock
        h = conv_bn_lrelu(h, w, b, g, be, k=3)
    w, b = params["down_s2"]                                # stride-2 ConvBlock
    hd, _ = conv2d_pallas(h, w, b, k=3)
    h = hd[:, ::2, ::2, :]
    # TODO(synk): fold stride 2 into the conv kernel index_map instead of
    #             computing the stride-1 conv and subsampling.
    w, b = params["up_deconv"]                              # ConvTranspose2d
    h = conv_transpose_2x(h, w, b)
    for (w, b, g, be) in params["up_conv"]:                 # MultiConvBlock
        h = conv_bn_lrelu(h, w, b, g, be, k=3)
    deeper = h

    # ---- skip branch: conv1x1 + BN + LReLU ----
    w, b, g, be = params["skip"]
    skip = conv_bn_lrelu(x, w, b, g, be, k=1)

    # ---- Concat(dim=channel) with center-crop-to-min spatial ----
    hm = min(deeper.shape[1], skip.shape[1])
    wm = min(deeper.shape[2], skip.shape[2])

    def _crop(t):
        dh = (t.shape[1] - hm) // 2
        dw = (t.shape[2] - wm) // 2
        return t[:, dh:dh + hm, dw:dw + wm, :]

    cat = jnp.concatenate([_crop(deeper), _crop(skip)], axis=-1)

    # ---- head: conv3x3 + BN + LReLU, then conv1x1 + BN + LReLU ----
    w, b, g, be = params["post3"]
    out = conv_bn_lrelu(cat, w, b, g, be, k=3)
    w, b, g, be = params["post1"]
    out = conv_bn_lrelu(out, w, b, g, be, k=1)

    return jnp.transpose(out, (0, 3, 1, 2))                 # NHWC -> NCHW


# --------------------------------------------------------------------------
# pure-JAX reference (XLA convs) for a numerical sanity check
# --------------------------------------------------------------------------
def _ref_conv(x, w_hwio, b, stride=1, pad=1):
    if pad:
        x = jnp.pad(x, ((0, 0), (pad, pad), (pad, pad), (0, 0)), mode="reflect")
    y = jax.lax.conv_general_dilated(
        x, w_hwio, (stride, stride), "VALID",
        dimension_numbers=("NHWC", "HWIO", "NHWC"))
    return y + b


def _ref_deconv(x, w_iohw, b):
    y = jax.lax.conv_general_dilated(
        x, deconv_weight_as_conv(w_iohw), (1, 1), ((1, 2), (1, 2)),
        lhs_dilation=(2, 2), dimension_numbers=("NHWC", "HWIO", "NHWC"))
    return y + b


def _ref_bn_lrelu(y, gamma, beta):
    mean = jnp.mean(y, axis=(0, 1, 2), keepdims=True)
    var = jnp.mean((y - mean) ** 2, axis=(0, 1, 2), keepdims=True)
    z = (y - mean) * jax.lax.rsqrt(var + EPS) * gamma + beta
    return jnp.where(z > 0, z, NEG_SLOPE * z)


def reference_forward(x_nchw, params):
    x = jnp.transpose(x_nchw, (0, 2, 3, 1))
    h = x
    for (w, b, g, be) in params["down_conv"]:
        h = _ref_bn_lrelu(_ref_conv(h, w, b), g, be)
    w, b = params["down_s2"]
    h = _ref_conv(h, w, b, stride=2)
    w, b = params["up_deconv"]
    h = _ref_deconv(h, w, b)
    for (w, b, g, be) in params["up_conv"]:
        h = _ref_bn_lrelu(_ref_conv(h, w, b), g, be)
    deeper = h
    w, b, g, be = params["skip"]
    skip = _ref_bn_lrelu(_ref_conv(x, w, b, pad=0), g, be)
    hm = min(deeper.shape[1], skip.shape[1])
    wm = min(deeper.shape[2], skip.shape[2])

    def _crop(t):
        dh = (t.shape[1] - hm) // 2
        dw = (t.shape[2] - wm) // 2
        return t[:, dh:dh + hm, dw:dw + wm, :]

    cat = jnp.concatenate([_crop(deeper), _crop(skip)], axis=-1)
    w, b, g, be = params["post3"]
    out = _ref_bn_lrelu(_ref_conv(cat, w, b), g, be)
    w, b, g, be = params["post1"]
    out = _ref_bn_lrelu(_ref_conv(out, w, b, pad=0), g, be)
    return jnp.transpose(out, (0, 3, 1, 2))


# --------------------------------------------------------------------------
# synthetic parameter init (mimics PyTorch uniform bounds; BN gamma=1, beta=0)
# --------------------------------------------------------------------------
def _conv_init(key, cin, cout, k):
    kw, kb = jax.random.split(key)
    bound = 1.0 / float((cin * k * k) ** 0.5)
    w_oihw = jax.random.uniform(kw, (cout, cin, k, k), jnp.float32, -bound, bound)
    b = jax.random.uniform(kb, (cout,), jnp.float32, -bound, bound)
    return jnp.transpose(w_oihw, (2, 3, 1, 0)), b            # (kH,kW,Cin,Cout)


def _deconv_init(key, cin, cout, k=3):
    kw, kb = jax.random.split(key)
    bound = 1.0 / float((cout * k * k) ** 0.5)
    w_iohw = jax.random.uniform(kw, (cin, cout, k, k), jnp.float32, -bound, bound)
    b = jax.random.uniform(kb, (cout,), jnp.float32, -bound, bound)
    return w_iohw, b


def init_params(key, in_ch, ch, skip_ch=4):
    keys = jax.random.split(key, 8)
    bn = lambda c: (jnp.ones((c,), jnp.float32), jnp.zeros((c,), jnp.float32))
    p = {"down_conv": [], "up_conv": []}
    for i in range(2):
        w, b = _conv_init(keys[i], in_ch, in_ch, 3)
        p["down_conv"].append((w, b) + bn(in_ch))
    p["down_s2"] = _conv_init(keys[2], in_ch, ch, 3)
    p["up_deconv"] = _deconv_init(keys[3], ch, ch, 3)
    for i in range(2):
        w, b = _conv_init(keys[4 + i], ch, ch, 3)
        p["up_conv"].append((w, b) + bn(ch))
    wsk, bsk = _conv_init(keys[6], in_ch, skip_ch, 1)
    p["skip"] = (wsk, bsk) + bn(skip_ch)
    k7, k8 = jax.random.split(keys[7])
    w3, b3 = _conv_init(k7, ch + skip_ch, in_ch, 3)
    p["post3"] = (w3, b3) + bn(in_ch)
    w1, b1 = _conv_init(k8, in_ch, in_ch, 1)
    p["post1"] = (w1, b1) + bn(in_ch)
    return p


# --------------------------------------------------------------------------
if __name__ == "__main__":
    key = jax.random.PRNGKey(0)
    k_x, k_p = jax.random.split(key)

    N, IN_CH, CH, H, W = 2, 4, 8, 16, 16
    x = jax.random.normal(k_x, (N, IN_CH, H, W), jnp.float32)
    params = init_params(k_p, IN_CH, CH, skip_ch=4)

    out = jax.jit(skip_connection_block)(x, params)
    jax.block_until_ready(out)
    assert out.shape == (N, IN_CH, H, W), out.shape

    ref = reference_forward(x, params)
    err = float(jnp.max(jnp.abs(out - ref)))
    assert err < 2e-2, f"max abs error vs reference: {err}"

    print("KERNEL_OK")
</pallas_src>

<mosaic_0001>
module attributes {stable_mosaic.version = 11 : i64} {
  func.func @kernel(%arg0: i32, %arg1: i32, %arg2: memref<1x1x10x18x4xf32, #tpu.memory_space<vmem>>, %arg3: memref<36x4xf32, #tpu.memory_space<vmem>>, %arg4: memref<1x4xf32, #tpu.memory_space<vmem>>, %arg5: memref<1x8x16x4xf32, #tpu.memory_space<vmem>>, %arg6: memref<1x1x2x4xf32, #tpu.memory_space<vmem>>) attributes {dimension_semantics = [#tpu.dimension_semantics<parallel>, #tpu.dimension_semantics<parallel>], iteration_bounds = array<i64: 2, 2>, scalar_prefetch = 0 : i64, scratch_operands = 0 : i64, tpu.core_type = #tpu.core_type<tc>, window_params = [{transform_indices = @transform_0, window_bounds = array<i64: 1, 1, 10, 18, 4>}, {pipeline_mode = #tpu.pipeline_mode<synchronous>, transform_indices = @transform_1, window_bounds = array<i64: 36, 4>}, {pipeline_mode = #tpu.pipeline_mode<synchronous>, transform_indices = @transform_2, window_bounds = array<i64: 1, 4>}, {transform_indices = @transform_3, window_bounds = array<i64: 1, 8, 16, 4>}, {transform_indices = @transform_4, window_bounds = array<i64: 1, 1, 2, 4>}]} {
    %c0 = arith.constant 0 : index
    %c0_0 = arith.constant 0 : index
    %c0_1 = arith.constant 0 : index
    %c0_2 = arith.constant 0 : index
    %c0_3 = arith.constant 0 : index
    %0 = vector.load %arg2[%c0, %c0_0, %c0_1, %c0_2, %c0_3] : memref<1x1x10x18x4xf32, #tpu.memory_space<vmem>>, vector<1x1x10x18x4xf32>
    %1 = vector.shape_cast %0 : vector<1x1x10x18x4xf32> to vector<10x18x4xf32>
    %2 = vector.extract_strided_slice %1 {offsets = [0, 0, 0], sizes = [8, 16, 4], strides = [1, 1, 1]} : vector<10x18x4xf32> to vector<8x16x4xf32>
    %3 = vector.extract_strided_slice %1 {offsets = [0, 1, 0], sizes = [8, 16, 4], strides = [1, 1, 1]} : vector<10x18x4xf32> to vector<8x16x4xf32>
    %4 = vector.extract_strided_slice %1 {offsets = [0, 2, 0], sizes = [8, 16, 4], strides = [1, 1, 1]} : vector<10x18x4xf32> to vector<8x16x4xf32>
    %5 = vector.extract_strided_slice %1 {offsets = [1, 0, 0], sizes = [8, 16, 4], strides = [1, 1, 1]} : vector<10x18x4xf32> to vector<8x16x4xf32>
    %6 = vector.extract_strided_slice %1 {offsets = [1, 1, 0], sizes = [8, 16, 4], strides = [1, 1, 1]} : vector<10x18x4xf32> to vector<8x16x4xf32>
    %7 = vector.extract_strided_slice %1 {offsets = [1, 2, 0], sizes = [8, 16, 4], strides = [1, 1, 1]} : vector<10x18x4xf32> to vector<8x16x4xf32>
    %8 = vector.extract_strided_slice %1 {offsets = [2, 0, 0], sizes = [8, 16, 4], strides = [1, 1, 1]} : vector<10x18x4xf32> to vector<8x16x4xf32>
    %9 = vector.extract_strided_slice %1 {offsets = [2, 1, 0], sizes = [8, 16, 4], strides = [1, 1, 1]} : vector<10x18x4xf32> to vector<8x16x4xf32>
    %10 = vector.extract_strided_slice %1 {offsets = [2, 2, 0], sizes = [8, 16, 4], strides = [1, 1, 1]} : vector<10x18x4xf32> to vector<8x16x4xf32>
    %11 = tpu.concatenate %2, %3, %4, %5, %6, %7, %8, %9, %10 in 2 : vector<8x16x4xf32>, vector<8x16x4xf32>, vector<8x16x4xf32>, vector<8x16x4xf32>, vector<8x16x4xf32>, vector<8x16x4xf32>, vector<8x16x4xf32>, vector<8x16x4xf32>, vector<8x16x4xf32> -> vector<8x16x36xf32>
    %12 = vector.shape_cast %11 : vector<8x16x36xf32> to vector<128x36xf32>
    %c0_4 = arith.constant 0 : index
    %c0_5 = arith.constant 0 : index
    %13 = vector.load %arg3[%c0_4, %c0_5] : memref<36x4xf32, #tpu.memory_space<vmem>>, vector<36x4xf32>
    %cst = arith.constant dense<0.000000e+00> : vector<128x4xf32>
    %14 = tpu.matmul %12, %13, %cst {dimension_numbers = #tpu.dot_dimension_numbers<[1], [0], [0], [1], [0, 0, 1, 1], [], []>} : vector<128x36xf32>, vector<36x4xf32>, vector<128x4xf32> -> vector<128x4xf32>
    %c0_6 = arith.constant 0 : index
    %c0_7 = arith.constant 0 : index
    %15 = vector.load %arg4[%c0_6, %c0_7] : memref<1x4xf32, #tpu.memory_space<vmem>>, vector<1x4xf32>
    %16 = vector.broadcast %15 : vector<1x4xf32> to vector<128x4xf32>
    %17 = arith.addf %14, %16 : vector<128x4xf32>
    %18 = vector.shape_cast %17 : vector<128x4xf32> to vector<1x8x16x4xf32>
    %c0_8 = arith.constant 0 : index
    %c0_9 = arith.constant 0 : index
    %c0_10 = arith.constant 0 : index
    %c0_11 = arith.constant 0 : index
    %19 = vector.load %arg5[%c0_8, %c0_9, %c0_10, %c0_11] : memref<1x8x16x4xf32, #tpu.memory_space<vmem>>, vector<1x8x16x4xf32>
    tpu.vector_store %arg5[%c0_8, %c0_9, %c0_10, %c0_11], %18 {strides = array<i32>} : memref<1x8x16x4xf32, #tpu.memory_space<vmem>>, vector<1x8x16x4xf32>,
    %cst_12 = arith.constant dense<0.000000e+00> : vector<4xf32>
    %20 = vector.multi_reduction <add>, %17, %cst_12 [0] : vector<128x4xf32> to vector<4xf32>
    %21 = vector.shape_cast %20 : vector<4xf32> to vector<1x4xf32>
    %22 = arith.mulf %17, %17 : vector<128x4xf32>
    %cst_13 = arith.constant dense<0.000000e+00> : vector<4xf32>
    %23 = vector.multi_reduction <add>, %22, %cst_13 [0] : vector<128x4xf32> to vector<4xf32>
    %24 = vector.shape_cast %23 : vector<4xf32> to vector<1x4xf32>
    %25 = tpu.concatenate %21, %24 in 0 : vector<1x4xf32>, vector<1x4xf32> -> vector<2x4xf32>
    %26 = vector.shape_cast %25 : vector<2x4xf32> to vector<1x1x2x4xf32>
    %c0_14 = arith.constant 0 : index
    %c0_15 = arith.constant 0 : index
    %c0_16 = arith.constant 0 : index
    %c0_17 = arith.constant 0 : index
    %27 = vector.load %arg6[%c0_14, %c0_15, %c0_16, %c0_17] : memref<1x1x2x4xf32, #tpu.memory_space<vmem>>, vector<1x1x2x4xf32>
    tpu.vector_store %arg6[%c0_14, %c0_15, %c0_16, %c0_17], %26 {strides = array<i32>} : memref<1x1x2x4xf32, #tpu.memory_space<vmem>>, vector<1x1x2x4xf32>,
    return
  }
  func.func @transform_0(%arg0: i32, %arg1: i32) -> (i32, i32, i32, i32, i32) {
    %c0_i32 = arith.constant 0 : i32
    %c0_i32_0 = arith.constant 0 : i32
    %c0_i32_1 = arith.constant 0 : i32
    %c0_i32_2 = arith.constant 0 : i32
    return %arg0, %arg1, %c0_i32, %c0_i32_0, %c0_i32_1 : i32, i32, i32, i32, i32
  }
  func.func @transform_1(%arg0: i32, %arg1: i32) -> (i32, i32) {
    %c0_i32 = arith.constant 0 : i32
    %c0_i32_0 = arith.constant 0 : i32
    %c0_i32_1 = arith.constant 0 : i32
    return %c0_i32, %c0_i32_0 : i32, i32
  }
  func.func @transform_2(%arg0: i32, %arg1: i32) -> (i32, i32) {
    %c0_i32 = arith.constant 0 : i32
    %c0_i32_0 = arith.constant 0 : i32
    %c0_i32_1 = arith.constant 0 : i32
    return %c0_i32, %c0_i32_0 : i32, i32
  }
  func.func @transform_3(%arg0: i32, %arg1: i32) -> (i32, i32, i32, i32) {
    %c0_i32 = arith.constant 0 : i32
    %c0_i32_0 = arith.constant 0 : i32
    %c0_i32_1 = arith.constant 0 : i32
    return %arg0, %arg1, %c0_i32, %c0_i32_0 : i32, i32, i32, i32
  }
  func.func @transform_4(%arg0: i32, %arg1: i32) -> (i32, i32, i32, i32) {
    %c0_i32 = arith.constant 0 : i32
    %c0_i32_0 = arith.constant 0 : i32
    %c0_i32_1 = arith.constant 0 : i32
    return %arg0, %arg1, %c0_i32, %c0_i32_0 : i32, i32, i32, i32
  }
}

module attributes {stable_mosaic.version = 11 : i64} {
  func.func @kernel(%arg0: i32, %arg1: i32, %arg2: memref<1x8x16x4xf32, #tpu.memory_space<vmem>>, %arg3: memref<1x4xf32, #tpu.memory_space<vmem>>, %arg4: memref<1x4xf32, #tpu.memory_space<vmem>>, %arg5: memref<1x8x16x4xf32, #tpu.memory_space<vmem>>) attributes {dimension_semantics = [#tpu.dimension_semantics<parallel>, #tpu.dimension_semantics<parallel>], iteration_bounds = array<i64: 2, 2>, scalar_prefetch = 0 : i64, scratch_operands = 0 : i64, tpu.core_type = #tpu.core_type<tc>, window_params = [{transform_indices = @transform_0, window_bounds = array<i64: 1, 8, 16, 4>}, {pipeline_mode = #tpu.pipeline_mode<synchronous>, transform_indices = @transform_1, window_bounds = array<i64: 1, 4>}, {pipeline_mode = #tpu.pipeline_mode<synchronous>, transform_indices = @transform_2, window_bounds = array<i64: 1, 4>}, {transform_indices = @transform_3, window_bounds = array<i64: 1, 8, 16, 4>}]} {
    %c0 = arith.constant 0 : index
    %c0_0 = arith.constant 0 : index
    %c0_1 = arith.constant 0 : index
    %c0_2 = arith.constant 0 : index
    %0 = vector.load %arg2[%c0, %c0_0, %c0_1, %c0_2] : memref<1x8x16x4xf32, #tpu.memory_space<vmem>>, vector<1x8x16x4xf32>
    %c0_3 = arith.constant 0 : index
    %c0_4 = arith.constant 0 : index
    %1 = vector.load %arg3[%c0_3, %c0_4] : memref<1x4xf32, #tpu.memory_space<vmem>>, vector<1x4xf32>
    %2 = vector.shape_cast %1 : vector<1x4xf32> to vector<1x1x1x4xf32>
    %c0_5 = arith.constant 0 : index
    %c0_6 = arith.constant 0 : index
    %3 = vector.load %arg4[%c0_5, %c0_6] : memref<1x4xf32, #tpu.memory_space<vmem>>, vector<1x4xf32>
    %4 = vector.shape_cast %3 : vector<1x4xf32> to vector<1x1x1x4xf32>
    %5 = vector.broadcast %2 : vector<1x1x1x4xf32> to vector<1x8x16x4xf32>
    %6 = arith.mulf %0, %5 : vector<1x8x16x4xf32>
    %7 = vector.broadcast %4 : vector<1x1x1x4xf32> to vector<1x8x16x4xf32>
    %8 = arith.addf %6, %7 : vector<1x8x16x4xf32>
    %cst = arith.constant 0.000000e+00 : f32
    %9 = vector.broadcast %cst : f32 to vector<1x8x16x4xf32>
    %10 = arith.cmpf ogt, %8, %9 : vector<1x8x16x4xf32>
    %cst_7 = arith.constant 2.000000e-01 : f32
    %11 = vector.broadcast %cst_7 : f32 to vector<1x8x16x4xf32>
    %12 = arith.mulf %11, %8 : vector<1x8x16x4xf32>
    %13 = arith.select %10, %8, %12 : vector<1x8x16x4xi1>, vector<1x8x16x4xf32>
    %c0_8 = arith.constant 0 : index
    %c0_9 = arith.constant 0 : index
    %c0_10 = arith.constant 0 : index
    %c0_11 = arith.constant 0 : index
    %14 = vector.load %arg5[%c0_8, %c0_9, %c0_10, %c0_11] : memref<1x8x16x4xf32, #tpu.memory_space<vmem>>, vector<1x8x16x4xf32>
    tpu.vector_store %arg5[%c0_8, %c0_9, %c0_10, %c0_11], %13 {strides = array<i32>} : memref<1x8x16x4xf32, #tpu.memory_space<vmem>>, vector<1x8x16x4xf32>,
    return
  }
  func.func @transform_0(%arg0: i32, %arg1: i32) -> (i32, i32, i32, i32) {
    %c0_i32 = arith.constant 0 : i32
    %c0_i32_0 = arith.constant 0 : i32
    %c0_i32_1 = arith.constant 0 : i32
    return %arg0, %arg1, %c0_i32, %c0_i32_0 : i32, i32, i32, i32
  }
  func.func @transform_1(%arg0: i32, %arg1: i32) -> (i32, i32) {
    %c0_i32 = arith.constant 0 : i32
    %c0_i32_0 = arith.constant 0 : i32
    %c0_i32_1 = arith.constant 0 : i32
    return %c0_i32, %c0_i32_0 : i32, i32
  }
  func.func @transform_2(%arg0: i32, %arg1: i32) -> (i32, i32) {
    %c0_i32 = arith.constant 0 : i32
    %c0_i32_0 = arith.constant 0 : i32
    %c0_i32_1 = arith.constant 0 : i32
    return %c0_i32, %c0_i32_0 : i32, i32
  }
  func.func @transform_3(%arg0: i32, %arg1: i32) -> (i32, i32, i32, i32) {
    %c0_i32 = arith.constant 0 : i32
    %c0_i32_0 = arith.constant 0 : i32
    %c0_i32_1 = arith.constant 0 : i32
    return %arg0, %arg1, %c0_i32, %c0_i32_0 : i32, i32, i32, i32
  }
}

module attributes {stable_mosaic.version = 11 : i64} {
  func.func @kernel(%arg0: i32, %arg1: i32, %arg2: memref<1x1x10x18x4xf32, #tpu.memory_space<vmem>>, %arg3: memref<36x8xf32, #tpu.memory_space<vmem>>, %arg4: memref<1x8xf32, #tpu.memory_space<vmem>>, %arg5: memref<1x8x16x8xf32, #tpu.memory_space<vmem>>, %arg6: memref<1x1x2x8xf32, #tpu.memory_space<vmem>>) attributes {dimension_semantics = [#tpu.dimension_semantics<parallel>, #tpu.dimension_semantics<parallel>], iteration_bounds = array<i64: 2, 2>, scalar_prefetch = 0 : i64, scratch_operands = 0 : i64, tpu.core_type = #tpu.core_type<tc>, window_params = [{transform_indices = @transform_0, window_bounds = array<i64: 1, 1, 10, 18, 4>}, {pipeline_mode = #tpu.pipeline_mode<synchronous>, transform_indices = @transform_1, window_bounds = array<i64: 36, 8>}, {pipeline_mode = #tpu.pipeline_mode<synchronous>, transform_indices = @transform_2, window_bounds = array<i64: 1, 8>}, {transform_indices = @transform_3, window_bounds = array<i64: 1, 8, 16, 8>}, {transform_indices = @transform_4, window_bounds = array<i64: 1, 1, 2, 8>}]} {
    %c0 = arith.constant 0 : index
    %c0_0 = arith.constant 0 : index
    %c0_1 = arith.constant 0 : index
    %c0_2 = arith.constant 0 : index
    %c0_3 = arith.constant 0 : index
    %0 = vector.load %arg2[%c0, %c0_0, %c0_1, %c0_2, %c0_3] : memref<1x1x10x18x4xf32, #tpu.memory_space<vmem>>, vector<1x1x10x18x4xf32>
    %1 = vector.shape_cast %0 : vector<1x1x10x18x4xf32> to vector<10x18x4xf32>
    %2 = vector.extract_strided_slice %1 {offsets = [0, 0, 0], sizes = [8, 16, 4], strides = [1, 1, 1]} : vector<10x18x4xf32> to vector<8x16x4xf32>
    %3 = vector.extract_strided_slice %1 {offsets = [0, 1, 0], sizes = [8, 16, 4], strides = [1, 1, 1]} : vector<10x18x4xf32> to vector<8x16x4xf32>
    %4 = vector.extract_strided_slice %1 {offsets = [0, 2, 0], sizes = [8, 16, 4], strides = [1, 1, 1]} : vector<10x18x4xf32> to vector<8x16x4xf32>
    %5 = vector.extract_strided_slice %1 {offsets = [1, 0, 0], sizes = [8, 16, 4], strides = [1, 1, 1]} : vector<10x18x4xf32> to vector<8x16x4xf32>
    %6 = vector.extract_strided_slice %1 {offsets = [1, 1, 0], sizes = [8, 16, 4], strides = [1, 1, 1]} : vector<10x18x4xf32> to vector<8x16x4xf32>
    %7 = vector.extract_strided_slice %1 {offsets = [1, 2, 0], sizes = [8, 16, 4], strides = [1, 1, 1]} : vector<10x18x4xf32> to vector<8x16x4xf32>
    %8 = vector.extract_strided_slice %1 {offsets = [2, 0, 0], sizes = [8, 16, 4], strides = [1, 1, 1]} : vector<10x18x4xf32> to vector<8x16x4xf32>
    %9 = vector.extract_strided_slice %1 {offsets = [2, 1, 0], sizes = [8, 16, 4], strides = [1, 1, 1]} : vector<10x18x4xf32> to vector<8x16x4xf32>
    %10 = vector.extract_strided_slice %1 {offsets = [2, 2, 0], sizes = [8, 16, 4], strides = [1, 1, 1]} : vector<10x18x4xf32> to vector<8x16x4xf32>
    %11 = tpu.concatenate %2, %3, %4, %5, %6, %7, %8, %9, %10 in 2 : vector<8x16x4xf32>, vector<8x16x4xf32>, vector<8x16x4xf32>, vector<8x16x4xf32>, vector<8x16x4xf32>, vector<8x16x4xf32>, vector<8x16x4xf32>, vector<8x16x4xf32>, vector<8x16x4xf32> -> vector<8x16x36xf32>
    %12 = vector.shape_cast %11 : vector<8x16x36xf32> to vector<128x36xf32>
    %c0_4 = arith.constant 0 : index
    %c0_5 = arith.constant 0 : index
    %13 = vector.load %arg3[%c0_4, %c0_5] : memref<36x8xf32, #tpu.memory_space<vmem>>, vector<36x8xf32>
    %cst = arith.constant dense<0.000000e+00> : vector<128x8xf32>
    %14 = tpu.matmul %12, %13, %cst {dimension_numbers = #tpu.dot_dimension_numbers<[1], [0], [0], [1], [0, 0, 1, 1], [], []>} : vector<128x36xf32>, vector<36x8xf32>, vector<128x8xf32> -> vector<128x8xf32>
    %c0_6 = arith.constant 0 : index
    %c0_7 = arith.constant 0 : index
    %15 = vector.load %arg4[%c0_6, %c0_7] : memref<1x8xf32, #tpu.memory_space<vmem>>, vector<1x8xf32>
    %16 = vector.broadcast %15 : vector<1x8xf32> to vector<128x8xf32>
    %17 = arith.addf %14, %16 : vector<128x8xf32>
    %18 = vector.shape_cast %17 : vector<128x8xf32> to vector<1x8x16x8xf32>
    %c0_8 = arith.constant 0 : index
    %c0_9 = arith.constant 0 : index
    %c0_10 = arith.constant 0 : index
    %c0_11 = arith.constant 0 : index
    %19 = vector.load %arg5[%c0_8, %c0_9, %c0_10, %c0_11] : memref<1x8x16x8xf32, #tpu.memory_space<vmem>>, vector<1x8x16x8xf32>
    tpu.vector_store %arg5[%c0_8, %c0_9, %c0_10, %c0_11], %18 {strides = array<i32>} : memref<1x8x16x8xf32, #tpu.memory_space<vmem>>, vector<1x8x16x8xf32>,
    %cst_12 = arith.constant dense<0.000000e+00> : vector<8xf32>
    %20 = vector.multi_reduction <add>, %17, %cst_12 [0] : vector<128x8xf32> to vector<8xf32>
    %21 = vector.shape_cast %20 : vector<8xf32> to vector<1x8xf32>
    %22 = arith.mulf %17, %17 : vector<128x8xf32>
    %cst_13 = arith.constant dense<0.000000e+00> : vector<8xf32>
    %23 = vector.multi_reduction <add>, %22, %cst_13 [0] : vector<128x8xf32> to vector<8xf32>
    %24 = vector.shape_cast %23 : vector<8xf32> to vector<1x8xf32>
    %25 = tpu.concatenate %21, %24 in 0 : vector<1x8xf32>, vector<1x8xf32> -> vector<2x8xf32>
    %26 = vector.shape_cast %25 : vector<2x8xf32> to vector<1x1x2x8xf32>
    %c0_14 = arith.constant 0 : index
    %c0_15 = arith.constant 0 : index
    %c0_16 = arith.constant 0 : index
    %c0_17 = arith.constant 0 : index
    %27 = vector.load %arg6[%c0_14, %c0_15, %c0_16, %c0_17] : memref<1x1x2x8xf32, #tpu.memory_space<vmem>>, vector<1x1x2x8xf32>
    tpu.vector_store %arg6[%c0_14, %c0_15, %c0_16, %c0_17], %26 {strides = array<i32>} : memref<1x1x2x8xf32, #tpu.memory_space<vmem>>, vector<1x1x2x8xf32>,
    return
  }
  func.func @transform_0(%arg0: i32, %arg1: i32) -> (i32, i32, i32, i32, i32) {
    %c0_i32 = arith.constant 0 : i32
    %c0_i32_0 = arith.constant 0 : i32
    %c0_i32_1 = arith.constant 0 : i32
    %c0_i32_2 = arith.constant 0 : i32
    return %arg0, %arg1, %c0_i32, %c0_i32_0, %c0_i32_1 : i32, i32, i32, i32, i32
  }
  func.func @transform_1(%arg0: i32, %arg1: i32) -> (i32, i32) {
    %c0_i32 = arith.constant 0 : i32
    %c0_i32_0 = arith.constant 0 : i32
    %c0_i32_1 = arith.constant 0 : i32
    return %c0_i32, %c0_i32_0 : i32, i32
  }
  func.func @transform_2(%arg0: i32, %arg1: i32) -> (i32, i32) {
    %c0_i32 = arith.constant 0 : i32
    %c0_i32_0 = arith.constant 0 : i32
    %c0_i32_1 = arith.constant 0 : i32
    return %c0_i32, %c0_i32_0 : i32, i32
  }
  func.func @transform_3(%arg0: i32, %arg1: i32) -> (i32, i32, i32, i32) {
    %c0_i32 = arith.constant 0 : i32
    %c0_i32_0 = arith.constant 0 : i32
    %c0_i32_1 = arith.constant 0 : i32
    return %arg0, %arg1, %c0_i32, %c0_i32_0 : i32, i32, i32, i32
  }
  func.func @transform_4(%arg0: i32, %arg1: i32) -> (i32, i32, i32, i32) {
    %c0_i32 = arith.constant 0 : i32
    %c0_i32_0 = arith.constant 0 : i32
    %c0_i32_1 = arith.constant 0 : i32
    return %arg0, %arg1, %c0_i32, %c0_i32_0 : i32, i32, i32, i32
  }
}

module attributes {stable_mosaic.version = 11 : i64} {
  func.func @kernel(%arg0: i32, %arg1: i32, %arg2: memref<1x1x10x18x8xf32, #tpu.memory_space<vmem>>, %arg3: memref<72x8xf32, #tpu.memory_space<vmem>>, %arg4: memref<1x8xf32, #tpu.memory_space<vmem>>, %arg5: memref<1x8x16x8xf32, #tpu.memory_space<vmem>>, %arg6: memref<1x1x2x8xf32, #tpu.memory_space<vmem>>) attributes {dimension_semantics = [#tpu.dimension_semantics<parallel>, #tpu.dimension_semantics<parallel>], iteration_bounds = array<i64: 2, 2>, scalar_prefetch = 0 : i64, scratch_operands = 0 : i64, tpu.core_type = #tpu.core_type<tc>, window_params = [{transform_indices = @transform_0, window_bounds = array<i64: 1, 1, 10, 18, 8>}, {pipeline_mode = #tpu.pipeline_mode<synchronous>, transform_indices = @transform_1, window_bounds = array<i64: 72, 8>}, {pipeline_mode = #tpu.pipeline_mode<synchronous>, transform_indices = @transform_2, window_bounds = array<i64: 1, 8>}, {transform_indices = @transform_3, window_bounds = array<i64: 1, 8, 16, 8>}, {transform_indices = @transform_4, window_bounds = array<i64: 1, 1, 2, 8>}]} {
    %c0 = arith.constant 0 : index
    %c0_0 = arith.constant 0 : index
    %c0_1 = arith.constant 0 : index
    %c0_2 = arith.constant 0 : index
    %c0_3 = arith.constant 0 : index
    %0 = vector.load %arg2[%c0, %c0_0, %c0_1, %c0_2, %c0_3] : memref<1x1x10x18x8xf32, #tpu.memory_space<vmem>>, vector<1x1x10x18x8xf32>
    %1 = vector.shape_cast %0 : vector<1x1x10x18x8xf32> to vector<10x18x8xf32>
    %2 = vector.extract_strided_slice %1 {offsets = [0, 0, 0], sizes = [8, 16, 8], strides = [1, 1, 1]} : vector<10x18x8xf32> to vector<8x16x8xf32>
    %3 = vector.extract_strided_slice %1 {offsets = [0, 1, 0], sizes = [8, 16, 8], strides = [1, 1, 1]} : vector<10x18x8xf32> to vector<8x16x8xf32>
    %4 = vector.extract_strided_slice %1 {offsets = [0, 2, 0], sizes = [8, 16, 8], strides = [1, 1, 1]} : vector<10x18x8xf32> to vector<8x16x8xf32>
    %5 = vector.extract_strided_slice %1 {offsets = [1, 0, 0], sizes = [8, 16, 8], strides = [1, 1, 1]} : vector<10x18x8xf32> to vector<8x16x8xf32>
    %6 = vector.extract_strided_slice %1 {offsets = [1, 1, 0], sizes = [8, 16, 8], strides = [1, 1, 1]} : vector<10x18x8xf32> to vector<8x16x8xf32>
    %7 = vector.extract_strided_slice %1 {offsets = [1, 2, 0], sizes = [8, 16, 8], strides = [1, 1, 1]} : vector<10x18x8xf32> to vector<8x16x8xf32>
    %8 = vector.extract_strided_slice %1 {offsets = [2, 0, 0], sizes = [8, 16, 8], strides = [1, 1, 1]} : vector<10x18x8xf32> to vector<8x16x8xf32>
    %9 = vector.extract_strided_slice %1 {offsets = [2, 1, 0], sizes = [8, 16, 8], strides = [1, 1, 1]} : vector<10x18x8xf32> to vector<8x16x8xf32>
    %10 = vector.extract_strided_slice %1 {offsets = [2, 2, 0], sizes = [8, 16, 8], strides = [1, 1, 1]} : vector<10x18x8xf32> to vector<8x16x8xf32>
    %11 = tpu.concatenate %2, %3, %4, %5, %6, %7, %8, %9, %10 in 2 : vector<8x16x8xf32>, vector<8x16x8xf32>, vector<8x16x8xf32>, vector<8x16x8xf32>, vector<8x16x8xf32>, vector<8x16x8xf32>, vector<8x16x8xf32>, vector<8x16x8xf32>, vector<8x16x8xf32> -> vector<8x16x72xf32>
    %12 = vector.shape_cast %11 : vector<8x16x72xf32> to vector<128x72xf32>
    %c0_4 = arith.constant 0 : index
    %c0_5 = arith.constant 0 : index
    %13 = vector.load %arg3[%c0_4, %c0_5] : memref<72x8xf32, #tpu.memory_space<vmem>>, vector<72x8xf32>
    %cst = arith.constant dense<0.000000e+00> : vector<128x8xf32>
    %14 = tpu.matmul %12, %13, %cst {dimension_numbers = #tpu.dot_dimension_numbers<[1], [0], [0], [1], [0, 0, 1, 1], [], []>} : vector<128x72xf32>, vector<72x8xf32>, vector<128x8xf32> -> vector<128x8xf32>
    %c0_6 = arith.constant 0 : index
    %c0_7 = arith.constant 0 : index
    %15 = vector.load %arg4[%c0_6, %c0_7] : memref<1x8xf32, #tpu.memory_space<vmem>>, vector<1x8xf32>
    %16 = vector.broadcast %15 : vector<1x8xf32> to vector<128x8xf32>
    %17 = arith.addf %14, %16 : vector<128x8xf32>
    %18 = vector.shape_cast %17 : vector<128x8xf32> to vector<1x8x16x8xf32>
    %c0_8 = arith.constant 0 : index
    %c0_9 = arith.constant 0 : index
    %c0_10 = arith.constant 0 : index
    %c0_11 = arith.constant 0 : index
    %19 = vector.load %arg5[%c0_8, %c0_9, %c0_10, %c0_11] : memref<1x8x16x8xf32, #tpu.memory_space<vmem>>, vector<1x8x16x8xf32>
    tpu.vector_store %arg5[%c0_8, %c0_9, %c0_10, %c0_11], %18 {strides = array<i32>} : memref<1x8x16x8xf32, #tpu.memory_space<vmem>>, vector<1x8x16x8xf32>,
    %cst_12 = arith.constant dense<0.000000e+00> : vector<8xf32>
    %20 = vector.multi_reduction <add>, %17, %cst_12 [0] : vector<128x8xf32> to vector<8xf32>
    %21 = vector.shape_cast %20 : vector<8xf32> to vector<1x8xf32>
    %22 = arith.mulf %17, %17 : vector<128x8xf32>
    %cst_13 = arith.constant dense<0.000000e+00> : vector<8xf32>
    %23 = vector.multi_reduction <add>, %22, %cst_13 [0] : vector<128x8xf32> to vector<8xf32>
    %24 = vector.shape_cast %23 : vector<8xf32> to vector<1x8xf32>
    %25 = tpu.concatenate %21, %24 in 0 : vector<1x8xf32>, vector<1x8xf32> -> vector<2x8xf32>
    %26 = vector.shape_cast %25 : vector<2x8xf32> to vector<1x1x2x8xf32>
    %c0_14 = arith.constant 0 : index
    %c0_15 = arith.constant 0 : index
    %c0_16 = arith.constant 0 : index
    %c0_17 = arith.constant 0 : index
    %27 = vector.load %arg6[%c0_14, %c0_15, %c0_16, %c0_17] : memref<1x1x2x8xf32, #tpu.memory_space<vmem>>, vector<1x1x2x8xf32>
    tpu.vector_store %arg6[%c0_14, %c0_15, %c0_16, %c0_17], %26 {strides = array<i32>} : memref<1x1x2x8xf32, #tpu.memory_space<vmem>>, vector<1x1x2x8xf32>,
    return
  }
  func.func @transform_0(%arg0: i32, %arg1: i32) -> (i32, i32, i32, i32, i32) {
    %c0_i32 = arith.constant 0 : i32
    %c0_i32_0 = arith.constant 0 : i32
    %c0_i32_1 = arith.constant 0 : i32
    %c0_i32_2 = arith.constant 0 : i32
    return %arg0, %arg1, %c0_i32, %c0_i32_0, %c0_i32_1 : i32, i32, i32, i32, i32
  }
  func.func @transform_1(%arg0: i32, %arg1: i32) -> (i32, i32) {
    %c0_i32 = arith.constant 0 : i32
    %c0_i32_0 = arith.constant 0 : i32
    %c0_i32_1 = arith.constant 0 : i32
    return %c0_i32, %c0_i32_0 : i32, i32
  }
  func.func @transform_2(%arg0: i32, %arg1: i32) -> (i32, i32) {
    %c0_i32 = arith.constant 0 : i32
    %c0_i32_0 = arith.constant 0 : i32
    %c0_i32_1 = arith.constant 0 : i32
    return %c0_i32, %c0_i32_0 : i32, i32
  }
  func.func @transform_3(%arg0: i32, %arg1: i32) -> (i32, i32, i32, i32) {
    %c0_i32 = arith.constant 0 : i32
    %c0_i32_0 = arith.constant 0 : i32
    %c0_i32_1 = arith.constant 0 : i32
    return %arg0, %arg1, %c0_i32, %c0_i32_0 : i32, i32, i32, i32
  }
  func.func @transform_4(%arg0: i32, %arg1: i32) -> (i32, i32, i32, i32) {
    %c0_i32 = arith.constant 0 : i32
    %c0_i32_0 = arith.constant 0 : i32
    %c0_i32_1 = arith.constant 0 : i32
    return %arg0, %arg1, %c0_i32, %c0_i32_0 : i32, i32, i32, i32
  }
}

module attributes {stable_mosaic.version = 11 : i64} {
  func.func @kernel(%arg0: i32, %arg1: i32, %arg2: memref<1x1x10x18x8xf32, #tpu.memory_space<vmem>>, %arg3: memref<72x8xf32, #tpu.memory_space<vmem>>, %arg4: memref<1x8xf32, #tpu.memory_space<vmem>>, %arg5: memref<1x8x16x8xf32, #tpu.memory_space<vmem>>, %arg6: memref<1x1x2x8xf32, #tpu.memory_space<vmem>>) attributes {dimension_semantics = [#tpu.dimension_semantics<parallel>, #tpu.dimension_semantics<parallel>], iteration_bounds = array<i64: 2, 2>, scalar_prefetch = 0 : i64, scratch_operands = 0 : i64, tpu.core_type = #tpu.core_type<tc>, window_params = [{transform_indices = @transform_0, window_bounds = array<i64: 1, 1, 10, 18, 8>}, {pipeline_mode = #tpu.pipeline_mode<synchronous>, transform_indices = @transform_1, window_bounds = array<i64: 72, 8>}, {pipeline_mode = #tpu.pipeline_mode<synchronous>, transform_indices = @transform_2, window_bounds = array<i64: 1, 8>}, {transform_indices = @transform_3, window_bounds = array<i64: 1, 8, 16, 8>}, {transform_indices = @transform_4, window_bounds = array<i64: 1, 1, 2, 8>}]} {
    %c0 = arith.constant 0 : index
    %c0_0 = arith.constant 0 : index
    %c0_1 = arith.constant 0 : index
    %c0_2 = arith.constant 0 : index
    %c0_3 = arith.constant 0 : index
    %0 = vector.load %arg2[%c0, %c0_0, %c0_1, %c0_2, %c0_3] : memref<1x1x10x18x8xf32, #tpu.memory_space<vmem>>, vector<1x1x10x18x8xf32>
    %1 = vector.shape_cast %0 : vector<1x1x10x18x8xf32> to vector<10x18x8xf32>
    %2 = vector.extract_strided_slice %1 {offsets = [0, 0, 0], sizes = [8, 16, 8], strides = [1, 1, 1]} : vector<10x18x8xf32> to vector<8x16x8xf32>
    %3 = vector.extract_strided_slice %1 {offsets = [0, 1, 0], sizes = [8, 16, 8], strides = [1, 1, 1]} : vector<10x18x8xf32> to vector<8x16x8xf32>
    %4 = vector.extract_strided_slice %1 {offsets = [0, 2, 0], sizes = [8, 16, 8], strides = [1, 1, 1]} : vector<10x18x8xf32> to vector<8x16x8xf32>
    %5 = vector.extract_strided_slice %1 {offsets = [1, 0, 0], sizes = [8, 16, 8], strides = [1, 1, 1]} : vector<10x18x8xf32> to vector<8x16x8xf32>
    %6 = vector.extract_strided_slice %1 {offsets = [1, 1, 0], sizes = [8, 16, 8], strides = [1, 1, 1]} : vector<10x18x8xf32> to vector<8x16x8xf32>
    %7 = vector.extract_strided_slice %1 {offsets = [1, 2, 0], sizes = [8, 16, 8], strides = [1, 1, 1]} : vector<10x18x8xf32> to vector<8x16x8xf32>
    %8 = vector.extract_strided_slice %1 {offsets = [2, 0, 0], sizes = [8, 16, 8], strides = [1, 1, 1]} : vector<10x18x8xf32> to vector<8x16x8xf32>
    %9 = vector.extract_strided_slice %1 {offsets = [2, 1, 0], sizes = [8, 16, 8], strides = [1, 1, 1]} : vector<10x18x8xf32> to vector<8x16x8xf32>
    %10 = vector.extract_strided_slice %1 {offsets = [2, 2, 0], sizes = [8, 16, 8], strides = [1, 1, 1]} : vector<10x18x8xf32> to vector<8x16x8xf32>
    %11 = tpu.concatenate %2, %3, %4, %5, %6, %7, %8, %9, %10 in 2 : vector<8x16x8xf32>, vector<8x16x8xf32>, vector<8x16x8xf32>, vector<8x16x8xf32>, vector<8x16x8xf32>, vector<8x16x8xf32>, vector<8x16x8xf32>, vector<8x16x8xf32>, vector<8x16x8xf32> -> vector<8x16x72xf32>
    %12 = vector.shape_cast %11 : vector<8x16x72xf32> to vector<128x72xf32>
    %c0_4 = arith.constant 0 : index
    %c0_5 = arith.constant 0 : index
    %13 = vector.load %arg3[%c0_4, %c0_5] : memref<72x8xf32, #tpu.memory_space<vmem>>, vector<72x8xf32>
    %cst = arith.constant dense<0.000000e+00> : vector<128x8xf32>
    %14 = tpu.matmul %12, %13, %cst {dimension_numbers = #tpu.dot_dimension_numbers<[1], [0], [0], [1], [0, 0, 1, 1], [], []>} : vector<128x72xf32>, vector<72x8xf32>, vector<128x8xf32> -> vector<128x8xf32>
    %c0_6 = arith.constant 0 : index
    %c0_7 = arith.constant 0 : index
    %15 = vector.load %arg4[%c0_6, %c0_7] : memref<1x8xf32, #tpu.memory_space<vmem>>, vector<1x8xf32>
    %16 = vector.broadcast %15 : vector<1x8xf32> to vector<128x8xf32>
    %17 = arith.addf %14, %16 : vector<128x8xf32>
    %18 = vector.shape_cast %17 : vector<128x8xf32> to vector<1x8x16x8xf32>
    %c0_8 = arith.constant 0 : index
    %c0_9 = arith.constant 0 : index
    %c0_10 = arith.constant 0 : index
    %c0_11 = arith.constant 0 : index
    %19 = vector.load %arg5[%c0_8, %c0_9, %c0_10, %c0_11] : memref<1x8x16x8xf32, #tpu.memory_space<vmem>>, vector<1x8x16x8xf32>
    tpu.vector_store %arg5[%c0_8, %c0_9, %c0_10, %c0_11], %18 {strides = array<i32>} : memref<1x8x16x8xf32, #tpu.memory_space<vmem>>, vector<1x8x16x8xf32>,
    %cst_12 = arith.constant dense<0.000000e+00> : vector<8xf32>
    %20 = vector.multi_reduction <add>, %17, %cst_12 [0] : vector<128x8xf32> to vector<8xf32>
    %21 = vector.shape_cast %20 : vector<8xf32> to vector<1x8xf32>
    %22 = arith.mulf %17, %17 : vector<128x8xf32>
    %cst_13 = arith.constant dense<0.000000e+00> : vector<8xf32>
    %23 = vector.multi_reduction <add>, %22, %cst_13 [0] : vector<128x8xf32> to vector<8xf32>
    %24 = vector.shape_cast %23 : vector<8xf32> to vector<1x8xf32>
    %25 = tpu.concatenate %21, %24 in 0 : vector<1x8xf32>, vector<1x8xf32> -> vector<2x8xf32>
    %26 = vector.shape_cast %25 : vector<2x8xf32> to vector<1x1x2x8xf32>
    %c0_14 = arith.constant 0 : index
    %c0_15 = arith.constant 0 : index
    %c0_16 = arith.constant 0 : index
    %c0_17 = arith.constant 0 : index
    %27 = vector.load %arg6[%c0_14, %c0_15, %c0_16, %c0_17] : memref<1x1x2x8xf32, #tpu.memory_space<vmem>>, vector<1x1x2x8xf32>
    tpu.vector_store %arg6[%c0_14, %c0_15, %c0_16, %c0_17], %26 {strides = array<i32>} : memref<1x1x2x8xf32, #tpu.memory_space<vmem>>, vector<1x1x2x8xf32>,
    return
  }
  func.func @transform_0(%arg0: i32, %arg1: i32) -> (i32, i32, i32, i32, i32) {
    %c0_i32 = arith.constant 0 : i32
    %c0_i32_0 = arith.constant 0 : i32
    %c0_i32_1 = arith.constant 0 : i32
    %c0_i32_2 = arith.constant 0 : i32
    return %arg0, %arg1, %c0_i32, %c0_i32_0, %c0_i32_1 : i32, i32, i32, i32, i32
  }
  func.func @transform_1(%arg0: i32, %arg1: i32) -> (i32, i32) {
    %c0_i32 = arith.constant 0 : i32
    %c0_i32_0 = arith.constant 0 : i32
    %c0_i32_1 = arith.constant 0 : i32
    return %c0_i32, %c0_i32_0 : i32, i32
  }
  func.func @transform_2(%arg0: i32, %arg1: i32) -> (i32, i32) {
    %c0_i32 = arith.constant 0 : i32
    %c0_i32_0 = arith.constant 0 : i32
    %c0_i32_1 = arith.constant 0 : i32
    return %c0_i32, %c0_i32_0 : i32, i32
  }
  func.func @transform_3(%arg0: i32, %arg1: i32) -> (i32, i32, i32, i32) {
    %c0_i32 = arith.constant 0 : i32
    %c0_i32_0 = arith.constant 0 : i32
    %c0_i32_1 = arith.constant 0 : i32
    return %arg0, %arg1, %c0_i32, %c0_i32_0 : i32, i32, i32, i32
  }
  func.func @transform_4(%arg0: i32, %arg1: i32) -> (i32, i32, i32, i32) {
    %c0_i32 = arith.constant 0 : i32
    %c0_i32_0 = arith.constant 0 : i32
    %c0_i32_1 = arith.constant 0 : i32
    return %arg0, %arg1, %c0_i32, %c0_i32_0 : i32, i32, i32, i32
  }
}

module attributes {stable_mosaic.version = 11 : i64} {
  func.func @kernel(%arg0: i32, %arg1: i32, %arg2: memref<1x8x16x8xf32, #tpu.memory_space<vmem>>, %arg3: memref<1x8xf32, #tpu.memory_space<vmem>>, %arg4: memref<1x8xf32, #tpu.memory_space<vmem>>, %arg5: memref<1x8x16x8xf32, #tpu.memory_space<vmem>>) attributes {dimension_semantics = [#tpu.dimension_semantics<parallel>, #tpu.dimension_semantics<parallel>], iteration_bounds = array<i64: 2, 2>, scalar_prefetch = 0 : i64, scratch_operands = 0 : i64, tpu.core_type = #tpu.core_type<tc>, window_params = [{transform_indices = @transform_0, window_bounds = array<i64: 1, 8, 16, 8>}, {pipeline_mode = #tpu.pipeline_mode<synchronous>, transform_indices = @transform_1, window_bounds = array<i64: 1, 8>}, {pipeline_mode = #tpu.pipeline_mode<synchronous>, transform_indices = @transform_2, window_bounds = array<i64: 1, 8>}, {transform_indices = @transform_3, window_bounds = array<i64: 1, 8, 16, 8>}]} {
    %c0 = arith.constant 0 : index
    %c0_0 = arith.constant 0 : index
    %c0_1 = arith.constant 0 : index
    %c0_2 = arith.constant 0 : index
    %0 = vector.load %arg2[%c0, %c0_0, %c0_1, %c0_2] : memref<1x8x16x8xf32, #tpu.memory_space<vmem>>, vector<1x8x16x8xf32>
    %c0_3 = arith.constant 0 : index
    %c0_4 = arith.constant 0 : index
    %1 = vector.load %arg3[%c0_3, %c0_4] : memref<1x8xf32, #tpu.memory_space<vmem>>, vector<1x8xf32>
    %2 = vector.shape_cast %1 : vector<1x8xf32> to vector<1x1x1x8xf32>
    %c0_5 = arith.constant 0 : index
    %c0_6 = arith.constant 0 : index
    %3 = vector.load %arg4[%c0_5, %c0_6] : memref<1x8xf32, #tpu.memory_space<vmem>>, vector<1x8xf32>
    %4 = vector.shape_cast %3 : vector<1x8xf32> to vector<1x1x1x8xf32>
    %5 = vector.broadcast %2 : vector<1x1x1x8xf32> to vector<1x8x16x8xf32>
    %6 = arith.mulf %0, %5 : vector<1x8x16x8xf32>
    %7 = vector.broadcast %4 : vector<1x1x1x8xf32> to vector<1x8x16x8xf32>
    %8 = arith.addf %6, %7 : vector<1x8x16x8xf32>
    %cst = arith.constant 0.000000e+00 : f32
    %9 = vector.broadcast %cst : f32 to vector<1x8x16x8xf32>
    %10 = arith.cmpf ogt, %8, %9 : vector<1x8x16x8xf32>
    %cst_7 = arith.constant 2.000000e-01 : f32
    %11 = vector.broadcast %cst_7 : f32 to vector<1x8x16x8xf32>
    %12 = arith.mulf %11, %8 : vector<1x8x16x8xf32>
    %13 = arith.select %10, %8, %12 : vector<1x8x16x8xi1>, vector<1x8x16x8xf32>
    %c0_8 = arith.constant 0 : index
    %c0_9 = arith.constant 0 : index
    %c0_10 = arith.constant 0 : index
    %c0_11 = arith.constant 0 : index
    %14 = vector.load %arg5[%c0_8, %c0_9, %c0_10, %c0_11] : memref<1x8x16x8xf32, #tpu.memory_space<vmem>>, vector<1x8x16x8xf32>
    tpu.vector_store %arg5[%c0_8, %c0_9, %c0_10, %c0_11], %13 {strides = array<i32>} : memref<1x8x16x8xf32, #tpu.memory_space<vmem>>, vector<1x8x16x8xf32>,
    return
  }
  func.func @transform_0(%arg0: i32, %arg1: i32) -> (i32, i32, i32, i32) {
    %c0_i32 = arith.constant 0 : i32
    %c0_i32_0 = arith.constant 0 : i32
    %c0_i32_1 = arith.constant 0 : i32
    return %arg0, %arg1, %c0_i32, %c0_i32_0 : i32, i32, i32, i32
  }
  func.func @transform_1(%arg0: i32, %arg1: i32) -> (i32, i32) {
    %c0_i32 = arith.constant 0 : i32
    %c0_i32_0 = arith.constant 0 : i32
    %c0_i32_1 = arith.constant 0 : i32
    return %c0_i32, %c0_i32_0 : i32, i32
  }
  func.func @transform_2(%arg0: i32, %arg1: i32) -> (i32, i32) {
    %c0_i32 = arith.constant 0 : i32
    %c0_i32_0 = arith.constant 0 : i32
    %c0_i32_1 = arith.constant 0 : i32
    return %c0_i32, %c0_i32_0 : i32, i32
  }
  func.func @transform_3(%arg0: i32, %arg1: i32) -> (i32, i32, i32, i32) {
    %c0_i32 = arith.constant 0 : i32
    %c0_i32_0 = arith.constant 0 : i32
    %c0_i32_1 = arith.constant 0 : i32
    return %arg0, %arg1, %c0_i32, %c0_i32_0 : i32, i32, i32, i32
  }
}

module attributes {stable_mosaic.version = 11 : i64} {
  func.func @kernel(%arg0: i32, %arg1: i32, %arg2: memref<1x8x16x4xf32, #tpu.memory_space<vmem>>, %arg3: memref<4x4xf32, #tpu.memory_space<vmem>>, %arg4: memref<1x4xf32, #tpu.memory_space<vmem>>, %arg5: memref<1x8x16x4xf32, #tpu.memory_space<vmem>>, %arg6: memref<1x1x2x4xf32, #tpu.memory_space<vmem>>) attributes {dimension_semantics = [#tpu.dimension_semantics<parallel>, #tpu.dimension_semantics<parallel>], iteration_bounds = array<i64: 2, 2>, scalar_prefetch = 0 : i64, scratch_operands = 0 : i64, tpu.core_type = #tpu.core_type<tc>, window_params = [{transform_indices = @transform_0, window_bounds = array<i64: 1, 8, 16, 4>}, {pipeline_mode = #tpu.pipeline_mode<synchronous>, transform_indices = @transform_1, window_bounds = array<i64: 4, 4>}, {pipeline_mode = #tpu.pipeline_mode<synchronous>, transform_indices = @transform_2, window_bounds = array<i64: 1, 4>}, {transform_indices = @transform_3, window_bounds = array<i64: 1, 8, 16, 4>}, {transform_indices = @transform_4, window_bounds = array<i64: 1, 1, 2, 4>}]} {
    %c0 = arith.constant 0 : index
    %c0_0 = arith.constant 0 : index
    %c0_1 = arith.constant 0 : index
    %c0_2 = arith.constant 0 : index
    %0 = vector.load %arg2[%c0, %c0_0, %c0_1, %c0_2] : memref<1x8x16x4xf32, #tpu.memory_space<vmem>>, vector<1x8x16x4xf32>
    %1 = vector.shape_cast %0 : vector<1x8x16x4xf32> to vector<8x16x4xf32>
    %2 = vector.shape_cast %1 : vector<8x16x4xf32> to vector<128x4xf32>
    %c0_3 = arith.constant 0 : index
    %c0_4 = arith.constant 0 : index
    %3 = vector.load %arg3[%c0_3, %c0_4] : memref<4x4xf32, #tpu.memory_space<vmem>>, vector<4x4xf32>
    %cst = arith.constant dense<0.000000e+00> : vector<128x4xf32>
    %4 = tpu.matmul %2, %3, %cst {dimension_numbers = #tpu.dot_dimension_numbers<[1], [0], [0], [1], [0, 0, 1, 1], [], []>} : vector<128x4xf32>, vector<4x4xf32>, vector<128x4xf32> -> vector<128x4xf32>
    %c0_5 = arith.constant 0 : index
    %c0_6 = arith.constant 0 : index
    %5 = vector.load %arg4[%c0_5, %c0_6] : memref<1x4xf32, #tpu.memory_space<vmem>>, vector<1x4xf32>
    %6 = vector.broadcast %5 : vector<1x4xf32> to vector<128x4xf32>
    %7 = arith.addf %4, %6 : vector<128x4xf32>
    %8 = vector.shape_cast %7 : vector<128x4xf32> to vector<1x8x16x4xf32>
    %c0_7 = arith.constant 0 : index
    %c0_8 = arith.constant 0 : index
    %c0_9 = arith.constant 0 : index
    %c0_10 = arith.constant 0 : index
    %9 = vector.load %arg5[%c0_7, %c0_8, %c0_9, %c0_10] : memref<1x8x16x4xf32, #tpu.memory_space<vmem>>, vector<1x8x16x4xf32>
    tpu.vector_store %arg5[%c0_7, %c0_8, %c0_9, %c0_10], %8 {strides = array<i32>} : memref<1x8x16x4xf32, #tpu.memory_space<vmem>>, vector<1x8x16x4xf32>,
    %cst_11 = arith.constant dense<0.000000e+00> : vector<4xf32>
    %10 = vector.multi_reduction <add>, %7, %cst_11 [0] : vector<128x4xf32> to vector<4xf32>
    %11 = vector.shape_cast %10 : vector<4xf32> to vector<1x4xf32>
    %12 = arith.mulf %7, %7 : vector<128x4xf32>
    %cst_12 = arith.constant dense<0.000000e+00> : vector<4xf32>
    %13 = vector.multi_reduction <add>, %12, %cst_12 [0] : vector<128x4xf32> to vector<4xf32>
    %14 = vector.shape_cast %13 : vector<4xf32> to vector<1x4xf32>
    %15 = tpu.concatenate %11, %14 in 0 : vector<1x4xf32>, vector<1x4xf32> -> vector<2x4xf32>
    %16 = vector.shape_cast %15 : vector<2x4xf32> to vector<1x1x2x4xf32>
    %c0_13 = arith.constant 0 : index
    %c0_14 = arith.constant 0 : index
    %c0_15 = arith.constant 0 : index
    %c0_16 = arith.constant 0 : index
    %17 = vector.load %arg6[%c0_13, %c0_14, %c0_15, %c0_16] : memref<1x1x2x4xf32, #tpu.memory_space<vmem>>, vector<1x1x2x4xf32>
    tpu.vector_store %arg6[%c0_13, %c0_14, %c0_15, %c0_16], %16 {strides = array<i32>} : memref<1x1x2x4xf32, #tpu.memory_space<vmem>>, vector<1x1x2x4xf32>,
    return
  }
  func.func @transform_0(%arg0: i32, %arg1: i32) -> (i32, i32, i32, i32) {
    %c0_i32 = arith.constant 0 : i32
    %c0_i32_0 = arith.constant 0 : i32
    %c0_i32_1 = arith.constant 0 : i32
    return %arg0, %arg1, %c0_i32, %c0_i32_0 : i32, i32, i32, i32
  }
  func.func @transform_1(%arg0: i32, %arg1: i32) -> (i32, i32) {
    %c0_i32 = arith.constant 0 : i32
    %c0_i32_0 = arith.constant 0 : i32
    %c0_i32_1 = arith.constant 0 : i32
    return %c0_i32, %c0_i32_0 : i32, i32
  }
  func.func @transform_2(%arg0: i32, %arg1: i32) -> (i32, i32) {
    %c0_i32 = arith.constant 0 : i32
    %c0_i32_0 = arith.constant 0 : i32
    %c0_i32_1 = arith.constant 0 : i32
    return %c0_i32, %c0_i32_0 : i32, i32
  }
  func.func @transform_3(%arg0: i32, %arg1: i32) -> (i32, i32, i32, i32) {
    %c0_i32 = arith.constant 0 : i32
    %c0_i32_0 = arith.constant 0 : i32
    %c0_i32_1 = arith.constant 0 : i32
    return %arg0, %arg1, %c0_i32, %c0_i32_0 : i32, i32, i32, i32
  }
  func.func @transform_4(%arg0: i32, %arg1: i32) -> (i32, i32, i32, i32) {
    %c0_i32 = arith.constant 0 : i32
    %c0_i32_0 = arith.constant 0 : i32
    %c0_i32_1 = arith.constant 0 : i32
    return %arg0, %arg1, %c0_i32, %c0_i32_0 : i32, i32, i32, i32
  }
}

module attributes {stable_mosaic.version = 11 : i64} {
  func.func @kernel(%arg0: i32, %arg1: i32, %arg2: memref<1x1x10x18x12xf32, #tpu.memory_space<vmem>>, %arg3: memref<108x4xf32, #tpu.memory_space<vmem>>, %arg4: memref<1x4xf32, #tpu.memory_space<vmem>>, %arg5: memref<1x8x16x4xf32, #tpu.memory_space<vmem>>, %arg6: memref<1x1x2x4xf32, #tpu.memory_space<vmem>>) attributes {dimension_semantics = [#tpu.dimension_semantics<parallel>, #tpu.dimension_semantics<parallel>], iteration_bounds = array<i64: 2, 2>, scalar_prefetch = 0 : i64, scratch_operands = 0 : i64, tpu.core_type = #tpu.core_type<tc>, window_params = [{transform_indices = @transform_0, window_bounds = array<i64: 1, 1, 10, 18, 12>}, {pipeline_mode = #tpu.pipeline_mode<synchronous>, transform_indices = @transform_1, window_bounds = array<i64: 108, 4>}, {pipeline_mode = #tpu.pipeline_mode<synchronous>, transform_indices = @transform_2, window_bounds = array<i64: 1, 4>}, {transform_indices = @transform_3, window_bounds = array<i64: 1, 8, 16, 4>}, {transform_indices = @transform_4, window_bounds = array<i64: 1, 1, 2, 4>}]} {
    %c0 = arith.constant 0 : index
    %c0_0 = arith.constant 0 : index
    %c0_1 = arith.constant 0 : index
    %c0_2 = arith.constant 0 : index
    %c0_3 = arith.constant 0 : index
    %0 = vector.load %arg2[%c0, %c0_0, %c0_1, %c0_2, %c0_3] : memref<1x1x10x18x12xf32, #tpu.memory_space<vmem>>, vector<1x1x10x18x12xf32>
    %1 = vector.shape_cast %0 : vector<1x1x10x18x12xf32> to vector<10x18x12xf32>
    %2 = vector.extract_strided_slice %1 {offsets = [0, 0, 0], sizes = [8, 16, 12], strides = [1, 1, 1]} : vector<10x18x12xf32> to vector<8x16x12xf32>
    %3 = vector.extract_strided_slice %1 {offsets = [0, 1, 0], sizes = [8, 16, 12], strides = [1, 1, 1]} : vector<10x18x12xf32> to vector<8x16x12xf32>
    %4 = vector.extract_strided_slice %1 {offsets = [0, 2, 0], sizes = [8, 16, 12], strides = [1, 1, 1]} : vector<10x18x12xf32> to vector<8x16x12xf32>
    %5 = vector.extract_strided_slice %1 {offsets = [1, 0, 0], sizes = [8, 16, 12], strides = [1, 1, 1]} : vector<10x18x12xf32> to vector<8x16x12xf32>
    %6 = vector.extract_strided_slice %1 {offsets = [1, 1, 0], sizes = [8, 16, 12], strides = [1, 1, 1]} : vector<10x18x12xf32> to vector<8x16x12xf32>
    %7 = vector.extract_strided_slice %1 {offsets = [1, 2, 0], sizes = [8, 16, 12], strides = [1, 1, 1]} : vector<10x18x12xf32> to vector<8x16x12xf32>
    %8 = vector.extract_strided_slice %1 {offsets = [2, 0, 0], sizes = [8, 16, 12], strides = [1, 1, 1]} : vector<10x18x12xf32> to vector<8x16x12xf32>
    %9 = vector.extract_strided_slice %1 {offsets = [2, 1, 0], sizes = [8, 16, 12], strides = [1, 1, 1]} : vector<10x18x12xf32> to vector<8x16x12xf32>
    %10 = vector.extract_strided_slice %1 {offsets = [2, 2, 0], sizes = [8, 16, 12], strides = [1, 1, 1]} : vector<10x18x12xf32> to vector<8x16x12xf32>
    %11 = tpu.concatenate %2, %3, %4, %5, %6, %7, %8, %9, %10 in 2 : vector<8x16x12xf32>, vector<8x16x12xf32>, vector<8x16x12xf32>, vector<8x16x12xf32>, vector<8x16x12xf32>, vector<8x16x12xf32>, vector<8x16x12xf32>, vector<8x16x12xf32>, vector<8x16x12xf32> -> vector<8x16x108xf32>
    %12 = vector.shape_cast %11 : vector<8x16x108xf32> to vector<128x108xf32>
    %c0_4 = arith.constant 0 : index
    %c0_5 = arith.constant 0 : index
    %13 = vector.load %arg3[%c0_4, %c0_5] : memref<108x4xf32, #tpu.memory_space<vmem>>, vector<108x4xf32>
    %cst = arith.constant dense<0.000000e+00> : vector<128x4xf32>
    %14 = tpu.matmul %12, %13, %cst {dimension_numbers = #tpu.dot_dimension_numbers<[1], [0], [0], [1], [0, 0, 1, 1], [], []>} : vector<128x108xf32>, vector<108x4xf32>, vector<128x4xf32> -> vector<128x4xf32>
    %c0_6 = arith.constant 0 : index
    %c0_7 = arith.constant 0 : index
    %15 = vector.load %arg4[%c0_6, %c0_7] : memref<1x4xf32, #tpu.memory_space<vmem>>, vector<1x4xf32>
    %16 = vector.broadcast %15 : vector<1x4xf32> to vector<128x4xf32>
    %17 = arith.addf %14, %16 : vector<128x4xf32>
    %18 = vector.shape_cast %17 : vector<128x4xf32> to vector<1x8x16x4xf32>
    %c0_8 = arith.constant 0 : index
    %c0_9 = arith.constant 0 : index
    %c0_10 = arith.constant 0 : index
    %c0_11 = arith.constant 0 : index
    %19 = vector.load %arg5[%c0_8, %c0_9, %c0_10, %c0_11] : memref<1x8x16x4xf32, #tpu.memory_space<vmem>>, vector<1x8x16x4xf32>
    tpu.vector_store %arg5[%c0_8, %c0_9, %c0_10, %c0_11], %18 {strides = array<i32>} : memref<1x8x16x4xf32, #tpu.memory_space<vmem>>, vector<1x8x16x4xf32>,
    %cst_12 = arith.constant dense<0.000000e+00> : vector<4xf32>
    %20 = vector.multi_reduction <add>, %17, %cst_12 [0] : vector<128x4xf32> to vector<4xf32>
    %21 = vector.shape_cast %20 : vector<4xf32> to vector<1x4xf32>
    %22 = arith.mulf %17, %17 : vector<128x4xf32>
    %cst_13 = arith.constant dense<0.000000e+00> : vector<4xf32>
    %23 = vector.multi_reduction <add>, %22, %cst_13 [0] : vector<128x4xf32> to vector<4xf32>
    %24 = vector.shape_cast %23 : vector<4xf32> to vector<1x4xf32>
    %25 = tpu.concatenate %21, %24 in 0 : vector<1x4xf32>, vector<1x4xf32> -> vector<2x4xf32>
    %26 = vector.shape_cast %25 : vector<2x4xf32> to vector<1x1x2x4xf32>
    %c0_14 = arith.constant 0 : index
    %c0_15 = arith.constant 0 : index
    %c0_16 = arith.constant 0 : index
    %c0_17 = arith.constant 0 : index
    %27 = vector.load %arg6[%c0_14, %c0_15, %c0_16, %c0_17] : memref<1x1x2x4xf32, #tpu.memory_space<vmem>>, vector<1x1x2x4xf32>
    tpu.vector_store %arg6[%c0_14, %c0_15, %c0_16, %c0_17], %26 {strides = array<i32>} : memref<1x1x2x4xf32, #tpu.memory_space<vmem>>, vector<1x1x2x4xf32>,
    return
  }
  func.func @transform_0(%arg0: i32, %arg1: i32) -> (i32, i32, i32, i32, i32) {
    %c0_i32 = arith.constant 0 : i32
    %c0_i32_0 = arith.constant 0 : i32
    %c0_i32_1 = arith.constant 0 : i32
    %c0_i32_2 = arith.constant 0 : i32
    return %arg0, %arg1, %c0_i32, %c0_i32_0, %c0_i32_1 : i32, i32, i32, i32, i32
  }
  func.func @transform_1(%arg0: i32, %arg1: i32) -> (i32, i32) {
    %c0_i32 = arith.constant 0 : i32
    %c0_i32_0 = arith.constant 0 : i32
    %c0_i32_1 = arith.constant 0 : i32
    return %c0_i32, %c0_i32_0 : i32, i32
  }
  func.func @transform_2(%arg0: i32, %arg1: i32) -> (i32, i32) {
    %c0_i32 = arith.constant 0 : i32
    %c0_i32_0 = arith.constant 0 : i32
    %c0_i32_1 = arith.constant 0 : i32
    return %c0_i32, %c0_i32_0 : i32, i32
  }
  func.func @transform_3(%arg0: i32, %arg1: i32) -> (i32, i32, i32, i32) {
    %c0_i32 = arith.constant 0 : i32
    %c0_i32_0 = arith.constant 0 : i32
    %c0_i32_1 = arith.constant 0 : i32
    return %arg0, %arg1, %c0_i32, %c0_i32_0 : i32, i32, i32, i32
  }
  func.func @transform_4(%arg0: i32, %arg1: i32) -> (i32, i32, i32, i32) {
    %c0_i32 = arith.constant 0 : i32
    %c0_i32_0 = arith.constant 0 : i32
    %c0_i32_1 = arith.constant 0 : i32
    return %arg0, %arg1, %c0_i32, %c0_i32_0 : i32, i32, i32, i32
  }
}

</mosaic_0001>

<bundles_post_ra>
// kernel: skip_connection_block.17
= control target key start
LH: loop header
LB: loop body
LE: loop exit
PB: predicated region body
PF: predicated region fallthrough
CT: control target
= control target key end

     0   :  { %s558_s12 = smov 0   ;;  %s560_s13 = smov 0   ;;  %s706_s0 = inlined_call_operand.vmem [shape: f32[2,16,16,4], index: 0, kind: input, shape index: {}]   ;;  %s707_s1 = inlined_call_operand.vmem [shape: f32[1,4], index: 1, kind: input, shape index: {}]   ;;  %s708_s2 = inlined_call_operand.vmem [shape: f32[1,4], index: 2, kind: input, shape index: {}]   ;;  %s709_s3 = inlined_call_operand.vmem [shape: f32[2,16,16,4], index: 3, kind: output, shape index: {}]  }
   0x1   :  { %s562_s14 = smov 0   ;;  %s564_s15 = smov 0  }
   0x2   :  { %s566_s16 = smov 0  }
   0x3 LB: > { %s22_s17 = sadd.s32 1, %s528_s14  ;;  %s25_s18 = sadd.s32 1, %s532_s15  ;;  %s536_s16 = sphi %s566_s16, %s13_s16   ;;  %s532_s15 = sphi %s564_s15, %s713_s15   ;;  %s528_s14 = sphi %s562_s14, %s712_s14   ;;  %s524_s13 = sphi %s560_s13, %s711_s13   ;;  %s520_s12 = sphi %s558_s12, %s710_s12  }
   0x4   : > { %p23_p0 = scmp.ge.s32.totalorder %s22_s17, 2  ;;  %p445_p1 = scmp.ge.s32.totalorder %s536_s16, 1 }
   0x5   : > { %p159_p2 = scmp.lt.s32.totalorder %s536_s16, 5 }
   0x6   : > { %s715_s17 = smov (%p23_p0, %s22_s17), 0  ;;  %s717_s18 = smov (!%p23_p0, %s25_s18), %s532_s15 }
   0x7   : > { %p160_p3 = pnand %p445_p1, %p159_p2  ;;  %p27_p4 = scmp.ge.s32.totalorder %s717_s18, 2 }
   0x8   : > { %s446_s19 = sshll.u32 (!%p160_p3), %s520_s12, 3  ;;  %p194_p5 = scmp.lt.s32.totalorder (!%p160_p3), %s524_s13, 1  ;;  %v594_v0 = vld [vmem:[%s707_s1] ss:$0 sm:$0xff] (!%p160_p3)  ;;  %vm325_vm0 = vcmask (!%p160_p3), 31744  }
   0x9   : > { %s719_s18 = smov (%p27_p4, %s717_s18), 0  ;;  %163 = sbr.rel (%p160_p3) target bundleno = 47 (0x2f), region = 32 }
   0xa   : > { %p196_p6 = scmp.lt.s32.totalorder (!%p160_p3), %s446_s19, 15  ;;  %v604_v1 = vld [vmem:[%s708_s2] ss:$0 sm:$0xff] (!%p160_p3) }
  0x10   : > { %s721_s13 = smov (!%p194_p5, %s524_s13), 1  ;;  %s723_s19 = smov (!%p196_p6, %s446_s19), 15 }
  0x11   : > { %s448_s20 = sshll.u32 %s721_s13, 5  ;;  %s447_s21 = sshll.u32 %s723_s19, 1 }
  0x12   : > { %s588_s22 = sadd.s32 %s448_s20, %s447_s21 }
  0x13   : > { %s449_s23 = sshll.u32 %s588_s22, 3 }
  0x14   : > { %s599_s28 = scalar_lea.vmem %s706_s0, %s449_s23  ;;  %s632_s6 = scalar_lea.vmem %s709_s3, %s449_s23 }
  0x15   : > { %v215_v2 = vld [vmem:[%s599_s28] sm:$0xff]  ;;  %v216_v3 = vld [vmem:[%s599_s28 + $0x8] sm:$0xff]  ;;  %v217_v4 = vld [vmem:[%s599_s28 + $0x10] sm:$0xff] }
  0x16   : > { %v239_v5 = vmul.f32 %v594_v0, %v215_v2  ;;  %v240_v6 = vmul.f32 %v594_v0, %v216_v3  ;;  %v241_v7 = vmul.f32 %v594_v0, %v217_v4  ;;  %v218_v8 = vld [vmem:[%s599_s28 + $0x18] sm:$0xff]  ;;  %v219_v9 = vld [vmem:[%s599_s28 + $0x20] sm:$0xff]  ;;  %v220_v10 = vld [vmem:[%s599_s28 + $0x28] sm:$0xff] }
  0x17   : > { %v242_v11 = vmul.f32 %v594_v0, %v218_v8  ;;  %v243_v12 = vmul.f32 %v594_v0, %v219_v9  ;;  %v244_v13 = vmul.f32 %v594_v0, %v220_v10  ;;  %v221_v14 = vld [vmem:[%s599_s28 + $0x30] sm:$0xff]  ;;  %v222_v15 = vld [vmem:[%s599_s28 + $0x38] sm:$0xff]  ;;  %v223_v24 = vld [vmem:[%s599_s28 + $0x40] sm:$0xff] }
  0x18   : > { %v261_v16 = vadd.f32 %v604_v1, %v239_v5  ;;  %v262_v17 = vadd.f32 %v604_v1, %v240_v6  ;;  %v263_v18 = vadd.f32 %v604_v1, %v241_v7  ;;  %v245_v19 = vmul.f32 %v594_v0, %v221_v14  ;;  %v224_v32 = vld [vmem:[%s599_s28 + $0x48] sm:$0xff]  ;;  %v225_v33 = vld [vmem:[%s599_s28 + $0x50] sm:$0xff]  ;;  %v226_v34 = vld [vmem:[%s599_s28 + $0x58] sm:$0xff] }
  0x19   : > { %v264_v20 = vadd.f32 %v604_v1, %v242_v11  ;;  %v265_v21 = vadd.f32 %v604_v1, %v243_v12  ;;  %v266_v22 = vadd.f32 %v604_v1, %v244_v13  ;;  %v246_v23 = vmul.f32 %v594_v0, %v222_v15  ;;  %v227_v46 = vld [vmem:[%s599_s28 + $0x60] sm:$0xff]  ;;  %v228_v47 = vld [vmem:[%s599_s28 + $0x68] sm:$0xff]  ;;  %v229_v58 = vld [vmem:[%s599_s28 + $0x70] sm:$0xff] }
  0x1a   : > { %vm277_vm1 = vcmp.gt.f32.partialorder %v261_v16, 0.0  ;;  %v293_v25 = vmul.f32 0.2, %v261_v16  ;;  %vm278_vm2 = vcmp.gt.f32.partialorder %v262_v17, 0.0  ;;  %v294_v26 = vmul.f32 0.2, %v262_v17 }
  0x1b   : > { %vm279_vm3 = vcmp.gt.f32.partialorder %v263_v18, 0.0  ;;  %v295_v27 = vmul.f32 0.2, %v263_v18  ;;  %vm280_vm4 = vcmp.gt.f32.partialorder %v264_v20, 0.0  ;;  %v296_v28 = vmul.f32 0.2, %v264_v20 }
  0x1c   : > { %v309_v29 = vsel %vm277_vm1, %v261_v16, %v293_v25  ;;  %v310_v30 = vsel %vm278_vm2, %v262_v17, %v294_v26  ;;  %vm281_vm5 = vcmp.gt.f32.partialorder %v265_v21, 0.0  ;;  %v297_v31 = vmul.f32 0.2, %v265_v21  ;;  %v230_v59 = vld [vmem:[%s599_s28 + $0x78] sm:$0xff] }
  0x1d   : > { %326 = vst.msk [vmem:[%s632_s6] sm:$0xff] %vm325_vm0, %v309_v29  ;;  %327 = vst.msk [vmem:[%s632_s6 + $0x8] sm:$0xff] %vm325_vm0, %v310_v30  ;;  %v311_v35 = vsel %vm279_vm3, %v263_v18, %v295_v27  ;;  %v312_v36 = vsel %vm280_vm4, %v264_v20, %v296_v28  ;;  %vm282_vm6 = vcmp.gt.f32.partialorder %v266_v22, 0.0  ;;  %v298_v37 = vmul.f32 0.2, %v266_v22 }
  0x1e   : > { %328 = vst.msk [vmem:[%s632_s6 + $0x10] sm:$0xff] %vm325_vm0, %v311_v35  ;;  %329 = vst.msk [vmem:[%s632_s6 + $0x18] sm:$0xff] %vm325_vm0, %v312_v36  ;;  %v313_v38 = vsel %vm281_vm5, %v265_v21, %v297_v31  ;;  %v267_v39 = vadd.f32 %v604_v1, %v245_v19  ;;  %v268_v40 = vadd.f32 %v604_v1, %v246_v23 }
  0x1f   : > { %v247_v41 = vmul.f32 %v594_v0, %v223_v24  ;;  %330 = vst.msk [vmem:[%s632_s6 + $0x20] sm:$0xff] %vm325_vm0, %v313_v38  ;;  %v314_v42 = vsel %vm282_vm6, %v266_v22, %v298_v37  ;;  %v248_v43 = vmul.f32 %v594_v0, %v224_v32  ;;  %v249_v44 = vmul.f32 %v594_v0, %v225_v33 }
  0x20   : > { %v250_v45 = vmul.f32 %v594_v0, %v226_v34  ;;  %331 = vst.msk [vmem:[%s632_s6 + $0x28] sm:$0xff] %vm325_vm0, %v314_v42  ;;  %vm283_vm7 = vcmp.gt.f32.partialorder %v267_v39, 0.0  ;;  %v299_v48 = vmul.f32 0.2, %v267_v39  ;;  %vm284_vm8 = vcmp.gt.f32.partialorder %v268_v40, 0.0 }
  0x21   : > { %v300_v49 = vmul.f32 0.2, %v268_v40  ;;  %v269_v50 = vadd.f32 %v604_v1, %v247_v41  ;;  %v270_v51 = vadd.f32 %v604_v1, %v248_v43  ;;  %v271_v52 = vadd.f32 %v604_v1, %v249_v44 }
  0x22   : > { %v272_v53 = vadd.f32 %v604_v1, %v250_v45  ;;  %v315_v54 = vsel %vm283_vm7, %v267_v39, %v299_v48  ;;  %v251_v56 = vmul.f32 %v594_v0, %v227_v46  ;;  %v252_v57 = vmul.f32 %v594_v0, %v228_v47 }
  0x23   : > { %v316_v55 = vsel %vm284_vm8, %v268_v40, %v300_v49  ;;  %332 = vst.msk [vmem:[%s632_s6 + $0x30] sm:$0xff] %vm325_vm0, %v315_v54  ;;  %vm285_vm9 = vcmp.gt.f32.partialorder %v269_v50, 0.0  ;;  %v301_v60 = vmul.f32 0.2, %v269_v50  ;;  %vm286_vm10 = vcmp.gt.f32.partialorder %v270_v51, 0.0 }
  0x24   : > { %333 = vst.msk [vmem:[%s632_s6 + $0x38] sm:$0xff] %vm325_vm0, %v316_v55  ;;  %v302_v61 = vmul.f32 0.2, %v270_v51  ;;  %vm287_vm11 = vcmp.gt.f32.partialorder %v271_v52, 0.0  ;;  %v303_v62 = vmul.f32 0.2, %v271_v52  ;;  %v273_v4 = vadd.f32 %v604_v1, %v251_v56 }
  0x25   : > { %vm288_vm12 = vcmp.gt.f32.partialorder %v272_v53, 0.0  ;;  %v304_v63 = vmul.f32 0.2, %v272_v53  ;;  %v317_v2 = vsel %vm285_vm9, %v269_v50, %v301_v60  ;;  %v274_v5 = vadd.f32 %v604_v1, %v252_v57 }
  0x26   : > { %v318_v3 = vsel %vm286_vm10, %v270_v51, %v302_v61  ;;  %334 = vst.msk [vmem:[%s632_s6 + $0x40] sm:$0xff] %vm325_vm0, %v317_v2  ;;  %v319_v6 = vsel %vm287_vm11, %v271_v52, %v303_v62  ;;  %v253_v8 = vmul.f32 %v594_v0, %v229_v58  ;;  %v254_v9 = vmul.f32 %v594_v0, %v230_v59 }
  0x27   : > { %335 = vst.msk [vmem:[%s632_s6 + $0x48] sm:$0xff] %vm325_vm0, %v318_v3  ;;  %v320_v7 = vsel %vm288_vm12, %v272_v53, %v304_v63  ;;  %336 = vst.msk [vmem:[%s632_s6 + $0x50] sm:$0xff] %vm325_vm0, %v319_v6  ;;  %vm289_vm13 = vcmp.gt.f32.partialorder %v273_v4, 0.0  ;;  %v305_v10 = vmul.f32 0.2, %v273_v4  ;;  %vm290_vm14 = vcmp.gt.f32.partialorder %v274_v5, 0.0 }
  0x28   : > { %337 = vst.msk [vmem:[%s632_s6 + $0x58] sm:$0xff] %vm325_vm0, %v320_v7  ;;  %v306_v11 = vmul.f32 0.2, %v274_v5  ;;  %v275_v12 = vadd.f32 %v604_v1, %v253_v8  ;;  %v276_v13 = vadd.f32 %v604_v1, %v254_v9 }
  0x29   : > { %v321_v14 = vsel %vm289_vm13, %v273_v4, %v305_v10 }
  0x2a   : > { %v322_v15 = vsel %vm290_vm14, %v274_v5, %v306_v11  ;;  %338 = vst.msk [vmem:[%s632_s6 + $0x60] sm:$0xff] %vm325_vm0, %v321_v14  ;;  %vm291_vm15 = vcmp.gt.f32.partialorder %v275_v12, 0.0  ;;  %v307_v0 = vmul.f32 0.2, %v275_v12  ;;  %vm292_vm1 = vcmp.gt.f32.partialorder %v276_v13, 0.0 }
  0x2b   : > { %339 = vst.msk [vmem:[%s632_s6 + $0x68] sm:$0xff] %vm325_vm0, %v322_v15  ;;  %v308_v16 = vmul.f32 0.2, %v276_v13 }
  0x2c   : > { %v323_v17 = vsel %vm291_vm15, %v275_v12, %v307_v0 }
  0x2d   : > { %v324_v18 = vsel %vm292_vm1, %v276_v13, %v308_v16  ;;  %340 = vst.msk [vmem:[%s632_s6 + $0x70] sm:$0xff] %vm325_vm0, %v323_v17 }
  0x2e   : > { %341 = vst.msk [vmem:[%s632_s6 + $0x78] sm:$0xff] %vm325_vm0, %v324_v18 }
  0x2f PF: > { %s13_s16 = sadd.s32 1, %s536_s16   ;;  %s710_s12 = smov %s528_s14 }
  0x30   : > { %p10_p7 = scmp.ge.s32.totalorder %s13_s16, 6   ;;  %s711_s13 = smov %s532_s15 }
  0x31   : > { %s712_s14 = smov %s715_s17  ;;  %s713_s15 = smov %s719_s18 }
  0x32   :  { %12 = sbr.rel (!%p10_p7) target bundleno = 3 (0x3), region = 62 }

// kernel: skip_connection_block.16
= control target key start
LH: loop header
LB: loop body
LE: loop exit
PB: predicated region body
PF: predicated region fallthrough
CT: control target
= control target key end

     0   :  { %s1630_s15 = smov 0   ;;  %s1632_s16 = smov 0   ;;  %s2340_s0 = inlined_call_operand.vmem [shape: f32[2,2,10,18,4], index: 0, kind: input, shape index: {}]   ;;  %s2341_s1 = inlined_call_operand.vmem [shape: f32[36,4], index: 1, kind: input, shape index: {}]   ;;  %s2342_s2 = inlined_call_operand.vmem [shape: f32[1,4], index: 2, kind: input, shape index: {}]   ;;  %s2343_s3 = inlined_call_operand.vmem [shape: f32[2,16,16,4], index: 3, kind: output, shape index: {0}]   ;;  %s2344_s4 = inlined_call_operand.vmem [shape: f32[2,2,2,4], index: 4, kind: output, shape index: {1}]  }
   0x1   :  { %s1634_s17 = smov 0   ;;  %s1636_s18 = smov 0  }
   0x2   :  { %s1638_s19 = smov 0  }
   0x3 LB: > { %s24_s20 = sadd.s32 1, %s1587_s17  ;;  %s27_s21 = sadd.s32 1, %s1591_s18  ;;  %s1595_s19 = sphi %s1638_s19, %s15_s19   ;;  %s1591_s18 = sphi %s1636_s18, %s2348_s18   ;;  %s1587_s17 = sphi %s1634_s17, %s2347_s17   ;;  %s1583_s16 = sphi %s1632_s16, %s2346_s16   ;;  %s1579_s15 = sphi %s1630_s15, %s2345_s15  }
   0x4   : > { %p25_p0 = scmp.ge.s32.totalorder %s24_s20, 2  ;;  %p1410_p1 = scmp.ge.s32.totalorder %s1595_s19, 1 }
   0x5   : > { %p187_p2 = scmp.lt.s32.totalorder %s1595_s19, 5 }
   0x6   : > { %s2350_s20 = smov (%p25_p0, %s24_s20), 0  ;;  %s2352_s21 = smov (!%p25_p0, %s27_s21), %s1591_s18 }
   0x7   : > { %p188_p3 = pnand %p1410_p1, %p187_p2  ;;  %p29_p4 = scmp.ge.s32.totalorder %s2352_s21, 2 }
   0x8   : > { %p230_p5 = scmp.lt.s32.totalorder (!%p188_p3), %s1583_s16, 1  ;;  %p232_p6 = scmp.lt.s32.totalorder (!%p188_p3), %s1579_s15, 1  ;;  %vm401_vm0 = vcmask (!%p188_p3), 1045504   ;;  %vm312_vm1 = vcmask (!%p188_p3), 1046528   ;;  %v940_v28 = vld [vmem:[%s2341_s1] sm:$0xff] (!%p188_p3)  ;;  %v941_v29 = vld [vmem:[%s2341_s1 + $0x8] sm:$0xff] (!%p188_p3) }
   0x9   : > { %s2354_s21 = smov (%p29_p4, %s2352_s21), 0  ;;  %191 = sbr.rel (%p188_p3) target bundleno = 630 (0x276), region = 32 }
   0xa   : > { %s1597_s30 = smov (!%p188_p3), 12   ;;  %s1598_s5 = smov (!%p188_p3), 8   ;;  %v1493_v30 = vpack.c.bf16 (!%p188_p3), %v941_v29, %v940_v28  ;;  %v942_v33 = vld [vmem:[%s2341_s1 + $0x10] sm:$0xff] (!%p188_p3)  ;;  %v943_v34 = vld [vmem:[%s2341_s1 + $0x18] sm:$0xff] (!%p188_p3)  ;;  %v944_v38 = vld [vmem:[%s2341_s1 + $0x20] sm:$0xf] (!%p188_p3) }
   0xb   : > { %s1599_s6 = smov (!%p188_p3), 4   ;;  %s1600_s7 = smov (!%p188_p3), 16   ;;  %v1497_v36 = vpack.c.bf16 (!%p188_p3), %v943_v34, %v942_v33  ;;  %vm1001_vm2 = vcmask (!%p188_p3), 1043456   ;;  %vm804_vm3 = vcmask (!%p188_p3), 31744   ;;  %vm821_vm4 = vcmask (!%p188_p3), 64512  }
   0xc   : > { %s1601_s8 = smov (!%p188_p3), 20   ;;  %s1602_s13 = smov (!%p188_p3), 24   ;;  %1494 = vmatprep.subr.bf16.mxu0 (!%p188_p3), %v1493_v30  ;;  %1501 = vmatprep.subr.bf16.mxu1 (!%p188_p3), %v1493_v30  ;;  %vm838_vm5 = vcmask (!%p188_p3), 97280   ;;  %vm855_vm6 = vcmask (!%p188_p3), 130048   ;;  %vm872_vm7 = vcmask (!%p188_p3), 162816   ;;  %vm889_vm8 = vcmask (!%p188_p3), 195584  }
   0xd   : > { %1496 = vmatpush3.bf16.msra.mxu0 (!%p188_p3), %v1493_v30  ;;  %1504 = vmatpush3.bf16.msra.mxu1 (!%p188_p3), %v1493_v30  ;;  %s1604_s9 = smov (!%p188_p3), 32   ;;  %vm906_vm9 = vcmask (!%p188_p3), 228352   ;;  %vm923_vm10 = vcmask (!%p188_p3), 261120   ;;  %vm952_vm11 = vcmask (!%p188_p3), 293888   ;;  %vm1256_vm12 = vcmask (!%p188_p3), 1040384  }
   0xe   : > { %1498 = vmatprep.subr.bf16.mxu0 (!%p188_p3), %v1497_v36  ;;  %1502 = vmatprep.subr.bf16.mxu1 (!%p188_p3), %v1497_v36  ;;  %vm1258_vm13 = vcmask (!%p188_p3), 25600  }
  0x10   : > { %s2356_s16 = smov (!%p230_p5, %s1583_s16), 1 }
  0x11   : > { %s1666_s22 = scalar_select %p232_p6, %s1579_s15, 1  ;;  %1500 = vmatpush3.bf16.msra.mxu0 %v1497_v36  ;;  %1505 = vmatpush3.bf16.msra.mxu1 %v1497_v36 }
  0x12   : > { %s1508_s23 = smul.u32 60, %s2356_s16  ;;  %1467 = vmatprep.subr.msk.mxu0 %vm1001_vm2, %v944_v38  ;;  %1503 = vmatprep.subr.msk.mxu1 %vm1001_vm2, %v944_v38 }
  0x13   : > { %s1507_s24 = smul.u32 30, %s1666_s22 }
  0x15   : > { %s236_s25 = sadd.s32 %s1508_s23, %s1507_s24  ;;  %1468 = vmatpush3.msk.msra.mxu0 %vm1001_vm2, %v944_v38  ;;  %1506 = vmatpush3.msk.msra.mxu1 %vm1001_vm2, %v944_v38 }
  0x16   : > { %s1411_s26 = sshll.u32 %s236_s25, 3 }
  0x17   : > { %s1673_s29 = scalar_lea.vmem %s2340_s0, %s1411_s26  ;;  %s1603_s26 = smov 28  }
  0x18   : > { %v1676_v0 = vld [vmem:[%s1673_s29 + $0x20] sm:$0xff]  ;;  %v1679_v1 = vld [vmem:[%s1673_s29 + $0x18] sm:$0xff]  ;;  %v1689_v3 = vld [vmem:[%s1673_s29 + $0x8] sm:$0xff] }
  0x19   : > { %v1682_v2 = vld [vmem:[%s1673_s29] sm:$0xff]  ;;  %494 = vrot.lane.b32.xlu1 %v1676_v0, %s1597_s30  ;;  %492 = vrot.lane.b32.xlu0 %v1679_v1, %s1597_s30  ;;  %v260_v6 = vld [vmem:[%s1673_s29 + $0x10] sm:$0x3]  ;;  %v403_v7 = vrot.slane %v1689_v3, 2  ;;  %v314_v8 = vrot.slane %v1689_v3, 1  ;;  %v318_v15 = vrot.slane %v1679_v1, 1 }
  0x1a   : > { %v402_v4 = vrot.slane %v1682_v2, 2  ;;  %v313_v5 = vrot.slane %v1682_v2, 1  ;;  %v405_v9 = vrot.slane %v260_v6, 2  ;;  %v316_v10 = vrot.slane %v260_v6, 1  ;;  %v263_v17 = vld [vmem:[%s1673_s29 + $0x28] sm:$0x3] }
  0x1b   : > { %v319_v16 = vrot.slane %v1676_v0, 1  ;;  %v407_v19 = vrot.slane %v1679_v1, 2  ;;  %v408_v20 = vrot.slane %v1676_v0, 2  ;;  %v321_v21 = vrot.slane %v263_v17, 1  ;;  %v1719_v25 = vld [vmem:[%s1673_s29 + $0x30] sm:$0xff]  ;;  %v1723_v27 = vld [vmem:[%s1673_s29 + $0x38] sm:$0xff] }
  0x1c   : > { %v404_v11 = vsel %vm401_vm0, %v402_v4, %v403_v7  ;;  %v315_v12 = vsel %vm312_vm1, %v313_v5, %v314_v8  ;;  %v406_v13 = vsel %vm401_vm0, %v403_v7, %v405_v9  ;;  %v317_v14 = vsel %vm312_vm1, %v314_v8, %v316_v10  ;;  %v266_v37 = vld [vmem:[%s1673_s29 + $0x40] sm:$0x3]  ;;  %v1770_v46 = vld [vmem:[%s1673_s29 + $0x48] sm:$0xff]  ;;  %v1773_v47 = vld [vmem:[%s1673_s29 + $0x50] sm:$0xff] }
  0x1d   : > { %442 = vrot.lane.b32.xlu1 %v404_v11, %s1598_s5  ;;  %353 = vrot.lane.b32.xlu0 %v315_v12, %s1599_s6  ;;  %v320_v18 = vsel %vm312_vm1, %v318_v15, %v319_v16  ;;  %v409_v22 = vsel %vm401_vm0, %v407_v19, %v408_v20  ;;  %v322_v23 = vsel %vm312_vm1, %v319_v16, %v321_v21  ;;  %v410_v24 = vrot.slane %v263_v17, 2  ;;  %v269_v51 = vld [vmem:[%s1673_s29 + $0x58] sm:$0x3]  ;;  %v1805_v59 = vld [vmem:[%s1673_s29 + $0x60] sm:$0xff] }
  0x1e   : > { %v323_v31 = vrot.slane %v1719_v25, 1  ;;  %v324_v32 = vrot.slane %v1723_v27, 1  ;;  %v412_v39 = vrot.slane %v1719_v25, 2  ;;  %v413_v40 = vrot.slane %v1723_v27, 2  ;;  %v1808_v60 = vld [vmem:[%s1673_s29 + $0x68] sm:$0xff]  ;;  %v1845_v17 = vld [vmem:[%s1673_s29 + $0x80] sm:$0xff] }
  0x1f   : > { %v411_v26 = vsel %vm401_vm0, %v408_v20, %v410_v24  ;;  %v326_v41 = vrot.slane %v266_v37, 1  ;;  %v415_v44 = vrot.slane %v266_v37, 2  ;;  %v328_v48 = vrot.slane %v1770_v46, 1  ;;  %v272_v4 = vld [vmem:[%s1673_s29 + $0x70] sm:$0x3] }
  0x20   : > { %v325_v35 = vsel %vm312_vm1, %v323_v31, %v324_v32  ;;  %v414_v42 = vsel %vm401_vm0, %v412_v39, %v413_v40  ;;  %v329_v49 = vrot.slane %v1773_v47, 1  ;;  %v417_v52 = vrot.slane %v1770_v46, 2 }
  0x21   : > { %444 = vrot.lane.b32.xlu1 %v406_v13, %s1598_s5  ;;  %355 = vrot.lane.b32.xlu0 %v317_v14, %s1599_s6  ;;  %v327_v43 = vsel %vm312_vm1, %v324_v32, %v326_v41  ;;  %v416_v45 = vsel %vm401_vm0, %v413_v40, %v415_v44  ;;  %v418_v53 = vrot.slane %v1773_v47, 2  ;;  %v331_v54 = vrot.slane %v269_v51, 1  ;;  %v1842_v14 = vld [vmem:[%s1673_s29 + $0x78] sm:$0xff] }
  0x22   : > { %v330_v50 = vsel %vm312_vm1, %v328_v48, %v329_v49  ;;  %v420_v57 = vrot.slane %v269_v51, 2  ;;  %v333_v61 = vrot.slane %v1805_v59, 1  ;;  %v334_v62 = vrot.slane %v1808_v60, 1 }
  0x23   : > { %v419_v55 = vsel %vm401_vm0, %v417_v52, %v418_v53  ;;  %v332_v56 = vsel %vm312_vm1, %v329_v49, %v331_v54  ;;  %v422_v5 = vrot.slane %v1805_v59, 2  ;;  %v423_v6 = vrot.slane %v1808_v60, 2  ;;  %v1892_v49 = vld [vmem:[%s1673_s29 + $0x90] sm:$0xff]  ;;  %v1900_v52 = vld [vmem:[%s1673_s29 + $0x98] sm:$0xff] }
  0x24   : > { %v421_v58 = vsel %vm401_vm0, %v418_v53, %v420_v57  ;;  %v335_v63 = vsel %vm312_vm1, %v333_v61, %v334_v62  ;;  %v336_v7 = vrot.slane %v272_v4, 1  ;;  %v425_v10 = vrot.slane %v272_v4, 2 }
  0x25   : > { %357 = vrot.lane.b32.xlu1 %v320_v18, %s1599_s6  ;;  %546 = vrot.lane.b32.xlu0 %v320_v18, %s1600_s7  ;;  %v424_v8 = vsel %vm401_vm0, %v422_v5, %v423_v6  ;;  %v338_v18 = vrot.slane %v1842_v14, 1  ;;  %v339_v19 = vrot.slane %v1845_v17, 1  ;;  %v427_v28 = vrot.slane %v1842_v14, 2 }
  0x26   : > { %v337_v9 = vsel %vm312_vm1, %v334_v62, %v336_v7  ;;  %v426_v11 = vsel %vm401_vm0, %v423_v6, %v425_v10  ;;  %v428_v29 = vrot.slane %v1845_v17, 2  ;;  %v343_v57 = vrot.slane %v1892_v49, 1 }
  0x28   : > { %v429_v33 = vsel %vm401_vm0, %v427_v28, %v428_v29 }
  0x29   : > { %599 = vrot.lane.b32.xlu1 %v409_v22, %s1601_s8  ;;  %548 = vrot.lane.b32.xlu0 %v322_v23, %s1600_s7 }
  0x2d   : > { %446 = vrot.lane.b32.xlu1 %v409_v22, %s1598_s5  ;;  %359 = vrot.lane.b32.xlu0 %v322_v23, %s1599_s6  ;;  %v340_v22 = vsel %vm312_vm1, %v338_v18, %v339_v19 }
  0x31   : > { %649 = vrot.lane.b32.xlu1 %v1719_v25, %s1602_s13  ;;  %601 = vrot.lane.b32.xlu0 %v411_v26, %s1601_s8 }
  0x35   : > { %496 = vrot.lane.b32.xlu1 %v1719_v25, %s1597_s30  ;;  %448 = vrot.lane.b32.xlu0 %v411_v26, %s1598_s5  ;;  %v275_v26 = vld [vmem:[%s1673_s29 + $0x88] sm:$0x3] }
  0x36   : > { %v341_v30 = vrot.slane %v275_v26, 1  ;;  %v430_v37 = vrot.slane %v275_v26, 2 }
  0x38   : > { %v342_v34 = vsel %vm312_vm1, %v339_v19, %v341_v30  ;;  %v431_v40 = vsel %vm401_vm0, %v428_v29, %v430_v37 }
  0x39   : > { %703 = vrot.lane.b32.xlu1 %v325_v35, %s1603_s26  ;;  %651 = vrot.lane.b32.xlu0 %v1723_v27, %s1602_s13 }
  0x3d   : > { %550 = vrot.lane.b32.xlu1 %v325_v35, %s1600_s7  ;;  %498 = vrot.lane.b32.xlu0 %v1723_v27, %s1597_s30 }
  0x41   : > { %756 = vrot.lane.b32.xlu1 %v414_v42, %s1604_s9  ;;  %705 = vrot.lane.b32.xlu0 %v327_v43, %s1603_s26 }
  0x45   : > { %552 = vrot.lane.b32.xlu1 %v327_v43, %s1600_s7  ;;  %361 = vrot.lane.b32.xlu0 %v325_v35, %s1599_s6 }
  0x49   : > { %758 = vrot.lane.b32.xlu1 %v416_v45, %s1604_s9  ;;  %603 = vrot.lane.b32.xlu0 %v414_v42, %s1601_s8 }
  0x4d   : > { %450 = vrot.lane.b32.xlu1 %v414_v42, %s1598_s5  ;;  %363 = vrot.lane.b32.xlu0 %v327_v43, %s1599_s6 }
  0x51   : > { %653 = vrot.lane.b32.xlu1 %v1770_v46, %s1602_s13  ;;  %605 = vrot.lane.b32.xlu0 %v416_v45, %s1601_s8 }
  0x55   : > { %500 = vrot.lane.b32.xlu1 %v1770_v46, %s1597_s30  ;;  %452 = vrot.lane.b32.xlu0 %v416_v45, %s1598_s5 }
  0x59   : > { %707 = vrot.lane.b32.xlu1 %v330_v50, %s1603_s26  ;;  %655 = vrot.lane.b32.xlu0 %v1773_v47, %s1602_s13 }
  0x5d   : > { %554 = vrot.lane.b32.xlu1 %v330_v50, %s1600_s7  ;;  %502 = vrot.lane.b32.xlu0 %v1773_v47, %s1597_s30 }
  0x61   : > { %760 = vrot.lane.b32.xlu1 %v419_v55, %s1604_s9  ;;  %709 = vrot.lane.b32.xlu0 %v332_v56, %s1603_s26 }
  0x65   : > { %556 = vrot.lane.b32.xlu1 %v332_v56, %s1600_s7  ;;  %365 = vrot.lane.b32.xlu0 %v330_v50, %s1599_s6 }
  0x69   : > { %762 = vrot.lane.b32.xlu1 %v421_v58, %s1604_s9  ;;  %607 = vrot.lane.b32.xlu0 %v419_v55, %s1601_s8 }
  0x6d   : > { %454 = vrot.lane.b32.xlu1 %v419_v55, %s1598_s5  ;;  %367 = vrot.lane.b32.xlu0 %v332_v56, %s1599_s6 }
  0x71   : > { %657 = vrot.lane.b32.xlu1 %v1805_v59, %s1602_s13  ;;  %609 = vrot.lane.b32.xlu0 %v421_v58, %s1601_s8 }
  0x75   : > { %504 = vrot.lane.b32.xlu1 %v1805_v59, %s1597_s30  ;;  %456 = vrot.lane.b32.xlu0 %v421_v58, %s1598_s5  ;;  %v344_v58 = vrot.slane %v1900_v52, 1 }
  0x77   : > { %v345_v5 = vsel %vm312_vm1, %v343_v57, %v344_v58 }
  0x79   : > { %711 = vrot.lane.b32.xlu1 %v335_v63, %s1603_s26  ;;  %659 = vrot.lane.b32.xlu0 %v1808_v60, %s1602_s13 }
  0x7d   : > { %558 = vrot.lane.b32.xlu1 %v335_v63, %s1600_s7  ;;  %506 = vrot.lane.b32.xlu0 %v1808_v60, %s1597_s30 }
  0x81   : > { %764 = vrot.lane.b32.xlu1 %v424_v8, %s1604_s9  ;;  %713 = vrot.lane.b32.xlu0 %v337_v9, %s1603_s26 }
  0x85   : > { %560 = vrot.lane.b32.xlu1 %v337_v9, %s1600_s7  ;;  %369 = vrot.lane.b32.xlu0 %v335_v63, %s1599_s6 }
  0x89   : > { %766 = vrot.lane.b32.xlu1 %v426_v11, %s1604_s9  ;;  %611 = vrot.lane.b32.xlu0 %v424_v8, %s1601_s8 }
  0x8b   : > { %v1837_v12 = vpop.permute.xlu1 %494  ;;  %v493_v13 = vpop.permute.xlu0 %492 }
  0x8d   : > { %458 = vrot.lane.b32.xlu1 %v424_v8, %s1598_s5  ;;  %371 = vrot.lane.b32.xlu0 %v337_v9, %s1599_s6  ;;  %v278_v9 = vld [vmem:[%s1673_s29 + $0xa0] sm:$0x3] }
  0x8e   : > { %v435_v29 = vrot.slane %v278_v9, 2 }
  0x8f   : > { %v443_v15 = vpop.permute.xlu1 %442  ;;  %v354_v16 = vpop.permute.xlu0 %353 }
  0x90   : > { %v805_v43 = vsel %vm804_vm3, %v1682_v2, %v354_v16  ;;  %v346_v16 = vrot.slane %v278_v9, 1 }
  0x91   : > { %661 = vrot.lane.b32.xlu1 %v1842_v14, %s1602_s13  ;;  %613 = vrot.lane.b32.xlu0 %v426_v11, %s1601_s8  ;;  %v822_v48 = vsel %vm821_vm4, %v805_v43, %v443_v15  ;;  %v432_v15 = vrot.slane %v1892_v49, 2  ;;  %v1967_v43 = vld [vmem:[%s1673_s29 + $0xa8] sm:$0xff] }
  0x92   : > { %v839_v2 = vsel %vm838_vm5, %v822_v48, %v493_v13 }
  0x93   : > { %v1852_v20 = vpop.permute.xlu1 %444  ;;  %v356_v21 = vpop.permute.xlu0 %355 }
  0x94   : > { %v806_v54 = vsel %vm804_vm3, %v1689_v3, %v356_v21 }
  0x95   : > { %508 = vrot.lane.b32.xlu1 %v1842_v14, %s1597_s30  ;;  %460 = vrot.lane.b32.xlu0 %v426_v11, %s1598_s5  ;;  %v823_v3 = vsel %vm821_vm4, %v806_v54, %v1852_v20 }
  0x96   : > { %v840_v6 = vsel %vm838_vm5, %v823_v3, %v1837_v12  ;;  %v433_v12 = vrot.slane %v1900_v52, 2 }
  0x97   : > { %v1858_v23 = vpop.permute.xlu1 %357  ;;  %v547_v24 = vpop.permute.xlu0 %546 }
  0x98   : > { %v856_v53 = vsel %vm855_vm6, %v839_v2, %v547_v24  ;;  %v347_v24 = vsel %vm312_vm1, %v344_v58, %v346_v16  ;;  %v1976_v2 = vld [vmem:[%s1673_s29 + $0xb0] sm:$0xff] }
  0x99   : > { %715 = vrot.lane.b32.xlu1 %v340_v22, %s1603_s26  ;;  %663 = vrot.lane.b32.xlu0 %v1845_v17, %s1602_s13 }
  0x9b   : > { %v600_v31 = vpop.permute.xlu1 %599  ;;  %v549_v32 = vpop.permute.xlu0 %548 }
  0x9c   : > { %v873_v55 = vsel %vm872_vm7, %v856_v53, %v600_v31  ;;  %v857_v10 = vsel %vm855_vm6, %v840_v6, %v549_v32  ;;  %v436_v32 = vsel %vm401_vm0, %v433_v12, %v435_v29  ;;  %v349_v53 = vrot.slane %v1976_v2, 1 }
  0x9d   : > { %562 = vrot.lane.b32.xlu1 %v340_v22, %s1600_s7  ;;  %510 = vrot.lane.b32.xlu0 %v1845_v17, %s1597_s30 }
  0x9f   : > { %v1871_v35 = vpop.permute.xlu1 %446  ;;  %v1873_v36 = vpop.permute.xlu0 %359 }
  0xa0   : > { %v808_v57 = vsel %vm804_vm3, %v1676_v0, %v1873_v36  ;;  %v281_v0 = vld [vmem:[%s1673_s29 + $0xb8] sm:$0x3] }
  0xa1   : > { %768 = vrot.lane.b32.xlu1 %v429_v33, %s1604_s9  ;;  %717 = vrot.lane.b32.xlu0 %v342_v34, %s1603_s26  ;;  %v351_v6 = vrot.slane %v281_v0, 1 }
  0xa3   : > { %v650_v38 = vpop.permute.xlu1 %649  ;;  %v602_v39 = vpop.permute.xlu0 %601 }
  0xa4   : > { %v890_v56 = vsel %vm889_vm8, %v873_v55, %v650_v38  ;;  %v874_v11 = vsel %vm872_vm7, %v857_v10, %v602_v39  ;;  %v807_v39 = vsel %vm804_vm3, %v1679_v1, %v1858_v23 }
  0xa5   : > { %564 = vrot.lane.b32.xlu1 %v342_v34, %s1600_s7  ;;  %373 = vrot.lane.b32.xlu0 %v340_v22, %s1599_s6  ;;  %v434_v22 = vsel %vm401_vm0, %v432_v15, %v433_v12  ;;  %v352_v15 = vsel %vm312_vm1, %v349_v53, %v351_v6 }
  0xa7   : > { %v1880_v41 = vpop.permute.xlu1 %496  ;;  %v1882_v42 = vpop.permute.xlu0 %448 }
  0xa8   : > { %v825_v58 = vsel %vm821_vm4, %v808_v57, %v1882_v42 }
  0xa9   : > { %770 = vrot.lane.b32.xlu1 %v431_v40, %s1604_s9  ;;  %615 = vrot.lane.b32.xlu0 %v429_v33, %s1601_s8 }
  0xab   : > { %v704_v44 = vpop.permute.xlu1 %703  ;;  %v652_v45 = vpop.permute.xlu0 %651 }
  0xac   : > { %v907_v61 = vsel %vm906_vm9, %v890_v56, %v704_v44  ;;  %v891_v13 = vsel %vm889_vm8, %v874_v11, %v652_v45 }
  0xad   : > { %462 = vrot.lane.b32.xlu1 %v429_v33, %s1598_s5  ;;  %375 = vrot.lane.b32.xlu0 %v342_v34, %s1599_s6 }
  0xaf   : > { %v1895_v50 = vpop.permute.xlu1 %550  ;;  %v1897_v51 = vpop.permute.xlu0 %498 }
  0xb1   : > { %665 = vrot.lane.b32.xlu1 %v1892_v49, %s1602_s13  ;;  %617 = vrot.lane.b32.xlu0 %v431_v40, %s1601_s8 }
  0xb3   : > { %v757_v62 = vpop.permute.xlu1 %756  ;;  %v706_v63 = vpop.permute.xlu0 %705 }
  0xb4   : > { %v924_v4 = vsel %vm923_vm10, %v907_v61, %v757_v62  ;;  %v908_v18 = vsel %vm906_vm9, %v891_v13, %v706_v63  ;;  %v842_v62 = vsel %vm838_vm5, %v825_v58, %v1897_v51  ;;  %v438_v51 = vrot.slane %v1976_v2, 2  ;;  %v284_v58 = vld [vmem:[%s1673_s29 + $0xd0] sm:$0x3] }
  0xb5   : > { %512 = vrot.lane.b32.xlu1 %v1892_v49, %s1597_s30  ;;  %464 = vrot.lane.b32.xlu0 %v431_v40, %s1598_s5  ;;  %v824_v40 = vsel %vm821_vm4, %v807_v39, %v1871_v35 }
  0xb6   : > { %1469 = vmatprep.mubr.msk.f32.mxu0 %vm952_vm11, %v924_v4  ;;  %v841_v44 = vsel %vm838_vm5, %v824_v40, %v1880_v41  ;;  %v348_v41 = vrot.slane %v1967_v43, 1 }
  0xb7   : > { %v1923_v7 = vpop.permute.xlu1 %552  ;;  %v1925_v8 = vpop.permute.xlu0 %361  ;;  %v858_v1 = vsel %vm855_vm6, %v841_v44, %v1895_v50  ;;  %v283_v44 = vld [vmem:[%s1673_s29 + $0xc8] sm:$0xff] }
  0xb8   : > { %v350_v61 = vsel %vm312_vm1, %v348_v41, %v349_v53  ;;  %v859_v36 = vsel %vm855_vm6, %v842_v62, %v1923_v7  ;;  %v595_v62 = vrot.slane %v283_v44, 2 }
  0xb9   : > { %719 = vrot.lane.b32.xlu1 %v345_v5, %s1603_s26  ;;  %667 = vrot.lane.b32.xlu0 %v1900_v52, %s1602_s13 }
  0xbb   : > { %v759_v19 = vpop.permute.xlu1 %758  ;;  %v604_v20 = vpop.permute.xlu0 %603 }
  0xbc   : > { %v925_v21 = vsel %vm923_vm10, %v908_v18, %v759_v19  ;;  %v875_v23 = vsel %vm872_vm7, %v858_v1, %v604_v20  ;;  %v440_v18 = vrot.slane %v281_v0, 2  ;;  %v544_v0 = vrot.slane %v284_v58, 1 }
  0xbd   : > { %566 = vrot.lane.b32.xlu1 %v345_v5, %s1600_s7  ;;  %514 = vrot.lane.b32.xlu0 %v1900_v52, %s1597_s30 }
  0xbe   : > { %1470 = vmatmul.mubr.msk.f32.vlgmr.msra.gmra.mrb[0].mxu0 %vm952_vm11, %v925_v21  ;;  %v441_v21 = vsel %vm401_vm0, %v438_v51, %v440_v18  ;;  %v286_v18 = vld [vmem:[%s1673_s29 + $0xe0] sm:$0xff] }
  0xbf   : > { %v1944_v26 = vpop.permute.xlu1 %450  ;;  %v1946_v28 = vpop.permute.xlu0 %363 }
  0xc1   : > { %772 = vrot.lane.b32.xlu1 %v434_v22, %s1604_s9  ;;  %721 = vrot.lane.b32.xlu0 %v347_v24, %s1603_s26 }
  0xc3   : > { %v654_v30 = vpop.permute.xlu1 %653  ;;  %v606_v31 = vpop.permute.xlu0 %605 }
  0xc4   : > { %v892_v35 = vsel %vm889_vm8, %v875_v23, %v654_v30  ;;  %v876_v4 = vsel %vm872_vm7, %v859_v36, %v606_v31  ;;  %v809_v31 = vsel %vm804_vm3, %v1719_v25, %v1925_v8  ;;  %v542_v23 = vrot.slane %v283_v44, 1 }
  0xc5   : > { %568 = vrot.lane.b32.xlu1 %v347_v24, %s1600_s7  ;;  %377 = vrot.lane.b32.xlu0 %v345_v5, %s1599_s6  ;;  %v437_v5 = vrot.slane %v1967_v43, 2 }
  0xc7   : > { %v1953_v33 = vpop.permute.xlu1 %500  ;;  %v1955_v34 = vpop.permute.xlu0 %452  ;;  %v439_v13 = vsel %vm401_vm0, %v437_v5, %v438_v51  ;;  %v545_v5 = vsel %vm312_vm1, %v542_v23, %v544_v0 }
  0xc9   : > { %774 = vrot.lane.b32.xlu1 %v436_v32, %s1604_s9  ;;  %619 = vrot.lane.b32.xlu0 %v434_v22, %s1601_s8 }
  0xcb   : > { %v708_v37 = vpop.permute.xlu1 %707  ;;  %v656_v38 = vpop.permute.xlu0 %655 }
  0xcc   : > { %v909_v54 = vsel %vm906_vm9, %v892_v35, %v708_v37  ;;  %v893_v42 = vsel %vm889_vm8, %v876_v4, %v656_v38  ;;  %v282_v37 = vld [vmem:[%s1673_s29 + $0xc0] sm:$0xff] }
  0xcd   : > { %466 = vrot.lane.b32.xlu1 %v434_v22, %s1598_s5  ;;  %379 = vrot.lane.b32.xlu0 %v347_v24, %s1599_s6 }
  0xcf   : > { %v1971_v45 = vpop.permute.xlu1 %554  ;;  %v1973_v48 = vpop.permute.xlu0 %502 }
  0xd1   : > { %669 = vrot.lane.b32.xlu1 %v1967_v43, %s1602_s13  ;;  %621 = vrot.lane.b32.xlu0 %v436_v32, %s1601_s8 }
  0xd3   : > { %v761_v55 = vpop.permute.xlu1 %760  ;;  %v710_v56 = vpop.permute.xlu0 %709 }
  0xd4   : > { %v926_v50 = vsel %vm923_vm10, %v909_v54, %v761_v55  ;;  %v910_v9 = vsel %vm906_vm9, %v893_v42, %v710_v56 }
  0xd5   : > { %516 = vrot.lane.b32.xlu1 %v1967_v43, %s1597_s30  ;;  %468 = vrot.lane.b32.xlu0 %v436_v32, %s1598_s5  ;;  %v826_v32 = vsel %vm821_vm4, %v809_v31, %v1944_v26  ;;  %v541_v26 = vrot.slane %v282_v37, 1 }
  0xd6   : > { %1472 = vmatprep.mubr.msk.f32.mxu0 %vm952_vm11, %v926_v50  ;;  %v843_v38 = vsel %vm838_vm5, %v826_v32, %v1953_v33 }
  0xd7   : > { %v2001_v63 = vpop.permute.xlu1 %556  ;;  %v2003_v3 = vpop.permute.xlu0 %365  ;;  %v860_v1 = vsel %vm855_vm6, %v843_v38, %v1971_v45  ;;  %v810_v45 = vsel %vm804_vm3, %v1723_v27, %v1946_v28  ;;  %v543_v55 = vsel %vm312_vm1, %v541_v26, %v542_v23  ;;  %v752_v38 = vrot.slane %v286_v18, 2 }
  0xd8   : > { %v827_v54 = vsel %vm821_vm4, %v810_v45, %v1955_v34 }
  0xd9   : > { %723 = vrot.lane.b32.xlu1 %v350_v61, %s1603_s26  ;;  %671 = vrot.lane.b32.xlu0 %v1976_v2, %s1602_s13  ;;  %v844_v56 = vsel %vm838_vm5, %v827_v54, %v1973_v48 }
  0xda   : > { %v861_v27 = vsel %vm855_vm6, %v844_v56, %v2001_v63 }
  0xdb   : > { %v763_v10 = vpop.permute.xlu1 %762  ;;  %v608_v11 = vpop.permute.xlu0 %607 }
  0xdc   : > { %v927_v7 = vsel %vm923_vm10, %v910_v9, %v763_v10  ;;  %v877_v25 = vsel %vm872_vm7, %v860_v1, %v608_v11  ;;  %v597_v9 = vrot.slane %v284_v58, 2 }
  0xdd   : > { %570 = vrot.lane.b32.xlu1 %v350_v61, %s1600_s7  ;;  %518 = vrot.lane.b32.xlu0 %v1976_v2, %s1597_s30 }
  0xde   : > { %1473 = vmatmul.mubr.msk.f32.gmra.mrb[2].mxu0 %vm952_vm11, %v927_v7  ;;  %v598_v7 = vsel %vm401_vm0, %v595_v62, %v597_v9 }
  0xdf   : > { %v2023_v12 = vpop.permute.xlu1 %454  ;;  %v2025_v16 = vpop.permute.xlu0 %367 }
  0xe1   : > { %776 = vrot.lane.b32.xlu1 %v439_v13, %s1604_s9  ;;  %725 = vrot.lane.b32.xlu0 %v352_v15, %s1603_s26 }
  0xe3   : > { %v658_v19 = vpop.permute.xlu1 %657  ;;  %v610_v20 = vpop.permute.xlu0 %609 }
  0xe4   : > { %v894_v8 = vsel %vm889_vm8, %v877_v25, %v658_v19  ;;  %v878_v28 = vsel %vm872_vm7, %v861_v27, %v610_v20  ;;  %v285_v19 = vld [vmem:[%s1673_s29 + $0xd8] sm:$0xff]  ;;  %v287_v20 = vld [vmem:[%s1673_s29 + $0xe8] sm:$0x3]  ;;  %s1412_s29 = sshll.u32 %s1579_s15, 3 }
  0xe5   : > { %572 = vrot.lane.b32.xlu1 %v352_v15, %s1600_s7  ;;  %381 = vrot.lane.b32.xlu0 %v350_v61, %s1599_s6  ;;  %v594_v61 = vrot.slane %v282_v37, 2  ;;  %v754_v26 = vrot.slane %v287_v20, 2  ;;  %p242_p7 = scmp.lt.s32.totalorder %s1412_s29, 15 }
  0xe7   : > { %v2032_v22 = vpop.permute.xlu1 %504  ;;  %v2034_v24 = vpop.permute.xlu0 %456  ;;  %v596_v63 = vsel %vm401_vm0, %v594_v61, %v595_v62  ;;  %s2358_s29 = smov (!%p242_p7, %s1412_s29), 15 }
  0xe8   : > { %s1413_s15 = sshll.u32 %s2358_s29, 1 }
  0xe9   : > { %778 = vrot.lane.b32.xlu1 %v441_v21, %s1604_s9  ;;  %623 = vrot.lane.b32.xlu0 %v439_v13, %s1601_s8 }
  0xeb   : > { %v712_v29 = vpop.permute.xlu1 %711  ;;  %v660_v30 = vpop.permute.xlu0 %659 }
  0xec   : > { %v911_v33 = vsel %vm906_vm9, %v894_v8, %v712_v29  ;;  %v895_v34 = vsel %vm889_vm8, %v878_v28, %v660_v30  ;;  %v698_v29 = vrot.slane %v285_v19, 1  ;;  %v701_v30 = vrot.slane %v287_v20, 1 }
  0xed   : > { %470 = vrot.lane.b32.xlu1 %v439_v13, %s1598_s5  ;;  %383 = vrot.lane.b32.xlu0 %v352_v15, %s1599_s6 }
  0xef   : > { %v2048_v39 = vpop.permute.xlu1 %558  ;;  %v2050_v40 = vpop.permute.xlu0 %506 }
  0xf1   : > { %673 = vrot.lane.b32.xlu1 %v282_v37, %s1602_s13  ;;  %625 = vrot.lane.b32.xlu0 %v441_v21, %s1601_s8 }
  0xf3   : > { %v765_v35 = vpop.permute.xlu1 %764  ;;  %v714_v41 = vpop.permute.xlu0 %713 }
  0xf4   : > { %v928_v53 = vsel %vm923_vm10, %v911_v33, %v765_v35  ;;  %v912_v48 = vsel %vm906_vm9, %v895_v34, %v714_v41  ;;  %v755_v41 = vsel %vm401_vm0, %v752_v38, %v754_v26 }
  0xf5   : > { %520 = vrot.lane.b32.xlu1 %v282_v37, %s1597_s30  ;;  %472 = vrot.lane.b32.xlu0 %v441_v21, %s1598_s5  ;;  %v699_v21 = vrot.slane %v286_v18, 1  ;;  %v811_v37 = vsel %vm804_vm3, %v1770_v46, %v2003_v3 }
  0xf6   : > { %1475 = vmatprep.mubr.msk.f32.mxu0 %vm952_vm11, %v928_v53  ;;  %v828_v1 = vsel %vm821_vm4, %v811_v37, %v2023_v12 }
  0xf7   : > { %v2072_v50 = vpop.permute.xlu1 %560  ;;  %v2074_v57 = vpop.permute.xlu0 %369  ;;  %v702_v25 = vsel %vm312_vm1, %v699_v21, %v701_v30  ;;  %v700_v8 = vsel %vm312_vm1, %v698_v29, %v699_v21  ;;  %v845_v23 = vsel %vm838_vm5, %v828_v1, %v2032_v22 }
  0xf8   : > { %v862_v46 = vsel %vm855_vm6, %v845_v23, %v2048_v39  ;;  %v812_v39 = vsel %vm804_vm3, %v1773_v47, %v2025_v16  ;;  %v813_v9 = vsel %vm804_vm3, %v1805_v59, %v2074_v57 }
  0xf9   : > { %727 = vrot.lane.b32.xlu1 %v543_v55, %s1603_s26  ;;  %675 = vrot.lane.b32.xlu0 %v283_v44, %s1602_s13  ;;  %v829_v56 = vsel %vm821_vm4, %v812_v39, %v2034_v24 }
  0xfa   : > { %v846_v58 = vsel %vm838_vm5, %v829_v56, %v2050_v40 }
  0xfb   : > { %v767_v36 = vpop.permute.xlu1 %766  ;;  %v612_v4 = vpop.permute.xlu0 %611  ;;  %v863_v34 = vsel %vm855_vm6, %v846_v58, %v2072_v50 }
  0xfc   : > { %v929_v42 = vsel %vm923_vm10, %v912_v48, %v767_v36  ;;  %v879_v3 = vsel %vm872_vm7, %v862_v46, %v612_v4 }
  0xfd   : > { %574 = vrot.lane.b32.xlu1 %v543_v55, %s1600_s7  ;;  %522 = vrot.lane.b32.xlu0 %v283_v44, %s1597_s30  ;;  %v751_v44 = vrot.slane %v285_v19, 2  ;;  %s1414_s30 = sshll.u32 %s2356_s16, 5 }
  0xfe   : > { %1476 = vmatmul.mubr.msk.f32.gmra.mrb[4].mxu0 %vm952_vm11, %v929_v42  ;;  %s246_s5 = sadd.s32 %s1414_s30, %s1413_s15 }
  0xff   : > { %v2090_v51 = vpop.permute.xlu1 %458  ;;  %v2092_v6 = vpop.permute.xlu0 %371  ;;  %v753_v53 = vsel %vm401_vm0, %v751_v44, %v752_v38  ;;  %s1415_s6 = sshll.u32 %s246_s5, 3 }
 0x100   : > { %v814_v59 = vsel %vm804_vm3, %v1808_v60, %v2092_v6  ;;  %s2238_s12 = scalar_lea.vmem %s2343_s3, %s1415_s6 }
 0x101   : > { %780 = vrot.lane.b32.xlu1 %v596_v63, %s1604_s9  ;;  %729 = vrot.lane.b32.xlu0 %v545_v5, %s1603_s26 }
 0x103   : > { %v662_v10 = vpop.permute.xlu1 %661  ;;  %v614_v11 = vpop.permute.xlu0 %613 }
 0x104   : > { %v896_v12 = vsel %vm889_vm8, %v879_v3, %v662_v10  ;;  %v880_v61 = vsel %vm872_vm7, %v863_v34, %v614_v11  ;;  %v830_v10 = vsel %vm821_vm4, %v813_v9, %v2090_v51 }
 0x105   : > { %627 = vrot.lane.b32.xlu1 %v596_v63, %s1601_s8  ;;  %576 = vrot.lane.b32.xlu0 %v545_v5, %s1600_s7 }
 0x107   : > { %v509_v13 = vpop.permute.xlu1 %508  ;;  %v2099_v15 = vpop.permute.xlu0 %460 }
 0x108   : > { %v847_v11 = vsel %vm838_vm5, %v830_v10, %v509_v13  ;;  %v831_v57 = vsel %vm821_vm4, %v814_v59, %v2099_v15 }
 0x109   : > { %629 = vrot.lane.b32.xlu1 %v598_v7, %s1601_s8  ;;  %782 = vrot.lane.b32.xlu0 %v598_v7, %s1604_s9 }
 0x10b   : > { %v716_v31 = vpop.permute.xlu1 %715  ;;  %v664_v32 = vpop.permute.xlu0 %663 }
 0x10c   : > { %v913_v45 = vsel %vm906_vm9, %v896_v12, %v716_v31  ;;  %v897_v47 = vsel %vm889_vm8, %v880_v61, %v664_v32 }
 0x10d   : > { %679 = vrot.lane.b32.xlu1 %v286_v18, %s1602_s13  ;;  %677 = vrot.lane.b32.xlu0 %v285_v19, %s1602_s13  ;;  %s1416_s13 = sshll.u32 %s2356_s16, 1 }
 0x10e   : > { %s255_s14 = sadd.s32 %s1416_s13, %s1666_s22 }
 0x10f   : > { %v563_v33 = vpop.permute.xlu1 %562  ;;  %v511_v35 = vpop.permute.xlu0 %510  ;;  %s1417_s23 = sshll.u32 %s255_s14, 1 }
 0x110   : > { %v864_v19 = vsel %vm855_vm6, %v847_v11, %v563_v33  ;;  %v848_v51 = vsel %vm838_vm5, %v831_v57, %v511_v35 }
 0x111   : > { %733 = vrot.lane.b32.xlu1 %v702_v25, %s1603_s26  ;;  %731 = vrot.lane.b32.xlu0 %v700_v8, %s1603_s26  ;;  %s257_s26 = scalar_lea.vmem %s2344_s4, %s1417_s23 }
 0x113   : > { %v769_v22 = vpop.permute.xlu1 %768  ;;  %v718_v54 = vpop.permute.xlu0 %717 }
 0x114   : > { %v930_v55 = vsel %vm923_vm10, %v913_v45, %v769_v22  ;;  %v914_v16 = vsel %vm906_vm9, %v897_v47, %v718_v54 }
 0x115   : > { %786 = vrot.lane.b32.xlu1 %v755_v41, %s1604_s9  ;;  %784 = vrot.lane.b32.xlu0 %v753_v53, %s1604_s9 }
 0x116   : > { %1478 = vmatprep.mubr.msk.f32.mxu0 %vm952_vm11, %v930_v55 }
 0x117   : > { %v565_v27 = vpop.permute.xlu1 %564  ;;  %v374_v28 = vpop.permute.xlu0 %373 }
 0x118   : > { %v865_v38 = vsel %vm855_vm6, %v848_v51, %v565_v27  ;;  %v815_v41 = vsel %vm804_vm3, %v1842_v14, %v374_v28 }
 0x11b   : > { %v771_v62 = vpop.permute.xlu1 %770  ;;  %v616_v0 = vpop.permute.xlu0 %615 }
 0x11c   : > { %v931_v24 = vsel %vm923_vm10, %v914_v16, %v771_v62  ;;  %v881_v20 = vsel %vm872_vm7, %v864_v19, %v616_v0 }
 0x11d   : > { %1479 = vmatmul.mubr.msk.f32.gmra.mrb[6].mxu0 %vm952_vm11, %v931_v24 }
 0x11f   : > { %v463_v48 = vpop.permute.xlu1 %462  ;;  %v376_v36 = vpop.permute.xlu0 %375 }
 0x120   : > { %v832_v53 = vsel %vm821_vm4, %v815_v41, %v463_v48  ;;  %v816_v14 = vsel %vm804_vm3, %v1845_v17, %v376_v36 }
 0x123   : > { %v666_v40 = vpop.permute.xlu1 %665  ;;  %v618_v4 = vpop.permute.xlu0 %617 }
 0x124   : > { %v898_v21 = vsel %vm889_vm8, %v881_v20, %v666_v40  ;;  %v882_v44 = vsel %vm872_vm7, %v865_v38, %v618_v4 }
 0x127   : > { %v513_v42 = vpop.permute.xlu1 %512  ;;  %v465_v63 = vpop.permute.xlu0 %464 }
 0x128   : > { %v849_v45 = vsel %vm838_vm5, %v832_v53, %v513_v42  ;;  %v833_v28 = vsel %vm821_vm4, %v816_v14, %v465_v63 }
 0x12b   : > { %v720_v5 = vpop.permute.xlu1 %719  ;;  %v668_v50 = vpop.permute.xlu0 %667 }
 0x12c   : > { %v915_v29 = vsel %vm906_vm9, %v898_v21, %v720_v5  ;;  %v899_v1 = vsel %vm889_vm8, %v882_v44, %v668_v50 }
 0x12f   : > { %v567_v7 = vpop.permute.xlu1 %566  ;;  %v515_v18 = vpop.permute.xlu0 %514 }
 0x130   : > { %v866_v55 = vsel %vm855_vm6, %v849_v45, %v567_v7  ;;  %v850_v47 = vsel %vm838_vm5, %v833_v28, %v515_v18 }
 0x133   : > { %v773_v30 = vpop.permute.xlu1 %772  ;;  %v722_v31 = vpop.permute.xlu0 %721 }
 0x134   : > { %v932_v32 = vsel %vm923_vm10, %v915_v29, %v773_v30  ;;  %v916_v25 = vsel %vm906_vm9, %v899_v1, %v722_v31 }
 0x135   : > { %1481 = vmatprep.mubr.msk.f32.mxu1 %vm952_vm11, %v932_v32 }
 0x137   : > { %v569_v13 = vpop.permute.xlu1 %568  ;;  %v378_v37 = vpop.permute.xlu0 %377 }
 0x138   : > { %v867_v0 = vsel %vm855_vm6, %v850_v47, %v569_v13  ;;  %v817_v18 = vsel %vm804_vm3, %v1892_v49, %v378_v37  ;;  %v2233_v47 = vld [vmem:[%s2342_s2] ss:$0 sm:$0xff] }
 0x13b   : > { %v775_v8 = vpop.permute.xlu1 %774  ;;  %v620_v26 = vpop.permute.xlu0 %619 }
 0x13c   : > { %v933_v60 = vsel %vm923_vm10, %v916_v25, %v775_v8  ;;  %v883_v39 = vsel %vm872_vm7, %v866_v55, %v620_v26 }
 0x13d   : > { %1482 = vmatmul.mubr.msk.f32.vlgmr.msra.gmra.mrb[0].mxu1 %vm952_vm11, %v933_v60 }
 0x13f   : > { %v467_v6 = vpop.permute.xlu1 %466  ;;  %v380_v15 = vpop.permute.xlu0 %379 }
 0x140   : > { %v834_v19 = vsel %vm821_vm4, %v817_v18, %v467_v6  ;;  %v818_v49 = vsel %vm804_vm3, %v1900_v52, %v380_v15 }
 0x143   : > { %v670_v23 = vpop.permute.xlu1 %669  ;;  %v622_v33 = vpop.permute.xlu0 %621 }
 0x144   : > { %v900_v56 = vsel %vm889_vm8, %v883_v39, %v670_v23  ;;  %v884_v24 = vsel %vm872_vm7, %v867_v0, %v622_v33 }
 0x147   : > { %v517_v35 = vpop.permute.xlu1 %516  ;;  %v469_v46 = vpop.permute.xlu0 %468 }
 0x148   : > { %v851_v20 = vsel %vm838_vm5, %v834_v19, %v517_v35  ;;  %v835_v37 = vsel %vm821_vm4, %v818_v49, %v469_v46 }
 0x14b   : > { %v724_v3 = vpop.permute.xlu1 %723  ;;  %v672_v12 = vpop.permute.xlu0 %671 }
 0x14c   : > { %v917_v58 = vsel %vm906_vm9, %v900_v56, %v724_v3  ;;  %v901_v48 = vsel %vm889_vm8, %v884_v24, %v672_v12 }
 0x14f   : > { %v571_v22 = vpop.permute.xlu1 %570  ;;  %v519_v54 = vpop.permute.xlu0 %518 }
 0x150   : > { %v868_v30 = vsel %vm855_vm6, %v851_v20, %v571_v22  ;;  %v852_v38 = vsel %vm838_vm5, %v835_v37, %v519_v54 }
 0x153   : > { %v777_v27 = vpop.permute.xlu1 %776  ;;  %v726_v34 = vpop.permute.xlu0 %725 }
 0x154   : > { %v934_v61 = vsel %vm923_vm10, %v917_v58, %v777_v27  ;;  %v918_v40 = vsel %vm906_vm9, %v901_v48, %v726_v34 }
 0x155   : > { %1484 = vmatprep.mubr.msk.f32.mxu1 %vm952_vm11, %v934_v61 }
 0x157   : > { %v573_v16 = vpop.permute.xlu1 %572  ;;  %v382_v62 = vpop.permute.xlu0 %381 }
 0x158   : > { %v869_v25 = vsel %vm855_vm6, %v852_v38, %v573_v16  ;;  %v819_v35 = vsel %vm804_vm3, %v1967_v43, %v382_v62 }
 0x15b   : > { %v779_v4 = vpop.permute.xlu1 %778  ;;  %v624_v42 = vpop.permute.xlu0 %623 }
 0x15c   : > { %v935_v17 = vsel %vm923_vm10, %v918_v40, %v779_v4  ;;  %v885_v31 = vsel %vm872_vm7, %v868_v30, %v624_v42 }
 0x15d   : > { %1485 = vmatmul.mubr.msk.f32.gmra.mrb[2].mxu1 %vm952_vm11, %v935_v17 }
 0x15f   : > { %v471_v36 = vpop.permute.xlu1 %470  ;;  %v384_v63 = vpop.permute.xlu0 %383 }
 0x160   : > { %v820_v46 = vsel %vm804_vm3, %v1976_v2, %v384_v63  ;;  %v836_v3 = vsel %vm821_vm4, %v819_v35, %v471_v36 }
 0x163   : > { %v674_v5 = vpop.permute.xlu1 %673  ;;  %v626_v50 = vpop.permute.xlu0 %625 }
 0x164   : > { %v902_v32 = vsel %vm889_vm8, %v885_v31, %v674_v5  ;;  %v886_v8 = vsel %vm872_vm7, %v869_v25, %v626_v50 }
 0x167   : > { %v521_v9 = vpop.permute.xlu1 %520  ;;  %v473_v10 = vpop.permute.xlu0 %472 }
 0x168   : > { %v837_v12 = vsel %vm821_vm4, %v820_v46, %v473_v10  ;;  %v853_v41 = vsel %vm838_vm5, %v836_v3, %v521_v9 }
 0x16b   : > { %v728_v11 = vpop.permute.xlu1 %727  ;;  %v676_v7 = vpop.permute.xlu0 %675 }
 0x16c   : > { %v919_v59 = vsel %vm906_vm9, %v902_v32, %v728_v11  ;;  %v903_v26 = vsel %vm889_vm8, %v886_v8, %v676_v7 }
 0x16f   : > { %v575_v21 = vpop.permute.xlu1 %574  ;;  %v523_v29 = vpop.permute.xlu0 %522 }
 0x170   : > { %v854_v53 = vsel %vm838_vm5, %v837_v12, %v523_v29  ;;  %v870_v54 = vsel %vm855_vm6, %v853_v41, %v575_v21 }
 0x173   : > { %v781_v57 = vpop.permute.xlu1 %780  ;;  %v730_v51 = vpop.permute.xlu0 %729 }
 0x174   : > { %v936_v13 = vsel %vm923_vm10, %v919_v59, %v781_v57  ;;  %v920_v60 = vsel %vm906_vm9, %v903_v26, %v730_v51 }
 0x175   : > { %1487 = vmatprep.mubr.msk.f32.mxu1 %vm952_vm11, %v936_v13 }
 0x177   : > { %v628_v44 = vpop.permute.xlu1 %627  ;;  %v577_v1 = vpop.permute.xlu0 %576 }
 0x178   : > { %v871_v55 = vsel %vm855_vm6, %v854_v53, %v577_v1  ;;  %v887_v43 = vsel %vm872_vm7, %v870_v54, %v628_v44 }
 0x17b   : > { %v630_v6 = vpop.permute.xlu1 %629  ;;  %v783_v23 = vpop.permute.xlu0 %782 }
 0x17c   : > { %v937_v52 = vsel %vm923_vm10, %v920_v60, %v783_v23  ;;  %v888_v2 = vsel %vm872_vm7, %v871_v55, %v630_v6 }
 0x17d   : > { %1488 = vmatmul.mubr.msk.f32.gmra.mrb[4].mxu1 %vm952_vm11, %v937_v52 }
 0x17f   : > { %v680_v15 = vpop.permute.xlu1 %679  ;;  %v678_v33 = vpop.permute.xlu0 %677 }
 0x180   : > { %v905_v39 = vsel %vm889_vm8, %v888_v2, %v680_v15  ;;  %v904_v56 = vsel %vm889_vm8, %v887_v43, %v678_v33 }
 0x183   : > { %v734_v45 = vpop.permute.xlu1 %733  ;;  %v732_v22 = vpop.permute.xlu0 %731 }
 0x184   : > { %v922_v58 = vsel %vm906_vm9, %v905_v39, %v734_v45  ;;  %v921_v27 = vsel %vm906_vm9, %v904_v56, %v732_v22 }
 0x187   : > { %v787_v34 = vpop.permute.xlu1 %786  ;;  %v785_v61 = vpop.permute.xlu0 %784 }
 0x188   : > { %v939_v14 = vsel %vm923_vm10, %v922_v58, %v787_v34  ;;  %v938_v28 = vsel %vm923_vm10, %v921_v27, %v785_v61 }
 0x189   : > { %1490 = vmatprep.mubr.msk.f32.mxu1 %vm952_vm11, %v938_v28 }
 0x18a   : > { %1491 = vmatmul.mubr.msk.f32.gmra.mrb[6].mxu1 %vm952_vm11, %v939_v14 }
 0x191   : > { %v1471_v16 = vpop.f32.mrb[0].mxu0 }
 0x192   : > { %v1077_v62 = vadd.f32 %v1471_v16, %v2233_v47  ;;  %v1071_v0 = vpop.f32.mrb[1].mxu0 }
 0x193   : > { %v1072_v24 = vadd.f32 %v2233_v47, %v1071_v0 }
 0x194   : > { %1151 = vst.msk [vmem:[%s2238_s12 + $0x8] sm:$0xff] %vm804_vm3, %v1077_v62  ;;  %v1167_v48 = vsel %vm804_vm3, %v1077_v62, 0.0  ;;  %v1204_v40 = vmul.f32 %v1077_v62, %v1077_v62 }
 0x195   : > { %1150 = vst.msk [vmem:[%s2238_s12] sm:$0xff] %vm804_vm3, %v1072_v24  ;;  %v1166_v4 = vsel %vm804_vm3, %v1072_v24, 0.0  ;;  %v1203_v42 = vmul.f32 %v1072_v24, %v1072_v24 }
 0x196   : > { %v1220_v17 = vsel %vm804_vm3, %v1204_v40, 0.0  ;;  %v1168_v36 = vadd.f32 %v1167_v48, %v1166_v4 }
 0x197   : > { %v1219_v63 = vsel %vm804_vm3, %v1203_v42, 0.0 }
 0x198   : > { %v1221_v5 = vadd.f32 %v1220_v17, %v1219_v63 }
 0x1b1   : > { %v1474_v50 = vpop.f32.mrb[2].mxu0 }
 0x1b2   : > { %v1087_v9 = vadd.f32 %v1474_v50, %v2233_v47  ;;  %v1081_v10 = vpop.f32.mrb[3].mxu0 }
 0x1b3   : > { %v1082_v11 = vadd.f32 %v2233_v47, %v1081_v10 }
 0x1b4   : > { %1153 = vst.msk [vmem:[%s2238_s12 + $0x18] sm:$0xff] %vm804_vm3, %v1087_v9  ;;  %v1206_v7 = vmul.f32 %v1087_v9, %v1087_v9  ;;  %v1171_v21 = vsel %vm804_vm3, %v1087_v9, 0.0 }
 0x1b5   : > { %1152 = vst.msk [vmem:[%s2238_s12 + $0x10] sm:$0xff] %vm804_vm3, %v1082_v11  ;;  %v1169_v18 = vsel %vm804_vm3, %v1082_v11, 0.0  ;;  %v1205_v19 = vmul.f32 %v1082_v11, %v1082_v11 }
 0x1b6   : > { %v1170_v20 = vadd.f32 %v1169_v18, %v1168_v36  ;;  %v1224_v32 = vsel %vm804_vm3, %v1206_v7, 0.0 }
 0x1b7   : > { %v1222_v29 = vsel %vm804_vm3, %v1205_v19, 0.0 }
 0x1b8   : > { %v1223_v30 = vadd.f32 %v1222_v29, %v1221_v5  ;;  %v1172_v31 = vadd.f32 %v1171_v21, %v1170_v20 }
 0x1ba   : > { %v1225_v59 = vadd.f32 %v1224_v32, %v1223_v30 }
 0x1d1   : > { %v1477_v57 = vpop.f32.mrb[4].mxu0 }
 0x1d2   : > { %v1097_v51 = vadd.f32 %v1477_v57, %v2233_v47  ;;  %v1091_v13 = vpop.f32.mrb[5].mxu0 }
 0x1d3   : > { %v1092_v49 = vadd.f32 %v2233_v47, %v1091_v13 }
 0x1d4   : > { %1155 = vst.msk [vmem:[%s2238_s12 + $0x28] sm:$0xff] %vm804_vm3, %v1097_v51  ;;  %v1208_v37 = vmul.f32 %v1097_v51, %v1097_v51  ;;  %v1175_v25 = vsel %vm804_vm3, %v1097_v51, 0.0 }
 0x1d5   : > { %1154 = vst.msk [vmem:[%s2238_s12 + $0x20] sm:$0xff] %vm804_vm3, %v1092_v49  ;;  %v1173_v38 = vsel %vm804_vm3, %v1092_v49, 0.0  ;;  %v1207_v44 = vmul.f32 %v1092_v49, %v1092_v49 }
 0x1d6   : > { %v1174_v1 = vadd.f32 %v1173_v38, %v1172_v31  ;;  %v1228_v6 = vsel %vm804_vm3, %v1208_v37, 0.0 }
 0x1d7   : > { %v1226_v8 = vsel %vm804_vm3, %v1207_v44, 0.0 }
 0x1d8   : > { %v1227_v26 = vadd.f32 %v1226_v8, %v1225_v59  ;;  %v1176_v60 = vadd.f32 %v1175_v25, %v1174_v1 }
 0x1da   : > { %v1229_v23 = vadd.f32 %v1228_v6, %v1227_v26 }
 0x1f0   : > { %v1480_v52 = vpop.f32.mrb[6].mxu0 }
 0x1f1   : > { %v1107_v15 = vadd.f32 %v1480_v52, %v2233_v47  ;;  %v1101_v33 = vpop.f32.mrb[7].mxu0 }
 0x1f2   : > { %v1102_v35 = vadd.f32 %v2233_v47, %v1101_v33 }
 0x1f3   : > { %1157 = vst.msk [vmem:[%s2238_s12 + $0x38] sm:$0xff] %vm804_vm3, %v1107_v15  ;;  %v1210_v46 = vmul.f32 %v1107_v15, %v1107_v15  ;;  %v1179_v53 = vsel %vm804_vm3, %v1107_v15, 0.0 }
 0x1f4   : > { %1156 = vst.msk [vmem:[%s2238_s12 + $0x30] sm:$0xff] %vm804_vm3, %v1102_v35  ;;  %v1177_v3 = vsel %vm804_vm3, %v1102_v35, 0.0  ;;  %v1209_v12 = vmul.f32 %v1102_v35, %v1102_v35 }
 0x1f5   : > { %v1178_v41 = vadd.f32 %v1177_v3, %v1176_v60  ;;  %v1232_v55 = vsel %vm804_vm3, %v1210_v46, 0.0 }
 0x1f6   : > { %v1230_v45 = vsel %vm804_vm3, %v1209_v12, 0.0 }
 0x1f7   : > { %v1231_v22 = vadd.f32 %v1230_v45, %v1229_v23  ;;  %v1180_v54 = vadd.f32 %v1179_v53, %v1178_v41 }
 0x1f9   : > { %v1233_v43 = vadd.f32 %v1232_v55, %v1231_v22 }
 0x210   : > { %v1483_v2 = vpop.f32.mrb[0].mxu1 }
 0x211   : > { %v1117_v39 = vadd.f32 %v1483_v2, %v2233_v47  ;;  %v1111_v56 = vpop.f32.mrb[1].mxu1 }
 0x212   : > { %v1112_v58 = vadd.f32 %v2233_v47, %v1111_v56 }
 0x213   : > { %1159 = vst.msk [vmem:[%s2238_s12 + $0x48] sm:$0xff] %vm804_vm3, %v1117_v39  ;;  %v1212_v27 = vmul.f32 %v1117_v39, %v1117_v39  ;;  %v1183_v28 = vsel %vm804_vm3, %v1117_v39, 0.0 }
 0x214   : > { %1158 = vst.msk [vmem:[%s2238_s12 + $0x40] sm:$0xff] %vm804_vm3, %v1112_v58  ;;  %v1181_v34 = vsel %vm804_vm3, %v1112_v58, 0.0  ;;  %v1211_v61 = vmul.f32 %v1112_v58, %v1112_v58 }
 0x215   : > { %v1182_v14 = vadd.f32 %v1181_v34, %v1180_v54  ;;  %v1236_v24 = vsel %vm804_vm3, %v1212_v27, 0.0 }
 0x216   : > { %v1234_v16 = vsel %vm804_vm3, %v1211_v61, 0.0 }
 0x217   : > { %v1235_v62 = vadd.f32 %v1234_v16, %v1233_v43  ;;  %v1184_v0 = vadd.f32 %v1183_v28, %v1182_v14 }
 0x219   : > { %v1237_v48 = vadd.f32 %v1236_v24, %v1235_v62 }
 0x230   : > { %v1486_v40 = vpop.f32.mrb[2].mxu1 }
 0x231   : > { %v1127_v4 = vadd.f32 %v1486_v40, %v2233_v47  ;;  %v1121_v42 = vpop.f32.mrb[3].mxu1 }
 0x232   : > { %v1122_v17 = vadd.f32 %v2233_v47, %v1121_v42 }
 0x233   : > { %1161 = vst.msk [vmem:[%s2238_s12 + $0x58] sm:$0xff] %vm804_vm3, %v1127_v4  ;;  %v1214_v36 = vmul.f32 %v1127_v4, %v1127_v4  ;;  %v1187_v9 = vsel %vm804_vm3, %v1127_v4, 0.0 }
 0x234   : > { %1160 = vst.msk [vmem:[%s2238_s12 + $0x50] sm:$0xff] %vm804_vm3, %v1122_v17  ;;  %v1185_v63 = vsel %vm804_vm3, %v1122_v17, 0.0  ;;  %v1213_v5 = vmul.f32 %v1122_v17, %v1122_v17 }
 0x235   : > { %v1186_v50 = vadd.f32 %v1185_v63, %v1184_v0  ;;  %v1240_v18 = vsel %vm804_vm3, %v1214_v36, 0.0 }
 0x236   : > { %v1238_v10 = vsel %vm804_vm3, %v1213_v5, 0.0 }
 0x237   : > { %v1239_v11 = vadd.f32 %v1238_v10, %v1237_v48  ;;  %v1188_v7 = vadd.f32 %v1187_v9, %v1186_v50 }
 0x239   : > { %v1241_v19 = vadd.f32 %v1240_v18, %v1239_v11 }
 0x250   : > { %v1489_v20 = vpop.f32.mrb[4].mxu1 }
 0x251   : > { %v1137_v21 = vadd.f32 %v1489_v20, %v2233_v47  ;;  %v1131_v29 = vpop.f32.mrb[5].mxu1 }
 0x252   : > { %v1132_v30 = vadd.f32 %v2233_v47, %v1131_v29 }
 0x253   : > { %1163 = vst.msk [vmem:[%s2238_s12 + $0x68] sm:$0xff] %vm804_vm3, %v1137_v21  ;;  %v1216_v31 = vmul.f32 %v1137_v21, %v1137_v21  ;;  %v1191_v51 = vsel %vm804_vm3, %v1137_v21, 0.0 }
 0x254   : > { %1162 = vst.msk [vmem:[%s2238_s12 + $0x60] sm:$0xff] %vm804_vm3, %v1132_v30  ;;  %v1189_v32 = vsel %vm804_vm3, %v1132_v30, 0.0  ;;  %v1215_v59 = vmul.f32 %v1132_v30, %v1132_v30 }
 0x255   : > { %v1190_v57 = vadd.f32 %v1189_v32, %v1188_v7  ;;  %v1244_v38 = vsel %vm804_vm3, %v1216_v31, 0.0 }
 0x256   : > { %v1242_v13 = vsel %vm804_vm3, %v1215_v59, 0.0 }
 0x257   : > { %v1243_v49 = vadd.f32 %v1242_v13, %v1241_v19  ;;  %v1192_v37 = vadd.f32 %v1191_v51, %v1190_v57 }
 0x259   : > { %v1245_v44 = vadd.f32 %v1244_v38, %v1243_v49 }
 0x25d   : > { %v1492_v1 = vpop.f32.mrb[6].mxu1 }
 0x25e   : > { %v1147_v25 = vadd.f32 %v1492_v1, %v2233_v47  ;;  %v1141_v8 = vpop.f32.mrb[7].mxu1 }
 0x25f   : > { %v1142_v26 = vadd.f32 %v2233_v47, %v1141_v8 }
 0x260   : > { %1165 = vst.msk [vmem:[%s2238_s12 + $0x78] sm:$0xff] %vm804_vm3, %v1147_v25  ;;  %v1218_v60 = vmul.f32 %v1147_v25, %v1147_v25  ;;  %v1195_v15 = vsel %vm804_vm3, %v1147_v25, 0.0 }
 0x261   : > { %1164 = vst.msk [vmem:[%s2238_s12 + $0x70] sm:$0xff] %vm804_vm3, %v1142_v26  ;;  %v1193_v6 = vsel %vm804_vm3, %v1142_v26, 0.0  ;;  %v1217_v23 = vmul.f32 %v1142_v26, %v1142_v26 }
 0x262   : > { %v1194_v52 = vadd.f32 %v1193_v6, %v1192_v37  ;;  %v1248_v3 = vsel %vm804_vm3, %v1218_v60, 0.0 }
 0x263   : > { %v1246_v33 = vsel %vm804_vm3, %v1217_v23, 0.0 }
 0x264   : > { %v1196_v35 = vadd.f32 %v1195_v15, %v1194_v52  ;;  %v1247_v46 = vadd.f32 %v1246_v33, %v1245_v44 }
 0x266   : > { %v1197_v47 = vrot.slane %v1196_v35, 4  ;;  %v1249_v12 = vadd.f32 %v1248_v3, %v1247_v46 }
 0x268   : > { %v1198_v41 = vadd.f32 %v1197_v47, %v1196_v35  ;;  %v1250_v53 = vrot.slane %v1249_v12, 4 }
 0x26a   : > { %v1199_v45 = vrot.slane %v1198_v41, 2  ;;  %v1251_v22 = vadd.f32 %v1250_v53, %v1249_v12 }
 0x26c   : > { %v1200_v54 = vadd.f32 %v1199_v45, %v1198_v41  ;;  %v1252_v55 = vrot.slane %v1251_v22, 2 }
 0x26e   : > { %v1201_v43 = vrot.slane %v1200_v54, 1  ;;  %v1253_v2 = vadd.f32 %v1252_v55, %v1251_v22 }
 0x270   : > { %v1254_v39 = vrot.slane %v1253_v2, 1  ;;  %v1202_v56 = vadd.f32 %v1201_v43, %v1200_v54 }
 0x272   : > { %v1255_v58 = vadd.f32 %v1254_v39, %v1253_v2 }
 0x274   : > { %v1257_v27 = vsel %vm1256_vm12, %v1202_v56, %v1255_v58 }
 0x275   : > { %1259 = vst.msk [vmem:[%s257_s26] sm:$0x3] %vm1258_vm13, %v1257_v27 }
 0x276 PF: > { %s15_s19 = sadd.s32 1, %s1595_s19   ;;  %s2345_s15 = smov %s1587_s17 }
 0x277   : > { %p12_p8 = scmp.ge.s32.totalorder %s15_s19, 6   ;;  %s2346_s16 = smov %s1591_s18 }
 0x278   : > { %s2347_s17 = smov %s2350_s20  ;;  %s2348_s18 = smov %s2354_s21 }
 0x279   :  { %14 = sbr.rel (!%p12_p8) target bundleno = 3 (0x3), region = 74 }

// kernel: skip_connection_block.20
= control target key start
LH: loop header
LB: loop body
LE: loop exit
PB: predicated region body
PF: predicated region fallthrough
CT: control target
= control target key end

     0   :  { %10 = vsyncpa [#allocation3], 0  ;;  %s2506_s0 = inlined_call_operand.vmem [shape: f32[2,2,10,18,4], index: 0, kind: input, shape index: {}]   ;;  %s2507_s1 = inlined_call_operand.vmem [shape: f32[36,8], index: 1, kind: input, shape index: {}]   ;;  %s2508_s2 = inlined_call_operand.vmem [shape: f32[1,8], index: 2, kind: input, shape index: {}]   ;;  %s2509_s3 = inlined_call_operand.vmem [shape: f32[2,16,16,8], index: 3, kind: output, shape index: {0}]   ;;  %s2510_s4 = inlined_call_operand.hbm [shape: f32[2,2,2,8], index: 4, kind: output, shape index: {1}]  }
   0x1   :  { %12 = vsyncpa [#allocation3 + $0x1], 0  ;;  %s1719_s15 = smov 0   ;;  %s1721_s16 = smov 0  }
   0x2   :  { %s1723_s17 = smov 0   ;;  %s1725_s18 = smov 0  }
   0x3   :  { %s1727_s19 = smov 0   ;;  %s1729_s20 = smov 0  }
   0x4   :  { %s1731_s21 = smov 0   ;;  %s1733_s22 = smov 0  }
   0x5 LB: > { %s1405_s23 = sadd.s32 4294967295, %s1683_s22   ;;  %s1406_s24 = sadd.s32 4294967294, %s1683_s22   ;;  %s1683_s22 = sphi %s1733_s22, %s18_s22   ;;  %s1679_s21 = sphi %s1731_s21, %s2525_s21   ;;  %s1675_s20 = sphi %s1729_s20, %s2524_s20   ;;  %s1671_s19 = sphi %s1727_s19, %s2523_s19   ;;  %s1667_s18 = sphi %s1725_s18, %s2522_s18   ;;  %s1663_s17 = sphi %s1723_s17, %s2521_s17   ;;  %s1659_s16 = sphi %s1721_s16, %s2520_s16   ;;  %s1655_s15 = sphi %s1719_s15, %s2519_s15  }
   0x6   : > { %s27_s25 = sadd.s32 1, %s1675_s20  ;;  %s30_s26 = sadd.s32 1, %s1679_s21 }
   0x7   : > { %p28_p0 = scmp.ge.s32.totalorder %s27_s25, 2  ;;  %p147_p1 = scmp.ne.s32.totalorder %s1663_s17, %s1659_s16 }
   0x8   : > { %p148_p2 = scmp.eq.s32.totalorder %s1405_s23, 3  ;;  %p153_p5 = scmp.ne.s32.totalorder %s1659_s16, %s1655_s15 }
   0x9   : > { %s2527_s25 = smov (%p28_p0, %s27_s25), 0  ;;  %s2529_s26 = smov (!%p28_p0, %s30_s26), %s1679_s21 }
   0xa   : > { %s133_s27 = ssub.s32 %s1675_s20, %s2527_s25  ;;  %p1770_p3 = por %p148_p2, %p147_p1 }
   0xb   : > { %p32_p4 = scmp.ge.s32.totalorder %s2529_s26, 2  ;;  %p154_p6 = scmp.eq.s32.totalorder %s1406_s24, 3 }
   0xc   : > { %p1409_p7 = scmp.ge.s32.totalorder %s1683_s22, 1  ;;  %p190_p9 = scmp.lt.s32.totalorder %s1683_s22, 5 }
   0xd   : > { %s2531_s26 = smov (%p32_p4, %s2529_s26), 0  ;;  %p1779_p8 = por %p154_p6, %p153_p5 }
   0xe   : > { %s132_s30 = ssub.s32 %s1679_s21, %s2531_s26  ;;  %s137_s5 = sadd.s32 1, %s1663_s17 }
   0xf   : > { %s134_s6 = sor.u32 %s133_s27, %s132_s30  ;;  %p191_p10 = pnand %p1409_p7, %p190_p9 }
  0x10   : > { %p135_p11 = scmp.eq.s32.totalorder %s134_s6, 0  ;;  %p230_p12 = scmp.lt.s32.totalorder (!%p191_p10), %s1671_s19, 1  ;;  %vm393_vm0 = vcmask (!%p191_p10), 1045504   ;;  %vm304_vm1 = vcmask (!%p191_p10), 1046528   ;;  %v932_v28 = vld [vmem:[%s2507_s1] sm:$0xff] (!%p191_p10)  ;;  %v933_v29 = vld [vmem:[%s2507_s1 + $0x8] sm:$0xff] (!%p191_p10) }
  0x11   : > { %194 = sbr.rel (%p191_p10) target bundleno = 651 (0x28b), region = 32  ;;  %p232_p13 = scmp.lt.s32.totalorder (!%p191_p10), %s1667_s18, 1  ;;  %v1494_v30 = vpack.c.bf16 (!%p191_p10), %v933_v29, %v932_v28  ;;  %v934_v33 = vld [vmem:[%s2507_s1 + $0x10] sm:$0xff] (!%p191_p10)  ;;  %v935_v34 = vld [vmem:[%s2507_s1 + $0x18] sm:$0xff] (!%p191_p10)  ;;  %v936_v38 = vld [vmem:[%s2507_s1 + $0x20] sm:$0xf] (!%p191_p10) }
  0x12   : > { %s1788_s7 = scalar_select %p135_p11, %s1663_s17, %s137_s5  }
  0x13   : > { %s1685_s27 = smov (!%p191_p10), 12   ;;  %s2511_s30 = smov (!%p191_p10), 8   ;;  %1495 = vmatprep.subr.bf16.mxu0 (!%p191_p10), %v1494_v30  ;;  %1502 = vmatprep.subr.bf16.mxu1 (!%p191_p10), %v1494_v30  ;;  %v1498_v36 = vpack.c.bf16 (!%p191_p10), %v935_v34, %v934_v33  ;;  %vm993_vm2 = vcmask (!%p191_p10), 1043456   ;;  %vm796_vm3 = vcmask (!%p191_p10), 31744   ;;  %vm813_vm4 = vcmask (!%p191_p10), 64512  }
  0x14   : > { %s1687_s5 = smov (!%p191_p10), 4   ;;  %s1688_s6 = smov (!%p191_p10), 16   ;;  %1497 = vmatpush3.bf16.msra.mxu0 (!%p191_p10), %v1494_v30  ;;  %1505 = vmatpush3.bf16.msra.mxu1 (!%p191_p10), %v1494_v30  ;;  %vm830_vm5 = vcmask (!%p191_p10), 97280   ;;  %vm847_vm6 = vcmask (!%p191_p10), 130048   ;;  %vm864_vm7 = vcmask (!%p191_p10), 162816   ;;  %vm881_vm8 = vcmask (!%p191_p10), 195584  }
  0x15   : > { %s1690_s14 = smov (!%p191_p10), 24   ;;  %1499 = vmatprep.subr.bf16.mxu0 (!%p191_p10), %v1498_v36  ;;  %1503 = vmatprep.subr.bf16.mxu1 (!%p191_p10), %v1498_v36  ;;  %s2518_s23 = smov (!%p191_p10), 8   ;;  %vm898_vm9 = vcmask (!%p191_p10), 228352   ;;  %vm915_vm10 = vcmask (!%p191_p10), 261120   ;;  %vm944_vm11 = vcmask (!%p191_p10), 293888   ;;  %vm1248_vm12 = vcmask (!%p191_p10), 1040384  }
  0x16   : > { %vm1250_vm13 = vcmask (!%p191_p10), 58368  }
  0x18   : > { %s1793_s8 = scalar_select %p230_p12, %s1671_s19, 1  ;;  %1501 = vmatpush3.bf16.msra.mxu0 %v1498_v36  ;;  %1506 = vmatpush3.bf16.msra.mxu1 %v1498_v36 }
  0x19   : > { %s233_s9 = scalar_select %p232_p13, %s1667_s18, 1  ;;  %1468 = vmatprep.subr.msk.mxu0 %vm993_vm2, %v936_v38  ;;  %1504 = vmatprep.subr.msk.mxu1 %vm993_vm2, %v936_v38 }
  0x1a   : > { %s1509_s10 = smul.u32 60, %s1793_s8 }
  0x1b   : > { %s1508_s11 = smul.u32 30, %s233_s9  ;;  %s2513_s9 = smov 20  }
  0x1c   : > { %1469 = vmatpush3.msk.msra.mxu0 %vm993_vm2, %v936_v38  ;;  %1507 = vmatpush3.msk.msra.mxu1 %vm993_vm2, %v936_v38 }
  0x1d   : > { %s236_s12 = sadd.s32 %s1509_s10, %s1508_s11 }
  0x1e   : > { %s1411_s13 = sshll.u32 %s236_s12, 3  ;;  %s1693_s12 = smov [#allocation2]  }
  0x1f   : > { %s1800_s24 = scalar_lea.vmem %s2506_s0, %s1411_s13  ;;  %s1691_s13 = smov 28  }
  0x20   : > { %v1803_v0 = vld [vmem:[%s1800_s24 + $0x20] sm:$0xff]  ;;  %v1806_v1 = vld [vmem:[%s1800_s24 + $0x18] sm:$0xff]  ;;  %v1816_v3 = vld [vmem:[%s1800_s24 + $0x8] sm:$0xff] }
  0x21   : > { %v1809_v2 = vld [vmem:[%s1800_s24] sm:$0xff]  ;;  %486 = vrot.lane.b32.xlu1 %v1803_v0, %s1685_s27  ;;  %484 = vrot.lane.b32.xlu0 %v1806_v1, %s1685_s27  ;;  %v252_v6 = vld [vmem:[%s1800_s24 + $0x10] sm:$0x3]  ;;  %v395_v7 = vrot.slane %v1816_v3, 2  ;;  %v306_v8 = vrot.slane %v1816_v3, 1  ;;  %v310_v15 = vrot.slane %v1806_v1, 1 }
  0x22   : > { %v394_v4 = vrot.slane %v1809_v2, 2  ;;  %v305_v5 = vrot.slane %v1809_v2, 1  ;;  %v397_v9 = vrot.slane %v252_v6, 2  ;;  %v308_v10 = vrot.slane %v252_v6, 1  ;;  %v255_v17 = vld [vmem:[%s1800_s24 + $0x28] sm:$0x3] }
  0x23   : > { %v311_v16 = vrot.slane %v1803_v0, 1  ;;  %v399_v19 = vrot.slane %v1806_v1, 2  ;;  %v400_v20 = vrot.slane %v1803_v0, 2  ;;  %v313_v21 = vrot.slane %v255_v17, 1  ;;  %v1846_v25 = vld [vmem:[%s1800_s24 + $0x30] sm:$0xff]  ;;  %v1850_v27 = vld [vmem:[%s1800_s24 + $0x38] sm:$0xff] }
  0x24   : > { %v396_v11 = vsel %vm393_vm0, %v394_v4, %v395_v7  ;;  %v307_v12 = vsel %vm304_vm1, %v305_v5, %v306_v8  ;;  %v398_v13 = vsel %vm393_vm0, %v395_v7, %v397_v9  ;;  %v309_v14 = vsel %vm304_vm1, %v306_v8, %v308_v10  ;;  %v258_v37 = vld [vmem:[%s1800_s24 + $0x40] sm:$0x3]  ;;  %v1897_v46 = vld [vmem:[%s1800_s24 + $0x48] sm:$0xff]  ;;  %v1900_v47 = vld [vmem:[%s1800_s24 + $0x50] sm:$0xff] }
  0x25   : > { %434 = vrot.lane.b32.xlu1 %v396_v11, %s2511_s30  ;;  %345 = vrot.lane.b32.xlu0 %v307_v12, %s1687_s5  ;;  %v312_v18 = vsel %vm304_vm1, %v310_v15, %v311_v16  ;;  %v401_v22 = vsel %vm393_vm0, %v399_v19, %v400_v20  ;;  %v314_v23 = vsel %vm304_vm1, %v311_v16, %v313_v21  ;;  %v402_v24 = vrot.slane %v255_v17, 2  ;;  %v261_v51 = vld [vmem:[%s1800_s24 + $0x58] sm:$0x3]  ;;  %v1932_v59 = vld [vmem:[%s1800_s24 + $0x60] sm:$0xff] }
  0x26   : > { %v315_v31 = vrot.slane %v1846_v25, 1  ;;  %v316_v32 = vrot.slane %v1850_v27, 1  ;;  %v404_v39 = vrot.slane %v1846_v25, 2  ;;  %v405_v40 = vrot.slane %v1850_v27, 2  ;;  %v1935_v60 = vld [vmem:[%s1800_s24 + $0x68] sm:$0xff]  ;;  %v1972_v17 = vld [vmem:[%s1800_s24 + $0x80] sm:$0xff] }
  0x27   : > { %v403_v26 = vsel %vm393_vm0, %v400_v20, %v402_v24  ;;  %v318_v41 = vrot.slane %v258_v37, 1  ;;  %v407_v44 = vrot.slane %v258_v37, 2  ;;  %v320_v48 = vrot.slane %v1897_v46, 1  ;;  %v264_v4 = vld [vmem:[%s1800_s24 + $0x70] sm:$0x3] }
  0x28   : > { %v317_v35 = vsel %vm304_vm1, %v315_v31, %v316_v32  ;;  %v406_v42 = vsel %vm393_vm0, %v404_v39, %v405_v40  ;;  %v321_v49 = vrot.slane %v1900_v47, 1  ;;  %v409_v52 = vrot.slane %v1897_v46, 2 }
  0x29   : > { %436 = vrot.lane.b32.xlu1 %v398_v13, %s2511_s30  ;;  %347 = vrot.lane.b32.xlu0 %v309_v14, %s1687_s5  ;;  %v319_v43 = vsel %vm304_vm1, %v316_v32, %v318_v41  ;;  %v408_v45 = vsel %vm393_vm0, %v405_v40, %v407_v44  ;;  %v410_v53 = vrot.slane %v1900_v47, 2  ;;  %v323_v54 = vrot.slane %v261_v51, 1  ;;  %v1969_v14 = vld [vmem:[%s1800_s24 + $0x78] sm:$0xff] }
  0x2a   : > { %v322_v50 = vsel %vm304_vm1, %v320_v48, %v321_v49  ;;  %v412_v57 = vrot.slane %v261_v51, 2  ;;  %v325_v61 = vrot.slane %v1932_v59, 1  ;;  %v326_v62 = vrot.slane %v1935_v60, 1 }
  0x2b   : > { %v411_v55 = vsel %vm393_vm0, %v409_v52, %v410_v53  ;;  %v324_v56 = vsel %vm304_vm1, %v321_v49, %v323_v54  ;;  %v414_v5 = vrot.slane %v1932_v59, 2  ;;  %v415_v6 = vrot.slane %v1935_v60, 2  ;;  %v2019_v49 = vld [vmem:[%s1800_s24 + $0x90] sm:$0xff]  ;;  %v2027_v52 = vld [vmem:[%s1800_s24 + $0x98] sm:$0xff] }
  0x2c   : > { %v413_v58 = vsel %vm393_vm0, %v410_v53, %v412_v57  ;;  %v327_v63 = vsel %vm304_vm1, %v325_v61, %v326_v62  ;;  %v328_v7 = vrot.slane %v264_v4, 1  ;;  %v417_v10 = vrot.slane %v264_v4, 2 }
  0x2d   : > { %349 = vrot.lane.b32.xlu1 %v312_v18, %s1687_s5  ;;  %538 = vrot.lane.b32.xlu0 %v312_v18, %s1688_s6  ;;  %v416_v8 = vsel %vm393_vm0, %v414_v5, %v415_v6  ;;  %v330_v18 = vrot.slane %v1969_v14, 1  ;;  %v331_v19 = vrot.slane %v1972_v17, 1  ;;  %v419_v28 = vrot.slane %v1969_v14, 2 }
  0x2e   : > { %v329_v9 = vsel %vm304_vm1, %v326_v62, %v328_v7  ;;  %v418_v11 = vsel %vm393_vm0, %v415_v6, %v417_v10  ;;  %v420_v29 = vrot.slane %v1972_v17, 2  ;;  %v335_v57 = vrot.slane %v2019_v49, 1 }
  0x30   : > { %v421_v33 = vsel %vm393_vm0, %v419_v28, %v420_v29 }
  0x31   : > { %591 = vrot.lane.b32.xlu1 %v401_v22, %s2513_s9  ;;  %540 = vrot.lane.b32.xlu0 %v314_v23, %s1688_s6 }
  0x35   : > { %438 = vrot.lane.b32.xlu1 %v401_v22, %s2511_s30  ;;  %351 = vrot.lane.b32.xlu0 %v314_v23, %s1687_s5  ;;  %v332_v22 = vsel %vm304_vm1, %v330_v18, %v331_v19 }
  0x39   : > { %641 = vrot.lane.b32.xlu1 %v1846_v25, %s1690_s14  ;;  %593 = vrot.lane.b32.xlu0 %v403_v26, %s2513_s9  ;;  %s2517_s9 = smov 20  }
  0x3d   : > { %488 = vrot.lane.b32.xlu1 %v1846_v25, %s1685_s27  ;;  %440 = vrot.lane.b32.xlu0 %v403_v26, %s2511_s30  ;;  %s1692_s30 = smov 32   ;;  %v267_v26 = vld [vmem:[%s1800_s24 + $0x88] sm:$0x3] }
  0x3e   : > { %v333_v30 = vrot.slane %v267_v26, 1  ;;  %v422_v37 = vrot.slane %v267_v26, 2 }
  0x40   : > { %v334_v34 = vsel %vm304_vm1, %v331_v19, %v333_v30  ;;  %v423_v40 = vsel %vm393_vm0, %v420_v29, %v422_v37 }
  0x41   : > { %695 = vrot.lane.b32.xlu1 %v317_v35, %s1691_s13  ;;  %643 = vrot.lane.b32.xlu0 %v1850_v27, %s1690_s14 }
  0x45   : > { %542 = vrot.lane.b32.xlu1 %v317_v35, %s1688_s6  ;;  %490 = vrot.lane.b32.xlu0 %v1850_v27, %s1685_s27 }
  0x49   : > { %748 = vrot.lane.b32.xlu1 %v406_v42, %s1692_s30  ;;  %697 = vrot.lane.b32.xlu0 %v319_v43, %s1691_s13 }
  0x4d   : > { %544 = vrot.lane.b32.xlu1 %v319_v43, %s1688_s6  ;;  %353 = vrot.lane.b32.xlu0 %v317_v35, %s1687_s5 }
  0x51   : > { %750 = vrot.lane.b32.xlu1 %v408_v45, %s1692_s30  ;;  %595 = vrot.lane.b32.xlu0 %v406_v42, %s2517_s9 }
  0x55   : > { %442 = vrot.lane.b32.xlu1 %v406_v42, %s2518_s23  ;;  %355 = vrot.lane.b32.xlu0 %v319_v43, %s1687_s5 }
  0x59   : > { %645 = vrot.lane.b32.xlu1 %v1897_v46, %s1690_s14  ;;  %597 = vrot.lane.b32.xlu0 %v408_v45, %s2517_s9 }
  0x5d   : > { %492 = vrot.lane.b32.xlu1 %v1897_v46, %s1685_s27  ;;  %444 = vrot.lane.b32.xlu0 %v408_v45, %s2518_s23 }
  0x61   : > { %699 = vrot.lane.b32.xlu1 %v322_v50, %s1691_s13  ;;  %647 = vrot.lane.b32.xlu0 %v1900_v47, %s1690_s14 }
  0x65   : > { %546 = vrot.lane.b32.xlu1 %v322_v50, %s1688_s6  ;;  %494 = vrot.lane.b32.xlu0 %v1900_v47, %s1685_s27 }
  0x69   : > { %752 = vrot.lane.b32.xlu1 %v411_v55, %s1692_s30  ;;  %701 = vrot.lane.b32.xlu0 %v324_v56, %s1691_s13 }
  0x6d   : > { %548 = vrot.lane.b32.xlu1 %v324_v56, %s1688_s6  ;;  %357 = vrot.lane.b32.xlu0 %v322_v50, %s1687_s5 }
  0x71   : > { %754 = vrot.lane.b32.xlu1 %v413_v58, %s1692_s30  ;;  %599 = vrot.lane.b32.xlu0 %v411_v55, %s2517_s9 }
  0x75   : > { %446 = vrot.lane.b32.xlu1 %v411_v55, %s2518_s23  ;;  %359 = vrot.lane.b32.xlu0 %v324_v56, %s1687_s5 }
  0x79   : > { %649 = vrot.lane.b32.xlu1 %v1932_v59, %s1690_s14  ;;  %601 = vrot.lane.b32.xlu0 %v413_v58, %s2517_s9 }
  0x7d   : > { %496 = vrot.lane.b32.xlu1 %v1932_v59, %s1685_s27  ;;  %448 = vrot.lane.b32.xlu0 %v413_v58, %s2518_s23  ;;  %v336_v58 = vrot.slane %v2027_v52, 1 }
  0x7f   : > { %v337_v5 = vsel %vm304_vm1, %v335_v57, %v336_v58 }
  0x81   : > { %703 = vrot.lane.b32.xlu1 %v327_v63, %s1691_s13  ;;  %651 = vrot.lane.b32.xlu0 %v1935_v60, %s1690_s14 }
  0x85   : > { %550 = vrot.lane.b32.xlu1 %v327_v63, %s1688_s6  ;;  %498 = vrot.lane.b32.xlu0 %v1935_v60, %s1685_s27 }
  0x89   : > { %756 = vrot.lane.b32.xlu1 %v416_v8, %s1692_s30  ;;  %705 = vrot.lane.b32.xlu0 %v329_v9, %s1691_s13 }
  0x8d   : > { %552 = vrot.lane.b32.xlu1 %v329_v9, %s1688_s6  ;;  %361 = vrot.lane.b32.xlu0 %v327_v63, %s1687_s5 }
  0x91   : > { %758 = vrot.lane.b32.xlu1 %v418_v11, %s1692_s30  ;;  %603 = vrot.lane.b32.xlu0 %v416_v8, %s2517_s9 }
  0x93   : > { %v1964_v12 = vpop.permute.xlu1 %486  ;;  %v485_v13 = vpop.permute.xlu0 %484 }
  0x95   : > { %450 = vrot.lane.b32.xlu1 %v416_v8, %s2518_s23  ;;  %363 = vrot.lane.b32.xlu0 %v329_v9, %s1687_s5  ;;  %v270_v9 = vld [vmem:[%s1800_s24 + $0xa0] sm:$0x3] }
  0x96   : > { %v427_v29 = vrot.slane %v270_v9, 2 }
  0x97   : > { %v435_v15 = vpop.permute.xlu1 %434  ;;  %v346_v16 = vpop.permute.xlu0 %345 }
  0x98   : > { %v797_v43 = vsel %vm796_vm3, %v1809_v2, %v346_v16  ;;  %v338_v16 = vrot.slane %v270_v9, 1 }
  0x99   : > { %653 = vrot.lane.b32.xlu1 %v1969_v14, %s1690_s14  ;;  %605 = vrot.lane.b32.xlu0 %v418_v11, %s2517_s9  ;;  %v814_v48 = vsel %vm813_vm4, %v797_v43, %v435_v15  ;;  %v424_v15 = vrot.slane %v2019_v49, 2  ;;  %v2094_v43 = vld [vmem:[%s1800_s24 + $0xa8] sm:$0xff] }
  0x9a   : > { %v831_v2 = vsel %vm830_vm5, %v814_v48, %v485_v13 }
  0x9b   : > { %v1979_v20 = vpop.permute.xlu1 %436  ;;  %v348_v21 = vpop.permute.xlu0 %347 }
  0x9c   : > { %v798_v54 = vsel %vm796_vm3, %v1816_v3, %v348_v21 }
  0x9d   : > { %500 = vrot.lane.b32.xlu1 %v1969_v14, %s1685_s27  ;;  %452 = vrot.lane.b32.xlu0 %v418_v11, %s2518_s23  ;;  %v815_v3 = vsel %vm813_vm4, %v798_v54, %v1979_v20 }
  0x9e   : > { %v832_v6 = vsel %vm830_vm5, %v815_v3, %v1964_v12  ;;  %v425_v12 = vrot.slane %v2027_v52, 2 }
  0x9f   : > { %v1985_v23 = vpop.permute.xlu1 %349  ;;  %v539_v24 = vpop.permute.xlu0 %538 }
  0xa0   : > { %v848_v53 = vsel %vm847_vm6, %v831_v2, %v539_v24  ;;  %v339_v24 = vsel %vm304_vm1, %v336_v58, %v338_v16  ;;  %v2103_v2 = vld [vmem:[%s1800_s24 + $0xb0] sm:$0xff] }
  0xa1   : > { %707 = vrot.lane.b32.xlu1 %v332_v22, %s1691_s13  ;;  %655 = vrot.lane.b32.xlu0 %v1972_v17, %s1690_s14 }
  0xa3   : > { %v592_v31 = vpop.permute.xlu1 %591  ;;  %v541_v32 = vpop.permute.xlu0 %540 }
  0xa4   : > { %v865_v55 = vsel %vm864_vm7, %v848_v53, %v592_v31  ;;  %v849_v10 = vsel %vm847_vm6, %v832_v6, %v541_v32  ;;  %v428_v32 = vsel %vm393_vm0, %v425_v12, %v427_v29  ;;  %v341_v53 = vrot.slane %v2103_v2, 1 }
  0xa5   : > { %554 = vrot.lane.b32.xlu1 %v332_v22, %s1688_s6  ;;  %502 = vrot.lane.b32.xlu0 %v1972_v17, %s1685_s27 }
  0xa7   : > { %v1998_v35 = vpop.permute.xlu1 %438  ;;  %v2000_v36 = vpop.permute.xlu0 %351 }
  0xa8   : > { %v800_v57 = vsel %vm796_vm3, %v1803_v0, %v2000_v36  ;;  %v273_v0 = vld [vmem:[%s1800_s24 + $0xb8] sm:$0x3] }
  0xa9   : > { %760 = vrot.lane.b32.xlu1 %v421_v33, %s1692_s30  ;;  %709 = vrot.lane.b32.xlu0 %v334_v34, %s1691_s13  ;;  %v343_v6 = vrot.slane %v273_v0, 1 }
  0xab   : > { %v642_v38 = vpop.permute.xlu1 %641  ;;  %v594_v39 = vpop.permute.xlu0 %593 }
  0xac   : > { %v882_v56 = vsel %vm881_vm8, %v865_v55, %v642_v38  ;;  %v866_v11 = vsel %vm864_vm7, %v849_v10, %v594_v39  ;;  %v799_v39 = vsel %vm796_vm3, %v1806_v1, %v1985_v23 }
  0xad   : > { %556 = vrot.lane.b32.xlu1 %v334_v34, %s1688_s6  ;;  %365 = vrot.lane.b32.xlu0 %v332_v22, %s1687_s5  ;;  %v426_v22 = vsel %vm393_vm0, %v424_v15, %v425_v12  ;;  %v344_v15 = vsel %vm304_vm1, %v341_v53, %v343_v6 }
  0xaf   : > { %v2007_v41 = vpop.permute.xlu1 %488  ;;  %v2009_v42 = vpop.permute.xlu0 %440 }
  0xb0   : > { %v817_v58 = vsel %vm813_vm4, %v800_v57, %v2009_v42 }
  0xb1   : > { %762 = vrot.lane.b32.xlu1 %v423_v40, %s1692_s30  ;;  %607 = vrot.lane.b32.xlu0 %v421_v33, %s2517_s9 }
  0xb3   : > { %v696_v44 = vpop.permute.xlu1 %695  ;;  %v644_v45 = vpop.permute.xlu0 %643 }
  0xb4   : > { %v899_v61 = vsel %vm898_vm9, %v882_v56, %v696_v44  ;;  %v883_v13 = vsel %vm881_vm8, %v866_v11, %v644_v45 }
  0xb5   : > { %454 = vrot.lane.b32.xlu1 %v421_v33, %s2518_s23  ;;  %367 = vrot.lane.b32.xlu0 %v334_v34, %s1687_s5 }
  0xb7   : > { %v2022_v50 = vpop.permute.xlu1 %542  ;;  %v2024_v51 = vpop.permute.xlu0 %490 }
  0xb9   : > { %657 = vrot.lane.b32.xlu1 %v2019_v49, %s1690_s14  ;;  %609 = vrot.lane.b32.xlu0 %v423_v40, %s2517_s9 }
  0xbb   : > { %v749_v62 = vpop.permute.xlu1 %748  ;;  %v698_v63 = vpop.permute.xlu0 %697 }
  0xbc   : > { %v916_v4 = vsel %vm915_vm10, %v899_v61, %v749_v62  ;;  %v900_v18 = vsel %vm898_vm9, %v883_v13, %v698_v63  ;;  %v834_v62 = vsel %vm830_vm5, %v817_v58, %v2024_v51  ;;  %v430_v51 = vrot.slane %v2103_v2, 2  ;;  %v276_v58 = vld [vmem:[%s1800_s24 + $0xd0] sm:$0x3] }
  0xbd   : > { %504 = vrot.lane.b32.xlu1 %v2019_v49, %s1685_s27  ;;  %456 = vrot.lane.b32.xlu0 %v423_v40, %s2518_s23  ;;  %v816_v40 = vsel %vm813_vm4, %v799_v39, %v1998_v35 }
  0xbe   : > { %1470 = vmatprep.mubr.msk.f32.mxu0 %vm944_vm11, %v916_v4  ;;  %v833_v44 = vsel %vm830_vm5, %v816_v40, %v2007_v41  ;;  %v340_v41 = vrot.slane %v2094_v43, 1 }
  0xbf   : > { %v2050_v7 = vpop.permute.xlu1 %544  ;;  %v2052_v8 = vpop.permute.xlu0 %353  ;;  %v850_v1 = vsel %vm847_vm6, %v833_v44, %v2022_v50  ;;  %v275_v44 = vld [vmem:[%s1800_s24 + $0xc8] sm:$0xff] }
  0xc0   : > { %v342_v61 = vsel %vm304_vm1, %v340_v41, %v341_v53  ;;  %v851_v36 = vsel %vm847_vm6, %v834_v62, %v2050_v7  ;;  %v587_v62 = vrot.slane %v275_v44, 2 }
  0xc1   : > { %711 = vrot.lane.b32.xlu1 %v337_v5, %s1691_s13  ;;  %659 = vrot.lane.b32.xlu0 %v2027_v52, %s1690_s14 }
  0xc3   : > { %v751_v19 = vpop.permute.xlu1 %750  ;;  %v596_v20 = vpop.permute.xlu0 %595 }
  0xc4   : > { %v917_v21 = vsel %vm915_vm10, %v900_v18, %v751_v19  ;;  %v867_v23 = vsel %vm864_vm7, %v850_v1, %v596_v20  ;;  %v432_v18 = vrot.slane %v273_v0, 2  ;;  %v536_v0 = vrot.slane %v276_v58, 1 }
  0xc5   : > { %558 = vrot.lane.b32.xlu1 %v337_v5, %s1688_s6  ;;  %506 = vrot.lane.b32.xlu0 %v2027_v52, %s1685_s27 }
  0xc6   : > { %1471 = vmatmul.mubr.msk.f32.vlgmr.msra.gmra.mrb[0].mxu0 %vm944_vm11, %v917_v21  ;;  %v433_v21 = vsel %vm393_vm0, %v430_v51, %v432_v18  ;;  %v278_v18 = vld [vmem:[%s1800_s24 + $0xe0] sm:$0xff] }
  0xc7   : > { %v2071_v26 = vpop.permute.xlu1 %442  ;;  %v2073_v28 = vpop.permute.xlu0 %355 }
  0xc9   : > { %764 = vrot.lane.b32.xlu1 %v426_v22, %s1692_s30  ;;  %713 = vrot.lane.b32.xlu0 %v339_v24, %s1691_s13 }
  0xcb   : > { %v646_v30 = vpop.permute.xlu1 %645  ;;  %v598_v31 = vpop.permute.xlu0 %597 }
  0xcc   : > { %v884_v35 = vsel %vm881_vm8, %v867_v23, %v646_v30  ;;  %v868_v4 = vsel %vm864_vm7, %v851_v36, %v598_v31  ;;  %v801_v31 = vsel %vm796_vm3, %v1846_v25, %v2052_v8  ;;  %v534_v23 = vrot.slane %v275_v44, 1 }
  0xcd   : > { %560 = vrot.lane.b32.xlu1 %v339_v24, %s1688_s6  ;;  %369 = vrot.lane.b32.xlu0 %v337_v5, %s1687_s5  ;;  %v429_v5 = vrot.slane %v2094_v43, 2 }
  0xcf   : > { %v2080_v33 = vpop.permute.xlu1 %492  ;;  %v2082_v34 = vpop.permute.xlu0 %444  ;;  %v431_v13 = vsel %vm393_vm0, %v429_v5, %v430_v51  ;;  %v537_v5 = vsel %vm304_vm1, %v534_v23, %v536_v0 }
  0xd1   : > { %766 = vrot.lane.b32.xlu1 %v428_v32, %s1692_s30  ;;  %611 = vrot.lane.b32.xlu0 %v426_v22, %s2517_s9 }
  0xd3   : > { %v700_v37 = vpop.permute.xlu1 %699  ;;  %v648_v38 = vpop.permute.xlu0 %647 }
  0xd4   : > { %v901_v54 = vsel %vm898_vm9, %v884_v35, %v700_v37  ;;  %v885_v42 = vsel %vm881_vm8, %v868_v4, %v648_v38  ;;  %v274_v37 = vld [vmem:[%s1800_s24 + $0xc0] sm:$0xff] }
  0xd5   : > { %458 = vrot.lane.b32.xlu1 %v426_v22, %s2518_s23  ;;  %371 = vrot.lane.b32.xlu0 %v339_v24, %s1687_s5 }
  0xd7   : > { %v2098_v45 = vpop.permute.xlu1 %546  ;;  %v2100_v48 = vpop.permute.xlu0 %494 }
  0xd9   : > { %661 = vrot.lane.b32.xlu1 %v2094_v43, %s1690_s14  ;;  %613 = vrot.lane.b32.xlu0 %v428_v32, %s2517_s9 }
  0xdb   : > { %v753_v55 = vpop.permute.xlu1 %752  ;;  %v702_v56 = vpop.permute.xlu0 %701 }
  0xdc   : > { %v918_v50 = vsel %vm915_vm10, %v901_v54, %v753_v55  ;;  %v902_v9 = vsel %vm898_vm9, %v885_v42, %v702_v56 }
  0xdd   : > { %508 = vrot.lane.b32.xlu1 %v2094_v43, %s1685_s27  ;;  %460 = vrot.lane.b32.xlu0 %v428_v32, %s2518_s23  ;;  %v818_v32 = vsel %vm813_vm4, %v801_v31, %v2071_v26  ;;  %v533_v26 = vrot.slane %v274_v37, 1 }
  0xde   : > { %1473 = vmatprep.mubr.msk.f32.mxu0 %vm944_vm11, %v918_v50  ;;  %v835_v38 = vsel %vm830_vm5, %v818_v32, %v2080_v33 }
  0xdf   : > { %v2128_v63 = vpop.permute.xlu1 %548  ;;  %v2130_v3 = vpop.permute.xlu0 %357  ;;  %v852_v1 = vsel %vm847_vm6, %v835_v38, %v2098_v45  ;;  %v802_v45 = vsel %vm796_vm3, %v1850_v27, %v2073_v28  ;;  %v535_v55 = vsel %vm304_vm1, %v533_v26, %v534_v23  ;;  %v744_v38 = vrot.slane %v278_v18, 2 }
  0xe0   : > { %v819_v54 = vsel %vm813_vm4, %v802_v45, %v2082_v34 }
  0xe1   : > { %715 = vrot.lane.b32.xlu1 %v342_v61, %s1691_s13  ;;  %663 = vrot.lane.b32.xlu0 %v2103_v2, %s1690_s14  ;;  %v836_v56 = vsel %vm830_vm5, %v819_v54, %v2100_v48 }
  0xe2   : > { %v853_v27 = vsel %vm847_vm6, %v836_v56, %v2128_v63 }
  0xe3   : > { %v755_v10 = vpop.permute.xlu1 %754  ;;  %v600_v11 = vpop.permute.xlu0 %599 }
  0xe4   : > { %v919_v7 = vsel %vm915_vm10, %v902_v9, %v755_v10  ;;  %v869_v25 = vsel %vm864_vm7, %v852_v1, %v600_v11  ;;  %v589_v9 = vrot.slane %v276_v58, 2 }
  0xe5   : > { %562 = vrot.lane.b32.xlu1 %v342_v61, %s1688_s6  ;;  %510 = vrot.lane.b32.xlu0 %v2103_v2, %s1685_s27 }
  0xe6   : > { %1474 = vmatmul.mubr.msk.f32.gmra.mrb[2].mxu0 %vm944_vm11, %v919_v7  ;;  %v590_v7 = vsel %vm393_vm0, %v587_v62, %v589_v9 }
  0xe7   : > { %v2150_v12 = vpop.permute.xlu1 %446  ;;  %v2152_v16 = vpop.permute.xlu0 %359 }
  0xe9   : > { %768 = vrot.lane.b32.xlu1 %v431_v13, %s1692_s30  ;;  %717 = vrot.lane.b32.xlu0 %v344_v15, %s1691_s13 }
  0xeb   : > { %v650_v19 = vpop.permute.xlu1 %649  ;;  %v602_v20 = vpop.permute.xlu0 %601 }
  0xec   : > { %v886_v8 = vsel %vm881_vm8, %v869_v25, %v650_v19  ;;  %v870_v28 = vsel %vm864_vm7, %v853_v27, %v602_v20  ;;  %v277_v19 = vld [vmem:[%s1800_s24 + $0xd8] sm:$0xff]  ;;  %v279_v20 = vld [vmem:[%s1800_s24 + $0xe8] sm:$0x3]  ;;  %s1412_s24 = sshll.u32 %s1667_s18, 3 }
  0xed   : > { %564 = vrot.lane.b32.xlu1 %v344_v15, %s1688_s6  ;;  %373 = vrot.lane.b32.xlu0 %v342_v61, %s1687_s5  ;;  %v586_v61 = vrot.slane %v274_v37, 2  ;;  %v746_v26 = vrot.slane %v279_v20, 2  ;;  %p242_p0 = scmp.lt.s32.totalorder %s1412_s24, 15 }
  0xef   : > { %v2159_v22 = vpop.permute.xlu1 %496  ;;  %v2161_v24 = vpop.permute.xlu0 %448  ;;  %v588_v63 = vsel %vm393_vm0, %v586_v61, %v587_v62  ;;  %s2533_s24 = smov (!%p242_p0, %s1412_s24), 15 }
  0xf1   : > { %770 = vrot.lane.b32.xlu1 %v433_v21, %s1692_s30  ;;  %615 = vrot.lane.b32.xlu0 %v431_v13, %s2517_s9 }
  0xf3   : > { %v704_v29 = vpop.permute.xlu1 %703  ;;  %v652_v30 = vpop.permute.xlu0 %651 }
  0xf4   : > { %v903_v33 = vsel %vm898_vm9, %v886_v8, %v704_v29  ;;  %v887_v34 = vsel %vm881_vm8, %v870_v28, %v652_v30  ;;  %v690_v29 = vrot.slane %v277_v19, 1  ;;  %v693_v30 = vrot.slane %v279_v20, 1 }
  0xf5   : > { %462 = vrot.lane.b32.xlu1 %v431_v13, %s2518_s23  ;;  %375 = vrot.lane.b32.xlu0 %v344_v15, %s1687_s5  ;;  %s1414_s5 = sshll.u32 %s1793_s8, 5  ;;  %s227_s8 = sand.u32 1, %s1659_s16  }
  0xf7   : > { %v2175_v39 = vpop.permute.xlu1 %550  ;;  %v2177_v40 = vpop.permute.xlu0 %498 }
  0xf9   : > { %665 = vrot.lane.b32.xlu1 %v274_v37, %s1690_s14  ;;  %617 = vrot.lane.b32.xlu0 %v433_v21, %s2517_s9 }
  0xfb   : > { %v757_v35 = vpop.permute.xlu1 %756  ;;  %v706_v41 = vpop.permute.xlu0 %705 }
  0xfc   : > { %v920_v53 = vsel %vm915_vm10, %v903_v33, %v757_v35  ;;  %v904_v48 = vsel %vm898_vm9, %v887_v34, %v706_v41  ;;  %v747_v41 = vsel %vm393_vm0, %v744_v38, %v746_v26 }
  0xfd   : > { %512 = vrot.lane.b32.xlu1 %v274_v37, %s1685_s27  ;;  %464 = vrot.lane.b32.xlu0 %v433_v21, %s2518_s23  ;;  %v691_v21 = vrot.slane %v278_v18, 1  ;;  %v803_v37 = vsel %vm796_vm3, %v1897_v46, %v2130_v3  ;;  %s1435_s23 = sshll.u32 %s1671_s19, 1 }
  0xfe   : > { %1476 = vmatprep.mubr.msk.f32.mxu0 %vm944_vm11, %v920_v53  ;;  %v820_v1 = vsel %vm813_vm4, %v803_v37, %v2150_v12 }
  0xff   : > { %v2199_v50 = vpop.permute.xlu1 %552  ;;  %v2201_v57 = vpop.permute.xlu0 %361  ;;  %v694_v25 = vsel %vm304_vm1, %v691_v21, %v693_v30  ;;  %v692_v8 = vsel %vm304_vm1, %v690_v29, %v691_v21  ;;  %v837_v23 = vsel %vm830_vm5, %v820_v1, %v2159_v22 }
 0x100   : > { %v854_v46 = vsel %vm847_vm6, %v837_v23, %v2175_v39  ;;  %v804_v39 = vsel %vm796_vm3, %v1900_v47, %v2152_v16  ;;  %v805_v9 = vsel %vm796_vm3, %v1932_v59, %v2201_v57 }
 0x101   : > { %719 = vrot.lane.b32.xlu1 %v535_v55, %s1691_s13  ;;  %667 = vrot.lane.b32.xlu0 %v275_v44, %s1690_s14  ;;  %v821_v56 = vsel %vm813_vm4, %v804_v39, %v2161_v24 }
 0x102   : > { %v838_v58 = vsel %vm830_vm5, %v821_v56, %v2177_v40 }
 0x103   : > { %v759_v36 = vpop.permute.xlu1 %758  ;;  %v604_v4 = vpop.permute.xlu0 %603  ;;  %v855_v34 = vsel %vm847_vm6, %v838_v58, %v2199_v50 }
 0x104   : > { %v921_v42 = vsel %vm915_vm10, %v904_v48, %v759_v36  ;;  %v871_v3 = vsel %vm864_vm7, %v854_v46, %v604_v4 }
 0x105   : > { %566 = vrot.lane.b32.xlu1 %v535_v55, %s1688_s6  ;;  %514 = vrot.lane.b32.xlu0 %v275_v44, %s1685_s27  ;;  %v743_v44 = vrot.slane %v277_v19, 2  ;;  %s1413_s27 = sshll.u32 %s2533_s24, 1  ;;  %s1278_s24 = sadd.s32 %s1667_s18, %s1435_s23 }
 0x106   : > { %1477 = vmatmul.mubr.msk.f32.gmra.mrb[4].mxu0 %vm944_vm11, %v921_v42  ;;  %s1263_s18 = scalar_lea.sflag [#allocation3], %s227_s8 }
 0x107   : > { %v2217_v51 = vpop.permute.xlu1 %450  ;;  %v2219_v6 = vpop.permute.xlu0 %363  ;;  %v745_v53 = vsel %vm393_vm0, %v743_v44, %v744_v38 }
 0x108   : > { %v806_v59 = vsel %vm796_vm3, %v1935_v60, %v2219_v6 }
 0x109   : > { %772 = vrot.lane.b32.xlu1 %v588_v63, %s1692_s30  ;;  %721 = vrot.lane.b32.xlu0 %v537_v5, %s1691_s13 }
 0x10b   : > { %v654_v10 = vpop.permute.xlu1 %653  ;;  %v606_v11 = vpop.permute.xlu0 %605 }
 0x10c   : > { %v888_v12 = vsel %vm881_vm8, %v871_v3, %v654_v10  ;;  %v872_v61 = vsel %vm864_vm7, %v855_v34, %v606_v11  ;;  %v822_v10 = vsel %vm813_vm4, %v805_v9, %v2217_v51 }
 0x10d   : > { %619 = vrot.lane.b32.xlu1 %v588_v63, %s2517_s9  ;;  %568 = vrot.lane.b32.xlu0 %v537_v5, %s1688_s6  ;;  %s246_s6 = sadd.s32 %s1414_s5, %s1413_s27  ;;  %s1436_s27 = sshll.u32 %s1278_s24, 5 }
 0x10e   : > { %s2453_s11 = scalar_lea.hbm %s2510_s4, %s1436_s27 }
 0x10f   : > { %v501_v13 = vpop.permute.xlu1 %500  ;;  %v2226_v15 = vpop.permute.xlu0 %452 }
 0x110   : > { %v839_v11 = vsel %vm830_vm5, %v822_v10, %v501_v13  ;;  %v823_v57 = vsel %vm813_vm4, %v806_v59, %v2226_v15 }
 0x111   : > { %621 = vrot.lane.b32.xlu1 %v590_v7, %s2517_s9  ;;  %774 = vrot.lane.b32.xlu0 %v590_v7, %s1692_s30  ;;  %s1410_s9 = sshll.u32 %s227_s8, 1 }
 0x112   : > { %s229_s5 = scalar_lea.vmem [#allocation2], %s1410_s9 }
 0x113   : > { %v708_v31 = vpop.permute.xlu1 %707  ;;  %v656_v32 = vpop.permute.xlu0 %655 }
 0x114   : > { %v905_v45 = vsel %vm898_vm9, %v888_v12, %v708_v31  ;;  %v889_v47 = vsel %vm881_vm8, %v872_v61, %v656_v32 }
 0x115   : > { %671 = vrot.lane.b32.xlu1 %v278_v18, %s1690_s14  ;;  %669 = vrot.lane.b32.xlu0 %v277_v19, %s1690_s14  ;;  %s1415_s14 = sshll.u32 %s246_s6, 3  ;;  %s1282_s6 = sshll.u32 %s229_s5, 4  ;;  %s2455_s6 = int_to_ptr.vmem [resolvable:$true] %s1282_s6 }
 0x116   : > { %s1589_s19 = scalar_lea.vmem %s2455_s6, 32 }
 0x117   : > { %v555_v33 = vpop.permute.xlu1 %554  ;;  %v503_v35 = vpop.permute.xlu0 %502  ;;  %p1590_p1 = scmp.ne.s32.totalorder %s2455_s6, %s1589_s19 }
 0x118   : > { %v856_v19 = vsel %vm847_vm6, %v839_v11, %v555_v33  ;;  %v840_v51 = vsel %vm830_vm5, %v823_v57, %v503_v35 }
 0x119   : > { %725 = vrot.lane.b32.xlu1 %v694_v25, %s1691_s13  ;;  %723 = vrot.lane.b32.xlu0 %v692_v8, %s1691_s13  ;;  %p1591_p2 = pnand %p1590_p1, %p1770_p3  ;;  %s1593_s13 = sshll.u32 %s1693_s12, 4  ;;  %s1594_s13 = int_to_ptr.vmem [resolvable:$false] %s1593_s13 }
 0x11a   : > { %p1596_p5 = scmp.lt.s32.totalorder %s2455_s6, %s1594_s13 }
 0x11b   : > { %v761_v22 = vpop.permute.xlu1 %760  ;;  %v710_v54 = vpop.permute.xlu0 %709  ;;  %p1592_p4 = pneg %p1591_p2 }
 0x11c   : > { %v922_v55 = vsel %vm915_vm10, %v905_v45, %v761_v22  ;;  %v906_v16 = vsel %vm898_vm9, %v889_v47, %v710_v54 }
 0x11d   : > { %778 = vrot.lane.b32.xlu1 %v747_v41, %s1692_s30  ;;  %776 = vrot.lane.b32.xlu0 %v745_v53, %s1692_s30  ;;  %s2365_s30 = scalar_lea.vmem %s2509_s3, %s1415_s14 }
 0x11e   : > { %1479 = vmatprep.mubr.msk.f32.mxu0 %vm944_vm11, %v922_v55 }
 0x11f   : > { %v557_v27 = vpop.permute.xlu1 %556  ;;  %v366_v28 = vpop.permute.xlu0 %365 }
 0x120   : > { %v857_v38 = vsel %vm847_vm6, %v840_v51, %v557_v27  ;;  %v807_v41 = vsel %vm796_vm3, %v1969_v14, %v366_v28 }
 0x123   : > { %v763_v62 = vpop.permute.xlu1 %762  ;;  %v608_v0 = vpop.permute.xlu0 %607 }
 0x124   : > { %v923_v24 = vsel %vm915_vm10, %v906_v16, %v763_v62  ;;  %v873_v20 = vsel %vm864_vm7, %v856_v19, %v608_v0 }
 0x125   : > { %1480 = vmatmul.mubr.msk.f32.gmra.mrb[6].mxu0 %vm944_vm11, %v923_v24 }
 0x127   : > { %v455_v48 = vpop.permute.xlu1 %454  ;;  %v368_v36 = vpop.permute.xlu0 %367 }
 0x128   : > { %v824_v53 = vsel %vm813_vm4, %v807_v41, %v455_v48  ;;  %v808_v14 = vsel %vm796_vm3, %v1972_v17, %v368_v36 }
 0x12b   : > { %v658_v40 = vpop.permute.xlu1 %657  ;;  %v610_v4 = vpop.permute.xlu0 %609 }
 0x12c   : > { %v890_v21 = vsel %vm881_vm8, %v873_v20, %v658_v40  ;;  %v874_v44 = vsel %vm864_vm7, %v857_v38, %v610_v4 }
 0x12f   : > { %v505_v42 = vpop.permute.xlu1 %504  ;;  %v457_v63 = vpop.permute.xlu0 %456 }
 0x130   : > { %v841_v45 = vsel %vm830_vm5, %v824_v53, %v505_v42  ;;  %v825_v28 = vsel %vm813_vm4, %v808_v14, %v457_v63 }
 0x133   : > { %v712_v5 = vpop.permute.xlu1 %711  ;;  %v660_v50 = vpop.permute.xlu0 %659 }
 0x134   : > { %v907_v29 = vsel %vm898_vm9, %v890_v21, %v712_v5  ;;  %v891_v1 = vsel %vm881_vm8, %v874_v44, %v660_v50 }
 0x137   : > { %v559_v7 = vpop.permute.xlu1 %558  ;;  %v507_v18 = vpop.permute.xlu0 %506 }
 0x138   : > { %v858_v55 = vsel %vm847_vm6, %v841_v45, %v559_v7  ;;  %v842_v47 = vsel %vm830_vm5, %v825_v28, %v507_v18 }
 0x13b   : > { %v765_v30 = vpop.permute.xlu1 %764  ;;  %v714_v31 = vpop.permute.xlu0 %713 }
 0x13c   : > { %v924_v32 = vsel %vm915_vm10, %v907_v29, %v765_v30  ;;  %v908_v25 = vsel %vm898_vm9, %v891_v1, %v714_v31 }
 0x13d   : > { %1482 = vmatprep.mubr.msk.f32.mxu1 %vm944_vm11, %v924_v32 }
 0x13f   : > { %v561_v13 = vpop.permute.xlu1 %560  ;;  %v370_v37 = vpop.permute.xlu0 %369 }
 0x140   : > { %v859_v0 = vsel %vm847_vm6, %v842_v47, %v561_v13  ;;  %v809_v18 = vsel %vm796_vm3, %v2019_v49, %v370_v37  ;;  %v2360_v47 = vld [vmem:[%s2508_s2] ss:$0 sm:$0xff] }
 0x143   : > { %v767_v8 = vpop.permute.xlu1 %766  ;;  %v612_v26 = vpop.permute.xlu0 %611 }
 0x144   : > { %v925_v60 = vsel %vm915_vm10, %v908_v25, %v767_v8  ;;  %v875_v39 = vsel %vm864_vm7, %v858_v55, %v612_v26 }
 0x145   : > { %1483 = vmatmul.mubr.msk.f32.vlgmr.msra.gmra.mrb[0].mxu1 %vm944_vm11, %v925_v60 }
 0x147   : > { %v459_v6 = vpop.permute.xlu1 %458  ;;  %v372_v15 = vpop.permute.xlu0 %371 }
 0x148   : > { %v826_v19 = vsel %vm813_vm4, %v809_v18, %v459_v6  ;;  %v810_v49 = vsel %vm796_vm3, %v2027_v52, %v372_v15 }
 0x14b   : > { %v662_v23 = vpop.permute.xlu1 %661  ;;  %v614_v33 = vpop.permute.xlu0 %613 }
 0x14c   : > { %v892_v56 = vsel %vm881_vm8, %v875_v39, %v662_v23  ;;  %v876_v24 = vsel %vm864_vm7, %v859_v0, %v614_v33 }
 0x14f   : > { %v509_v35 = vpop.permute.xlu1 %508  ;;  %v461_v46 = vpop.permute.xlu0 %460 }
 0x150   : > { %v843_v20 = vsel %vm830_vm5, %v826_v19, %v509_v35  ;;  %v827_v37 = vsel %vm813_vm4, %v810_v49, %v461_v46 }
 0x153   : > { %v716_v3 = vpop.permute.xlu1 %715  ;;  %v664_v12 = vpop.permute.xlu0 %663 }
 0x154   : > { %v909_v58 = vsel %vm898_vm9, %v892_v56, %v716_v3  ;;  %v893_v48 = vsel %vm881_vm8, %v876_v24, %v664_v12 }
 0x157   : > { %v563_v22 = vpop.permute.xlu1 %562  ;;  %v511_v54 = vpop.permute.xlu0 %510 }
 0x158   : > { %v860_v30 = vsel %vm847_vm6, %v843_v20, %v563_v22  ;;  %v844_v38 = vsel %vm830_vm5, %v827_v37, %v511_v54 }
 0x15b   : > { %v769_v27 = vpop.permute.xlu1 %768  ;;  %v718_v34 = vpop.permute.xlu0 %717 }
 0x15c   : > { %v926_v61 = vsel %vm915_vm10, %v909_v58, %v769_v27  ;;  %v910_v40 = vsel %vm898_vm9, %v893_v48, %v718_v34 }
 0x15d   : > { %1485 = vmatprep.mubr.msk.f32.mxu1 %vm944_vm11, %v926_v61 }
 0x15f   : > { %v565_v16 = vpop.permute.xlu1 %564  ;;  %v374_v62 = vpop.permute.xlu0 %373 }
 0x160   : > { %v861_v25 = vsel %vm847_vm6, %v844_v38, %v565_v16  ;;  %v811_v35 = vsel %vm796_vm3, %v2094_v43, %v374_v62 }
 0x163   : > { %v771_v4 = vpop.permute.xlu1 %770  ;;  %v616_v42 = vpop.permute.xlu0 %615 }
 0x164   : > { %v927_v17 = vsel %vm915_vm10, %v910_v40, %v771_v4  ;;  %v877_v31 = vsel %vm864_vm7, %v860_v30, %v616_v42 }
 0x165   : > { %1486 = vmatmul.mubr.msk.f32.gmra.mrb[2].mxu1 %vm944_vm11, %v927_v17 }
 0x167   : > { %v463_v36 = vpop.permute.xlu1 %462  ;;  %v376_v63 = vpop.permute.xlu0 %375 }
 0x168   : > { %v812_v46 = vsel %vm796_vm3, %v2103_v2, %v376_v63  ;;  %v828_v3 = vsel %vm813_vm4, %v811_v35, %v463_v36 }
 0x16b   : > { %v666_v5 = vpop.permute.xlu1 %665  ;;  %v618_v50 = vpop.permute.xlu0 %617 }
 0x16c   : > { %v894_v32 = vsel %vm881_vm8, %v877_v31, %v666_v5  ;;  %v878_v8 = vsel %vm864_vm7, %v861_v25, %v618_v50 }
 0x16f   : > { %v513_v9 = vpop.permute.xlu1 %512  ;;  %v465_v10 = vpop.permute.xlu0 %464 }
 0x170   : > { %v829_v12 = vsel %vm813_vm4, %v812_v46, %v465_v10  ;;  %v845_v41 = vsel %vm830_vm5, %v828_v3, %v513_v9 }
 0x173   : > { %v720_v11 = vpop.permute.xlu1 %719  ;;  %v668_v7 = vpop.permute.xlu0 %667 }
 0x174   : > { %v911_v59 = vsel %vm898_vm9, %v894_v32, %v720_v11  ;;  %v895_v26 = vsel %vm881_vm8, %v878_v8, %v668_v7 }
 0x177   : > { %v567_v21 = vpop.permute.xlu1 %566  ;;  %v515_v29 = vpop.permute.xlu0 %514 }
 0x178   : > { %v846_v53 = vsel %vm830_vm5, %v829_v12, %v515_v29  ;;  %v862_v54 = vsel %vm847_vm6, %v845_v41, %v567_v21 }
 0x17b   : > { %v773_v57 = vpop.permute.xlu1 %772  ;;  %v722_v51 = vpop.permute.xlu0 %721 }
 0x17c   : > { %v928_v13 = vsel %vm915_vm10, %v911_v59, %v773_v57  ;;  %v912_v60 = vsel %vm898_vm9, %v895_v26, %v722_v51 }
 0x17d   : > { %1488 = vmatprep.mubr.msk.f32.mxu1 %vm944_vm11, %v928_v13 }
 0x17f   : > { %v620_v44 = vpop.permute.xlu1 %619  ;;  %v569_v1 = vpop.permute.xlu0 %568 }
 0x180   : > { %v863_v55 = vsel %vm847_vm6, %v846_v53, %v569_v1  ;;  %v879_v43 = vsel %vm864_vm7, %v862_v54, %v620_v44 }
 0x183   : > { %v622_v6 = vpop.permute.xlu1 %621  ;;  %v775_v23 = vpop.permute.xlu0 %774 }
 0x184   : > { %v929_v52 = vsel %vm915_vm10, %v912_v60, %v775_v23  ;;  %v880_v2 = vsel %vm864_vm7, %v863_v55, %v622_v6 }
 0x185   : > { %1489 = vmatmul.mubr.msk.f32.gmra.mrb[4].mxu1 %vm944_vm11, %v929_v52 }
 0x187   : > { %v672_v15 = vpop.permute.xlu1 %671  ;;  %v670_v33 = vpop.permute.xlu0 %669 }
 0x188   : > { %v897_v39 = vsel %vm881_vm8, %v880_v2, %v672_v15  ;;  %v896_v56 = vsel %vm881_vm8, %v879_v43, %v670_v33 }
 0x18b   : > { %v726_v45 = vpop.permute.xlu1 %725  ;;  %v724_v22 = vpop.permute.xlu0 %723 }
 0x18c   : > { %v914_v58 = vsel %vm898_vm9, %v897_v39, %v726_v45  ;;  %v913_v27 = vsel %vm898_vm9, %v896_v56, %v724_v22 }
 0x18f   : > { %v779_v34 = vpop.permute.xlu1 %778  ;;  %v777_v61 = vpop.permute.xlu0 %776 }
 0x190   : > { %v931_v14 = vsel %vm915_vm10, %v914_v58, %v779_v34  ;;  %v930_v28 = vsel %vm915_vm10, %v913_v27, %v777_v61 }
 0x191   : > { %1491 = vmatprep.mubr.msk.f32.mxu1 %vm944_vm11, %v930_v28 }
 0x192   : > { %1492 = vmatmul.mubr.msk.f32.gmra.mrb[6].mxu1 %vm944_vm11, %v931_v14 }
 0x199   : > { %v1472_v16 = vpop.f32.mrb[0].mxu0 }
 0x19a   : > { %v1069_v62 = vadd.f32 %v1472_v16, %v2360_v47  ;;  %v1063_v0 = vpop.f32.mrb[1].mxu0 }
 0x19b   : > { %v1064_v24 = vadd.f32 %v2360_v47, %v1063_v0 }
 0x19c   : > { %1143 = vst.msk [vmem:[%s2365_s30 + $0x8] sm:$0xff] %vm813_vm4, %v1069_v62  ;;  %v1159_v48 = vsel %vm813_vm4, %v1069_v62, 0.0  ;;  %v1196_v40 = vmul.f32 %v1069_v62, %v1069_v62 }
 0x19d   : > { %1142 = vst.msk [vmem:[%s2365_s30] sm:$0xff] %vm813_vm4, %v1064_v24  ;;  %v1158_v4 = vsel %vm813_vm4, %v1064_v24, 0.0  ;;  %v1195_v42 = vmul.f32 %v1064_v24, %v1064_v24 }
 0x19e   : > { %v1212_v17 = vsel %vm813_vm4, %v1196_v40, 0.0  ;;  %v1160_v36 = vadd.f32 %v1159_v48, %v1158_v4 }
 0x19f   : > { %v1211_v63 = vsel %vm813_vm4, %v1195_v42, 0.0 }
 0x1a0   : > { %v1213_v5 = vadd.f32 %v1212_v17, %v1211_v63 }
 0x1b9   : > { %v1475_v50 = vpop.f32.mrb[2].mxu0 }
 0x1ba   : > { %v1079_v9 = vadd.f32 %v1475_v50, %v2360_v47  ;;  %v1073_v10 = vpop.f32.mrb[3].mxu0 }
 0x1bb   : > { %v1074_v11 = vadd.f32 %v2360_v47, %v1073_v10 }
 0x1bc   : > { %1145 = vst.msk [vmem:[%s2365_s30 + $0x18] sm:$0xff] %vm813_vm4, %v1079_v9  ;;  %v1198_v7 = vmul.f32 %v1079_v9, %v1079_v9  ;;  %v1163_v21 = vsel %vm813_vm4, %v1079_v9, 0.0 }
 0x1bd   : > { %1144 = vst.msk [vmem:[%s2365_s30 + $0x10] sm:$0xff] %vm813_vm4, %v1074_v11  ;;  %v1161_v18 = vsel %vm813_vm4, %v1074_v11, 0.0  ;;  %v1197_v19 = vmul.f32 %v1074_v11, %v1074_v11 }
 0x1be   : > { %v1162_v20 = vadd.f32 %v1161_v18, %v1160_v36  ;;  %v1216_v32 = vsel %vm813_vm4, %v1198_v7, 0.0 }
 0x1bf   : > { %v1214_v29 = vsel %vm813_vm4, %v1197_v19, 0.0 }
 0x1c0   : > { %v1215_v30 = vadd.f32 %v1214_v29, %v1213_v5  ;;  %v1164_v31 = vadd.f32 %v1163_v21, %v1162_v20 }
 0x1c2   : > { %v1217_v59 = vadd.f32 %v1216_v32, %v1215_v30 }
 0x1d9   : > { %v1478_v57 = vpop.f32.mrb[4].mxu0 }
 0x1da   : > { %v1089_v51 = vadd.f32 %v1478_v57, %v2360_v47  ;;  %v1083_v13 = vpop.f32.mrb[5].mxu0 }
 0x1db   : > { %v1084_v49 = vadd.f32 %v2360_v47, %v1083_v13 }
 0x1dc   : > { %1147 = vst.msk [vmem:[%s2365_s30 + $0x28] sm:$0xff] %vm813_vm4, %v1089_v51  ;;  %v1200_v37 = vmul.f32 %v1089_v51, %v1089_v51  ;;  %v1167_v25 = vsel %vm813_vm4, %v1089_v51, 0.0 }
 0x1dd   : > { %1146 = vst.msk [vmem:[%s2365_s30 + $0x20] sm:$0xff] %vm813_vm4, %v1084_v49  ;;  %v1165_v38 = vsel %vm813_vm4, %v1084_v49, 0.0  ;;  %v1199_v44 = vmul.f32 %v1084_v49, %v1084_v49 }
 0x1de   : > { %v1166_v1 = vadd.f32 %v1165_v38, %v1164_v31  ;;  %v1220_v6 = vsel %vm813_vm4, %v1200_v37, 0.0 }
 0x1df   : > { %v1218_v8 = vsel %vm813_vm4, %v1199_v44, 0.0 }
 0x1e0   : > { %v1219_v26 = vadd.f32 %v1218_v8, %v1217_v59  ;;  %v1168_v60 = vadd.f32 %v1167_v25, %v1166_v1 }
 0x1e2   : > { %v1221_v23 = vadd.f32 %v1220_v6, %v1219_v26 }
 0x1f8   : > { %v1481_v52 = vpop.f32.mrb[6].mxu0 }
 0x1f9   : > { %v1099_v15 = vadd.f32 %v1481_v52, %v2360_v47  ;;  %v1093_v33 = vpop.f32.mrb[7].mxu0 }
 0x1fa   : > { %v1094_v35 = vadd.f32 %v2360_v47, %v1093_v33 }
 0x1fb   : > { %1149 = vst.msk [vmem:[%s2365_s30 + $0x38] sm:$0xff] %vm813_vm4, %v1099_v15  ;;  %v1202_v46 = vmul.f32 %v1099_v15, %v1099_v15  ;;  %v1171_v53 = vsel %vm813_vm4, %v1099_v15, 0.0 }
 0x1fc   : > { %1148 = vst.msk [vmem:[%s2365_s30 + $0x30] sm:$0xff] %vm813_vm4, %v1094_v35  ;;  %v1169_v3 = vsel %vm813_vm4, %v1094_v35, 0.0  ;;  %v1201_v12 = vmul.f32 %v1094_v35, %v1094_v35 }
 0x1fd   : > { %v1170_v41 = vadd.f32 %v1169_v3, %v1168_v60  ;;  %v1224_v55 = vsel %vm813_vm4, %v1202_v46, 0.0 }
 0x1fe   : > { %v1222_v45 = vsel %vm813_vm4, %v1201_v12, 0.0 }
 0x1ff   : > { %v1223_v22 = vadd.f32 %v1222_v45, %v1221_v23  ;;  %v1172_v54 = vadd.f32 %v1171_v53, %v1170_v41 }
 0x201   : > { %v1225_v43 = vadd.f32 %v1224_v55, %v1223_v22 }
 0x218   : > { %v1484_v2 = vpop.f32.mrb[0].mxu1 }
 0x219   : > { %v1109_v39 = vadd.f32 %v1484_v2, %v2360_v47  ;;  %v1103_v56 = vpop.f32.mrb[1].mxu1 }
 0x21a   : > { %v1104_v58 = vadd.f32 %v2360_v47, %v1103_v56 }
 0x21b   : > { %1151 = vst.msk [vmem:[%s2365_s30 + $0x48] sm:$0xff] %vm813_vm4, %v1109_v39  ;;  %v1204_v27 = vmul.f32 %v1109_v39, %v1109_v39  ;;  %v1175_v28 = vsel %vm813_vm4, %v1109_v39, 0.0 }
 0x21c   : > { %1150 = vst.msk [vmem:[%s2365_s30 + $0x40] sm:$0xff] %vm813_vm4, %v1104_v58  ;;  %v1173_v34 = vsel %vm813_vm4, %v1104_v58, 0.0  ;;  %v1203_v61 = vmul.f32 %v1104_v58, %v1104_v58 }
 0x21d   : > { %v1174_v14 = vadd.f32 %v1173_v34, %v1172_v54  ;;  %v1228_v24 = vsel %vm813_vm4, %v1204_v27, 0.0 }
 0x21e   : > { %v1226_v16 = vsel %vm813_vm4, %v1203_v61, 0.0 }
 0x21f   : > { %v1227_v62 = vadd.f32 %v1226_v16, %v1225_v43  ;;  %v1176_v0 = vadd.f32 %v1175_v28, %v1174_v14 }
 0x221   : > { %v1229_v48 = vadd.f32 %v1228_v24, %v1227_v62 }
 0x238   : > { %v1487_v40 = vpop.f32.mrb[2].mxu1 }
 0x239   : > { %v1119_v4 = vadd.f32 %v1487_v40, %v2360_v47  ;;  %v1113_v42 = vpop.f32.mrb[3].mxu1 }
 0x23a   : > { %v1114_v17 = vadd.f32 %v2360_v47, %v1113_v42 }
 0x23b   : > { %1153 = vst.msk [vmem:[%s2365_s30 + $0x58] sm:$0xff] %vm813_vm4, %v1119_v4  ;;  %v1206_v36 = vmul.f32 %v1119_v4, %v1119_v4  ;;  %v1179_v9 = vsel %vm813_vm4, %v1119_v4, 0.0 }
 0x23c   : > { %1152 = vst.msk [vmem:[%s2365_s30 + $0x50] sm:$0xff] %vm813_vm4, %v1114_v17  ;;  %v1177_v63 = vsel %vm813_vm4, %v1114_v17, 0.0  ;;  %v1205_v5 = vmul.f32 %v1114_v17, %v1114_v17 }
 0x23d   : > { %v1178_v50 = vadd.f32 %v1177_v63, %v1176_v0  ;;  %v1232_v18 = vsel %vm813_vm4, %v1206_v36, 0.0 }
 0x23e   : > { %v1230_v10 = vsel %vm813_vm4, %v1205_v5, 0.0 }
 0x23f   : > { %v1231_v11 = vadd.f32 %v1230_v10, %v1229_v48  ;;  %v1180_v7 = vadd.f32 %v1179_v9, %v1178_v50 }
 0x241   : > { %v1233_v19 = vadd.f32 %v1232_v18, %v1231_v11 }
 0x258   : > { %v1490_v20 = vpop.f32.mrb[4].mxu1 }
 0x259   : > { %v1129_v21 = vadd.f32 %v1490_v20, %v2360_v47  ;;  %v1123_v29 = vpop.f32.mrb[5].mxu1 }
 0x25a   : > { %v1124_v30 = vadd.f32 %v2360_v47, %v1123_v29 }
 0x25b   : > { %1155 = vst.msk [vmem:[%s2365_s30 + $0x68] sm:$0xff] %vm813_vm4, %v1129_v21  ;;  %v1208_v31 = vmul.f32 %v1129_v21, %v1129_v21  ;;  %v1183_v51 = vsel %vm813_vm4, %v1129_v21, 0.0 }
 0x25c   : > { %1154 = vst.msk [vmem:[%s2365_s30 + $0x60] sm:$0xff] %vm813_vm4, %v1124_v30  ;;  %v1181_v32 = vsel %vm813_vm4, %v1124_v30, 0.0  ;;  %v1207_v59 = vmul.f32 %v1124_v30, %v1124_v30 }
 0x25d   : > { %v1182_v57 = vadd.f32 %v1181_v32, %v1180_v7  ;;  %v1236_v38 = vsel %vm813_vm4, %v1208_v31, 0.0 }
 0x25e   : > { %v1234_v13 = vsel %vm813_vm4, %v1207_v59, 0.0 }
 0x25f   : > { %v1235_v49 = vadd.f32 %v1234_v13, %v1233_v19  ;;  %v1184_v37 = vadd.f32 %v1183_v51, %v1182_v57 }
 0x261   : > { %v1237_v44 = vadd.f32 %v1236_v38, %v1235_v49 }
 0x265   : > { %v1493_v1 = vpop.f32.mrb[6].mxu1 }
 0x266   : > { %v1139_v25 = vadd.f32 %v1493_v1, %v2360_v47  ;;  %v1133_v8 = vpop.f32.mrb[7].mxu1 }
 0x267   : > { %v1134_v26 = vadd.f32 %v2360_v47, %v1133_v8 }
 0x268   : > { %1157 = vst.msk [vmem:[%s2365_s30 + $0x78] sm:$0xff] %vm813_vm4, %v1139_v25  ;;  %v1210_v60 = vmul.f32 %v1139_v25, %v1139_v25  ;;  %v1187_v15 = vsel %vm813_vm4, %v1139_v25, 0.0 }
 0x269   : > { %1156 = vst.msk [vmem:[%s2365_s30 + $0x70] sm:$0xff] %vm813_vm4, %v1134_v26  ;;  %v1185_v6 = vsel %vm813_vm4, %v1134_v26, 0.0  ;;  %v1209_v23 = vmul.f32 %v1134_v26, %v1134_v26  ;;  %s1595_s30 = scalar_lea.vmem %s1594_s13, 64 }
 0x26a   : > { %v1186_v52 = vadd.f32 %v1185_v6, %v1184_v37  ;;  %v1240_v3 = vsel %vm813_vm4, %v1210_v60, 0.0  ;;  %p1597_p6 = scmp.lt.s32.totalorder %s1595_s30, %s1589_s19 }
 0x26b   : > { %v1238_v33 = vsel %vm813_vm4, %v1209_v23, 0.0 }
 0x26c   : > { %v1188_v35 = vadd.f32 %v1187_v15, %v1186_v52  ;;  %v1239_v46 = vadd.f32 %v1238_v33, %v1237_v44  ;;  %p1598_p7 = por %p1597_p6, %p1596_p5 }
 0x26e   : > { %v1189_v47 = vrot.slane %v1188_v35, 4  ;;  %v1241_v12 = vadd.f32 %v1240_v3, %v1239_v46  ;;  %p1599_p9 = pnand %p1598_p7, %p1592_p4 }
 0x270   : > { %v1190_v41 = vadd.f32 %v1189_v47, %v1188_v35  ;;  %v1242_v53 = vrot.slane %v1241_v12, 4 }
 0x272   : > { %v1191_v45 = vrot.slane %v1190_v41, 2  ;;  %v1243_v22 = vadd.f32 %v1242_v53, %v1241_v12 }
 0x274   : > { %v1192_v54 = vadd.f32 %v1191_v45, %v1190_v41  ;;  %v1244_v55 = vrot.slane %v1243_v22, 2 }
 0x276   : > { %v1193_v43 = vrot.slane %v1192_v54, 1  ;;  %v1245_v2 = vadd.f32 %v1244_v55, %v1243_v22 }
 0x278   : > { %v1246_v39 = vrot.slane %v1245_v2, 1  ;;  %v1194_v56 = vadd.f32 %v1193_v43, %v1192_v54 }
 0x27a   : > { %v1247_v58 = vadd.f32 %v1246_v39, %v1245_v2 }
 0x27c   : > { %v1249_v27 = vsel %vm1248_vm12, %v1194_v56, %v1247_v58 }
 0x27d   : > { %1251 = vst.msk [vmem:[%s229_s5] sm:$0x3] %vm1250_vm13, %v1249_v27 }
 0x27e   : > { %1602 = shalt.err (!%p1599_p9)
}
 0x27f   : > { %s1603_s8 = scalar_lea.hbm %s2453_s11, 32  ;;  %s1607_s24 = scalar_lea.hbm %s2510_s4, 128 }
 0x280   : > { %p1604_p10 = scmp.ne.s32.totalorder %s2453_s11, %s1603_s8  ;;  %p1608_p13 = scmp.lt.u32.totalorder %s2453_s11, %s2510_s4 }
 0x281   : > { %p1609_p0 = scmp.lt.u32.totalorder %s1607_s24, %s1603_s8  ;;  %p1611_p2 = scmp.lt.u32.totalorder %s1603_s8, %s2453_s11 }
 0x282   : > { %p1605_p11 = pnand %p1604_p10, %p1770_p3 }
 0x283   : > { %p1610_p1 = por %p1609_p0, %p1608_p13 }
 0x284   : > { %p1606_p12 = pneg %p1605_p11 }
 0x285   : > { %p1612_p4 = por %p1611_p2, %p1610_p1 }
 0x287   : > { %p1613_p5 = pnand %p1612_p4, %p1606_p12 }
 0x289   : > { %1616 = shalt.err (!%p1613_p5)
}
 0x28a   : > { %1510 = dma.vmem_to_hbm [thread:$0]  (%p1770_p3), %s2455_s6, 32, %s2453_s11, %s1263_s18  }
 0x28b PF: > { %p1516_p6 = scmp.ge.s32.totalorder %s1683_s22, 2  ;;  %s1307_s14 = sand.u32 1, %s1655_s15  }
 0x28c   : > { %s1308_s10 = scalar_lea.sflag [#allocation3], %s1307_s14 }
 0x28d   : > { %p1513_p7 = pnand %p1516_p6, %p1779_p8 }
 0x28f   : > { %1650 = dma.done.wait (!%p1513_p7), %s1308_s10, 32  }
 0x290   : > { %1652 = vsyncadd (!%p1513_p7), %s1308_s10, 4294967264  ;;  %s18_s22 = sadd.s32 1, %s1683_s22   ;;  %s2519_s15 = smov %s1659_s16 }
 0x291   : > { %p15_p9 = scmp.ge.s32.totalorder %s18_s22, 6   ;;  %s2520_s16 = smov %s1663_s17 }
 0x292   : > { %s2521_s17 = smov %s1788_s7  ;;  %s2522_s18 = smov %s1675_s20 }
 0x293   : > { %s2523_s19 = smov %s1679_s21  ;;  %s2524_s20 = smov %s2527_s25 }
 0x294   : > { %s2525_s21 = smov %s2531_s26  ;;  %17 = sbr.rel (!%p15_p9) target bundleno = 5 (0x5), region = 79 }
 0x29b   :  { %1313 = vsyncpa [#allocation3], 1 }
 0x29c   :  { %1315 = vsyncpa [#allocation3 + $0x1], 1 }

// kernel: skip_connection_block.21
= control target key start
LH: loop header
LB: loop body
LE: loop exit
PB: predicated region body
PF: predicated region fallthrough
CT: control target
= control target key end

     0   :  { %10 = vsyncpa [#allocation3], 0  ;;  %s2541_s0 = inlined_call_operand.vmem [shape: f32[2,2,10,18,8], index: 0, kind: input, shape index: {}]   ;;  %s2542_s1 = inlined_call_operand.vmem [shape: f32[72,8], index: 1, kind: input, shape index: {}]   ;;  %s2543_s2 = inlined_call_operand.vmem [shape: f32[1,8], index: 2, kind: input, shape index: {}]   ;;  %s2544_s3 = inlined_call_operand.vmem [shape: f32[2,16,16,8], index: 3, kind: output, shape index: {0}]   ;;  %s2545_s4 = inlined_call_operand.hbm [shape: f32[2,2,2,8], index: 4, kind: output, shape index: {1}]  }
   0x1   :  { %12 = vsyncpa [#allocation3 + $0x1], 0  ;;  %s1742_s15 = smov 0   ;;  %s1744_s16 = smov 0  }
   0x2   :  { %s1746_s17 = smov 0   ;;  %s1748_s18 = smov 0  }
   0x3   :  { %s1750_s19 = smov 0   ;;  %s1752_s20 = smov 0  }
   0x4   :  { %s1754_s21 = smov 0   ;;  %s1756_s22 = smov 0  }
   0x5 LB: > { %s1405_s23 = sadd.s32 4294967295, %s1706_s22   ;;  %s1406_s24 = sadd.s32 4294967294, %s1706_s22   ;;  %s1706_s22 = sphi %s1756_s22, %s18_s22   ;;  %s1702_s21 = sphi %s1754_s21, %s2560_s21   ;;  %s1698_s20 = sphi %s1752_s20, %s2559_s20   ;;  %s1694_s19 = sphi %s1750_s19, %s2558_s19   ;;  %s1690_s18 = sphi %s1748_s18, %s2557_s18   ;;  %s1686_s17 = sphi %s1746_s17, %s2556_s17   ;;  %s1682_s16 = sphi %s1744_s16, %s2555_s16   ;;  %s1678_s15 = sphi %s1742_s15, %s2554_s15  }
   0x6   : > { %s27_s25 = sadd.s32 1, %s1698_s20  ;;  %s30_s26 = sadd.s32 1, %s1702_s21 }
   0x7   : > { %p28_p0 = scmp.ge.s32.totalorder %s27_s25, 2  ;;  %p147_p1 = scmp.ne.s32.totalorder %s1686_s17, %s1682_s16 }
   0x8   : > { %p148_p2 = scmp.eq.s32.totalorder %s1405_s23, 3  ;;  %p153_p5 = scmp.ne.s32.totalorder %s1682_s16, %s1678_s15 }
   0x9   : > { %s2562_s25 = smov (%p28_p0, %s27_s25), 0  ;;  %s2564_s26 = smov (!%p28_p0, %s30_s26), %s1702_s21 }
   0xa   : > { %s133_s27 = ssub.s32 %s1698_s20, %s2562_s25  ;;  %p1793_p3 = por %p148_p2, %p147_p1 }
   0xb   : > { %p32_p4 = scmp.ge.s32.totalorder %s2564_s26, 2  ;;  %p154_p6 = scmp.eq.s32.totalorder %s1406_s24, 3 }
   0xc   : > { %p1409_p7 = scmp.ge.s32.totalorder %s1706_s22, 1  ;;  %p190_p9 = scmp.lt.s32.totalorder %s1706_s22, 5 }
   0xd   : > { %s2566_s26 = smov (%p32_p4, %s2564_s26), 0  ;;  %p1802_p8 = por %p154_p6, %p153_p5 }
   0xe   : > { %s132_s30 = ssub.s32 %s1702_s21, %s2566_s26  ;;  %s137_s5 = sadd.s32 1, %s1686_s17 }
   0xf   : > { %s134_s6 = sor.u32 %s133_s27, %s132_s30  ;;  %p191_p10 = pnand %p1409_p7, %p190_p9 }
  0x10   : > { %p135_p11 = scmp.eq.s32.totalorder %s134_s6, 0  ;;  %p230_p12 = scmp.lt.s32.totalorder (!%p191_p10), %s1694_s19, 1  ;;  %vm393_vm0 = vcmask (!%p191_p10), 1045504   ;;  %vm304_vm1 = vcmask (!%p191_p10), 1046528   ;;  %v932_v24 = vld [vmem:[%s2542_s1] sm:$0xff] (!%p191_p10)  ;;  %v933_v25 = vld [vmem:[%s2542_s1 + $0x8] sm:$0xff] (!%p191_p10) }
  0x11   : > { %194 = sbr.rel (%p191_p10) target bundleno = 651 (0x28b), region = 32  ;;  %p232_p13 = scmp.lt.s32.totalorder (!%p191_p10), %s1690_s18, 1  ;;  %v1505_v26 = vpack.c.bf16 (!%p191_p10), %v933_v25, %v932_v24  ;;  %v934_v28 = vld [vmem:[%s2542_s1 + $0x10] sm:$0xff] (!%p191_p10)  ;;  %v935_v29 = vld [vmem:[%s2542_s1 + $0x18] sm:$0xff] (!%p191_p10)  ;;  %v936_v34 = vld [vmem:[%s2542_s1 + $0x20] sm:$0xff] (!%p191_p10)  ;;  %vm796_vm2 = vcmask (!%p191_p10), 64512  }
  0x12   : > { %s1811_s7 = scalar_select %p135_p11, %s1686_s17, %s137_s5  }
  0x13   : > { %s1708_s27 = smov (!%p191_p10), 24   ;;  %s2546_s30 = smov (!%p191_p10), 16   ;;  %1506 = vmatprep.subr.bf16.mxu0 (!%p191_p10), %v1505_v26  ;;  %1521 = vmatprep.subr.bf16.mxu1 (!%p191_p10), %v1505_v26  ;;  %v1509_v30 = vpack.c.bf16 (!%p191_p10), %v935_v29, %v934_v28  ;;  %v937_v35 = vld [vmem:[%s2542_s1 + $0x28] sm:$0xff] (!%p191_p10)  ;;  %v938_v39 = vld [vmem:[%s2542_s1 + $0x30] sm:$0xff] (!%p191_p10)  ;;  %v939_v40 = vld [vmem:[%s2542_s1 + $0x38] sm:$0xff] (!%p191_p10)  ;;  %vm813_vm3 = vcmask (!%p191_p10), 130048  }
  0x14   : > { %s1710_s5 = smov (!%p191_p10), 8   ;;  %s1711_s6 = smov (!%p191_p10), 32   ;;  %1508 = vmatpush3.bf16.msra.mxu0 (!%p191_p10), %v1505_v26  ;;  %1526 = vmatpush3.bf16.msra.mxu1 (!%p191_p10), %v1505_v26  ;;  %v1513_v36 = vpack.c.bf16 (!%p191_p10), %v937_v35, %v936_v34  ;;  %v1517_v42 = vpack.c.bf16 (!%p191_p10), %v939_v40, %v938_v39  ;;  %v940_v44 = vld [vmem:[%s2542_s1 + $0x40] sm:$0xff] (!%p191_p10)  ;;  %vm830_vm4 = vcmask (!%p191_p10), 195584   ;;  %vm847_vm5 = vcmask (!%p191_p10), 261120  }
  0x15   : > { %1510 = vmatprep.subr.bf16.mxu0 (!%p191_p10), %v1509_v30  ;;  %1522 = vmatprep.subr.bf16.mxu1 (!%p191_p10), %v1509_v30  ;;  %s1714_s23 = smov (!%p191_p10), 56   ;;  %vm864_vm6 = vcmask (!%p191_p10), 326656   ;;  %vm881_vm7 = vcmask (!%p191_p10), 392192   ;;  %vm898_vm8 = vcmask (!%p191_p10), 457728   ;;  %vm915_vm9 = vcmask (!%p191_p10), 523264   ;;  %s1716_s14 = smov (!%p191_p10), [#allocation2]  }
  0x16   : > { %vm948_vm10 = vcmask (!%p191_p10), 588800   ;;  %vm1248_vm11 = vcmask (!%p191_p10), 1040384   ;;  %vm1250_vm12 = vcmask (!%p191_p10), 58368  }
  0x18   : > { %s1816_s8 = scalar_select %p230_p12, %s1694_s19, 1  ;;  %1512 = vmatpush3.bf16.msra.mxu0 %v1509_v30  ;;  %1527 = vmatpush3.bf16.msra.mxu1 %v1509_v30 }
  0x19   : > { %s233_s9 = scalar_select %p232_p13, %s1690_s18, 1  ;;  %1514 = vmatprep.subr.bf16.mxu0 %v1513_v36  ;;  %1523 = vmatprep.subr.bf16.mxu1 %v1513_v36 }
  0x1a   : > { %s1532_s10 = smul.u32 60, %s1816_s8 }
  0x1b   : > { %s1531_s11 = smul.u32 30, %s233_s9  ;;  %s1713_s9 = smov 48  }
  0x1c   : > { %1516 = vmatpush3.bf16.msra.mxu0 %v1513_v36  ;;  %1528 = vmatpush3.bf16.msra.mxu1 %v1513_v36 }
  0x1d   : > { %s236_s12 = sadd.s32 %s1532_s10, %s1531_s11  ;;  %1518 = vmatprep.subr.bf16.mxu0 %v1517_v42  ;;  %1524 = vmatprep.subr.bf16.mxu1 %v1517_v42  ;;  %s2553_s10 = smov 16  }
  0x1e   : > { %s1411_s13 = sshll.u32 %s236_s12, 3 }
  0x1f   : > { %s1823_s24 = scalar_lea.vmem %s2541_s0, %s1411_s13  ;;  %s2548_s13 = smov 40  }
  0x20   : > { %v1826_v0 = vld [vmem:[%s1823_s24 + $0x20] sm:$0xff]  ;;  %v1829_v1 = vld [vmem:[%s1823_s24 + $0x18] sm:$0xff]  ;;  %v1839_v3 = vld [vmem:[%s1823_s24 + $0x8] sm:$0xff]  ;;  %1520 = vmatpush3.bf16.msra.mxu0 %v1517_v42  ;;  %1529 = vmatpush3.bf16.msra.mxu1 %v1517_v42 }
  0x21   : > { %v1832_v2 = vld [vmem:[%s1823_s24] sm:$0xff]  ;;  %486 = vrot.lane.b32.xlu1 %v1826_v0, %s1708_s27  ;;  %484 = vrot.lane.b32.xlu0 %v1829_v1, %s1708_s27  ;;  %v252_v6 = vld [vmem:[%s1823_s24 + $0x10] sm:$0x3]  ;;  %v395_v7 = vrot.slane %v1839_v3, 2  ;;  %v306_v8 = vrot.slane %v1839_v3, 1  ;;  %v310_v15 = vrot.slane %v1829_v1, 1 }
  0x22   : > { %v394_v4 = vrot.slane %v1832_v2, 2  ;;  %v305_v5 = vrot.slane %v1832_v2, 1  ;;  %v397_v9 = vrot.slane %v252_v6, 2  ;;  %v308_v10 = vrot.slane %v252_v6, 1  ;;  %v255_v17 = vld [vmem:[%s1823_s24 + $0x28] sm:$0x3]  ;;  %1479 = vmatprep.subr.mxu0 %v940_v44  ;;  %1525 = vmatprep.subr.mxu1 %v940_v44 }
  0x23   : > { %v311_v16 = vrot.slane %v1826_v0, 1  ;;  %v399_v19 = vrot.slane %v1829_v1, 2  ;;  %v400_v20 = vrot.slane %v1826_v0, 2  ;;  %v313_v21 = vrot.slane %v255_v17, 1  ;;  %v1881_v31 = vld [vmem:[%s1823_s24 + $0x30] sm:$0xff]  ;;  %v1885_v33 = vld [vmem:[%s1823_s24 + $0x38] sm:$0xff] }
  0x24   : > { %v396_v11 = vsel %vm393_vm0, %v394_v4, %v395_v7  ;;  %v307_v12 = vsel %vm304_vm1, %v305_v5, %v306_v8  ;;  %v398_v13 = vsel %vm393_vm0, %v395_v7, %v397_v9  ;;  %v309_v14 = vsel %vm304_vm1, %v306_v8, %v308_v10  ;;  %v258_v43 = vld [vmem:[%s1823_s24 + $0x40] sm:$0x3]  ;;  %1480 = vmatpush3.msra.mxu0 %v940_v44  ;;  %v1932_v52 = vld [vmem:[%s1823_s24 + $0x48] sm:$0xff]  ;;  %v1935_v53 = vld [vmem:[%s1823_s24 + $0x50] sm:$0xff] }
  0x25   : > { %434 = vrot.lane.b32.xlu1 %v396_v11, %s2546_s30  ;;  %345 = vrot.lane.b32.xlu0 %v307_v12, %s1710_s5  ;;  %v312_v18 = vsel %vm304_vm1, %v310_v15, %v311_v16  ;;  %v401_v22 = vsel %vm393_vm0, %v399_v19, %v400_v20  ;;  %v314_v23 = vsel %vm304_vm1, %v311_v16, %v313_v21  ;;  %v402_v27 = vrot.slane %v255_v17, 2  ;;  %v261_v57 = vld [vmem:[%s1823_s24 + $0x58] sm:$0x3]  ;;  %v1967_v5 = vld [vmem:[%s1823_s24 + $0x60] sm:$0xff] }
  0x26   : > { %v315_v37 = vrot.slane %v1881_v31, 1  ;;  %v316_v38 = vrot.slane %v1885_v33, 1  ;;  %v404_v45 = vrot.slane %v1881_v31, 2  ;;  %v405_v46 = vrot.slane %v1885_v33, 2  ;;  %1530 = vmatpush3.msra.mxu1 %v940_v44  ;;  %v1970_v6 = vld [vmem:[%s1823_s24 + $0x68] sm:$0xff] }
  0x27   : > { %v403_v32 = vsel %vm393_vm0, %v400_v20, %v402_v27  ;;  %v318_v47 = vrot.slane %v258_v43, 1  ;;  %v407_v50 = vrot.slane %v258_v43, 2  ;;  %v320_v54 = vrot.slane %v1932_v52, 1  ;;  %v264_v10 = vld [vmem:[%s1823_s24 + $0x70] sm:$0x3]  ;;  %v2004_v20 = vld [vmem:[%s1823_s24 + $0x78] sm:$0xff] }
  0x28   : > { %v317_v41 = vsel %vm304_vm1, %v315_v37, %v316_v38  ;;  %v406_v48 = vsel %vm393_vm0, %v404_v45, %v405_v46  ;;  %v321_v55 = vrot.slane %v1935_v53, 1  ;;  %v409_v58 = vrot.slane %v1932_v52, 2 }
  0x29   : > { %436 = vrot.lane.b32.xlu1 %v398_v13, %s2546_s30  ;;  %347 = vrot.lane.b32.xlu0 %v309_v14, %s1710_s5  ;;  %v319_v49 = vsel %vm304_vm1, %v316_v38, %v318_v47  ;;  %v408_v51 = vsel %vm393_vm0, %v405_v46, %v407_v50  ;;  %v410_v59 = vrot.slane %v1935_v53, 2  ;;  %v323_v60 = vrot.slane %v261_v57, 1 }
  0x2a   : > { %v322_v56 = vsel %vm304_vm1, %v320_v54, %v321_v55  ;;  %v412_v63 = vrot.slane %v261_v57, 2  ;;  %v325_v7 = vrot.slane %v1967_v5, 1  ;;  %v326_v8 = vrot.slane %v1970_v6, 1 }
  0x2b   : > { %v411_v61 = vsel %vm393_vm0, %v409_v58, %v410_v59  ;;  %v324_v62 = vsel %vm304_vm1, %v321_v55, %v323_v60  ;;  %v414_v11 = vrot.slane %v1967_v5, 2  ;;  %v415_v12 = vrot.slane %v1970_v6, 2  ;;  %v2054_v55 = vld [vmem:[%s1823_s24 + $0x90] sm:$0xff]  ;;  %v2062_v58 = vld [vmem:[%s1823_s24 + $0x98] sm:$0xff] }
  0x2c   : > { %v413_v4 = vsel %vm393_vm0, %v410_v59, %v412_v63  ;;  %v327_v9 = vsel %vm304_vm1, %v325_v7, %v326_v8  ;;  %v328_v13 = vrot.slane %v264_v10, 1  ;;  %v417_v16 = vrot.slane %v264_v10, 2 }
  0x2d   : > { %349 = vrot.lane.b32.xlu1 %v312_v18, %s1710_s5  ;;  %538 = vrot.lane.b32.xlu0 %v312_v18, %s1711_s6  ;;  %v416_v14 = vsel %vm393_vm0, %v414_v11, %v415_v12  ;;  %v330_v24 = vrot.slane %v2004_v20, 1  ;;  %v419_v34 = vrot.slane %v2004_v20, 2  ;;  %v335_v63 = vrot.slane %v2054_v55, 1 }
  0x2e   : > { %v329_v15 = vsel %vm304_vm1, %v326_v8, %v328_v13  ;;  %v418_v17 = vsel %vm393_vm0, %v415_v12, %v417_v16 }
  0x31   : > { %591 = vrot.lane.b32.xlu1 %v401_v22, %s2548_s13  ;;  %540 = vrot.lane.b32.xlu0 %v314_v23, %s1711_s6 }
  0x35   : > { %438 = vrot.lane.b32.xlu1 %v401_v22, %s2546_s30  ;;  %351 = vrot.lane.b32.xlu0 %v314_v23, %s1710_s5  ;;  %v2007_v23 = vld [vmem:[%s1823_s24 + $0x80] sm:$0xff] }
  0x36   : > { %v331_v25 = vrot.slane %v2007_v23, 1  ;;  %v420_v35 = vrot.slane %v2007_v23, 2 }
  0x38   : > { %v332_v28 = vsel %vm304_vm1, %v330_v24, %v331_v25  ;;  %v421_v39 = vsel %vm393_vm0, %v419_v34, %v420_v35 }
  0x39   : > { %641 = vrot.lane.b32.xlu1 %v1881_v31, %s1713_s9  ;;  %593 = vrot.lane.b32.xlu0 %v403_v32, %s2548_s13  ;;  %s2552_s13 = smov 40  }
  0x3d   : > { %488 = vrot.lane.b32.xlu1 %v1881_v31, %s1708_s27  ;;  %440 = vrot.lane.b32.xlu0 %v403_v32, %s2546_s30  ;;  %s1715_s30 = smov 64   ;;  %v267_v32 = vld [vmem:[%s1823_s24 + $0x88] sm:$0x3] }
  0x3e   : > { %v333_v36 = vrot.slane %v267_v32, 1  ;;  %v422_v43 = vrot.slane %v267_v32, 2 }
  0x40   : > { %v334_v40 = vsel %vm304_vm1, %v331_v25, %v333_v36  ;;  %v423_v46 = vsel %vm393_vm0, %v420_v35, %v422_v43 }
  0x41   : > { %695 = vrot.lane.b32.xlu1 %v317_v41, %s1714_s23  ;;  %643 = vrot.lane.b32.xlu0 %v1885_v33, %s1713_s9 }
  0x45   : > { %542 = vrot.lane.b32.xlu1 %v317_v41, %s1711_s6  ;;  %490 = vrot.lane.b32.xlu0 %v1885_v33, %s1708_s27 }
  0x49   : > { %748 = vrot.lane.b32.xlu1 %v406_v48, %s1715_s30  ;;  %697 = vrot.lane.b32.xlu0 %v319_v49, %s1714_s23 }
  0x4d   : > { %544 = vrot.lane.b32.xlu1 %v319_v49, %s1711_s6  ;;  %353 = vrot.lane.b32.xlu0 %v317_v41, %s1710_s5 }
  0x51   : > { %750 = vrot.lane.b32.xlu1 %v408_v51, %s1715_s30  ;;  %595 = vrot.lane.b32.xlu0 %v406_v48, %s2552_s13 }
  0x55   : > { %442 = vrot.lane.b32.xlu1 %v406_v48, %s2553_s10  ;;  %355 = vrot.lane.b32.xlu0 %v319_v49, %s1710_s5 }
  0x59   : > { %645 = vrot.lane.b32.xlu1 %v1932_v52, %s1713_s9  ;;  %597 = vrot.lane.b32.xlu0 %v408_v51, %s2552_s13 }
  0x5d   : > { %492 = vrot.lane.b32.xlu1 %v1932_v52, %s1708_s27  ;;  %444 = vrot.lane.b32.xlu0 %v408_v51, %s2553_s10 }
  0x61   : > { %699 = vrot.lane.b32.xlu1 %v322_v56, %s1714_s23  ;;  %647 = vrot.lane.b32.xlu0 %v1935_v53, %s1713_s9 }
  0x65   : > { %546 = vrot.lane.b32.xlu1 %v322_v56, %s1711_s6  ;;  %494 = vrot.lane.b32.xlu0 %v1935_v53, %s1708_s27 }
  0x69   : > { %752 = vrot.lane.b32.xlu1 %v411_v61, %s1715_s30  ;;  %701 = vrot.lane.b32.xlu0 %v324_v62, %s1714_s23 }
  0x6d   : > { %548 = vrot.lane.b32.xlu1 %v324_v62, %s1711_s6  ;;  %357 = vrot.lane.b32.xlu0 %v322_v56, %s1710_s5 }
  0x71   : > { %754 = vrot.lane.b32.xlu1 %v413_v4, %s1715_s30  ;;  %599 = vrot.lane.b32.xlu0 %v411_v61, %s2552_s13 }
  0x75   : > { %446 = vrot.lane.b32.xlu1 %v411_v61, %s2553_s10  ;;  %359 = vrot.lane.b32.xlu0 %v324_v62, %s1710_s5 }
  0x79   : > { %649 = vrot.lane.b32.xlu1 %v1967_v5, %s1713_s9  ;;  %601 = vrot.lane.b32.xlu0 %v413_v4, %s2552_s13 }
  0x7d   : > { %496 = vrot.lane.b32.xlu1 %v1967_v5, %s1708_s27  ;;  %448 = vrot.lane.b32.xlu0 %v413_v4, %s2553_s10  ;;  %v336_v4 = vrot.slane %v2062_v58, 1 }
  0x7f   : > { %v337_v11 = vsel %vm304_vm1, %v335_v63, %v336_v4 }
  0x81   : > { %703 = vrot.lane.b32.xlu1 %v327_v9, %s1714_s23  ;;  %651 = vrot.lane.b32.xlu0 %v1970_v6, %s1713_s9 }
  0x85   : > { %550 = vrot.lane.b32.xlu1 %v327_v9, %s1711_s6  ;;  %498 = vrot.lane.b32.xlu0 %v1970_v6, %s1708_s27 }
  0x89   : > { %756 = vrot.lane.b32.xlu1 %v416_v14, %s1715_s30  ;;  %705 = vrot.lane.b32.xlu0 %v329_v15, %s1714_s23 }
  0x8d   : > { %552 = vrot.lane.b32.xlu1 %v329_v15, %s1711_s6  ;;  %361 = vrot.lane.b32.xlu0 %v327_v9, %s1710_s5 }
  0x91   : > { %758 = vrot.lane.b32.xlu1 %v418_v17, %s1715_s30  ;;  %603 = vrot.lane.b32.xlu0 %v416_v14, %s2552_s13 }
  0x93   : > { %v1999_v18 = vpop.permute.xlu1 %486  ;;  %v485_v19 = vpop.permute.xlu0 %484 }
  0x95   : > { %450 = vrot.lane.b32.xlu1 %v416_v14, %s2553_s10  ;;  %363 = vrot.lane.b32.xlu0 %v329_v15, %s1710_s5  ;;  %v270_v15 = vld [vmem:[%s1823_s24 + $0xa0] sm:$0x3] }
  0x96   : > { %v427_v35 = vrot.slane %v270_v15, 2 }
  0x97   : > { %v435_v21 = vpop.permute.xlu1 %434  ;;  %v346_v22 = vpop.permute.xlu0 %345 }
  0x98   : > { %v797_v49 = vsel %vm796_vm2, %v1832_v2, %v346_v22  ;;  %v338_v22 = vrot.slane %v270_v15, 1 }
  0x99   : > { %653 = vrot.lane.b32.xlu1 %v2004_v20, %s1713_s9  ;;  %605 = vrot.lane.b32.xlu0 %v418_v17, %s2552_s13  ;;  %v814_v54 = vsel %vm813_vm3, %v797_v49, %v435_v21  ;;  %v424_v21 = vrot.slane %v2054_v55, 2  ;;  %v2129_v49 = vld [vmem:[%s1823_s24 + $0xa8] sm:$0xff] }
  0x9a   : > { %v831_v2 = vsel %vm830_vm4, %v814_v54, %v485_v19 }
  0x9b   : > { %v2014_v26 = vpop.permute.xlu1 %436  ;;  %v348_v27 = vpop.permute.xlu0 %347 }
  0x9c   : > { %v798_v60 = vsel %vm796_vm2, %v1839_v3, %v348_v27 }
  0x9d   : > { %500 = vrot.lane.b32.xlu1 %v2004_v20, %s1708_s27  ;;  %452 = vrot.lane.b32.xlu0 %v418_v17, %s2553_s10  ;;  %v815_v3 = vsel %vm813_vm3, %v798_v60, %v2014_v26 }
  0x9e   : > { %v832_v12 = vsel %vm830_vm4, %v815_v3, %v1999_v18  ;;  %v425_v18 = vrot.slane %v2062_v58, 2 }
  0x9f   : > { %v2020_v29 = vpop.permute.xlu1 %349  ;;  %v539_v30 = vpop.permute.xlu0 %538 }
  0xa0   : > { %v848_v59 = vsel %vm847_vm5, %v831_v2, %v539_v30  ;;  %v339_v30 = vsel %vm304_vm1, %v336_v4, %v338_v22  ;;  %v2138_v2 = vld [vmem:[%s1823_s24 + $0xb0] sm:$0xff] }
  0xa1   : > { %707 = vrot.lane.b32.xlu1 %v332_v28, %s1714_s23  ;;  %655 = vrot.lane.b32.xlu0 %v2007_v23, %s1713_s9 }
  0xa3   : > { %v592_v37 = vpop.permute.xlu1 %591  ;;  %v541_v38 = vpop.permute.xlu0 %540 }
  0xa4   : > { %v865_v61 = vsel %vm864_vm6, %v848_v59, %v592_v37  ;;  %v849_v16 = vsel %vm847_vm5, %v832_v12, %v541_v38  ;;  %v428_v38 = vsel %vm393_vm0, %v425_v18, %v427_v35  ;;  %v341_v59 = vrot.slane %v2138_v2, 1 }
  0xa5   : > { %554 = vrot.lane.b32.xlu1 %v332_v28, %s1711_s6  ;;  %502 = vrot.lane.b32.xlu0 %v2007_v23, %s1708_s27 }
  0xa7   : > { %v2033_v41 = vpop.permute.xlu1 %438  ;;  %v2035_v42 = vpop.permute.xlu0 %351 }
  0xa8   : > { %v800_v63 = vsel %vm796_vm2, %v1826_v0, %v2035_v42  ;;  %v273_v0 = vld [vmem:[%s1823_s24 + $0xb8] sm:$0x3] }
  0xa9   : > { %760 = vrot.lane.b32.xlu1 %v421_v39, %s1715_s30  ;;  %709 = vrot.lane.b32.xlu0 %v334_v40, %s1714_s23  ;;  %v343_v12 = vrot.slane %v273_v0, 1 }
  0xab   : > { %v642_v44 = vpop.permute.xlu1 %641  ;;  %v594_v45 = vpop.permute.xlu0 %593 }
  0xac   : > { %v882_v62 = vsel %vm881_vm7, %v865_v61, %v642_v44  ;;  %v866_v17 = vsel %vm864_vm6, %v849_v16, %v594_v45  ;;  %v799_v45 = vsel %vm796_vm2, %v1829_v1, %v2020_v29 }
  0xad   : > { %556 = vrot.lane.b32.xlu1 %v334_v40, %s1711_s6  ;;  %365 = vrot.lane.b32.xlu0 %v332_v28, %s1710_s5  ;;  %v426_v28 = vsel %vm393_vm0, %v424_v21, %v425_v18  ;;  %v344_v21 = vsel %vm304_vm1, %v341_v59, %v343_v12 }
  0xaf   : > { %v2042_v47 = vpop.permute.xlu1 %488  ;;  %v2044_v48 = vpop.permute.xlu0 %440 }
  0xb0   : > { %v817_v4 = vsel %vm813_vm3, %v800_v63, %v2044_v48 }
  0xb1   : > { %762 = vrot.lane.b32.xlu1 %v423_v46, %s1715_s30  ;;  %607 = vrot.lane.b32.xlu0 %v421_v39, %s2552_s13 }
  0xb3   : > { %v696_v50 = vpop.permute.xlu1 %695  ;;  %v644_v51 = vpop.permute.xlu0 %643 }
  0xb4   : > { %v899_v7 = vsel %vm898_vm8, %v882_v62, %v696_v50  ;;  %v883_v19 = vsel %vm881_vm7, %v866_v17, %v644_v51 }
  0xb5   : > { %454 = vrot.lane.b32.xlu1 %v421_v39, %s2553_s10  ;;  %367 = vrot.lane.b32.xlu0 %v334_v40, %s1710_s5 }
  0xb7   : > { %v2057_v56 = vpop.permute.xlu1 %542  ;;  %v2059_v57 = vpop.permute.xlu0 %490 }
  0xb9   : > { %657 = vrot.lane.b32.xlu1 %v2054_v55, %s1713_s9  ;;  %609 = vrot.lane.b32.xlu0 %v423_v46, %s2552_s13 }
  0xbb   : > { %v749_v8 = vpop.permute.xlu1 %748  ;;  %v698_v9 = vpop.permute.xlu0 %697 }
  0xbc   : > { %v916_v10 = vsel %vm915_vm9, %v899_v7, %v749_v8  ;;  %v900_v24 = vsel %vm898_vm8, %v883_v19, %v698_v9  ;;  %v834_v8 = vsel %vm830_vm4, %v817_v4, %v2059_v57  ;;  %v430_v57 = vrot.slane %v2138_v2, 2  ;;  %v276_v4 = vld [vmem:[%s1823_s24 + $0xd0] sm:$0x3] }
  0xbd   : > { %504 = vrot.lane.b32.xlu1 %v2054_v55, %s1708_s27  ;;  %456 = vrot.lane.b32.xlu0 %v423_v46, %s2553_s10  ;;  %v816_v46 = vsel %vm813_vm3, %v799_v45, %v2033_v41 }
  0xbe   : > { %1481 = vmatprep.mubr.msk.f32.mxu0 %vm948_vm10, %v916_v10  ;;  %v833_v50 = vsel %vm830_vm4, %v816_v46, %v2042_v47  ;;  %v340_v47 = vrot.slane %v2129_v49, 1 }
  0xbf   : > { %v2085_v13 = vpop.permute.xlu1 %544  ;;  %v2087_v14 = vpop.permute.xlu0 %353  ;;  %v850_v1 = vsel %vm847_vm5, %v833_v50, %v2057_v56  ;;  %v275_v50 = vld [vmem:[%s1823_s24 + $0xc8] sm:$0xff] }
  0xc0   : > { %v342_v7 = vsel %vm304_vm1, %v340_v47, %v341_v59  ;;  %v851_v42 = vsel %vm847_vm5, %v834_v8, %v2085_v13  ;;  %v587_v8 = vrot.slane %v275_v50, 2 }
  0xc1   : > { %711 = vrot.lane.b32.xlu1 %v337_v11, %s1714_s23  ;;  %659 = vrot.lane.b32.xlu0 %v2062_v58, %s1713_s9 }
  0xc3   : > { %v751_v25 = vpop.permute.xlu1 %750  ;;  %v596_v26 = vpop.permute.xlu0 %595 }
  0xc4   : > { %v917_v27 = vsel %vm915_vm9, %v900_v24, %v751_v25  ;;  %v867_v29 = vsel %vm864_vm6, %v850_v1, %v596_v26  ;;  %v432_v24 = vrot.slane %v273_v0, 2  ;;  %v536_v0 = vrot.slane %v276_v4, 1 }
  0xc5   : > { %558 = vrot.lane.b32.xlu1 %v337_v11, %s1711_s6  ;;  %506 = vrot.lane.b32.xlu0 %v2062_v58, %s1708_s27 }
  0xc6   : > { %1482 = vmatmul.mubr.msk.f32.vlgmr.msra.gmra.mrb[0].mxu0 %vm948_vm10, %v917_v27  ;;  %v433_v27 = vsel %vm393_vm0, %v430_v57, %v432_v24  ;;  %v278_v24 = vld [vmem:[%s1823_s24 + $0xe0] sm:$0xff] }
  0xc7   : > { %v2106_v32 = vpop.permute.xlu1 %442  ;;  %v2108_v34 = vpop.permute.xlu0 %355 }
  0xc9   : > { %764 = vrot.lane.b32.xlu1 %v426_v28, %s1715_s30  ;;  %713 = vrot.lane.b32.xlu0 %v339_v30, %s1714_s23 }
  0xcb   : > { %v646_v36 = vpop.permute.xlu1 %645  ;;  %v598_v37 = vpop.permute.xlu0 %597 }
  0xcc   : > { %v884_v41 = vsel %vm881_vm7, %v867_v29, %v646_v36  ;;  %v868_v10 = vsel %vm864_vm6, %v851_v42, %v598_v37  ;;  %v801_v37 = vsel %vm796_vm2, %v1881_v31, %v2087_v14  ;;  %v534_v29 = vrot.slane %v275_v50, 1 }
  0xcd   : > { %560 = vrot.lane.b32.xlu1 %v339_v30, %s1711_s6  ;;  %369 = vrot.lane.b32.xlu0 %v337_v11, %s1710_s5  ;;  %v429_v11 = vrot.slane %v2129_v49, 2 }
  0xcf   : > { %v2115_v39 = vpop.permute.xlu1 %492  ;;  %v2117_v40 = vpop.permute.xlu0 %444  ;;  %v431_v19 = vsel %vm393_vm0, %v429_v11, %v430_v57  ;;  %v537_v11 = vsel %vm304_vm1, %v534_v29, %v536_v0 }
  0xd1   : > { %766 = vrot.lane.b32.xlu1 %v428_v38, %s1715_s30  ;;  %611 = vrot.lane.b32.xlu0 %v426_v28, %s2552_s13 }
  0xd3   : > { %v700_v43 = vpop.permute.xlu1 %699  ;;  %v648_v44 = vpop.permute.xlu0 %647 }
  0xd4   : > { %v901_v60 = vsel %vm898_vm8, %v884_v41, %v700_v43  ;;  %v885_v48 = vsel %vm881_vm7, %v868_v10, %v648_v44  ;;  %v274_v43 = vld [vmem:[%s1823_s24 + $0xc0] sm:$0xff] }
  0xd5   : > { %458 = vrot.lane.b32.xlu1 %v426_v28, %s2553_s10  ;;  %371 = vrot.lane.b32.xlu0 %v339_v30, %s1710_s5 }
  0xd7   : > { %v2133_v51 = vpop.permute.xlu1 %546  ;;  %v2135_v54 = vpop.permute.xlu0 %494 }
  0xd9   : > { %661 = vrot.lane.b32.xlu1 %v2129_v49, %s1713_s9  ;;  %613 = vrot.lane.b32.xlu0 %v428_v38, %s2552_s13 }
  0xdb   : > { %v753_v61 = vpop.permute.xlu1 %752  ;;  %v702_v62 = vpop.permute.xlu0 %701 }
  0xdc   : > { %v918_v56 = vsel %vm915_vm9, %v901_v60, %v753_v61  ;;  %v902_v15 = vsel %vm898_vm8, %v885_v48, %v702_v62 }
  0xdd   : > { %508 = vrot.lane.b32.xlu1 %v2129_v49, %s1708_s27  ;;  %460 = vrot.lane.b32.xlu0 %v428_v38, %s2553_s10  ;;  %v818_v38 = vsel %vm813_vm3, %v801_v37, %v2106_v32  ;;  %v533_v32 = vrot.slane %v274_v43, 1 }
  0xde   : > { %1484 = vmatprep.mubr.msk.f32.mxu0 %vm948_vm10, %v918_v56  ;;  %v835_v44 = vsel %vm830_vm4, %v818_v38, %v2115_v39 }
  0xdf   : > { %v2163_v9 = vpop.permute.xlu1 %548  ;;  %v2165_v3 = vpop.permute.xlu0 %357  ;;  %v852_v1 = vsel %vm847_vm5, %v835_v44, %v2133_v51  ;;  %v802_v51 = vsel %vm796_vm2, %v1885_v33, %v2108_v34  ;;  %v535_v61 = vsel %vm304_vm1, %v533_v32, %v534_v29  ;;  %v744_v44 = vrot.slane %v278_v24, 2 }
  0xe0   : > { %v819_v60 = vsel %vm813_vm3, %v802_v51, %v2117_v40 }
  0xe1   : > { %715 = vrot.lane.b32.xlu1 %v342_v7, %s1714_s23  ;;  %663 = vrot.lane.b32.xlu0 %v2138_v2, %s1713_s9  ;;  %v836_v62 = vsel %vm830_vm4, %v819_v60, %v2135_v54 }
  0xe2   : > { %v853_v33 = vsel %vm847_vm5, %v836_v62, %v2163_v9 }
  0xe3   : > { %v755_v16 = vpop.permute.xlu1 %754  ;;  %v600_v17 = vpop.permute.xlu0 %599 }
  0xe4   : > { %v919_v13 = vsel %vm915_vm9, %v902_v15, %v755_v16  ;;  %v869_v31 = vsel %vm864_vm6, %v852_v1, %v600_v17  ;;  %v589_v15 = vrot.slane %v276_v4, 2 }
  0xe5   : > { %562 = vrot.lane.b32.xlu1 %v342_v7, %s1711_s6  ;;  %510 = vrot.lane.b32.xlu0 %v2138_v2, %s1708_s27 }
  0xe6   : > { %1485 = vmatmul.mubr.msk.f32.gmra.mrb[2].mxu0 %vm948_vm10, %v919_v13  ;;  %v590_v13 = vsel %vm393_vm0, %v587_v8, %v589_v15 }
  0xe7   : > { %v2185_v18 = vpop.permute.xlu1 %446  ;;  %v2187_v22 = vpop.permute.xlu0 %359 }
  0xe9   : > { %768 = vrot.lane.b32.xlu1 %v431_v19, %s1715_s30  ;;  %717 = vrot.lane.b32.xlu0 %v344_v21, %s1714_s23 }
  0xeb   : > { %v650_v25 = vpop.permute.xlu1 %649  ;;  %v602_v26 = vpop.permute.xlu0 %601 }
  0xec   : > { %v886_v14 = vsel %vm881_vm7, %v869_v31, %v650_v25  ;;  %v870_v34 = vsel %vm864_vm6, %v853_v33, %v602_v26  ;;  %v277_v25 = vld [vmem:[%s1823_s24 + $0xd8] sm:$0xff]  ;;  %v279_v26 = vld [vmem:[%s1823_s24 + $0xe8] sm:$0x3]  ;;  %s1412_s24 = sshll.u32 %s1690_s18, 3 }
  0xed   : > { %564 = vrot.lane.b32.xlu1 %v344_v21, %s1711_s6  ;;  %373 = vrot.lane.b32.xlu0 %v342_v7, %s1710_s5  ;;  %v586_v7 = vrot.slane %v274_v43, 2  ;;  %v746_v32 = vrot.slane %v279_v26, 2  ;;  %p242_p0 = scmp.lt.s32.totalorder %s1412_s24, 15 }
  0xef   : > { %v2194_v28 = vpop.permute.xlu1 %496  ;;  %v2196_v30 = vpop.permute.xlu0 %448  ;;  %v588_v9 = vsel %vm393_vm0, %v586_v7, %v587_v8  ;;  %s2568_s24 = smov (!%p242_p0, %s1412_s24), 15 }
  0xf1   : > { %770 = vrot.lane.b32.xlu1 %v433_v27, %s1715_s30  ;;  %615 = vrot.lane.b32.xlu0 %v431_v19, %s2552_s13 }
  0xf3   : > { %v704_v35 = vpop.permute.xlu1 %703  ;;  %v652_v36 = vpop.permute.xlu0 %651 }
  0xf4   : > { %v903_v39 = vsel %vm898_vm8, %v886_v14, %v704_v35  ;;  %v887_v40 = vsel %vm881_vm7, %v870_v34, %v652_v36  ;;  %v690_v35 = vrot.slane %v277_v25, 1  ;;  %v693_v36 = vrot.slane %v279_v26, 1 }
  0xf5   : > { %462 = vrot.lane.b32.xlu1 %v431_v19, %s2553_s10  ;;  %375 = vrot.lane.b32.xlu0 %v344_v21, %s1710_s5  ;;  %s1414_s5 = sshll.u32 %s1816_s8, 5  ;;  %s227_s8 = sand.u32 1, %s1682_s16  }
  0xf7   : > { %v2210_v45 = vpop.permute.xlu1 %550  ;;  %v2212_v46 = vpop.permute.xlu0 %498 }
  0xf9   : > { %665 = vrot.lane.b32.xlu1 %v274_v43, %s1713_s9  ;;  %617 = vrot.lane.b32.xlu0 %v433_v27, %s2552_s13 }
  0xfb   : > { %v757_v41 = vpop.permute.xlu1 %756  ;;  %v706_v47 = vpop.permute.xlu0 %705 }
  0xfc   : > { %v920_v59 = vsel %vm915_vm9, %v903_v39, %v757_v41  ;;  %v904_v54 = vsel %vm898_vm8, %v887_v40, %v706_v47  ;;  %v747_v47 = vsel %vm393_vm0, %v744_v44, %v746_v32 }
  0xfd   : > { %512 = vrot.lane.b32.xlu1 %v274_v43, %s1708_s27  ;;  %464 = vrot.lane.b32.xlu0 %v433_v27, %s2553_s10  ;;  %v691_v27 = vrot.slane %v278_v24, 1  ;;  %v803_v43 = vsel %vm796_vm2, %v1932_v52, %v2165_v3  ;;  %s1434_s10 = sshll.u32 %s1694_s19, 1 }
  0xfe   : > { %1487 = vmatprep.mubr.msk.f32.mxu0 %vm948_vm10, %v920_v59  ;;  %v820_v1 = vsel %vm813_vm3, %v803_v43, %v2185_v18 }
  0xff   : > { %v2234_v56 = vpop.permute.xlu1 %552  ;;  %v2236_v63 = vpop.permute.xlu0 %361  ;;  %v694_v31 = vsel %vm304_vm1, %v691_v27, %v693_v36  ;;  %v692_v14 = vsel %vm304_vm1, %v690_v35, %v691_v27  ;;  %v837_v29 = vsel %vm830_vm4, %v820_v1, %v2194_v28 }
 0x100   : > { %v854_v52 = vsel %vm847_vm5, %v837_v29, %v2210_v45  ;;  %v804_v45 = vsel %vm796_vm2, %v1935_v53, %v2187_v22  ;;  %v805_v15 = vsel %vm796_vm2, %v1967_v5, %v2236_v63 }
 0x101   : > { %719 = vrot.lane.b32.xlu1 %v535_v61, %s1714_s23  ;;  %667 = vrot.lane.b32.xlu0 %v275_v50, %s1713_s9  ;;  %v821_v62 = vsel %vm813_vm3, %v804_v45, %v2196_v30 }
 0x102   : > { %v838_v4 = vsel %vm830_vm4, %v821_v62, %v2212_v46 }
 0x103   : > { %v759_v42 = vpop.permute.xlu1 %758  ;;  %v604_v10 = vpop.permute.xlu0 %603  ;;  %v855_v40 = vsel %vm847_vm5, %v838_v4, %v2234_v56 }
 0x104   : > { %v921_v48 = vsel %vm915_vm9, %v904_v54, %v759_v42  ;;  %v871_v3 = vsel %vm864_vm6, %v854_v52, %v604_v10 }
 0x105   : > { %566 = vrot.lane.b32.xlu1 %v535_v61, %s1711_s6  ;;  %514 = vrot.lane.b32.xlu0 %v275_v50, %s1708_s27  ;;  %v743_v50 = vrot.slane %v277_v25, 2  ;;  %s1413_s27 = sshll.u32 %s2568_s24, 1  ;;  %s1278_s24 = sadd.s32 %s1690_s18, %s1434_s10 }
 0x106   : > { %1488 = vmatmul.mubr.msk.f32.gmra.mrb[4].mxu0 %vm948_vm10, %v921_v48  ;;  %s1263_s18 = scalar_lea.sflag [#allocation3], %s227_s8 }
 0x107   : > { %v2252_v57 = vpop.permute.xlu1 %450  ;;  %v2254_v12 = vpop.permute.xlu0 %363  ;;  %v745_v59 = vsel %vm393_vm0, %v743_v50, %v744_v44 }
 0x108   : > { %v806_v5 = vsel %vm796_vm2, %v1970_v6, %v2254_v12 }
 0x109   : > { %772 = vrot.lane.b32.xlu1 %v588_v9, %s1715_s30  ;;  %721 = vrot.lane.b32.xlu0 %v537_v11, %s1714_s23 }
 0x10b   : > { %v654_v16 = vpop.permute.xlu1 %653  ;;  %v606_v17 = vpop.permute.xlu0 %605 }
 0x10c   : > { %v888_v18 = vsel %vm881_vm7, %v871_v3, %v654_v16  ;;  %v872_v7 = vsel %vm864_vm6, %v855_v40, %v606_v17  ;;  %v822_v16 = vsel %vm813_vm3, %v805_v15, %v2252_v57 }
 0x10d   : > { %619 = vrot.lane.b32.xlu1 %v588_v9, %s2552_s13  ;;  %568 = vrot.lane.b32.xlu0 %v537_v11, %s1711_s6  ;;  %s246_s6 = sadd.s32 %s1414_s5, %s1413_s27  ;;  %s1435_s27 = sshll.u32 %s1278_s24, 5 }
 0x10e   : > { %s2488_s12 = scalar_lea.hbm %s2545_s4, %s1435_s27 }
 0x10f   : > { %v501_v19 = vpop.permute.xlu1 %500  ;;  %v2261_v21 = vpop.permute.xlu0 %452 }
 0x110   : > { %v839_v17 = vsel %vm830_vm4, %v822_v16, %v501_v19  ;;  %v823_v63 = vsel %vm813_vm3, %v806_v5, %v2261_v21 }
 0x111   : > { %621 = vrot.lane.b32.xlu1 %v590_v13, %s2552_s13  ;;  %774 = vrot.lane.b32.xlu0 %v590_v13, %s1715_s30  ;;  %s1410_s13 = sshll.u32 %s227_s8, 1 }
 0x112   : > { %s229_s5 = scalar_lea.vmem [#allocation2], %s1410_s13 }
 0x113   : > { %v708_v37 = vpop.permute.xlu1 %707  ;;  %v656_v38 = vpop.permute.xlu0 %655 }
 0x114   : > { %v905_v51 = vsel %vm898_vm8, %v888_v18, %v708_v37  ;;  %v889_v53 = vsel %vm881_vm7, %v872_v7, %v656_v38 }
 0x115   : > { %671 = vrot.lane.b32.xlu1 %v278_v24, %s1713_s9  ;;  %669 = vrot.lane.b32.xlu0 %v277_v25, %s1713_s9  ;;  %s1415_s9 = sshll.u32 %s246_s6, 3  ;;  %s1282_s6 = sshll.u32 %s229_s5, 4  ;;  %s2490_s6 = int_to_ptr.vmem [resolvable:$true] %s1282_s6 }
 0x116   : > { %s1612_s19 = scalar_lea.vmem %s2490_s6, 32 }
 0x117   : > { %v555_v39 = vpop.permute.xlu1 %554  ;;  %v503_v41 = vpop.permute.xlu0 %502  ;;  %p1613_p1 = scmp.ne.s32.totalorder %s2490_s6, %s1612_s19 }
 0x118   : > { %v856_v25 = vsel %vm847_vm5, %v839_v17, %v555_v39  ;;  %v840_v57 = vsel %vm830_vm4, %v823_v63, %v503_v41 }
 0x119   : > { %725 = vrot.lane.b32.xlu1 %v694_v31, %s1714_s23  ;;  %723 = vrot.lane.b32.xlu0 %v692_v14, %s1714_s23  ;;  %p1614_p2 = pnand %p1613_p1, %p1793_p3  ;;  %s1616_s23 = sshll.u32 %s1716_s14, 4  ;;  %s1617_s23 = int_to_ptr.vmem [resolvable:$false] %s1616_s23 }
 0x11a   : > { %p1619_p5 = scmp.lt.s32.totalorder %s2490_s6, %s1617_s23 }
 0x11b   : > { %v761_v28 = vpop.permute.xlu1 %760  ;;  %v710_v60 = vpop.permute.xlu0 %709  ;;  %p1615_p4 = pneg %p1614_p2 }
 0x11c   : > { %v922_v61 = vsel %vm915_vm9, %v905_v51, %v761_v28  ;;  %v906_v22 = vsel %vm898_vm8, %v889_v53, %v710_v60 }
 0x11d   : > { %778 = vrot.lane.b32.xlu1 %v747_v47, %s1715_s30  ;;  %776 = vrot.lane.b32.xlu0 %v745_v59, %s1715_s30  ;;  %s2400_s30 = scalar_lea.vmem %s2544_s3, %s1415_s9 }
 0x11e   : > { %1490 = vmatprep.mubr.msk.f32.mxu0 %vm948_vm10, %v922_v61 }
 0x11f   : > { %v557_v33 = vpop.permute.xlu1 %556  ;;  %v366_v34 = vpop.permute.xlu0 %365 }
 0x120   : > { %v857_v44 = vsel %vm847_vm5, %v840_v57, %v557_v33  ;;  %v807_v47 = vsel %vm796_vm2, %v2004_v20, %v366_v34 }
 0x123   : > { %v763_v8 = vpop.permute.xlu1 %762  ;;  %v608_v0 = vpop.permute.xlu0 %607 }
 0x124   : > { %v923_v30 = vsel %vm915_vm9, %v906_v22, %v763_v8  ;;  %v873_v26 = vsel %vm864_vm6, %v856_v25, %v608_v0 }
 0x125   : > { %1491 = vmatmul.mubr.msk.f32.gmra.mrb[6].mxu0 %vm948_vm10, %v923_v30 }
 0x127   : > { %v455_v54 = vpop.permute.xlu1 %454  ;;  %v368_v42 = vpop.permute.xlu0 %367 }
 0x128   : > { %v824_v59 = vsel %vm813_vm3, %v807_v47, %v455_v54  ;;  %v808_v20 = vsel %vm796_vm2, %v2007_v23, %v368_v42 }
 0x12b   : > { %v658_v46 = vpop.permute.xlu1 %657  ;;  %v610_v10 = vpop.permute.xlu0 %609 }
 0x12c   : > { %v890_v27 = vsel %vm881_vm7, %v873_v26, %v658_v46  ;;  %v874_v50 = vsel %vm864_vm6, %v857_v44, %v610_v10 }
 0x12f   : > { %v505_v48 = vpop.permute.xlu1 %504  ;;  %v457_v9 = vpop.permute.xlu0 %456 }
 0x130   : > { %v841_v51 = vsel %vm830_vm4, %v824_v59, %v505_v48  ;;  %v825_v34 = vsel %vm813_vm3, %v808_v20, %v457_v9 }
 0x133   : > { %v712_v11 = vpop.permute.xlu1 %711  ;;  %v660_v56 = vpop.permute.xlu0 %659 }
 0x134   : > { %v907_v35 = vsel %vm898_vm8, %v890_v27, %v712_v11  ;;  %v891_v1 = vsel %vm881_vm7, %v874_v50, %v660_v56 }
 0x137   : > { %v559_v13 = vpop.permute.xlu1 %558  ;;  %v507_v24 = vpop.permute.xlu0 %506 }
 0x138   : > { %v858_v61 = vsel %vm847_vm5, %v841_v51, %v559_v13  ;;  %v842_v53 = vsel %vm830_vm4, %v825_v34, %v507_v24 }
 0x13b   : > { %v765_v36 = vpop.permute.xlu1 %764  ;;  %v714_v37 = vpop.permute.xlu0 %713 }
 0x13c   : > { %v924_v38 = vsel %vm915_vm9, %v907_v35, %v765_v36  ;;  %v908_v31 = vsel %vm898_vm8, %v891_v1, %v714_v37 }
 0x13d   : > { %1493 = vmatprep.mubr.msk.f32.mxu1 %vm948_vm10, %v924_v38 }
 0x13f   : > { %v561_v19 = vpop.permute.xlu1 %560  ;;  %v370_v43 = vpop.permute.xlu0 %369 }
 0x140   : > { %v859_v0 = vsel %vm847_vm5, %v842_v53, %v561_v19  ;;  %v809_v24 = vsel %vm796_vm2, %v2054_v55, %v370_v43  ;;  %v2395_v53 = vld [vmem:[%s2543_s2] ss:$0 sm:$0xff] }
 0x143   : > { %v767_v14 = vpop.permute.xlu1 %766  ;;  %v612_v32 = vpop.permute.xlu0 %611 }
 0x144   : > { %v925_v6 = vsel %vm915_vm9, %v908_v31, %v767_v14  ;;  %v875_v45 = vsel %vm864_vm6, %v858_v61, %v612_v32 }
 0x145   : > { %1494 = vmatmul.mubr.msk.f32.vlgmr.msra.gmra.mrb[0].mxu1 %vm948_vm10, %v925_v6 }
 0x147   : > { %v459_v12 = vpop.permute.xlu1 %458  ;;  %v372_v21 = vpop.permute.xlu0 %371 }
 0x148   : > { %v826_v25 = vsel %vm813_vm3, %v809_v24, %v459_v12  ;;  %v810_v55 = vsel %vm796_vm2, %v2062_v58, %v372_v21 }
 0x14b   : > { %v662_v29 = vpop.permute.xlu1 %661  ;;  %v614_v39 = vpop.permute.xlu0 %613 }
 0x14c   : > { %v892_v62 = vsel %vm881_vm7, %v875_v45, %v662_v29  ;;  %v876_v30 = vsel %vm864_vm6, %v859_v0, %v614_v39 }
 0x14f   : > { %v509_v41 = vpop.permute.xlu1 %508  ;;  %v461_v52 = vpop.permute.xlu0 %460 }
 0x150   : > { %v843_v26 = vsel %vm830_vm4, %v826_v25, %v509_v41  ;;  %v827_v43 = vsel %vm813_vm3, %v810_v55, %v461_v52 }
 0x153   : > { %v716_v3 = vpop.permute.xlu1 %715  ;;  %v664_v18 = vpop.permute.xlu0 %663 }
 0x154   : > { %v909_v4 = vsel %vm898_vm8, %v892_v62, %v716_v3  ;;  %v893_v54 = vsel %vm881_vm7, %v876_v30, %v664_v18 }
 0x157   : > { %v563_v28 = vpop.permute.xlu1 %562  ;;  %v511_v60 = vpop.permute.xlu0 %510 }
 0x158   : > { %v860_v36 = vsel %vm847_vm5, %v843_v26, %v563_v28  ;;  %v844_v44 = vsel %vm830_vm4, %v827_v43, %v511_v60 }
 0x15b   : > { %v769_v33 = vpop.permute.xlu1 %768  ;;  %v718_v40 = vpop.permute.xlu0 %717 }
 0x15c   : > { %v926_v7 = vsel %vm915_vm9, %v909_v4, %v769_v33  ;;  %v910_v46 = vsel %vm898_vm8, %v893_v54, %v718_v40 }
 0x15d   : > { %1496 = vmatprep.mubr.msk.f32.mxu1 %vm948_vm10, %v926_v7 }
 0x15f   : > { %v565_v22 = vpop.permute.xlu1 %564  ;;  %v374_v8 = vpop.permute.xlu0 %373 }
 0x160   : > { %v861_v31 = vsel %vm847_vm5, %v844_v44, %v565_v22  ;;  %v811_v41 = vsel %vm796_vm2, %v2129_v49, %v374_v8 }
 0x163   : > { %v771_v10 = vpop.permute.xlu1 %770  ;;  %v616_v48 = vpop.permute.xlu0 %615 }
 0x164   : > { %v927_v23 = vsel %vm915_vm9, %v910_v46, %v771_v10  ;;  %v877_v37 = vsel %vm864_vm6, %v860_v36, %v616_v48 }
 0x165   : > { %1497 = vmatmul.mubr.msk.f32.gmra.mrb[2].mxu1 %vm948_vm10, %v927_v23 }
 0x167   : > { %v463_v42 = vpop.permute.xlu1 %462  ;;  %v376_v9 = vpop.permute.xlu0 %375 }
 0x168   : > { %v812_v52 = vsel %vm796_vm2, %v2138_v2, %v376_v9  ;;  %v828_v3 = vsel %vm813_vm3, %v811_v41, %v463_v42 }
 0x16b   : > { %v666_v11 = vpop.permute.xlu1 %665  ;;  %v618_v56 = vpop.permute.xlu0 %617 }
 0x16c   : > { %v894_v38 = vsel %vm881_vm7, %v877_v37, %v666_v11  ;;  %v878_v14 = vsel %vm864_vm6, %v861_v31, %v618_v56 }
 0x16f   : > { %v513_v15 = vpop.permute.xlu1 %512  ;;  %v465_v16 = vpop.permute.xlu0 %464 }
 0x170   : > { %v829_v18 = vsel %vm813_vm3, %v812_v52, %v465_v16  ;;  %v845_v47 = vsel %vm830_vm4, %v828_v3, %v513_v15 }
 0x173   : > { %v720_v17 = vpop.permute.xlu1 %719  ;;  %v668_v13 = vpop.permute.xlu0 %667 }
 0x174   : > { %v911_v5 = vsel %vm898_vm8, %v894_v38, %v720_v17  ;;  %v895_v32 = vsel %vm881_vm7, %v878_v14, %v668_v13 }
 0x177   : > { %v567_v27 = vpop.permute.xlu1 %566  ;;  %v515_v35 = vpop.permute.xlu0 %514 }
 0x178   : > { %v846_v59 = vsel %vm830_vm4, %v829_v18, %v515_v35  ;;  %v862_v60 = vsel %vm847_vm5, %v845_v47, %v567_v27 }
 0x17b   : > { %v773_v63 = vpop.permute.xlu1 %772  ;;  %v722_v57 = vpop.permute.xlu0 %721 }
 0x17c   : > { %v928_v19 = vsel %vm915_vm9, %v911_v5, %v773_v63  ;;  %v912_v6 = vsel %vm898_vm8, %v895_v32, %v722_v57 }
 0x17d   : > { %1499 = vmatprep.mubr.msk.f32.mxu1 %vm948_vm10, %v928_v19 }
 0x17f   : > { %v620_v50 = vpop.permute.xlu1 %619  ;;  %v569_v1 = vpop.permute.xlu0 %568 }
 0x180   : > { %v863_v61 = vsel %vm847_vm5, %v846_v59, %v569_v1  ;;  %v879_v49 = vsel %vm864_vm6, %v862_v60, %v620_v50 }
 0x183   : > { %v622_v12 = vpop.permute.xlu1 %621  ;;  %v775_v29 = vpop.permute.xlu0 %774 }
 0x184   : > { %v929_v58 = vsel %vm915_vm9, %v912_v6, %v775_v29  ;;  %v880_v2 = vsel %vm864_vm6, %v863_v61, %v622_v12 }
 0x185   : > { %1500 = vmatmul.mubr.msk.f32.gmra.mrb[4].mxu1 %vm948_vm10, %v929_v58 }
 0x187   : > { %v672_v21 = vpop.permute.xlu1 %671  ;;  %v670_v39 = vpop.permute.xlu0 %669 }
 0x188   : > { %v897_v45 = vsel %vm881_vm7, %v880_v2, %v672_v21  ;;  %v896_v62 = vsel %vm881_vm7, %v879_v49, %v670_v39 }
 0x18b   : > { %v726_v51 = vpop.permute.xlu1 %725  ;;  %v724_v28 = vpop.permute.xlu0 %723 }
 0x18c   : > { %v914_v4 = vsel %vm898_vm8, %v897_v45, %v726_v51  ;;  %v913_v33 = vsel %vm898_vm8, %v896_v62, %v724_v28 }
 0x18f   : > { %v779_v40 = vpop.permute.xlu1 %778  ;;  %v777_v7 = vpop.permute.xlu0 %776 }
 0x190   : > { %v931_v20 = vsel %vm915_vm9, %v914_v4, %v779_v40  ;;  %v930_v34 = vsel %vm915_vm9, %v913_v33, %v777_v7 }
 0x191   : > { %1502 = vmatprep.mubr.msk.f32.mxu1 %vm948_vm10, %v930_v34 }
 0x192   : > { %1503 = vmatmul.mubr.msk.f32.gmra.mrb[6].mxu1 %vm948_vm10, %v931_v20 }
 0x199   : > { %v1483_v22 = vpop.f32.mrb[0].mxu0 }
 0x19a   : > { %v1069_v8 = vadd.f32 %v1483_v22, %v2395_v53  ;;  %v1063_v0 = vpop.f32.mrb[1].mxu0 }
 0x19b   : > { %v1064_v30 = vadd.f32 %v2395_v53, %v1063_v0 }
 0x19c   : > { %1143 = vst.msk [vmem:[%s2400_s30 + $0x8] sm:$0xff] %vm796_vm2, %v1069_v8  ;;  %v1159_v54 = vsel %vm796_vm2, %v1069_v8, 0.0  ;;  %v1196_v46 = vmul.f32 %v1069_v8, %v1069_v8 }
 0x19d   : > { %1142 = vst.msk [vmem:[%s2400_s30] sm:$0xff] %vm796_vm2, %v1064_v30  ;;  %v1158_v10 = vsel %vm796_vm2, %v1064_v30, 0.0  ;;  %v1195_v48 = vmul.f32 %v1064_v30, %v1064_v30 }
 0x19e   : > { %v1212_v23 = vsel %vm796_vm2, %v1196_v46, 0.0  ;;  %v1160_v42 = vadd.f32 %v1159_v54, %v1158_v10 }
 0x19f   : > { %v1211_v9 = vsel %vm796_vm2, %v1195_v48, 0.0 }
 0x1a0   : > { %v1213_v11 = vadd.f32 %v1212_v23, %v1211_v9 }
 0x1b9   : > { %v1486_v56 = vpop.f32.mrb[2].mxu0 }
 0x1ba   : > { %v1079_v15 = vadd.f32 %v1486_v56, %v2395_v53  ;;  %v1073_v16 = vpop.f32.mrb[3].mxu0 }
 0x1bb   : > { %v1074_v17 = vadd.f32 %v2395_v53, %v1073_v16 }
 0x1bc   : > { %1145 = vst.msk [vmem:[%s2400_s30 + $0x18] sm:$0xff] %vm796_vm2, %v1079_v15  ;;  %v1198_v13 = vmul.f32 %v1079_v15, %v1079_v15  ;;  %v1163_v27 = vsel %vm796_vm2, %v1079_v15, 0.0 }
 0x1bd   : > { %1144 = vst.msk [vmem:[%s2400_s30 + $0x10] sm:$0xff] %vm796_vm2, %v1074_v17  ;;  %v1161_v24 = vsel %vm796_vm2, %v1074_v17, 0.0  ;;  %v1197_v25 = vmul.f32 %v1074_v17, %v1074_v17 }
 0x1be   : > { %v1162_v26 = vadd.f32 %v1161_v24, %v1160_v42  ;;  %v1216_v38 = vsel %vm796_vm2, %v1198_v13, 0.0 }
 0x1bf   : > { %v1214_v35 = vsel %vm796_vm2, %v1197_v25, 0.0 }
 0x1c0   : > { %v1215_v36 = vadd.f32 %v1214_v35, %v1213_v11  ;;  %v1164_v37 = vadd.f32 %v1163_v27, %v1162_v26 }
 0x1c2   : > { %v1217_v5 = vadd.f32 %v1216_v38, %v1215_v36 }
 0x1d9   : > { %v1489_v63 = vpop.f32.mrb[4].mxu0 }
 0x1da   : > { %v1089_v57 = vadd.f32 %v1489_v63, %v2395_v53  ;;  %v1083_v19 = vpop.f32.mrb[5].mxu0 }
 0x1db   : > { %v1084_v55 = vadd.f32 %v2395_v53, %v1083_v19 }
 0x1dc   : > { %1147 = vst.msk [vmem:[%s2400_s30 + $0x28] sm:$0xff] %vm796_vm2, %v1089_v57  ;;  %v1200_v43 = vmul.f32 %v1089_v57, %v1089_v57  ;;  %v1167_v31 = vsel %vm796_vm2, %v1089_v57, 0.0 }
 0x1dd   : > { %1146 = vst.msk [vmem:[%s2400_s30 + $0x20] sm:$0xff] %vm796_vm2, %v1084_v55  ;;  %v1165_v44 = vsel %vm796_vm2, %v1084_v55, 0.0  ;;  %v1199_v50 = vmul.f32 %v1084_v55, %v1084_v55 }
 0x1de   : > { %v1166_v1 = vadd.f32 %v1165_v44, %v1164_v37  ;;  %v1220_v12 = vsel %vm796_vm2, %v1200_v43, 0.0 }
 0x1df   : > { %v1218_v14 = vsel %vm796_vm2, %v1199_v50, 0.0 }
 0x1e0   : > { %v1219_v32 = vadd.f32 %v1218_v14, %v1217_v5  ;;  %v1168_v6 = vadd.f32 %v1167_v31, %v1166_v1 }
 0x1e2   : > { %v1221_v29 = vadd.f32 %v1220_v12, %v1219_v32 }
 0x1f8   : > { %v1492_v58 = vpop.f32.mrb[6].mxu0 }
 0x1f9   : > { %v1099_v21 = vadd.f32 %v1492_v58, %v2395_v53  ;;  %v1093_v39 = vpop.f32.mrb[7].mxu0 }
 0x1fa   : > { %v1094_v41 = vadd.f32 %v2395_v53, %v1093_v39 }
 0x1fb   : > { %1149 = vst.msk [vmem:[%s2400_s30 + $0x38] sm:$0xff] %vm796_vm2, %v1099_v21  ;;  %v1202_v52 = vmul.f32 %v1099_v21, %v1099_v21  ;;  %v1171_v59 = vsel %vm796_vm2, %v1099_v21, 0.0 }
 0x1fc   : > { %1148 = vst.msk [vmem:[%s2400_s30 + $0x30] sm:$0xff] %vm796_vm2, %v1094_v41  ;;  %v1169_v3 = vsel %vm796_vm2, %v1094_v41, 0.0  ;;  %v1201_v18 = vmul.f32 %v1094_v41, %v1094_v41 }
 0x1fd   : > { %v1170_v47 = vadd.f32 %v1169_v3, %v1168_v6  ;;  %v1224_v61 = vsel %vm796_vm2, %v1202_v52, 0.0 }
 0x1fe   : > { %v1222_v51 = vsel %vm796_vm2, %v1201_v18, 0.0 }
 0x1ff   : > { %v1223_v28 = vadd.f32 %v1222_v51, %v1221_v29  ;;  %v1172_v60 = vadd.f32 %v1171_v59, %v1170_v47 }
 0x201   : > { %v1225_v49 = vadd.f32 %v1224_v61, %v1223_v28 }
 0x218   : > { %v1495_v2 = vpop.f32.mrb[0].mxu1 }
 0x219   : > { %v1109_v45 = vadd.f32 %v1495_v2, %v2395_v53  ;;  %v1103_v62 = vpop.f32.mrb[1].mxu1 }
 0x21a   : > { %v1104_v4 = vadd.f32 %v2395_v53, %v1103_v62 }
 0x21b   : > { %1151 = vst.msk [vmem:[%s2400_s30 + $0x48] sm:$0xff] %vm796_vm2, %v1109_v45  ;;  %v1204_v33 = vmul.f32 %v1109_v45, %v1109_v45  ;;  %v1175_v34 = vsel %vm796_vm2, %v1109_v45, 0.0 }
 0x21c   : > { %1150 = vst.msk [vmem:[%s2400_s30 + $0x40] sm:$0xff] %vm796_vm2, %v1104_v4  ;;  %v1173_v40 = vsel %vm796_vm2, %v1104_v4, 0.0  ;;  %v1203_v7 = vmul.f32 %v1104_v4, %v1104_v4 }
 0x21d   : > { %v1174_v20 = vadd.f32 %v1173_v40, %v1172_v60  ;;  %v1228_v30 = vsel %vm796_vm2, %v1204_v33, 0.0 }
 0x21e   : > { %v1226_v22 = vsel %vm796_vm2, %v1203_v7, 0.0 }
 0x21f   : > { %v1227_v8 = vadd.f32 %v1226_v22, %v1225_v49  ;;  %v1176_v0 = vadd.f32 %v1175_v34, %v1174_v20 }
 0x221   : > { %v1229_v54 = vadd.f32 %v1228_v30, %v1227_v8 }
 0x238   : > { %v1498_v46 = vpop.f32.mrb[2].mxu1 }
 0x239   : > { %v1119_v10 = vadd.f32 %v1498_v46, %v2395_v53  ;;  %v1113_v48 = vpop.f32.mrb[3].mxu1 }
 0x23a   : > { %v1114_v23 = vadd.f32 %v2395_v53, %v1113_v48 }
 0x23b   : > { %1153 = vst.msk [vmem:[%s2400_s30 + $0x58] sm:$0xff] %vm796_vm2, %v1119_v10  ;;  %v1206_v42 = vmul.f32 %v1119_v10, %v1119_v10  ;;  %v1179_v15 = vsel %vm796_vm2, %v1119_v10, 0.0 }
 0x23c   : > { %1152 = vst.msk [vmem:[%s2400_s30 + $0x50] sm:$0xff] %vm796_vm2, %v1114_v23  ;;  %v1177_v9 = vsel %vm796_vm2, %v1114_v23, 0.0  ;;  %v1205_v11 = vmul.f32 %v1114_v23, %v1114_v23 }
 0x23d   : > { %v1178_v56 = vadd.f32 %v1177_v9, %v1176_v0  ;;  %v1232_v24 = vsel %vm796_vm2, %v1206_v42, 0.0 }
 0x23e   : > { %v1230_v16 = vsel %vm796_vm2, %v1205_v11, 0.0 }
 0x23f   : > { %v1231_v17 = vadd.f32 %v1230_v16, %v1229_v54  ;;  %v1180_v13 = vadd.f32 %v1179_v15, %v1178_v56 }
 0x241   : > { %v1233_v25 = vadd.f32 %v1232_v24, %v1231_v17 }
 0x258   : > { %v1501_v26 = vpop.f32.mrb[4].mxu1 }
 0x259   : > { %v1129_v27 = vadd.f32 %v1501_v26, %v2395_v53  ;;  %v1123_v35 = vpop.f32.mrb[5].mxu1 }
 0x25a   : > { %v1124_v36 = vadd.f32 %v2395_v53, %v1123_v35 }
 0x25b   : > { %1155 = vst.msk [vmem:[%s2400_s30 + $0x68] sm:$0xff] %vm796_vm2, %v1129_v27  ;;  %v1208_v37 = vmul.f32 %v1129_v27, %v1129_v27  ;;  %v1183_v57 = vsel %vm796_vm2, %v1129_v27, 0.0 }
 0x25c   : > { %1154 = vst.msk [vmem:[%s2400_s30 + $0x60] sm:$0xff] %vm796_vm2, %v1124_v36  ;;  %v1181_v38 = vsel %vm796_vm2, %v1124_v36, 0.0  ;;  %v1207_v5 = vmul.f32 %v1124_v36, %v1124_v36 }
 0x25d   : > { %v1182_v63 = vadd.f32 %v1181_v38, %v1180_v13  ;;  %v1236_v44 = vsel %vm796_vm2, %v1208_v37, 0.0 }
 0x25e   : > { %v1234_v19 = vsel %vm796_vm2, %v1207_v5, 0.0 }
 0x25f   : > { %v1235_v55 = vadd.f32 %v1234_v19, %v1233_v25  ;;  %v1184_v43 = vadd.f32 %v1183_v57, %v1182_v63 }
 0x261   : > { %v1237_v50 = vadd.f32 %v1236_v44, %v1235_v55 }
 0x265   : > { %v1504_v1 = vpop.f32.mrb[6].mxu1 }
 0x266   : > { %v1139_v31 = vadd.f32 %v1504_v1, %v2395_v53  ;;  %v1133_v14 = vpop.f32.mrb[7].mxu1 }
 0x267   : > { %v1134_v32 = vadd.f32 %v2395_v53, %v1133_v14 }
 0x268   : > { %1157 = vst.msk [vmem:[%s2400_s30 + $0x78] sm:$0xff] %vm796_vm2, %v1139_v31  ;;  %v1210_v6 = vmul.f32 %v1139_v31, %v1139_v31  ;;  %v1187_v21 = vsel %vm796_vm2, %v1139_v31, 0.0 }
 0x269   : > { %1156 = vst.msk [vmem:[%s2400_s30 + $0x70] sm:$0xff] %vm796_vm2, %v1134_v32  ;;  %v1185_v12 = vsel %vm796_vm2, %v1134_v32, 0.0  ;;  %v1209_v29 = vmul.f32 %v1134_v32, %v1134_v32  ;;  %s1618_s30 = scalar_lea.vmem %s1617_s23, 64 }
 0x26a   : > { %v1186_v58 = vadd.f32 %v1185_v12, %v1184_v43  ;;  %v1240_v3 = vsel %vm796_vm2, %v1210_v6, 0.0  ;;  %p1620_p6 = scmp.lt.s32.totalorder %s1618_s30, %s1612_s19 }
 0x26b   : > { %v1238_v39 = vsel %vm796_vm2, %v1209_v29, 0.0 }
 0x26c   : > { %v1188_v41 = vadd.f32 %v1187_v21, %v1186_v58  ;;  %v1239_v52 = vadd.f32 %v1238_v39, %v1237_v50  ;;  %p1621_p7 = por %p1620_p6, %p1619_p5 }
 0x26e   : > { %v1189_v53 = vrot.slane %v1188_v41, 4  ;;  %v1241_v18 = vadd.f32 %v1240_v3, %v1239_v52  ;;  %p1622_p9 = pnand %p1621_p7, %p1615_p4 }
 0x270   : > { %v1190_v47 = vadd.f32 %v1189_v53, %v1188_v41  ;;  %v1242_v59 = vrot.slane %v1241_v18, 4 }
 0x272   : > { %v1191_v51 = vrot.slane %v1190_v47, 2  ;;  %v1243_v28 = vadd.f32 %v1242_v59, %v1241_v18 }
 0x274   : > { %v1192_v60 = vadd.f32 %v1191_v51, %v1190_v47  ;;  %v1244_v61 = vrot.slane %v1243_v28, 2 }
 0x276   : > { %v1193_v49 = vrot.slane %v1192_v60, 1  ;;  %v1245_v2 = vadd.f32 %v1244_v61, %v1243_v28 }
 0x278   : > { %v1246_v45 = vrot.slane %v1245_v2, 1  ;;  %v1194_v62 = vadd.f32 %v1193_v49, %v1192_v60 }
 0x27a   : > { %v1247_v4 = vadd.f32 %v1246_v45, %v1245_v2 }
 0x27c   : > { %v1249_v33 = vsel %vm1248_vm11, %v1194_v62, %v1247_v4 }
 0x27d   : > { %1251 = vst.msk [vmem:[%s229_s5] sm:$0x3] %vm1250_vm12, %v1249_v33 }
 0x27e   : > { %1625 = shalt.err (!%p1622_p9)
}
 0x27f   : > { %s1626_s8 = scalar_lea.hbm %s2488_s12, 32  ;;  %s1630_s24 = scalar_lea.hbm %s2545_s4, 128 }
 0x280   : > { %p1627_p10 = scmp.ne.s32.totalorder %s2488_s12, %s1626_s8  ;;  %p1631_p13 = scmp.lt.u32.totalorder %s2488_s12, %s2545_s4 }
 0x281   : > { %p1632_p0 = scmp.lt.u32.totalorder %s1630_s24, %s1626_s8  ;;  %p1634_p2 = scmp.lt.u32.totalorder %s1626_s8, %s2488_s12 }
 0x282   : > { %p1628_p11 = pnand %p1627_p10, %p1793_p3 }
 0x283   : > { %p1633_p1 = por %p1632_p0, %p1631_p13 }
 0x284   : > { %p1629_p12 = pneg %p1628_p11 }
 0x285   : > { %p1635_p4 = por %p1634_p2, %p1633_p1 }
 0x287   : > { %p1636_p5 = pnand %p1635_p4, %p1629_p12 }
 0x289   : > { %1639 = shalt.err (!%p1636_p5)
}
 0x28a   : > { %1533 = dma.vmem_to_hbm [thread:$0]  (%p1793_p3), %s2490_s6, 32, %s2488_s12, %s1263_s18  }
 0x28b PF: > { %p1539_p6 = scmp.ge.s32.totalorder %s1706_s22, 2  ;;  %s1307_s9 = sand.u32 1, %s1678_s15  }
 0x28c   : > { %s1308_s11 = scalar_lea.sflag [#allocation3], %s1307_s9 }
 0x28d   : > { %p1536_p7 = pnand %p1539_p6, %p1802_p8 }
 0x28f   : > { %1673 = dma.done.wait (!%p1536_p7), %s1308_s11, 32  }
 0x290   : > { %1675 = vsyncadd (!%p1536_p7), %s1308_s11, 4294967264  ;;  %s18_s22 = sadd.s32 1, %s1706_s22   ;;  %s2554_s15 = smov %s1682_s16 }
 0x291   : > { %p15_p9 = scmp.ge.s32.totalorder %s18_s22, 6   ;;  %s2555_s16 = smov %s1686_s17 }
 0x292   : > { %s2556_s17 = smov %s1811_s7  ;;  %s2557_s18 = smov %s1698_s20 }
 0x293   : > { %s2558_s19 = smov %s1702_s21  ;;  %s2559_s20 = smov %s2562_s25 }
 0x294   : > { %s2560_s21 = smov %s2566_s26  ;;  %17 = sbr.rel (!%p15_p9) target bundleno = 5 (0x5), region = 79 }
 0x29b   :  { %1313 = vsyncpa [#allocation3], 1 }
 0x29c   :  { %1315 = vsyncpa [#allocation3 + $0x1], 1 }

// kernel: skip_connection_block.23
= control target key start
LH: loop header
LB: loop body
LE: loop exit
PB: predicated region body
PF: predicated region fallthrough
CT: control target
= control target key end

     0   :  { %s558_s12 = smov 0   ;;  %s560_s13 = smov 0   ;;  %s706_s0 = inlined_call_operand.vmem [shape: f32[2,16,16,8], index: 0, kind: input, shape index: {}]   ;;  %s707_s1 = inlined_call_operand.vmem [shape: f32[1,8], index: 1, kind: input, shape index: {}]   ;;  %s708_s2 = inlined_call_operand.vmem [shape: f32[1,8], index: 2, kind: input, shape index: {}]   ;;  %s709_s3 = inlined_call_operand.vmem [shape: f32[2,16,16,8], index: 3, kind: output, shape index: {}]  }
   0x1   :  { %s562_s14 = smov 0   ;;  %s564_s15 = smov 0  }
   0x2   :  { %s566_s16 = smov 0  }
   0x3 LB: > { %s22_s17 = sadd.s32 1, %s528_s14  ;;  %s25_s18 = sadd.s32 1, %s532_s15  ;;  %s536_s16 = sphi %s566_s16, %s13_s16   ;;  %s532_s15 = sphi %s564_s15, %s713_s15   ;;  %s528_s14 = sphi %s562_s14, %s712_s14   ;;  %s524_s13 = sphi %s560_s13, %s711_s13   ;;  %s520_s12 = sphi %s558_s12, %s710_s12  }
   0x4   : > { %p23_p0 = scmp.ge.s32.totalorder %s22_s17, 2  ;;  %p445_p1 = scmp.ge.s32.totalorder %s536_s16, 1 }
   0x5   : > { %p159_p2 = scmp.lt.s32.totalorder %s536_s16, 5 }
   0x6   : > { %s715_s17 = smov (%p23_p0, %s22_s17), 0  ;;  %s717_s18 = smov (!%p23_p0, %s25_s18), %s532_s15 }
   0x7   : > { %p160_p3 = pnand %p445_p1, %p159_p2  ;;  %p27_p4 = scmp.ge.s32.totalorder %s717_s18, 2 }
   0x8   : > { %s446_s19 = sshll.u32 (!%p160_p3), %s520_s12, 3  ;;  %p194_p5 = scmp.lt.s32.totalorder (!%p160_p3), %s524_s13, 1  ;;  %v594_v0 = vld [vmem:[%s707_s1] ss:$0 sm:$0xff] (!%p160_p3)  ;;  %vm325_vm0 = vcmask (!%p160_p3), 64512  }
   0x9   : > { %s719_s18 = smov (%p27_p4, %s717_s18), 0  ;;  %163 = sbr.rel (%p160_p3) target bundleno = 47 (0x2f), region = 32 }
   0xa   : > { %p196_p6 = scmp.lt.s32.totalorder (!%p160_p3), %s446_s19, 15  ;;  %v604_v1 = vld [vmem:[%s708_s2] ss:$0 sm:$0xff] (!%p160_p3) }
  0x10   : > { %s721_s13 = smov (!%p194_p5, %s524_s13), 1  ;;  %s723_s19 = smov (!%p196_p6, %s446_s19), 15 }
  0x11   : > { %s448_s20 = sshll.u32 %s721_s13, 5  ;;  %s447_s21 = sshll.u32 %s723_s19, 1 }
  0x12   : > { %s588_s22 = sadd.s32 %s448_s20, %s447_s21 }
  0x13   : > { %s449_s23 = sshll.u32 %s588_s22, 3 }
  0x14   : > { %s599_s28 = scalar_lea.vmem %s706_s0, %s449_s23  ;;  %s632_s6 = scalar_lea.vmem %s709_s3, %s449_s23 }
  0x15   : > { %v215_v2 = vld [vmem:[%s599_s28] sm:$0xff]  ;;  %v216_v3 = vld [vmem:[%s599_s28 + $0x8] sm:$0xff]  ;;  %v217_v4 = vld [vmem:[%s599_s28 + $0x10] sm:$0xff] }
  0x16   : > { %v239_v5 = vmul.f32 %v594_v0, %v215_v2  ;;  %v240_v6 = vmul.f32 %v594_v0, %v216_v3  ;;  %v241_v7 = vmul.f32 %v594_v0, %v217_v4  ;;  %v218_v8 = vld [vmem:[%s599_s28 + $0x18] sm:$0xff]  ;;  %v219_v9 = vld [vmem:[%s599_s28 + $0x20] sm:$0xff]  ;;  %v220_v10 = vld [vmem:[%s599_s28 + $0x28] sm:$0xff] }
  0x17   : > { %v242_v11 = vmul.f32 %v594_v0, %v218_v8  ;;  %v243_v12 = vmul.f32 %v594_v0, %v219_v9  ;;  %v244_v13 = vmul.f32 %v594_v0, %v220_v10  ;;  %v221_v14 = vld [vmem:[%s599_s28 + $0x30] sm:$0xff]  ;;  %v222_v15 = vld [vmem:[%s599_s28 + $0x38] sm:$0xff]  ;;  %v223_v24 = vld [vmem:[%s599_s28 + $0x40] sm:$0xff] }
  0x18   : > { %v261_v16 = vadd.f32 %v604_v1, %v239_v5  ;;  %v262_v17 = vadd.f32 %v604_v1, %v240_v6  ;;  %v263_v18 = vadd.f32 %v604_v1, %v241_v7  ;;  %v245_v19 = vmul.f32 %v594_v0, %v221_v14  ;;  %v224_v32 = vld [vmem:[%s599_s28 + $0x48] sm:$0xff]  ;;  %v225_v33 = vld [vmem:[%s599_s28 + $0x50] sm:$0xff]  ;;  %v226_v34 = vld [vmem:[%s599_s28 + $0x58] sm:$0xff] }
  0x19   : > { %v264_v20 = vadd.f32 %v604_v1, %v242_v11  ;;  %v265_v21 = vadd.f32 %v604_v1, %v243_v12  ;;  %v266_v22 = vadd.f32 %v604_v1, %v244_v13  ;;  %v246_v23 = vmul.f32 %v594_v0, %v222_v15  ;;  %v227_v46 = vld [vmem:[%s599_s28 + $0x60] sm:$0xff]  ;;  %v228_v47 = vld [vmem:[%s599_s28 + $0x68] sm:$0xff]  ;;  %v229_v58 = vld [vmem:[%s599_s28 + $0x70] sm:$0xff] }
  0x1a   : > { %vm277_vm1 = vcmp.gt.f32.partialorder %v261_v16, 0.0  ;;  %v293_v25 = vmul.f32 0.2, %v261_v16  ;;  %vm278_vm2 = vcmp.gt.f32.partialorder %v262_v17, 0.0  ;;  %v294_v26 = vmul.f32 0.2, %v262_v17 }
  0x1b   : > { %vm279_vm3 = vcmp.gt.f32.partialorder %v263_v18, 0.0  ;;  %v295_v27 = vmul.f32 0.2, %v263_v18  ;;  %vm280_vm4 = vcmp.gt.f32.partialorder %v264_v20, 0.0  ;;  %v296_v28 = vmul.f32 0.2, %v264_v20 }
  0x1c   : > { %v309_v29 = vsel %vm277_vm1, %v261_v16, %v293_v25  ;;  %v310_v30 = vsel %vm278_vm2, %v262_v17, %v294_v26  ;;  %vm281_vm5 = vcmp.gt.f32.partialorder %v265_v21, 0.0  ;;  %v297_v31 = vmul.f32 0.2, %v265_v21  ;;  %v230_v59 = vld [vmem:[%s599_s28 + $0x78] sm:$0xff] }
  0x1d   : > { %326 = vst.msk [vmem:[%s632_s6] sm:$0xff] %vm325_vm0, %v309_v29  ;;  %327 = vst.msk [vmem:[%s632_s6 + $0x8] sm:$0xff] %vm325_vm0, %v310_v30  ;;  %v311_v35 = vsel %vm279_vm3, %v263_v18, %v295_v27  ;;  %v312_v36 = vsel %vm280_vm4, %v264_v20, %v296_v28  ;;  %vm282_vm6 = vcmp.gt.f32.partialorder %v266_v22, 0.0  ;;  %v298_v37 = vmul.f32 0.2, %v266_v22 }
  0x1e   : > { %328 = vst.msk [vmem:[%s632_s6 + $0x10] sm:$0xff] %vm325_vm0, %v311_v35  ;;  %329 = vst.msk [vmem:[%s632_s6 + $0x18] sm:$0xff] %vm325_vm0, %v312_v36  ;;  %v313_v38 = vsel %vm281_vm5, %v265_v21, %v297_v31  ;;  %v267_v39 = vadd.f32 %v604_v1, %v245_v19  ;;  %v268_v40 = vadd.f32 %v604_v1, %v246_v23 }
  0x1f   : > { %v247_v41 = vmul.f32 %v594_v0, %v223_v24  ;;  %330 = vst.msk [vmem:[%s632_s6 + $0x20] sm:$0xff] %vm325_vm0, %v313_v38  ;;  %v314_v42 = vsel %vm282_vm6, %v266_v22, %v298_v37  ;;  %v248_v43 = vmul.f32 %v594_v0, %v224_v32  ;;  %v249_v44 = vmul.f32 %v594_v0, %v225_v33 }
  0x20   : > { %v250_v45 = vmul.f32 %v594_v0, %v226_v34  ;;  %331 = vst.msk [vmem:[%s632_s6 + $0x28] sm:$0xff] %vm325_vm0, %v314_v42  ;;  %vm283_vm7 = vcmp.gt.f32.partialorder %v267_v39, 0.0  ;;  %v299_v48 = vmul.f32 0.2, %v267_v39  ;;  %vm284_vm8 = vcmp.gt.f32.partialorder %v268_v40, 0.0 }
  0x21   : > { %v300_v49 = vmul.f32 0.2, %v268_v40  ;;  %v269_v50 = vadd.f32 %v604_v1, %v247_v41  ;;  %v270_v51 = vadd.f32 %v604_v1, %v248_v43  ;;  %v271_v52 = vadd.f32 %v604_v1, %v249_v44 }
  0x22   : > { %v272_v53 = vadd.f32 %v604_v1, %v250_v45  ;;  %v315_v54 = vsel %vm283_vm7, %v267_v39, %v299_v48  ;;  %v251_v56 = vmul.f32 %v594_v0, %v227_v46  ;;  %v252_v57 = vmul.f32 %v594_v0, %v228_v47 }
  0x23   : > { %v316_v55 = vsel %vm284_vm8, %v268_v40, %v300_v49  ;;  %332 = vst.msk [vmem:[%s632_s6 + $0x30] sm:$0xff] %vm325_vm0, %v315_v54  ;;  %vm285_vm9 = vcmp.gt.f32.partialorder %v269_v50, 0.0  ;;  %v301_v60 = vmul.f32 0.2, %v269_v50  ;;  %vm286_vm10 = vcmp.gt.f32.partialorder %v270_v51, 0.0 }
  0x24   : > { %333 = vst.msk [vmem:[%s632_s6 + $0x38] sm:$0xff] %vm325_vm0, %v316_v55  ;;  %v302_v61 = vmul.f32 0.2, %v270_v51  ;;  %vm287_vm11 = vcmp.gt.f32.partialorder %v271_v52, 0.0  ;;  %v303_v62 = vmul.f32 0.2, %v271_v52  ;;  %v273_v4 = vadd.f32 %v604_v1, %v251_v56 }
  0x25   : > { %vm288_vm12 = vcmp.gt.f32.partialorder %v272_v53, 0.0  ;;  %v304_v63 = vmul.f32 0.2, %v272_v53  ;;  %v317_v2 = vsel %vm285_vm9, %v269_v50, %v301_v60  ;;  %v274_v5 = vadd.f32 %v604_v1, %v252_v57 }
  0x26   : > { %v318_v3 = vsel %vm286_vm10, %v270_v51, %v302_v61  ;;  %334 = vst.msk [vmem:[%s632_s6 + $0x40] sm:$0xff] %vm325_vm0, %v317_v2  ;;  %v319_v6 = vsel %vm287_vm11, %v271_v52, %v303_v62  ;;  %v253_v8 = vmul.f32 %v594_v0, %v229_v58  ;;  %v254_v9 = vmul.f32 %v594_v0, %v230_v59 }
  0x27   : > { %335 = vst.msk [vmem:[%s632_s6 + $0x48] sm:$0xff] %vm325_vm0, %v318_v3  ;;  %v320_v7 = vsel %vm288_vm12, %v272_v53, %v304_v63  ;;  %336 = vst.msk [vmem:[%s632_s6 + $0x50] sm:$0xff] %vm325_vm0, %v319_v6  ;;  %vm289_vm13 = vcmp.gt.f32.partialorder %v273_v4, 0.0  ;;  %v305_v10 = vmul.f32 0.2, %v273_v4  ;;  %vm290_vm14 = vcmp.gt.f32.partialorder %v274_v5, 0.0 }
  0x28   : > { %337 = vst.msk [vmem:[%s632_s6 + $0x58] sm:$0xff] %vm325_vm0, %v320_v7  ;;  %v306_v11 = vmul.f32 0.2, %v274_v5  ;;  %v275_v12 = vadd.f32 %v604_v1, %v253_v8  ;;  %v276_v13 = vadd.f32 %v604_v1, %v254_v9 }
  0x29   : > { %v321_v14 = vsel %vm289_vm13, %v273_v4, %v305_v10 }
  0x2a   : > { %v322_v15 = vsel %vm290_vm14, %v274_v5, %v306_v11  ;;  %338 = vst.msk [vmem:[%s632_s6 + $0x60] sm:$0xff] %vm325_vm0, %v321_v14  ;;  %vm291_vm15 = vcmp.gt.f32.partialorder %v275_v12, 0.0  ;;  %v307_v0 = vmul.f32 0.2, %v275_v12  ;;  %vm292_vm1 = vcmp.gt.f32.partialorder %v276_v13, 0.0 }
  0x2b   : > { %339 = vst.msk [vmem:[%s632_s6 + $0x68] sm:$0xff] %vm325_vm0, %v322_v15  ;;  %v308_v16 = vmul.f32 0.2, %v276_v13 }
  0x2c   : > { %v323_v17 = vsel %vm291_vm15, %v275_v12, %v307_v0 }
  0x2d   : > { %v324_v18 = vsel %vm292_vm1, %v276_v13, %v308_v16  ;;  %340 = vst.msk [vmem:[%s632_s6 + $0x70] sm:$0xff] %vm325_vm0, %v323_v17 }
  0x2e   : > { %341 = vst.msk [vmem:[%s632_s6 + $0x78] sm:$0xff] %vm325_vm0, %v324_v18 }
  0x2f PF: > { %s13_s16 = sadd.s32 1, %s536_s16   ;;  %s710_s12 = smov %s528_s14 }
  0x30   : > { %p10_p7 = scmp.ge.s32.totalorder %s13_s16, 6   ;;  %s711_s13 = smov %s532_s15 }
  0x31   : > { %s712_s14 = smov %s715_s17  ;;  %s713_s15 = smov %s719_s18 }
  0x32   :  { %12 = sbr.rel (!%p10_p7) target bundleno = 3 (0x3), region = 62 }

// kernel: skip_connection_block.26
= control target key start
LH: loop header
LB: loop body
LE: loop exit
PB: predicated region body
PF: predicated region fallthrough
CT: control target
= control target key end

     0   :  { %s926_s15 = smov 0   ;;  %s928_s16 = smov 0   ;;  %s1120_s0 = inlined_call_operand.vmem [shape: f32[2,16,16,4], index: 0, kind: input, shape index: {}]   ;;  %s1121_s1 = inlined_call_operand.vmem [shape: f32[4,4], index: 1, kind: input, shape index: {}]   ;;  %s1122_s2 = inlined_call_operand.vmem [shape: f32[1,4], index: 2, kind: input, shape index: {}]   ;;  %s1123_s3 = inlined_call_operand.vmem [shape: f32[2,16,16,4], index: 3, kind: output, shape index: {0}]   ;;  %s1124_s4 = inlined_call_operand.vmem [shape: f32[2,2,2,4], index: 4, kind: output, shape index: {1}]  }
   0x1   :  { %s930_s17 = smov 0   ;;  %s932_s18 = smov 0  }
   0x2   :  { %s934_s19 = smov 0  }
   0x3 LB: > { %s24_s20 = sadd.s32 1, %s891_s17  ;;  %s27_s21 = sadd.s32 1, %s895_s18  ;;  %s899_s19 = sphi %s934_s19, %s15_s19   ;;  %s895_s18 = sphi %s932_s18, %s1128_s18   ;;  %s891_s17 = sphi %s930_s17, %s1127_s17   ;;  %s887_s16 = sphi %s928_s16, %s1126_s16   ;;  %s883_s15 = sphi %s926_s15, %s1125_s15  }
   0x4   : > { %p25_p0 = scmp.ge.s32.totalorder %s24_s20, 2  ;;  %p745_p1 = scmp.ge.s32.totalorder %s899_s19, 1 }
   0x5   : > { %p189_p2 = scmp.lt.s32.totalorder %s899_s19, 5 }
   0x6   : > { %s1130_s20 = smov (%p25_p0, %s24_s20), 0  ;;  %s1132_s21 = smov (!%p25_p0, %s27_s21), %s895_s18 }
   0x7   : > { %p190_p3 = pnand %p745_p1, %p189_p2  ;;  %p29_p4 = scmp.ge.s32.totalorder %s1132_s21, 2 }
   0x8   : > { %v279_v0 = vld [vmem:[%s1121_s1] sm:$0xf] (!%p190_p3)  ;;  %vm336_vm0 = vcmask (!%p190_p3), 1043456   ;;  %s746_s24 = sshll.u32 (!%p190_p3), %s883_s15, 3  ;;  %p234_p5 = scmp.lt.s32.totalorder (!%p190_p3), %s887_s16, 1  ;;  %vm287_vm1 = vcmask (!%p190_p3), 31744  }
   0x9   : > { %s1134_s21 = smov (%p29_p4, %s1132_s21), 0  ;;  %193 = sbr.rel (%p190_p3) target bundleno = 287 (0x11f), region = 32 }
   0xa   : > { %793 = vmatprep.subr.msk.mxu0 (!%p190_p3), %vm336_vm0, %v279_v0  ;;  %p236_p6 = scmp.lt.s32.totalorder (!%p190_p3), %s746_s24, 15  ;;  %819 = vmatprep.subr.msk.mxu1 (!%p190_p3), %vm336_vm0, %v279_v0  ;;  %v992_v17 = vld [vmem:[%s1122_s2] ss:$0 sm:$0xff] (!%p190_p3)  ;;  %p257_p7 = scmp.lt.s32.totalorder (!%p190_p3), %s883_s15, 1  ;;  %vm591_vm2 = vcmask (!%p190_p3), 1040384   ;;  %vm593_vm3 = vcmask (!%p190_p3), 25600  }
   0xb   : > { %794 = vmatpush3.msk.msra.mxu0 (!%p190_p3), %vm336_vm0, %v279_v0  ;;  %820 = vmatpush3.msk.msra.mxu1 (!%p190_p3), %vm336_vm0, %v279_v0 }
  0x10   : > { %s1136_s16 = smov (!%p234_p5, %s887_s16), 1  ;;  %s1138_s24 = smov (!%p236_p6, %s746_s24), 15 }
  0x11   : > { %s748_s25 = sshll.u32 %s1136_s16, 5  ;;  %s747_s26 = sshll.u32 %s1138_s24, 1 }
  0x12   : > { %s965_s27 = sadd.s32 %s748_s25, %s747_s26  ;;  %s1140_s15 = smov (!%p257_p7, %s883_s15), 1 }
  0x13   : > { %s749_s28 = sshll.u32 %s965_s27, 3  ;;  %s754_s11 = sshll.u32 %s1136_s16, 1 }
  0x14   : > { %s242_s5 = scalar_lea.vmem %s1120_s0, %s749_s28  ;;  %s999_s10 = scalar_lea.vmem %s1123_s3, %s749_s28 }
  0x15   : > { %v263_v1 = vld [vmem:[%s242_s5] sm:$0xff]  ;;  %v264_v2 = vld [vmem:[%s242_s5 + $0x8] sm:$0xff]  ;;  %v265_v3 = vld [vmem:[%s242_s5 + $0x10] sm:$0xff]  ;;  %s260_s12 = sadd.s32 %s754_s11, %s1140_s15 }
  0x16   : > { %795 = vmatprep.mubr.msk.f32.mxu0 %vm287_vm1, %v263_v1  ;;  %v271_v4 = vld [vmem:[%s242_s5 + $0x40] sm:$0xff]  ;;  %v266_v5 = vld [vmem:[%s242_s5 + $0x18] sm:$0xff]  ;;  %v272_v6 = vld [vmem:[%s242_s5 + $0x48] sm:$0xff]  ;;  %s755_s13 = sshll.u32 %s260_s12, 1 }
  0x17   : > { %796 = vmatmul.mubr.msk.f32.vlgmr.msra.gmra.mrb[0].mxu0 %vm287_vm1, %v264_v2  ;;  %807 = vmatprep.mubr.msk.f32.mxu1 %vm287_vm1, %v271_v4  ;;  %v273_v7 = vld [vmem:[%s242_s5 + $0x50] sm:$0xff]  ;;  %v267_v8 = vld [vmem:[%s242_s5 + $0x20] sm:$0xff]  ;;  %v274_v9 = vld [vmem:[%s242_s5 + $0x58] sm:$0xff]  ;;  %s262_s23 = scalar_lea.vmem %s1124_s4, %s755_s13 }
  0x18   : > { %798 = vmatprep.mubr.msk.f32.mxu0 %vm287_vm1, %v265_v3  ;;  %808 = vmatmul.mubr.msk.f32.vlgmr.msra.gmra.mrb[0].mxu1 %vm287_vm1, %v272_v6  ;;  %v275_v10 = vld [vmem:[%s242_s5 + $0x60] sm:$0xff]  ;;  %v268_v11 = vld [vmem:[%s242_s5 + $0x28] sm:$0xff]  ;;  %v269_v12 = vld [vmem:[%s242_s5 + $0x30] sm:$0xff] }
  0x19   : > { %810 = vmatprep.mubr.msk.f32.mxu1 %vm287_vm1, %v273_v7  ;;  %v276_v13 = vld [vmem:[%s242_s5 + $0x68] sm:$0xff]  ;;  %v277_v14 = vld [vmem:[%s242_s5 + $0x70] sm:$0xff]  ;;  %v270_v15 = vld [vmem:[%s242_s5 + $0x38] sm:$0xff] }
  0x1a   : > { %v278_v16 = vld [vmem:[%s242_s5 + $0x78] sm:$0xff] }
  0x1b   : > { %799 = vmatmul.mubr.msk.f32.gmra.mrb[2].mxu0 %vm287_vm1, %v266_v5 }
  0x1c   : > { %801 = vmatprep.mubr.msk.f32.mxu0 %vm287_vm1, %v267_v8  ;;  %811 = vmatmul.mubr.msk.f32.gmra.mrb[2].mxu1 %vm287_vm1, %v274_v9 }
  0x1d   : > { %813 = vmatprep.mubr.msk.f32.mxu1 %vm287_vm1, %v275_v10 }
  0x1f   : > { %802 = vmatmul.mubr.msk.f32.gmra.mrb[4].mxu0 %vm287_vm1, %v268_v11 }
  0x20   : > { %804 = vmatprep.mubr.msk.f32.mxu0 %vm287_vm1, %v269_v12  ;;  %814 = vmatmul.mubr.msk.f32.gmra.mrb[4].mxu1 %vm287_vm1, %v276_v13 }
  0x21   : > { %816 = vmatprep.mubr.msk.f32.mxu1 %vm287_vm1, %v277_v14 }
  0x23   : > { %805 = vmatmul.mubr.msk.f32.gmra.mrb[6].mxu0 %vm287_vm1, %v270_v15 }
  0x24   : > { %817 = vmatmul.mubr.msk.f32.gmra.mrb[6].mxu1 %vm287_vm1, %v278_v16 }
  0xea   : > { %v797_v18 = vpop.f32.mrb[0].mxu0 }
  0xeb   : > { %v412_v19 = vadd.f32 %v797_v18, %v992_v17  ;;  %v406_v20 = vpop.f32.mrb[1].mxu0  ;;  %v809_v22 = vpop.f32.mrb[0].mxu1 }
  0xec   : > { %v407_v21 = vadd.f32 %v992_v17, %v406_v20  ;;  %v1007_v25 = vadd.f32 %v809_v22, %v992_v17  ;;  %v446_v26 = vpop.f32.mrb[1].mxu1 }
  0xed   : > { %486 = vst.msk [vmem:[%s999_s10 + $0x8] sm:$0xff] %vm287_vm1, %v412_v19  ;;  %v502_v23 = vsel %vm287_vm1, %v412_v19, 0.0  ;;  %v539_v24 = vmul.f32 %v412_v19, %v412_v19  ;;  %v1013_v30 = vadd.f32 %v992_v17, %v446_v26 }
  0xee   : > { %485 = vst.msk [vmem:[%s999_s10] sm:$0xff] %vm287_vm1, %v407_v21  ;;  %v501_v27 = vsel %vm287_vm1, %v407_v21, 0.0  ;;  %v538_v28 = vmul.f32 %v407_v21, %v407_v21  ;;  %v800_v29 = vpop.f32.mrb[2].mxu0  ;;  %494 = vst.msk [vmem:[%s999_s10 + $0x48] sm:$0xff] %vm287_vm1, %v1007_v25 }
  0xef   : > { %v555_v31 = vsel %vm287_vm1, %v539_v24, 0.0  ;;  %v503_v32 = vadd.f32 %v502_v23, %v501_v27  ;;  %v422_v33 = vadd.f32 %v800_v29, %v992_v17  ;;  %v416_v34 = vpop.f32.mrb[3].mxu0  ;;  %493 = vst.msk [vmem:[%s999_s10 + $0x40] sm:$0xff] %vm287_vm1, %v1013_v30  ;;  %v812_v37 = vpop.f32.mrb[2].mxu1  ;;  %v546_v8 = vmul.f32 %v1013_v30, %v1013_v30 }
  0xf0   : > { %v554_v35 = vsel %vm287_vm1, %v538_v28, 0.0  ;;  %v417_v36 = vadd.f32 %v992_v17, %v416_v34  ;;  %v456_v39 = vpop.f32.mrb[3].mxu1  ;;  %v1031_v44 = vadd.f32 %v812_v37, %v992_v17  ;;  %v516_v20 = vsel %vm287_vm1, %v1013_v30, 0.0 }
  0xf1   : > { %v556_v38 = vadd.f32 %v555_v31, %v554_v35  ;;  %488 = vst.msk [vmem:[%s999_s10 + $0x18] sm:$0xff] %vm287_vm1, %v422_v33  ;;  %v541_v40 = vmul.f32 %v422_v33, %v422_v33  ;;  %v506_v48 = vsel %vm287_vm1, %v422_v33, 0.0  ;;  %v457_v60 = vadd.f32 %v992_v17, %v456_v39 }
  0xf2   : > { %487 = vst.msk [vmem:[%s999_s10 + $0x10] sm:$0xff] %vm287_vm1, %v417_v36  ;;  %v504_v41 = vsel %vm287_vm1, %v417_v36, 0.0  ;;  %v540_v42 = vmul.f32 %v417_v36, %v417_v36  ;;  %v803_v43 = vpop.f32.mrb[4].mxu0  ;;  %496 = vst.msk [vmem:[%s999_s10 + $0x58] sm:$0xff] %vm287_vm1, %v1031_v44  ;;  %v547_v23 = vmul.f32 %v1007_v25, %v1007_v25  ;;  %v569_v27 = vsel %vm287_vm1, %v546_v8, 0.0 }
  0xf3   : > { %v505_v45 = vadd.f32 %v504_v41, %v503_v32  ;;  %v432_v46 = vadd.f32 %v803_v43, %v992_v17  ;;  %v426_v47 = vpop.f32.mrb[5].mxu0  ;;  %v815_v51 = vpop.f32.mrb[4].mxu1  ;;  %v559_v56 = vsel %vm287_vm1, %v541_v40, 0.0  ;;  %495 = vst.msk [vmem:[%s999_s10 + $0x50] sm:$0xff] %vm287_vm1, %v457_v60  ;;  %v548_v28 = vmul.f32 %v457_v60, %v457_v60 }
  0xf4   : > { %v557_v49 = vsel %vm287_vm1, %v540_v42, 0.0  ;;  %v427_v50 = vadd.f32 %v992_v17, %v426_v47  ;;  %v466_v55 = vpop.f32.mrb[5].mxu1  ;;  %v472_v13 = vadd.f32 %v815_v51, %v992_v17  ;;  %v518_v32 = vsel %vm287_vm1, %v1007_v25, 0.0 }
  0xf5   : > { %v558_v52 = vadd.f32 %v557_v49, %v556_v38  ;;  %490 = vst.msk [vmem:[%s999_s10 + $0x28] sm:$0xff] %vm287_vm1, %v432_v46  ;;  %v543_v53 = vmul.f32 %v432_v46, %v432_v46  ;;  %v507_v54 = vadd.f32 %v506_v48, %v505_v45  ;;  %v510_v1 = vsel %vm287_vm1, %v432_v46, 0.0 }
  0xf6   : > { %489 = vst.msk [vmem:[%s999_s10 + $0x20] sm:$0xff] %vm287_vm1, %v427_v50  ;;  %v508_v57 = vsel %vm287_vm1, %v427_v50, 0.0  ;;  %v542_v58 = vmul.f32 %v427_v50, %v427_v50  ;;  %v806_v59 = vpop.f32.mrb[6].mxu0  ;;  %v467_v16 = vadd.f32 %v992_v17, %v466_v55  ;;  %498 = vst.msk [vmem:[%s999_s10 + $0x68] sm:$0xff] %vm287_vm1, %v472_v13  ;;  %v520_v33 = vsel %vm287_vm1, %v457_v60, 0.0 }
  0xf7   : > { %v509_v61 = vadd.f32 %v508_v57, %v507_v54  ;;  %v560_v62 = vadd.f32 %v559_v56, %v558_v52  ;;  %v442_v63 = vadd.f32 %v806_v59, %v992_v17  ;;  %v436_v0 = vpop.f32.mrb[7].mxu0  ;;  %v818_v4 = vpop.f32.mrb[6].mxu1  ;;  %v563_v5 = vsel %vm287_vm1, %v543_v53, 0.0 }
  0xf8   : > { %v561_v2 = vsel %vm287_vm1, %v542_v58, 0.0  ;;  %v437_v3 = vadd.f32 %v992_v17, %v436_v0  ;;  %v476_v9 = vpop.f32.mrb[7].mxu1  ;;  %v482_v21 = vadd.f32 %v818_v4, %v992_v17  ;;  %497 = vst.msk [vmem:[%s999_s10 + $0x60] sm:$0xff] %vm287_vm1, %v467_v16  ;;  %v571_v36 = vsel %vm287_vm1, %v547_v23, 0.0 }
  0xf9   : > { %v562_v6 = vadd.f32 %v561_v2, %v560_v62  ;;  %492 = vst.msk [vmem:[%s999_s10 + $0x38] sm:$0xff] %vm287_vm1, %v442_v63  ;;  %v511_v7 = vadd.f32 %v510_v1, %v509_v61  ;;  %v545_v10 = vmul.f32 %v442_v63, %v442_v63  ;;  %v514_v18 = vsel %vm287_vm1, %v442_v63, 0.0 }
  0xfa   : > { %491 = vst.msk [vmem:[%s999_s10 + $0x30] sm:$0xff] %vm287_vm1, %v437_v3  ;;  %v512_v11 = vsel %vm287_vm1, %v437_v3, 0.0  ;;  %v544_v12 = vmul.f32 %v437_v3, %v437_v3  ;;  %500 = vst.msk [vmem:[%s999_s10 + $0x78] sm:$0xff] %vm287_vm1, %v482_v21  ;;  %v477_v29 = vadd.f32 %v992_v17, %v476_v9  ;;  %v549_v37 = vmul.f32 %v1031_v44, %v1031_v44 }
  0xfb   : > { %v513_v14 = vadd.f32 %v512_v11, %v511_v7  ;;  %v564_v15 = vadd.f32 %v563_v5, %v562_v6  ;;  %v567_v26 = vsel %vm287_vm1, %v545_v10, 0.0  ;;  %v573_v38 = vsel %vm287_vm1, %v548_v28, 0.0 }
  0xfc   : > { %v565_v19 = vsel %vm287_vm1, %v544_v12, 0.0  ;;  %499 = vst.msk [vmem:[%s999_s10 + $0x70] sm:$0xff] %vm287_vm1, %v477_v29  ;;  %v550_v39 = vmul.f32 %v467_v16, %v467_v16  ;;  %v522_v41 = vsel %vm287_vm1, %v1031_v44, 0.0  ;;  %v524_v25 = vsel %vm287_vm1, %v467_v16, 0.0 }
  0xfd   : > { %v566_v22 = vadd.f32 %v565_v19, %v564_v15  ;;  %v515_v24 = vadd.f32 %v514_v18, %v513_v14  ;;  %v575_v45 = vsel %vm287_vm1, %v549_v37, 0.0  ;;  %v551_v46 = vmul.f32 %v472_v13, %v472_v13 }
  0xfe   : > { %v577_v47 = vsel %vm287_vm1, %v550_v39, 0.0  ;;  %v552_v48 = vmul.f32 %v477_v29, %v477_v29  ;;  %v526_v51 = vsel %vm287_vm1, %v472_v13, 0.0  ;;  %v528_v52 = vsel %vm287_vm1, %v477_v29, 0.0 }
  0xff   : > { %v517_v30 = vadd.f32 %v516_v20, %v515_v24  ;;  %v568_v31 = vadd.f32 %v567_v26, %v566_v22  ;;  %v579_v54 = vsel %vm287_vm1, %v551_v46, 0.0  ;;  %v553_v55 = vmul.f32 %v482_v21, %v482_v21 }
 0x100   : > { %v581_v56 = vsel %vm287_vm1, %v552_v48, 0.0  ;;  %v530_v59 = vsel %vm287_vm1, %v482_v21, 0.0 }
 0x101   : > { %v570_v34 = vadd.f32 %v569_v27, %v568_v31  ;;  %v519_v35 = vadd.f32 %v518_v32, %v517_v30  ;;  %v583_v62 = vsel %vm287_vm1, %v553_v55, 0.0 }
 0x103   : > { %v521_v17 = vadd.f32 %v520_v33, %v519_v35  ;;  %v572_v40 = vadd.f32 %v571_v36, %v570_v34 }
 0x105   : > { %v574_v42 = vadd.f32 %v573_v38, %v572_v40  ;;  %v523_v43 = vadd.f32 %v522_v41, %v521_v17 }
 0x107   : > { %v525_v49 = vadd.f32 %v524_v25, %v523_v43  ;;  %v576_v50 = vadd.f32 %v575_v45, %v574_v42 }
 0x109   : > { %v578_v53 = vadd.f32 %v577_v47, %v576_v50  ;;  %v527_v44 = vadd.f32 %v526_v51, %v525_v49 }
 0x10b   : > { %v529_v57 = vadd.f32 %v528_v52, %v527_v44  ;;  %v580_v58 = vadd.f32 %v579_v54, %v578_v53 }
 0x10d   : > { %v531_v60 = vadd.f32 %v530_v59, %v529_v57  ;;  %v582_v61 = vadd.f32 %v581_v56, %v580_v58 }
 0x10f   : > { %v532_v63 = vrot.slane %v531_v60, 4  ;;  %v584_v0 = vadd.f32 %v583_v62, %v582_v61 }
 0x111   : > { %v533_v1 = vadd.f32 %v532_v63, %v531_v60  ;;  %v585_v2 = vrot.slane %v584_v0, 4 }
 0x113   : > { %v534_v3 = vrot.slane %v533_v1, 2  ;;  %v586_v4 = vadd.f32 %v585_v2, %v584_v0 }
 0x115   : > { %v535_v5 = vadd.f32 %v534_v3, %v533_v1  ;;  %v587_v6 = vrot.slane %v586_v4, 2 }
 0x117   : > { %v536_v7 = vrot.slane %v535_v5, 1  ;;  %v588_v8 = vadd.f32 %v587_v6, %v586_v4 }
 0x119   : > { %v589_v9 = vrot.slane %v588_v8, 1  ;;  %v537_v10 = vadd.f32 %v536_v7, %v535_v5 }
 0x11b   : > { %v590_v11 = vadd.f32 %v589_v9, %v588_v8 }
 0x11d   : > { %v592_v12 = vsel %vm591_vm2, %v537_v10, %v590_v11 }
 0x11e   : > { %594 = vst.msk [vmem:[%s262_s23] sm:$0x3] %vm593_vm3, %v592_v12 }
 0x11f PF: > { %s15_s19 = sadd.s32 1, %s899_s19   ;;  %s1125_s15 = smov %s891_s17 }
 0x120   : > { %p12_p8 = scmp.ge.s32.totalorder %s15_s19, 6   ;;  %s1126_s16 = smov %s895_s18 }
 0x121   : > { %s1127_s17 = smov %s1130_s20  ;;  %s1128_s18 = smov %s1134_s21 }
 0x122   :  { %14 = sbr.rel (!%p12_p8) target bundleno = 3 (0x3), region = 74 }

// kernel: skip_connection_block.22
= control target key start
LH: loop header
LB: loop body
LE: loop exit
PB: predicated region body
PF: predicated region fallthrough
CT: control target
= control target key end

     0   :  { %s1653_s15 = smov 0   ;;  %s1655_s16 = smov 0   ;;  %s2375_s0 = inlined_call_operand.vmem [shape: f32[2,2,10,18,8], index: 0, kind: input, shape index: {}]   ;;  %s2376_s1 = inlined_call_operand.vmem [shape: f32[72,8], index: 1, kind: input, shape index: {}]   ;;  %s2377_s2 = inlined_call_operand.vmem [shape: f32[1,8], index: 2, kind: input, shape index: {}]   ;;  %s2378_s3 = inlined_call_operand.vmem [shape: f32[2,16,16,8], index: 3, kind: output, shape index: {0}]   ;;  %s2379_s4 = inlined_call_operand.vmem [shape: f32[2,2,2,8], index: 4, kind: output, shape index: {1}]  }
   0x1   :  { %s1657_s17 = smov 0   ;;  %s1659_s18 = smov 0  }
   0x2   :  { %s1661_s19 = smov 0  }
   0x3 LB: > { %s24_s20 = sadd.s32 1, %s1610_s17  ;;  %s27_s21 = sadd.s32 1, %s1614_s18  ;;  %s1618_s19 = sphi %s1661_s19, %s15_s19   ;;  %s1614_s18 = sphi %s1659_s18, %s2383_s18   ;;  %s1610_s17 = sphi %s1657_s17, %s2382_s17   ;;  %s1606_s16 = sphi %s1655_s16, %s2381_s16   ;;  %s1602_s15 = sphi %s1653_s15, %s2380_s15  }
   0x4   : > { %p25_p0 = scmp.ge.s32.totalorder %s24_s20, 2  ;;  %p1410_p1 = scmp.ge.s32.totalorder %s1618_s19, 1 }
   0x5   : > { %p187_p2 = scmp.lt.s32.totalorder %s1618_s19, 5 }
   0x6   : > { %s2385_s20 = smov (%p25_p0, %s24_s20), 0  ;;  %s2387_s21 = smov (!%p25_p0, %s27_s21), %s1614_s18 }
   0x7   : > { %p188_p3 = pnand %p1410_p1, %p187_p2  ;;  %p29_p4 = scmp.ge.s32.totalorder %s2387_s21, 2 }
   0x8   : > { %p230_p5 = scmp.lt.s32.totalorder (!%p188_p3), %s1606_s16, 1  ;;  %p232_p6 = scmp.lt.s32.totalorder (!%p188_p3), %s1602_s15, 1  ;;  %vm401_vm0 = vcmask (!%p188_p3), 1045504   ;;  %vm312_vm1 = vcmask (!%p188_p3), 1046528   ;;  %v940_v24 = vld [vmem:[%s2376_s1] sm:$0xff] (!%p188_p3)  ;;  %v941_v25 = vld [vmem:[%s2376_s1 + $0x8] sm:$0xff] (!%p188_p3) }
   0x9   : > { %s2389_s21 = smov (%p29_p4, %s2387_s21), 0  ;;  %191 = sbr.rel (%p188_p3) target bundleno = 630 (0x276), region = 32 }
   0xa   : > { %s1620_s30 = smov (!%p188_p3), 24   ;;  %s1621_s5 = smov (!%p188_p3), 16   ;;  %v1504_v26 = vpack.c.bf16 (!%p188_p3), %v941_v25, %v940_v24  ;;  %v942_v28 = vld [vmem:[%s2376_s1 + $0x10] sm:$0xff] (!%p188_p3)  ;;  %v943_v29 = vld [vmem:[%s2376_s1 + $0x18] sm:$0xff] (!%p188_p3)  ;;  %v944_v34 = vld [vmem:[%s2376_s1 + $0x20] sm:$0xff] (!%p188_p3)  ;;  %vm804_vm2 = vcmask (!%p188_p3), 64512  }
   0xb   : > { %s1622_s6 = smov (!%p188_p3), 8   ;;  %s1623_s7 = smov (!%p188_p3), 32   ;;  %v1508_v30 = vpack.c.bf16 (!%p188_p3), %v943_v29, %v942_v28  ;;  %v945_v35 = vld [vmem:[%s2376_s1 + $0x28] sm:$0xff] (!%p188_p3)  ;;  %v946_v39 = vld [vmem:[%s2376_s1 + $0x30] sm:$0xff] (!%p188_p3)  ;;  %v947_v40 = vld [vmem:[%s2376_s1 + $0x38] sm:$0xff] (!%p188_p3)  ;;  %vm821_vm3 = vcmask (!%p188_p3), 130048  }
   0xc   : > { %s1624_s12 = smov (!%p188_p3), 40   ;;  %1505 = vmatprep.subr.bf16.mxu0 (!%p188_p3), %v1504_v26  ;;  %1520 = vmatprep.subr.bf16.mxu1 (!%p188_p3), %v1504_v26  ;;  %s1625_s8 = smov (!%p188_p3), 48   ;;  %v1512_v36 = vpack.c.bf16 (!%p188_p3), %v945_v35, %v944_v34  ;;  %v1516_v42 = vpack.c.bf16 (!%p188_p3), %v947_v40, %v946_v39  ;;  %v948_v44 = vld [vmem:[%s2376_s1 + $0x40] sm:$0xff] (!%p188_p3)  ;;  %vm838_vm4 = vcmask (!%p188_p3), 195584   ;;  %vm855_vm5 = vcmask (!%p188_p3), 261120  }
   0xd   : > { %1507 = vmatpush3.bf16.msra.mxu0 (!%p188_p3), %v1504_v26  ;;  %1525 = vmatpush3.bf16.msra.mxu1 (!%p188_p3), %v1504_v26  ;;  %s1626_s14 = smov (!%p188_p3), 56   ;;  %vm872_vm6 = vcmask (!%p188_p3), 326656   ;;  %vm889_vm7 = vcmask (!%p188_p3), 392192   ;;  %vm906_vm8 = vcmask (!%p188_p3), 457728   ;;  %vm923_vm9 = vcmask (!%p188_p3), 523264  }
   0xe   : > { %1509 = vmatprep.subr.bf16.mxu0 (!%p188_p3), %v1508_v30  ;;  %1521 = vmatprep.subr.bf16.mxu1 (!%p188_p3), %v1508_v30  ;;  %vm956_vm10 = vcmask (!%p188_p3), 588800   ;;  %vm1256_vm11 = vcmask (!%p188_p3), 1040384   ;;  %vm1258_vm12 = vcmask (!%p188_p3), 58368  }
  0x10   : > { %s2391_s16 = smov (!%p230_p5, %s1606_s16), 1 }
  0x11   : > { %s1689_s22 = scalar_select %p232_p6, %s1602_s15, 1  ;;  %1511 = vmatpush3.bf16.msra.mxu0 %v1508_v30  ;;  %1526 = vmatpush3.bf16.msra.mxu1 %v1508_v30 }
  0x12   : > { %s1531_s23 = smul.u32 60, %s2391_s16  ;;  %1513 = vmatprep.subr.bf16.mxu0 %v1512_v36  ;;  %1522 = vmatprep.subr.bf16.mxu1 %v1512_v36 }
  0x13   : > { %s1530_s24 = smul.u32 30, %s1689_s22 }
  0x15   : > { %s236_s25 = sadd.s32 %s1531_s23, %s1530_s24  ;;  %1515 = vmatpush3.bf16.msra.mxu0 %v1512_v36  ;;  %1527 = vmatpush3.bf16.msra.mxu1 %v1512_v36 }
  0x16   : > { %s1411_s26 = sshll.u32 %s236_s25, 3  ;;  %1517 = vmatprep.subr.bf16.mxu0 %v1516_v42  ;;  %1523 = vmatprep.subr.bf16.mxu1 %v1516_v42  ;;  %s1627_s25 = smov 64  }
  0x17   : > { %s1696_s29 = scalar_lea.vmem %s2375_s0, %s1411_s26 }
  0x18   : > { %v1699_v0 = vld [vmem:[%s1696_s29 + $0x20] sm:$0xff]  ;;  %v1702_v1 = vld [vmem:[%s1696_s29 + $0x18] sm:$0xff]  ;;  %v1712_v3 = vld [vmem:[%s1696_s29 + $0x8] sm:$0xff] }
  0x19   : > { %v1705_v2 = vld [vmem:[%s1696_s29] sm:$0xff]  ;;  %494 = vrot.lane.b32.xlu1 %v1699_v0, %s1620_s30  ;;  %492 = vrot.lane.b32.xlu0 %v1702_v1, %s1620_s30  ;;  %v260_v6 = vld [vmem:[%s1696_s29 + $0x10] sm:$0x3]  ;;  %v403_v7 = vrot.slane %v1712_v3, 2  ;;  %v314_v8 = vrot.slane %v1712_v3, 1  ;;  %v318_v15 = vrot.slane %v1702_v1, 1 }
  0x1a   : > { %v402_v4 = vrot.slane %v1705_v2, 2  ;;  %v313_v5 = vrot.slane %v1705_v2, 1  ;;  %v405_v9 = vrot.slane %v260_v6, 2  ;;  %v316_v10 = vrot.slane %v260_v6, 1  ;;  %v263_v17 = vld [vmem:[%s1696_s29 + $0x28] sm:$0x3]  ;;  %1519 = vmatpush3.bf16.msra.mxu0 %v1516_v42  ;;  %1528 = vmatpush3.bf16.msra.mxu1 %v1516_v42 }
  0x1b   : > { %v319_v16 = vrot.slane %v1699_v0, 1  ;;  %v407_v19 = vrot.slane %v1702_v1, 2  ;;  %v408_v20 = vrot.slane %v1699_v0, 2  ;;  %v321_v21 = vrot.slane %v263_v17, 1  ;;  %v1754_v31 = vld [vmem:[%s1696_s29 + $0x30] sm:$0xff]  ;;  %v1758_v33 = vld [vmem:[%s1696_s29 + $0x38] sm:$0xff]  ;;  %1478 = vmatprep.subr.mxu0 %v948_v44  ;;  %1524 = vmatprep.subr.mxu1 %v948_v44 }
  0x1c   : > { %v404_v11 = vsel %vm401_vm0, %v402_v4, %v403_v7  ;;  %v315_v12 = vsel %vm312_vm1, %v313_v5, %v314_v8  ;;  %v406_v13 = vsel %vm401_vm0, %v403_v7, %v405_v9  ;;  %v317_v14 = vsel %vm312_vm1, %v314_v8, %v316_v10  ;;  %v266_v43 = vld [vmem:[%s1696_s29 + $0x40] sm:$0x3]  ;;  %v1805_v52 = vld [vmem:[%s1696_s29 + $0x48] sm:$0xff]  ;;  %v1808_v53 = vld [vmem:[%s1696_s29 + $0x50] sm:$0xff] }
  0x1d   : > { %442 = vrot.lane.b32.xlu1 %v404_v11, %s1621_s5  ;;  %353 = vrot.lane.b32.xlu0 %v315_v12, %s1622_s6  ;;  %v320_v18 = vsel %vm312_vm1, %v318_v15, %v319_v16  ;;  %v409_v22 = vsel %vm401_vm0, %v407_v19, %v408_v20  ;;  %v322_v23 = vsel %vm312_vm1, %v319_v16, %v321_v21  ;;  %v410_v27 = vrot.slane %v263_v17, 2  ;;  %v269_v57 = vld [vmem:[%s1696_s29 + $0x58] sm:$0x3]  ;;  %v1840_v5 = vld [vmem:[%s1696_s29 + $0x60] sm:$0xff] }
  0x1e   : > { %v323_v37 = vrot.slane %v1754_v31, 1  ;;  %v324_v38 = vrot.slane %v1758_v33, 1  ;;  %v412_v45 = vrot.slane %v1754_v31, 2  ;;  %v413_v46 = vrot.slane %v1758_v33, 2  ;;  %1479 = vmatpush3.msra.mxu0 %v948_v44  ;;  %1529 = vmatpush3.msra.mxu1 %v948_v44  ;;  %v1843_v6 = vld [vmem:[%s1696_s29 + $0x68] sm:$0xff] }
  0x1f   : > { %v411_v32 = vsel %vm401_vm0, %v408_v20, %v410_v27  ;;  %v326_v47 = vrot.slane %v266_v43, 1  ;;  %v415_v50 = vrot.slane %v266_v43, 2  ;;  %v328_v54 = vrot.slane %v1805_v52, 1  ;;  %v272_v10 = vld [vmem:[%s1696_s29 + $0x70] sm:$0x3]  ;;  %v1877_v20 = vld [vmem:[%s1696_s29 + $0x78] sm:$0xff] }
  0x20   : > { %v325_v41 = vsel %vm312_vm1, %v323_v37, %v324_v38  ;;  %v414_v48 = vsel %vm401_vm0, %v412_v45, %v413_v46  ;;  %v329_v55 = vrot.slane %v1808_v53, 1  ;;  %v417_v58 = vrot.slane %v1805_v52, 2 }
  0x21   : > { %444 = vrot.lane.b32.xlu1 %v406_v13, %s1621_s5  ;;  %355 = vrot.lane.b32.xlu0 %v317_v14, %s1622_s6  ;;  %v327_v49 = vsel %vm312_vm1, %v324_v38, %v326_v47  ;;  %v416_v51 = vsel %vm401_vm0, %v413_v46, %v415_v50  ;;  %v418_v59 = vrot.slane %v1808_v53, 2  ;;  %v331_v60 = vrot.slane %v269_v57, 1 }
  0x22   : > { %v330_v56 = vsel %vm312_vm1, %v328_v54, %v329_v55  ;;  %v420_v63 = vrot.slane %v269_v57, 2  ;;  %v333_v7 = vrot.slane %v1840_v5, 1  ;;  %v334_v8 = vrot.slane %v1843_v6, 1 }
  0x23   : > { %v419_v61 = vsel %vm401_vm0, %v417_v58, %v418_v59  ;;  %v332_v62 = vsel %vm312_vm1, %v329_v55, %v331_v60  ;;  %v422_v11 = vrot.slane %v1840_v5, 2  ;;  %v423_v12 = vrot.slane %v1843_v6, 2  ;;  %v1927_v55 = vld [vmem:[%s1696_s29 + $0x90] sm:$0xff]  ;;  %v1935_v58 = vld [vmem:[%s1696_s29 + $0x98] sm:$0xff] }
  0x24   : > { %v421_v4 = vsel %vm401_vm0, %v418_v59, %v420_v63  ;;  %v335_v9 = vsel %vm312_vm1, %v333_v7, %v334_v8  ;;  %v336_v13 = vrot.slane %v272_v10, 1  ;;  %v425_v16 = vrot.slane %v272_v10, 2 }
  0x25   : > { %357 = vrot.lane.b32.xlu1 %v320_v18, %s1622_s6  ;;  %546 = vrot.lane.b32.xlu0 %v320_v18, %s1623_s7  ;;  %v424_v14 = vsel %vm401_vm0, %v422_v11, %v423_v12  ;;  %v338_v24 = vrot.slane %v1877_v20, 1  ;;  %v427_v34 = vrot.slane %v1877_v20, 2  ;;  %v343_v63 = vrot.slane %v1927_v55, 1 }
  0x26   : > { %v337_v15 = vsel %vm312_vm1, %v334_v8, %v336_v13  ;;  %v426_v17 = vsel %vm401_vm0, %v423_v12, %v425_v16 }
  0x29   : > { %599 = vrot.lane.b32.xlu1 %v409_v22, %s1624_s12  ;;  %548 = vrot.lane.b32.xlu0 %v322_v23, %s1623_s7 }
  0x2d   : > { %446 = vrot.lane.b32.xlu1 %v409_v22, %s1621_s5  ;;  %359 = vrot.lane.b32.xlu0 %v322_v23, %s1622_s6  ;;  %v1880_v23 = vld [vmem:[%s1696_s29 + $0x80] sm:$0xff] }
  0x2e   : > { %v339_v25 = vrot.slane %v1880_v23, 1  ;;  %v428_v35 = vrot.slane %v1880_v23, 2 }
  0x30   : > { %v340_v28 = vsel %vm312_vm1, %v338_v24, %v339_v25  ;;  %v429_v39 = vsel %vm401_vm0, %v427_v34, %v428_v35 }
  0x31   : > { %649 = vrot.lane.b32.xlu1 %v1754_v31, %s1625_s8  ;;  %601 = vrot.lane.b32.xlu0 %v411_v32, %s1624_s12 }
  0x35   : > { %496 = vrot.lane.b32.xlu1 %v1754_v31, %s1620_s30  ;;  %448 = vrot.lane.b32.xlu0 %v411_v32, %s1621_s5  ;;  %v275_v32 = vld [vmem:[%s1696_s29 + $0x88] sm:$0x3] }
  0x36   : > { %v341_v36 = vrot.slane %v275_v32, 1  ;;  %v430_v43 = vrot.slane %v275_v32, 2 }
  0x38   : > { %v342_v40 = vsel %vm312_vm1, %v339_v25, %v341_v36  ;;  %v431_v46 = vsel %vm401_vm0, %v428_v35, %v430_v43 }
  0x39   : > { %703 = vrot.lane.b32.xlu1 %v325_v41, %s1626_s14  ;;  %651 = vrot.lane.b32.xlu0 %v1758_v33, %s1625_s8 }
  0x3d   : > { %550 = vrot.lane.b32.xlu1 %v325_v41, %s1623_s7  ;;  %498 = vrot.lane.b32.xlu0 %v1758_v33, %s1620_s30 }
  0x41   : > { %756 = vrot.lane.b32.xlu1 %v414_v48, %s1627_s25  ;;  %705 = vrot.lane.b32.xlu0 %v327_v49, %s1626_s14 }
  0x45   : > { %552 = vrot.lane.b32.xlu1 %v327_v49, %s1623_s7  ;;  %361 = vrot.lane.b32.xlu0 %v325_v41, %s1622_s6 }
  0x49   : > { %758 = vrot.lane.b32.xlu1 %v416_v51, %s1627_s25  ;;  %603 = vrot.lane.b32.xlu0 %v414_v48, %s1624_s12 }
  0x4d   : > { %450 = vrot.lane.b32.xlu1 %v414_v48, %s1621_s5  ;;  %363 = vrot.lane.b32.xlu0 %v327_v49, %s1622_s6 }
  0x51   : > { %653 = vrot.lane.b32.xlu1 %v1805_v52, %s1625_s8  ;;  %605 = vrot.lane.b32.xlu0 %v416_v51, %s1624_s12 }
  0x55   : > { %500 = vrot.lane.b32.xlu1 %v1805_v52, %s1620_s30  ;;  %452 = vrot.lane.b32.xlu0 %v416_v51, %s1621_s5 }
  0x59   : > { %707 = vrot.lane.b32.xlu1 %v330_v56, %s1626_s14  ;;  %655 = vrot.lane.b32.xlu0 %v1808_v53, %s1625_s8 }
  0x5d   : > { %554 = vrot.lane.b32.xlu1 %v330_v56, %s1623_s7  ;;  %502 = vrot.lane.b32.xlu0 %v1808_v53, %s1620_s30 }
  0x61   : > { %760 = vrot.lane.b32.xlu1 %v419_v61, %s1627_s25  ;;  %709 = vrot.lane.b32.xlu0 %v332_v62, %s1626_s14 }
  0x65   : > { %556 = vrot.lane.b32.xlu1 %v332_v62, %s1623_s7  ;;  %365 = vrot.lane.b32.xlu0 %v330_v56, %s1622_s6 }
  0x69   : > { %762 = vrot.lane.b32.xlu1 %v421_v4, %s1627_s25  ;;  %607 = vrot.lane.b32.xlu0 %v419_v61, %s1624_s12 }
  0x6d   : > { %454 = vrot.lane.b32.xlu1 %v419_v61, %s1621_s5  ;;  %367 = vrot.lane.b32.xlu0 %v332_v62, %s1622_s6 }
  0x71   : > { %657 = vrot.lane.b32.xlu1 %v1840_v5, %s1625_s8  ;;  %609 = vrot.lane.b32.xlu0 %v421_v4, %s1624_s12 }
  0x75   : > { %504 = vrot.lane.b32.xlu1 %v1840_v5, %s1620_s30  ;;  %456 = vrot.lane.b32.xlu0 %v421_v4, %s1621_s5  ;;  %v344_v4 = vrot.slane %v1935_v58, 1 }
  0x77   : > { %v345_v11 = vsel %vm312_vm1, %v343_v63, %v344_v4 }
  0x79   : > { %711 = vrot.lane.b32.xlu1 %v335_v9, %s1626_s14  ;;  %659 = vrot.lane.b32.xlu0 %v1843_v6, %s1625_s8 }
  0x7d   : > { %558 = vrot.lane.b32.xlu1 %v335_v9, %s1623_s7  ;;  %506 = vrot.lane.b32.xlu0 %v1843_v6, %s1620_s30 }
  0x81   : > { %764 = vrot.lane.b32.xlu1 %v424_v14, %s1627_s25  ;;  %713 = vrot.lane.b32.xlu0 %v337_v15, %s1626_s14 }
  0x85   : > { %560 = vrot.lane.b32.xlu1 %v337_v15, %s1623_s7  ;;  %369 = vrot.lane.b32.xlu0 %v335_v9, %s1622_s6 }
  0x89   : > { %766 = vrot.lane.b32.xlu1 %v426_v17, %s1627_s25  ;;  %611 = vrot.lane.b32.xlu0 %v424_v14, %s1624_s12 }
  0x8b   : > { %v1872_v18 = vpop.permute.xlu1 %494  ;;  %v493_v19 = vpop.permute.xlu0 %492 }
  0x8d   : > { %458 = vrot.lane.b32.xlu1 %v424_v14, %s1621_s5  ;;  %371 = vrot.lane.b32.xlu0 %v337_v15, %s1622_s6  ;;  %v278_v15 = vld [vmem:[%s1696_s29 + $0xa0] sm:$0x3] }
  0x8e   : > { %v435_v35 = vrot.slane %v278_v15, 2 }
  0x8f   : > { %v443_v21 = vpop.permute.xlu1 %442  ;;  %v354_v22 = vpop.permute.xlu0 %353 }
  0x90   : > { %v805_v49 = vsel %vm804_vm2, %v1705_v2, %v354_v22  ;;  %v346_v22 = vrot.slane %v278_v15, 1 }
  0x91   : > { %661 = vrot.lane.b32.xlu1 %v1877_v20, %s1625_s8  ;;  %613 = vrot.lane.b32.xlu0 %v426_v17, %s1624_s12  ;;  %v822_v54 = vsel %vm821_vm3, %v805_v49, %v443_v21  ;;  %v432_v21 = vrot.slane %v1927_v55, 2  ;;  %v2002_v49 = vld [vmem:[%s1696_s29 + $0xa8] sm:$0xff] }
  0x92   : > { %v839_v2 = vsel %vm838_vm4, %v822_v54, %v493_v19 }
  0x93   : > { %v1887_v26 = vpop.permute.xlu1 %444  ;;  %v356_v27 = vpop.permute.xlu0 %355 }
  0x94   : > { %v806_v60 = vsel %vm804_vm2, %v1712_v3, %v356_v27 }
  0x95   : > { %508 = vrot.lane.b32.xlu1 %v1877_v20, %s1620_s30  ;;  %460 = vrot.lane.b32.xlu0 %v426_v17, %s1621_s5  ;;  %v823_v3 = vsel %vm821_vm3, %v806_v60, %v1887_v26 }
  0x96   : > { %v840_v12 = vsel %vm838_vm4, %v823_v3, %v1872_v18  ;;  %v433_v18 = vrot.slane %v1935_v58, 2 }
  0x97   : > { %v1893_v29 = vpop.permute.xlu1 %357  ;;  %v547_v30 = vpop.permute.xlu0 %546 }
  0x98   : > { %v856_v59 = vsel %vm855_vm5, %v839_v2, %v547_v30  ;;  %v347_v30 = vsel %vm312_vm1, %v344_v4, %v346_v22  ;;  %v2011_v2 = vld [vmem:[%s1696_s29 + $0xb0] sm:$0xff] }
  0x99   : > { %715 = vrot.lane.b32.xlu1 %v340_v28, %s1626_s14  ;;  %663 = vrot.lane.b32.xlu0 %v1880_v23, %s1625_s8 }
  0x9b   : > { %v600_v37 = vpop.permute.xlu1 %599  ;;  %v549_v38 = vpop.permute.xlu0 %548 }
  0x9c   : > { %v873_v61 = vsel %vm872_vm6, %v856_v59, %v600_v37  ;;  %v857_v16 = vsel %vm855_vm5, %v840_v12, %v549_v38  ;;  %v436_v38 = vsel %vm401_vm0, %v433_v18, %v435_v35  ;;  %v349_v59 = vrot.slane %v2011_v2, 1 }
  0x9d   : > { %562 = vrot.lane.b32.xlu1 %v340_v28, %s1623_s7  ;;  %510 = vrot.lane.b32.xlu0 %v1880_v23, %s1620_s30 }
  0x9f   : > { %v1906_v41 = vpop.permute.xlu1 %446  ;;  %v1908_v42 = vpop.permute.xlu0 %359 }
  0xa0   : > { %v808_v63 = vsel %vm804_vm2, %v1699_v0, %v1908_v42  ;;  %v281_v0 = vld [vmem:[%s1696_s29 + $0xb8] sm:$0x3] }
  0xa1   : > { %768 = vrot.lane.b32.xlu1 %v429_v39, %s1627_s25  ;;  %717 = vrot.lane.b32.xlu0 %v342_v40, %s1626_s14  ;;  %v351_v12 = vrot.slane %v281_v0, 1 }
  0xa3   : > { %v650_v44 = vpop.permute.xlu1 %649  ;;  %v602_v45 = vpop.permute.xlu0 %601 }
  0xa4   : > { %v890_v62 = vsel %vm889_vm7, %v873_v61, %v650_v44  ;;  %v874_v17 = vsel %vm872_vm6, %v857_v16, %v602_v45  ;;  %v807_v45 = vsel %vm804_vm2, %v1702_v1, %v1893_v29 }
  0xa5   : > { %564 = vrot.lane.b32.xlu1 %v342_v40, %s1623_s7  ;;  %373 = vrot.lane.b32.xlu0 %v340_v28, %s1622_s6  ;;  %v434_v28 = vsel %vm401_vm0, %v432_v21, %v433_v18  ;;  %v352_v21 = vsel %vm312_vm1, %v349_v59, %v351_v12 }
  0xa7   : > { %v1915_v47 = vpop.permute.xlu1 %496  ;;  %v1917_v48 = vpop.permute.xlu0 %448 }
  0xa8   : > { %v825_v4 = vsel %vm821_vm3, %v808_v63, %v1917_v48 }
  0xa9   : > { %770 = vrot.lane.b32.xlu1 %v431_v46, %s1627_s25  ;;  %615 = vrot.lane.b32.xlu0 %v429_v39, %s1624_s12 }
  0xab   : > { %v704_v50 = vpop.permute.xlu1 %703  ;;  %v652_v51 = vpop.permute.xlu0 %651 }
  0xac   : > { %v907_v7 = vsel %vm906_vm8, %v890_v62, %v704_v50  ;;  %v891_v19 = vsel %vm889_vm7, %v874_v17, %v652_v51 }
  0xad   : > { %462 = vrot.lane.b32.xlu1 %v429_v39, %s1621_s5  ;;  %375 = vrot.lane.b32.xlu0 %v342_v40, %s1622_s6 }
  0xaf   : > { %v1930_v56 = vpop.permute.xlu1 %550  ;;  %v1932_v57 = vpop.permute.xlu0 %498 }
  0xb1   : > { %665 = vrot.lane.b32.xlu1 %v1927_v55, %s1625_s8  ;;  %617 = vrot.lane.b32.xlu0 %v431_v46, %s1624_s12 }
  0xb3   : > { %v757_v8 = vpop.permute.xlu1 %756  ;;  %v706_v9 = vpop.permute.xlu0 %705 }
  0xb4   : > { %v924_v10 = vsel %vm923_vm9, %v907_v7, %v757_v8  ;;  %v908_v24 = vsel %vm906_vm8, %v891_v19, %v706_v9  ;;  %v842_v8 = vsel %vm838_vm4, %v825_v4, %v1932_v57  ;;  %v438_v57 = vrot.slane %v2011_v2, 2  ;;  %v284_v4 = vld [vmem:[%s1696_s29 + $0xd0] sm:$0x3] }
  0xb5   : > { %512 = vrot.lane.b32.xlu1 %v1927_v55, %s1620_s30  ;;  %464 = vrot.lane.b32.xlu0 %v431_v46, %s1621_s5  ;;  %v824_v46 = vsel %vm821_vm3, %v807_v45, %v1906_v41 }
  0xb6   : > { %1480 = vmatprep.mubr.msk.f32.mxu0 %vm956_vm10, %v924_v10  ;;  %v841_v50 = vsel %vm838_vm4, %v824_v46, %v1915_v47  ;;  %v348_v47 = vrot.slane %v2002_v49, 1 }
  0xb7   : > { %v1958_v13 = vpop.permute.xlu1 %552  ;;  %v1960_v14 = vpop.permute.xlu0 %361  ;;  %v858_v1 = vsel %vm855_vm5, %v841_v50, %v1930_v56  ;;  %v283_v50 = vld [vmem:[%s1696_s29 + $0xc8] sm:$0xff] }
  0xb8   : > { %v350_v7 = vsel %vm312_vm1, %v348_v47, %v349_v59  ;;  %v859_v42 = vsel %vm855_vm5, %v842_v8, %v1958_v13  ;;  %v595_v8 = vrot.slane %v283_v50, 2 }
  0xb9   : > { %719 = vrot.lane.b32.xlu1 %v345_v11, %s1626_s14  ;;  %667 = vrot.lane.b32.xlu0 %v1935_v58, %s1625_s8 }
  0xbb   : > { %v759_v25 = vpop.permute.xlu1 %758  ;;  %v604_v26 = vpop.permute.xlu0 %603 }
  0xbc   : > { %v925_v27 = vsel %vm923_vm9, %v908_v24, %v759_v25  ;;  %v875_v29 = vsel %vm872_vm6, %v858_v1, %v604_v26  ;;  %v440_v24 = vrot.slane %v281_v0, 2  ;;  %v544_v0 = vrot.slane %v284_v4, 1 }
  0xbd   : > { %566 = vrot.lane.b32.xlu1 %v345_v11, %s1623_s7  ;;  %514 = vrot.lane.b32.xlu0 %v1935_v58, %s1620_s30 }
  0xbe   : > { %1481 = vmatmul.mubr.msk.f32.vlgmr.msra.gmra.mrb[0].mxu0 %vm956_vm10, %v925_v27  ;;  %v441_v27 = vsel %vm401_vm0, %v438_v57, %v440_v24  ;;  %v286_v24 = vld [vmem:[%s1696_s29 + $0xe0] sm:$0xff] }
  0xbf   : > { %v1979_v32 = vpop.permute.xlu1 %450  ;;  %v1981_v34 = vpop.permute.xlu0 %363 }
  0xc1   : > { %772 = vrot.lane.b32.xlu1 %v434_v28, %s1627_s25  ;;  %721 = vrot.lane.b32.xlu0 %v347_v30, %s1626_s14 }
  0xc3   : > { %v654_v36 = vpop.permute.xlu1 %653  ;;  %v606_v37 = vpop.permute.xlu0 %605 }
  0xc4   : > { %v892_v41 = vsel %vm889_vm7, %v875_v29, %v654_v36  ;;  %v876_v10 = vsel %vm872_vm6, %v859_v42, %v606_v37  ;;  %v809_v37 = vsel %vm804_vm2, %v1754_v31, %v1960_v14  ;;  %v542_v29 = vrot.slane %v283_v50, 1 }
  0xc5   : > { %568 = vrot.lane.b32.xlu1 %v347_v30, %s1623_s7  ;;  %377 = vrot.lane.b32.xlu0 %v345_v11, %s1622_s6  ;;  %v437_v11 = vrot.slane %v2002_v49, 2 }
  0xc7   : > { %v1988_v39 = vpop.permute.xlu1 %500  ;;  %v1990_v40 = vpop.permute.xlu0 %452  ;;  %v439_v19 = vsel %vm401_vm0, %v437_v11, %v438_v57  ;;  %v545_v11 = vsel %vm312_vm1, %v542_v29, %v544_v0 }
  0xc9   : > { %774 = vrot.lane.b32.xlu1 %v436_v38, %s1627_s25  ;;  %619 = vrot.lane.b32.xlu0 %v434_v28, %s1624_s12 }
  0xcb   : > { %v708_v43 = vpop.permute.xlu1 %707  ;;  %v656_v44 = vpop.permute.xlu0 %655 }
  0xcc   : > { %v909_v60 = vsel %vm906_vm8, %v892_v41, %v708_v43  ;;  %v893_v48 = vsel %vm889_vm7, %v876_v10, %v656_v44  ;;  %v282_v43 = vld [vmem:[%s1696_s29 + $0xc0] sm:$0xff] }
  0xcd   : > { %466 = vrot.lane.b32.xlu1 %v434_v28, %s1621_s5  ;;  %379 = vrot.lane.b32.xlu0 %v347_v30, %s1622_s6 }
  0xcf   : > { %v2006_v51 = vpop.permute.xlu1 %554  ;;  %v2008_v54 = vpop.permute.xlu0 %502 }
  0xd1   : > { %669 = vrot.lane.b32.xlu1 %v2002_v49, %s1625_s8  ;;  %621 = vrot.lane.b32.xlu0 %v436_v38, %s1624_s12 }
  0xd3   : > { %v761_v61 = vpop.permute.xlu1 %760  ;;  %v710_v62 = vpop.permute.xlu0 %709 }
  0xd4   : > { %v926_v56 = vsel %vm923_vm9, %v909_v60, %v761_v61  ;;  %v910_v15 = vsel %vm906_vm8, %v893_v48, %v710_v62 }
  0xd5   : > { %516 = vrot.lane.b32.xlu1 %v2002_v49, %s1620_s30  ;;  %468 = vrot.lane.b32.xlu0 %v436_v38, %s1621_s5  ;;  %v826_v38 = vsel %vm821_vm3, %v809_v37, %v1979_v32  ;;  %v541_v32 = vrot.slane %v282_v43, 1 }
  0xd6   : > { %1483 = vmatprep.mubr.msk.f32.mxu0 %vm956_vm10, %v926_v56  ;;  %v843_v44 = vsel %vm838_vm4, %v826_v38, %v1988_v39 }
  0xd7   : > { %v2036_v9 = vpop.permute.xlu1 %556  ;;  %v2038_v3 = vpop.permute.xlu0 %365  ;;  %v860_v1 = vsel %vm855_vm5, %v843_v44, %v2006_v51  ;;  %v810_v51 = vsel %vm804_vm2, %v1758_v33, %v1981_v34  ;;  %v543_v61 = vsel %vm312_vm1, %v541_v32, %v542_v29  ;;  %v752_v44 = vrot.slane %v286_v24, 2 }
  0xd8   : > { %v827_v60 = vsel %vm821_vm3, %v810_v51, %v1990_v40 }
  0xd9   : > { %723 = vrot.lane.b32.xlu1 %v350_v7, %s1626_s14  ;;  %671 = vrot.lane.b32.xlu0 %v2011_v2, %s1625_s8  ;;  %v844_v62 = vsel %vm838_vm4, %v827_v60, %v2008_v54 }
  0xda   : > { %v861_v33 = vsel %vm855_vm5, %v844_v62, %v2036_v9 }
  0xdb   : > { %v763_v16 = vpop.permute.xlu1 %762  ;;  %v608_v17 = vpop.permute.xlu0 %607 }
  0xdc   : > { %v927_v13 = vsel %vm923_vm9, %v910_v15, %v763_v16  ;;  %v877_v31 = vsel %vm872_vm6, %v860_v1, %v608_v17  ;;  %v597_v15 = vrot.slane %v284_v4, 2 }
  0xdd   : > { %570 = vrot.lane.b32.xlu1 %v350_v7, %s1623_s7  ;;  %518 = vrot.lane.b32.xlu0 %v2011_v2, %s1620_s30 }
  0xde   : > { %1484 = vmatmul.mubr.msk.f32.gmra.mrb[2].mxu0 %vm956_vm10, %v927_v13  ;;  %v598_v13 = vsel %vm401_vm0, %v595_v8, %v597_v15 }
  0xdf   : > { %v2058_v18 = vpop.permute.xlu1 %454  ;;  %v2060_v22 = vpop.permute.xlu0 %367 }
  0xe1   : > { %776 = vrot.lane.b32.xlu1 %v439_v19, %s1627_s25  ;;  %725 = vrot.lane.b32.xlu0 %v352_v21, %s1626_s14 }
  0xe3   : > { %v658_v25 = vpop.permute.xlu1 %657  ;;  %v610_v26 = vpop.permute.xlu0 %609 }
  0xe4   : > { %v894_v14 = vsel %vm889_vm7, %v877_v31, %v658_v25  ;;  %v878_v34 = vsel %vm872_vm6, %v861_v33, %v610_v26  ;;  %v285_v25 = vld [vmem:[%s1696_s29 + $0xd8] sm:$0xff]  ;;  %v287_v26 = vld [vmem:[%s1696_s29 + $0xe8] sm:$0x3]  ;;  %s1412_s29 = sshll.u32 %s1602_s15, 3 }
  0xe5   : > { %572 = vrot.lane.b32.xlu1 %v352_v21, %s1623_s7  ;;  %381 = vrot.lane.b32.xlu0 %v350_v7, %s1622_s6  ;;  %v594_v7 = vrot.slane %v282_v43, 2  ;;  %v754_v32 = vrot.slane %v287_v26, 2  ;;  %p242_p7 = scmp.lt.s32.totalorder %s1412_s29, 15 }
  0xe7   : > { %v2067_v28 = vpop.permute.xlu1 %504  ;;  %v2069_v30 = vpop.permute.xlu0 %456  ;;  %v596_v9 = vsel %vm401_vm0, %v594_v7, %v595_v8  ;;  %s2393_s29 = smov (!%p242_p7, %s1412_s29), 15 }
  0xe8   : > { %s1413_s15 = sshll.u32 %s2393_s29, 1 }
  0xe9   : > { %778 = vrot.lane.b32.xlu1 %v441_v27, %s1627_s25  ;;  %623 = vrot.lane.b32.xlu0 %v439_v19, %s1624_s12 }
  0xeb   : > { %v712_v35 = vpop.permute.xlu1 %711  ;;  %v660_v36 = vpop.permute.xlu0 %659 }
  0xec   : > { %v911_v39 = vsel %vm906_vm8, %v894_v14, %v712_v35  ;;  %v895_v40 = vsel %vm889_vm7, %v878_v34, %v660_v36  ;;  %v698_v35 = vrot.slane %v285_v25, 1  ;;  %v701_v36 = vrot.slane %v287_v26, 1 }
  0xed   : > { %470 = vrot.lane.b32.xlu1 %v439_v19, %s1621_s5  ;;  %383 = vrot.lane.b32.xlu0 %v352_v21, %s1622_s6 }
  0xef   : > { %v2083_v45 = vpop.permute.xlu1 %558  ;;  %v2085_v46 = vpop.permute.xlu0 %506 }
  0xf1   : > { %673 = vrot.lane.b32.xlu1 %v282_v43, %s1625_s8  ;;  %625 = vrot.lane.b32.xlu0 %v441_v27, %s1624_s12 }
  0xf3   : > { %v765_v41 = vpop.permute.xlu1 %764  ;;  %v714_v47 = vpop.permute.xlu0 %713 }
  0xf4   : > { %v928_v59 = vsel %vm923_vm9, %v911_v39, %v765_v41  ;;  %v912_v54 = vsel %vm906_vm8, %v895_v40, %v714_v47  ;;  %v755_v47 = vsel %vm401_vm0, %v752_v44, %v754_v32 }
  0xf5   : > { %520 = vrot.lane.b32.xlu1 %v282_v43, %s1620_s30  ;;  %472 = vrot.lane.b32.xlu0 %v441_v27, %s1621_s5  ;;  %v699_v27 = vrot.slane %v286_v24, 1  ;;  %v811_v43 = vsel %vm804_vm2, %v1805_v52, %v2038_v3 }
  0xf6   : > { %1486 = vmatprep.mubr.msk.f32.mxu0 %vm956_vm10, %v928_v59  ;;  %v828_v1 = vsel %vm821_vm3, %v811_v43, %v2058_v18 }
  0xf7   : > { %v2107_v56 = vpop.permute.xlu1 %560  ;;  %v2109_v63 = vpop.permute.xlu0 %369  ;;  %v702_v31 = vsel %vm312_vm1, %v699_v27, %v701_v36  ;;  %v700_v14 = vsel %vm312_vm1, %v698_v35, %v699_v27  ;;  %v845_v29 = vsel %vm838_vm4, %v828_v1, %v2067_v28 }
  0xf8   : > { %v862_v52 = vsel %vm855_vm5, %v845_v29, %v2083_v45  ;;  %v812_v45 = vsel %vm804_vm2, %v1808_v53, %v2060_v22  ;;  %v813_v15 = vsel %vm804_vm2, %v1840_v5, %v2109_v63 }
  0xf9   : > { %727 = vrot.lane.b32.xlu1 %v543_v61, %s1626_s14  ;;  %675 = vrot.lane.b32.xlu0 %v283_v50, %s1625_s8  ;;  %v829_v62 = vsel %vm821_vm3, %v812_v45, %v2069_v30 }
  0xfa   : > { %v846_v4 = vsel %vm838_vm4, %v829_v62, %v2085_v46 }
  0xfb   : > { %v767_v42 = vpop.permute.xlu1 %766  ;;  %v612_v10 = vpop.permute.xlu0 %611  ;;  %v863_v40 = vsel %vm855_vm5, %v846_v4, %v2107_v56 }
  0xfc   : > { %v929_v48 = vsel %vm923_vm9, %v912_v54, %v767_v42  ;;  %v879_v3 = vsel %vm872_vm6, %v862_v52, %v612_v10 }
  0xfd   : > { %574 = vrot.lane.b32.xlu1 %v543_v61, %s1623_s7  ;;  %522 = vrot.lane.b32.xlu0 %v283_v50, %s1620_s30  ;;  %v751_v50 = vrot.slane %v285_v25, 2  ;;  %s1414_s30 = sshll.u32 %s2391_s16, 5 }
  0xfe   : > { %1487 = vmatmul.mubr.msk.f32.gmra.mrb[4].mxu0 %vm956_vm10, %v929_v48  ;;  %s246_s5 = sadd.s32 %s1414_s30, %s1413_s15 }
  0xff   : > { %v2125_v57 = vpop.permute.xlu1 %458  ;;  %v2127_v12 = vpop.permute.xlu0 %371  ;;  %v753_v59 = vsel %vm401_vm0, %v751_v50, %v752_v44  ;;  %s1415_s6 = sshll.u32 %s246_s5, 3 }
 0x100   : > { %v814_v5 = vsel %vm804_vm2, %v1843_v6, %v2127_v12  ;;  %s2273_s28 = scalar_lea.vmem %s2378_s3, %s1415_s6 }
 0x101   : > { %780 = vrot.lane.b32.xlu1 %v596_v9, %s1627_s25  ;;  %729 = vrot.lane.b32.xlu0 %v545_v11, %s1626_s14 }
 0x103   : > { %v662_v16 = vpop.permute.xlu1 %661  ;;  %v614_v17 = vpop.permute.xlu0 %613 }
 0x104   : > { %v896_v18 = vsel %vm889_vm7, %v879_v3, %v662_v16  ;;  %v880_v7 = vsel %vm872_vm6, %v863_v40, %v614_v17  ;;  %v830_v16 = vsel %vm821_vm3, %v813_v15, %v2125_v57 }
 0x105   : > { %627 = vrot.lane.b32.xlu1 %v596_v9, %s1624_s12  ;;  %576 = vrot.lane.b32.xlu0 %v545_v11, %s1623_s7 }
 0x107   : > { %v509_v19 = vpop.permute.xlu1 %508  ;;  %v2134_v21 = vpop.permute.xlu0 %460 }
 0x108   : > { %v847_v17 = vsel %vm838_vm4, %v830_v16, %v509_v19  ;;  %v831_v63 = vsel %vm821_vm3, %v814_v5, %v2134_v21 }
 0x109   : > { %629 = vrot.lane.b32.xlu1 %v598_v13, %s1624_s12  ;;  %782 = vrot.lane.b32.xlu0 %v598_v13, %s1627_s25 }
 0x10b   : > { %v716_v37 = vpop.permute.xlu1 %715  ;;  %v664_v38 = vpop.permute.xlu0 %663 }
 0x10c   : > { %v913_v51 = vsel %vm906_vm8, %v896_v18, %v716_v37  ;;  %v897_v53 = vsel %vm889_vm7, %v880_v7, %v664_v38 }
 0x10d   : > { %679 = vrot.lane.b32.xlu1 %v286_v24, %s1625_s8  ;;  %677 = vrot.lane.b32.xlu0 %v285_v25, %s1625_s8  ;;  %s1416_s8 = sshll.u32 %s2391_s16, 1 }
 0x10e   : > { %s255_s9 = sadd.s32 %s1416_s8, %s1689_s22 }
 0x10f   : > { %v563_v39 = vpop.permute.xlu1 %562  ;;  %v511_v41 = vpop.permute.xlu0 %510  ;;  %s1417_s10 = sshll.u32 %s255_s9, 1 }
 0x110   : > { %v864_v25 = vsel %vm855_vm5, %v847_v17, %v563_v39  ;;  %v848_v57 = vsel %vm838_vm4, %v831_v63, %v511_v41 }
 0x111   : > { %733 = vrot.lane.b32.xlu1 %v702_v31, %s1626_s14  ;;  %731 = vrot.lane.b32.xlu0 %v700_v14, %s1626_s14  ;;  %s257_s14 = scalar_lea.vmem %s2379_s4, %s1417_s10 }
 0x113   : > { %v769_v28 = vpop.permute.xlu1 %768  ;;  %v718_v60 = vpop.permute.xlu0 %717 }
 0x114   : > { %v930_v61 = vsel %vm923_vm9, %v913_v51, %v769_v28  ;;  %v914_v22 = vsel %vm906_vm8, %v897_v53, %v718_v60 }
 0x115   : > { %786 = vrot.lane.b32.xlu1 %v755_v47, %s1627_s25  ;;  %784 = vrot.lane.b32.xlu0 %v753_v59, %s1627_s25 }
 0x116   : > { %1489 = vmatprep.mubr.msk.f32.mxu0 %vm956_vm10, %v930_v61 }
 0x117   : > { %v565_v33 = vpop.permute.xlu1 %564  ;;  %v374_v34 = vpop.permute.xlu0 %373 }
 0x118   : > { %v865_v44 = vsel %vm855_vm5, %v848_v57, %v565_v33  ;;  %v815_v47 = vsel %vm804_vm2, %v1877_v20, %v374_v34 }
 0x11b   : > { %v771_v8 = vpop.permute.xlu1 %770  ;;  %v616_v0 = vpop.permute.xlu0 %615 }
 0x11c   : > { %v931_v30 = vsel %vm923_vm9, %v914_v22, %v771_v8  ;;  %v881_v26 = vsel %vm872_vm6, %v864_v25, %v616_v0 }
 0x11d   : > { %1490 = vmatmul.mubr.msk.f32.gmra.mrb[6].mxu0 %vm956_vm10, %v931_v30 }
 0x11f   : > { %v463_v54 = vpop.permute.xlu1 %462  ;;  %v376_v42 = vpop.permute.xlu0 %375 }
 0x120   : > { %v832_v59 = vsel %vm821_vm3, %v815_v47, %v463_v54  ;;  %v816_v20 = vsel %vm804_vm2, %v1880_v23, %v376_v42 }
 0x123   : > { %v666_v46 = vpop.permute.xlu1 %665  ;;  %v618_v10 = vpop.permute.xlu0 %617 }
 0x124   : > { %v898_v27 = vsel %vm889_vm7, %v881_v26, %v666_v46  ;;  %v882_v50 = vsel %vm872_vm6, %v865_v44, %v618_v10 }
 0x127   : > { %v513_v48 = vpop.permute.xlu1 %512  ;;  %v465_v9 = vpop.permute.xlu0 %464 }
 0x128   : > { %v849_v51 = vsel %vm838_vm4, %v832_v59, %v513_v48  ;;  %v833_v34 = vsel %vm821_vm3, %v816_v20, %v465_v9 }
 0x12b   : > { %v720_v11 = vpop.permute.xlu1 %719  ;;  %v668_v56 = vpop.permute.xlu0 %667 }
 0x12c   : > { %v915_v35 = vsel %vm906_vm8, %v898_v27, %v720_v11  ;;  %v899_v1 = vsel %vm889_vm7, %v882_v50, %v668_v56 }
 0x12f   : > { %v567_v13 = vpop.permute.xlu1 %566  ;;  %v515_v24 = vpop.permute.xlu0 %514 }
 0x130   : > { %v866_v61 = vsel %vm855_vm5, %v849_v51, %v567_v13  ;;  %v850_v53 = vsel %vm838_vm4, %v833_v34, %v515_v24 }
 0x133   : > { %v773_v36 = vpop.permute.xlu1 %772  ;;  %v722_v37 = vpop.permute.xlu0 %721 }
 0x134   : > { %v932_v38 = vsel %vm923_vm9, %v915_v35, %v773_v36  ;;  %v916_v31 = vsel %vm906_vm8, %v899_v1, %v722_v37 }
 0x135   : > { %1492 = vmatprep.mubr.msk.f32.mxu1 %vm956_vm10, %v932_v38 }
 0x137   : > { %v569_v19 = vpop.permute.xlu1 %568  ;;  %v378_v43 = vpop.permute.xlu0 %377 }
 0x138   : > { %v867_v0 = vsel %vm855_vm5, %v850_v53, %v569_v19  ;;  %v817_v24 = vsel %vm804_vm2, %v1927_v55, %v378_v43  ;;  %v2268_v53 = vld [vmem:[%s2377_s2] ss:$0 sm:$0xff] }
 0x13b   : > { %v775_v14 = vpop.permute.xlu1 %774  ;;  %v620_v32 = vpop.permute.xlu0 %619 }
 0x13c   : > { %v933_v6 = vsel %vm923_vm9, %v916_v31, %v775_v14  ;;  %v883_v45 = vsel %vm872_vm6, %v866_v61, %v620_v32 }
 0x13d   : > { %1493 = vmatmul.mubr.msk.f32.vlgmr.msra.gmra.mrb[0].mxu1 %vm956_vm10, %v933_v6 }
 0x13f   : > { %v467_v12 = vpop.permute.xlu1 %466  ;;  %v380_v21 = vpop.permute.xlu0 %379 }
 0x140   : > { %v834_v25 = vsel %vm821_vm3, %v817_v24, %v467_v12  ;;  %v818_v55 = vsel %vm804_vm2, %v1935_v58, %v380_v21 }
 0x143   : > { %v670_v29 = vpop.permute.xlu1 %669  ;;  %v622_v39 = vpop.permute.xlu0 %621 }
 0x144   : > { %v900_v62 = vsel %vm889_vm7, %v883_v45, %v670_v29  ;;  %v884_v30 = vsel %vm872_vm6, %v867_v0, %v622_v39 }
 0x147   : > { %v517_v41 = vpop.permute.xlu1 %516  ;;  %v469_v52 = vpop.permute.xlu0 %468 }
 0x148   : > { %v851_v26 = vsel %vm838_vm4, %v834_v25, %v517_v41  ;;  %v835_v43 = vsel %vm821_vm3, %v818_v55, %v469_v52 }
 0x14b   : > { %v724_v3 = vpop.permute.xlu1 %723  ;;  %v672_v18 = vpop.permute.xlu0 %671 }
 0x14c   : > { %v917_v4 = vsel %vm906_vm8, %v900_v62, %v724_v3  ;;  %v901_v54 = vsel %vm889_vm7, %v884_v30, %v672_v18 }
 0x14f   : > { %v571_v28 = vpop.permute.xlu1 %570  ;;  %v519_v60 = vpop.permute.xlu0 %518 }
 0x150   : > { %v868_v36 = vsel %vm855_vm5, %v851_v26, %v571_v28  ;;  %v852_v44 = vsel %vm838_vm4, %v835_v43, %v519_v60 }
 0x153   : > { %v777_v33 = vpop.permute.xlu1 %776  ;;  %v726_v40 = vpop.permute.xlu0 %725 }
 0x154   : > { %v934_v7 = vsel %vm923_vm9, %v917_v4, %v777_v33  ;;  %v918_v46 = vsel %vm906_vm8, %v901_v54, %v726_v40 }
 0x155   : > { %1495 = vmatprep.mubr.msk.f32.mxu1 %vm956_vm10, %v934_v7 }
 0x157   : > { %v573_v22 = vpop.permute.xlu1 %572  ;;  %v382_v8 = vpop.permute.xlu0 %381 }
 0x158   : > { %v869_v31 = vsel %vm855_vm5, %v852_v44, %v573_v22  ;;  %v819_v41 = vsel %vm804_vm2, %v2002_v49, %v382_v8 }
 0x15b   : > { %v779_v10 = vpop.permute.xlu1 %778  ;;  %v624_v48 = vpop.permute.xlu0 %623 }
 0x15c   : > { %v935_v23 = vsel %vm923_vm9, %v918_v46, %v779_v10  ;;  %v885_v37 = vsel %vm872_vm6, %v868_v36, %v624_v48 }
 0x15d   : > { %1496 = vmatmul.mubr.msk.f32.gmra.mrb[2].mxu1 %vm956_vm10, %v935_v23 }
 0x15f   : > { %v471_v42 = vpop.permute.xlu1 %470  ;;  %v384_v9 = vpop.permute.xlu0 %383 }
 0x160   : > { %v820_v52 = vsel %vm804_vm2, %v2011_v2, %v384_v9  ;;  %v836_v3 = vsel %vm821_vm3, %v819_v41, %v471_v42 }
 0x163   : > { %v674_v11 = vpop.permute.xlu1 %673  ;;  %v626_v56 = vpop.permute.xlu0 %625 }
 0x164   : > { %v902_v38 = vsel %vm889_vm7, %v885_v37, %v674_v11  ;;  %v886_v14 = vsel %vm872_vm6, %v869_v31, %v626_v56 }
 0x167   : > { %v521_v15 = vpop.permute.xlu1 %520  ;;  %v473_v16 = vpop.permute.xlu0 %472 }
 0x168   : > { %v837_v18 = vsel %vm821_vm3, %v820_v52, %v473_v16  ;;  %v853_v47 = vsel %vm838_vm4, %v836_v3, %v521_v15 }
 0x16b   : > { %v728_v17 = vpop.permute.xlu1 %727  ;;  %v676_v13 = vpop.permute.xlu0 %675 }
 0x16c   : > { %v919_v5 = vsel %vm906_vm8, %v902_v38, %v728_v17  ;;  %v903_v32 = vsel %vm889_vm7, %v886_v14, %v676_v13 }
 0x16f   : > { %v575_v27 = vpop.permute.xlu1 %574  ;;  %v523_v35 = vpop.permute.xlu0 %522 }
 0x170   : > { %v854_v59 = vsel %vm838_vm4, %v837_v18, %v523_v35  ;;  %v870_v60 = vsel %vm855_vm5, %v853_v47, %v575_v27 }
 0x173   : > { %v781_v63 = vpop.permute.xlu1 %780  ;;  %v730_v57 = vpop.permute.xlu0 %729 }
 0x174   : > { %v936_v19 = vsel %vm923_vm9, %v919_v5, %v781_v63  ;;  %v920_v6 = vsel %vm906_vm8, %v903_v32, %v730_v57 }
 0x175   : > { %1498 = vmatprep.mubr.msk.f32.mxu1 %vm956_vm10, %v936_v19 }
 0x177   : > { %v628_v50 = vpop.permute.xlu1 %627  ;;  %v577_v1 = vpop.permute.xlu0 %576 }
 0x178   : > { %v871_v61 = vsel %vm855_vm5, %v854_v59, %v577_v1  ;;  %v887_v49 = vsel %vm872_vm6, %v870_v60, %v628_v50 }
 0x17b   : > { %v630_v12 = vpop.permute.xlu1 %629  ;;  %v783_v29 = vpop.permute.xlu0 %782 }
 0x17c   : > { %v937_v58 = vsel %vm923_vm9, %v920_v6, %v783_v29  ;;  %v888_v2 = vsel %vm872_vm6, %v871_v61, %v630_v12 }
 0x17d   : > { %1499 = vmatmul.mubr.msk.f32.gmra.mrb[4].mxu1 %vm956_vm10, %v937_v58 }
 0x17f   : > { %v680_v21 = vpop.permute.xlu1 %679  ;;  %v678_v39 = vpop.permute.xlu0 %677 }
 0x180   : > { %v905_v45 = vsel %vm889_vm7, %v888_v2, %v680_v21  ;;  %v904_v62 = vsel %vm889_vm7, %v887_v49, %v678_v39 }
 0x183   : > { %v734_v51 = vpop.permute.xlu1 %733  ;;  %v732_v28 = vpop.permute.xlu0 %731 }
 0x184   : > { %v922_v4 = vsel %vm906_vm8, %v905_v45, %v734_v51  ;;  %v921_v33 = vsel %vm906_vm8, %v904_v62, %v732_v28 }
 0x187   : > { %v787_v40 = vpop.permute.xlu1 %786  ;;  %v785_v7 = vpop.permute.xlu0 %784 }
 0x188   : > { %v939_v20 = vsel %vm923_vm9, %v922_v4, %v787_v40  ;;  %v938_v34 = vsel %vm923_vm9, %v921_v33, %v785_v7 }
 0x189   : > { %1501 = vmatprep.mubr.msk.f32.mxu1 %vm956_vm10, %v938_v34 }
 0x18a   : > { %1502 = vmatmul.mubr.msk.f32.gmra.mrb[6].mxu1 %vm956_vm10, %v939_v20 }
 0x191   : > { %v1482_v22 = vpop.f32.mrb[0].mxu0 }
 0x192   : > { %v1077_v8 = vadd.f32 %v1482_v22, %v2268_v53  ;;  %v1071_v0 = vpop.f32.mrb[1].mxu0 }
 0x193   : > { %v1072_v30 = vadd.f32 %v2268_v53, %v1071_v0 }
 0x194   : > { %1151 = vst.msk [vmem:[%s2273_s28 + $0x8] sm:$0xff] %vm804_vm2, %v1077_v8  ;;  %v1167_v54 = vsel %vm804_vm2, %v1077_v8, 0.0  ;;  %v1204_v46 = vmul.f32 %v1077_v8, %v1077_v8 }
 0x195   : > { %1150 = vst.msk [vmem:[%s2273_s28] sm:$0xff] %vm804_vm2, %v1072_v30  ;;  %v1166_v10 = vsel %vm804_vm2, %v1072_v30, 0.0  ;;  %v1203_v48 = vmul.f32 %v1072_v30, %v1072_v30 }
 0x196   : > { %v1220_v23 = vsel %vm804_vm2, %v1204_v46, 0.0  ;;  %v1168_v42 = vadd.f32 %v1167_v54, %v1166_v10 }
 0x197   : > { %v1219_v9 = vsel %vm804_vm2, %v1203_v48, 0.0 }
 0x198   : > { %v1221_v11 = vadd.f32 %v1220_v23, %v1219_v9 }
 0x1b1   : > { %v1485_v56 = vpop.f32.mrb[2].mxu0 }
 0x1b2   : > { %v1087_v15 = vadd.f32 %v1485_v56, %v2268_v53  ;;  %v1081_v16 = vpop.f32.mrb[3].mxu0 }
 0x1b3   : > { %v1082_v17 = vadd.f32 %v2268_v53, %v1081_v16 }
 0x1b4   : > { %1153 = vst.msk [vmem:[%s2273_s28 + $0x18] sm:$0xff] %vm804_vm2, %v1087_v15  ;;  %v1206_v13 = vmul.f32 %v1087_v15, %v1087_v15  ;;  %v1171_v27 = vsel %vm804_vm2, %v1087_v15, 0.0 }
 0x1b5   : > { %1152 = vst.msk [vmem:[%s2273_s28 + $0x10] sm:$0xff] %vm804_vm2, %v1082_v17  ;;  %v1169_v24 = vsel %vm804_vm2, %v1082_v17, 0.0  ;;  %v1205_v25 = vmul.f32 %v1082_v17, %v1082_v17 }
 0x1b6   : > { %v1170_v26 = vadd.f32 %v1169_v24, %v1168_v42  ;;  %v1224_v38 = vsel %vm804_vm2, %v1206_v13, 0.0 }
 0x1b7   : > { %v1222_v35 = vsel %vm804_vm2, %v1205_v25, 0.0 }
 0x1b8   : > { %v1223_v36 = vadd.f32 %v1222_v35, %v1221_v11  ;;  %v1172_v37 = vadd.f32 %v1171_v27, %v1170_v26 }
 0x1ba   : > { %v1225_v5 = vadd.f32 %v1224_v38, %v1223_v36 }
 0x1d1   : > { %v1488_v63 = vpop.f32.mrb[4].mxu0 }
 0x1d2   : > { %v1097_v57 = vadd.f32 %v1488_v63, %v2268_v53  ;;  %v1091_v19 = vpop.f32.mrb[5].mxu0 }
 0x1d3   : > { %v1092_v55 = vadd.f32 %v2268_v53, %v1091_v19 }
 0x1d4   : > { %1155 = vst.msk [vmem:[%s2273_s28 + $0x28] sm:$0xff] %vm804_vm2, %v1097_v57  ;;  %v1208_v43 = vmul.f32 %v1097_v57, %v1097_v57  ;;  %v1175_v31 = vsel %vm804_vm2, %v1097_v57, 0.0 }
 0x1d5   : > { %1154 = vst.msk [vmem:[%s2273_s28 + $0x20] sm:$0xff] %vm804_vm2, %v1092_v55  ;;  %v1173_v44 = vsel %vm804_vm2, %v1092_v55, 0.0  ;;  %v1207_v50 = vmul.f32 %v1092_v55, %v1092_v55 }
 0x1d6   : > { %v1174_v1 = vadd.f32 %v1173_v44, %v1172_v37  ;;  %v1228_v12 = vsel %vm804_vm2, %v1208_v43, 0.0 }
 0x1d7   : > { %v1226_v14 = vsel %vm804_vm2, %v1207_v50, 0.0 }
 0x1d8   : > { %v1227_v32 = vadd.f32 %v1226_v14, %v1225_v5  ;;  %v1176_v6 = vadd.f32 %v1175_v31, %v1174_v1 }
 0x1da   : > { %v1229_v29 = vadd.f32 %v1228_v12, %v1227_v32 }
 0x1f0   : > { %v1491_v58 = vpop.f32.mrb[6].mxu0 }
 0x1f1   : > { %v1107_v21 = vadd.f32 %v1491_v58, %v2268_v53  ;;  %v1101_v39 = vpop.f32.mrb[7].mxu0 }
 0x1f2   : > { %v1102_v41 = vadd.f32 %v2268_v53, %v1101_v39 }
 0x1f3   : > { %1157 = vst.msk [vmem:[%s2273_s28 + $0x38] sm:$0xff] %vm804_vm2, %v1107_v21  ;;  %v1210_v52 = vmul.f32 %v1107_v21, %v1107_v21  ;;  %v1179_v59 = vsel %vm804_vm2, %v1107_v21, 0.0 }
 0x1f4   : > { %1156 = vst.msk [vmem:[%s2273_s28 + $0x30] sm:$0xff] %vm804_vm2, %v1102_v41  ;;  %v1177_v3 = vsel %vm804_vm2, %v1102_v41, 0.0  ;;  %v1209_v18 = vmul.f32 %v1102_v41, %v1102_v41 }
 0x1f5   : > { %v1178_v47 = vadd.f32 %v1177_v3, %v1176_v6  ;;  %v1232_v61 = vsel %vm804_vm2, %v1210_v52, 0.0 }
 0x1f6   : > { %v1230_v51 = vsel %vm804_vm2, %v1209_v18, 0.0 }
 0x1f7   : > { %v1231_v28 = vadd.f32 %v1230_v51, %v1229_v29  ;;  %v1180_v60 = vadd.f32 %v1179_v59, %v1178_v47 }
 0x1f9   : > { %v1233_v49 = vadd.f32 %v1232_v61, %v1231_v28 }
 0x210   : > { %v1494_v2 = vpop.f32.mrb[0].mxu1 }
 0x211   : > { %v1117_v45 = vadd.f32 %v1494_v2, %v2268_v53  ;;  %v1111_v62 = vpop.f32.mrb[1].mxu1 }
 0x212   : > { %v1112_v4 = vadd.f32 %v2268_v53, %v1111_v62 }
 0x213   : > { %1159 = vst.msk [vmem:[%s2273_s28 + $0x48] sm:$0xff] %vm804_vm2, %v1117_v45  ;;  %v1212_v33 = vmul.f32 %v1117_v45, %v1117_v45  ;;  %v1183_v34 = vsel %vm804_vm2, %v1117_v45, 0.0 }
 0x214   : > { %1158 = vst.msk [vmem:[%s2273_s28 + $0x40] sm:$0xff] %vm804_vm2, %v1112_v4  ;;  %v1181_v40 = vsel %vm804_vm2, %v1112_v4, 0.0  ;;  %v1211_v7 = vmul.f32 %v1112_v4, %v1112_v4 }
 0x215   : > { %v1182_v20 = vadd.f32 %v1181_v40, %v1180_v60  ;;  %v1236_v30 = vsel %vm804_vm2, %v1212_v33, 0.0 }
 0x216   : > { %v1234_v22 = vsel %vm804_vm2, %v1211_v7, 0.0 }
 0x217   : > { %v1235_v8 = vadd.f32 %v1234_v22, %v1233_v49  ;;  %v1184_v0 = vadd.f32 %v1183_v34, %v1182_v20 }
 0x219   : > { %v1237_v54 = vadd.f32 %v1236_v30, %v1235_v8 }
 0x230   : > { %v1497_v46 = vpop.f32.mrb[2].mxu1 }
 0x231   : > { %v1127_v10 = vadd.f32 %v1497_v46, %v2268_v53  ;;  %v1121_v48 = vpop.f32.mrb[3].mxu1 }
 0x232   : > { %v1122_v23 = vadd.f32 %v2268_v53, %v1121_v48 }
 0x233   : > { %1161 = vst.msk [vmem:[%s2273_s28 + $0x58] sm:$0xff] %vm804_vm2, %v1127_v10  ;;  %v1214_v42 = vmul.f32 %v1127_v10, %v1127_v10  ;;  %v1187_v15 = vsel %vm804_vm2, %v1127_v10, 0.0 }
 0x234   : > { %1160 = vst.msk [vmem:[%s2273_s28 + $0x50] sm:$0xff] %vm804_vm2, %v1122_v23  ;;  %v1185_v9 = vsel %vm804_vm2, %v1122_v23, 0.0  ;;  %v1213_v11 = vmul.f32 %v1122_v23, %v1122_v23 }
 0x235   : > { %v1186_v56 = vadd.f32 %v1185_v9, %v1184_v0  ;;  %v1240_v24 = vsel %vm804_vm2, %v1214_v42, 0.0 }
 0x236   : > { %v1238_v16 = vsel %vm804_vm2, %v1213_v11, 0.0 }
 0x237   : > { %v1239_v17 = vadd.f32 %v1238_v16, %v1237_v54  ;;  %v1188_v13 = vadd.f32 %v1187_v15, %v1186_v56 }
 0x239   : > { %v1241_v25 = vadd.f32 %v1240_v24, %v1239_v17 }
 0x250   : > { %v1500_v26 = vpop.f32.mrb[4].mxu1 }
 0x251   : > { %v1137_v27 = vadd.f32 %v1500_v26, %v2268_v53  ;;  %v1131_v35 = vpop.f32.mrb[5].mxu1 }
 0x252   : > { %v1132_v36 = vadd.f32 %v2268_v53, %v1131_v35 }
 0x253   : > { %1163 = vst.msk [vmem:[%s2273_s28 + $0x68] sm:$0xff] %vm804_vm2, %v1137_v27  ;;  %v1216_v37 = vmul.f32 %v1137_v27, %v1137_v27  ;;  %v1191_v57 = vsel %vm804_vm2, %v1137_v27, 0.0 }
 0x254   : > { %1162 = vst.msk [vmem:[%s2273_s28 + $0x60] sm:$0xff] %vm804_vm2, %v1132_v36  ;;  %v1189_v38 = vsel %vm804_vm2, %v1132_v36, 0.0  ;;  %v1215_v5 = vmul.f32 %v1132_v36, %v1132_v36 }
 0x255   : > { %v1190_v63 = vadd.f32 %v1189_v38, %v1188_v13  ;;  %v1244_v44 = vsel %vm804_vm2, %v1216_v37, 0.0 }
 0x256   : > { %v1242_v19 = vsel %vm804_vm2, %v1215_v5, 0.0 }
 0x257   : > { %v1243_v55 = vadd.f32 %v1242_v19, %v1241_v25  ;;  %v1192_v43 = vadd.f32 %v1191_v57, %v1190_v63 }
 0x259   : > { %v1245_v50 = vadd.f32 %v1244_v44, %v1243_v55 }
 0x25d   : > { %v1503_v1 = vpop.f32.mrb[6].mxu1 }
 0x25e   : > { %v1147_v31 = vadd.f32 %v1503_v1, %v2268_v53  ;;  %v1141_v14 = vpop.f32.mrb[7].mxu1 }
 0x25f   : > { %v1142_v32 = vadd.f32 %v2268_v53, %v1141_v14 }
 0x260   : > { %1165 = vst.msk [vmem:[%s2273_s28 + $0x78] sm:$0xff] %vm804_vm2, %v1147_v31  ;;  %v1218_v6 = vmul.f32 %v1147_v31, %v1147_v31  ;;  %v1195_v21 = vsel %vm804_vm2, %v1147_v31, 0.0 }
 0x261   : > { %1164 = vst.msk [vmem:[%s2273_s28 + $0x70] sm:$0xff] %vm804_vm2, %v1142_v32  ;;  %v1193_v12 = vsel %vm804_vm2, %v1142_v32, 0.0  ;;  %v1217_v29 = vmul.f32 %v1142_v32, %v1142_v32 }
 0x262   : > { %v1194_v58 = vadd.f32 %v1193_v12, %v1192_v43  ;;  %v1248_v3 = vsel %vm804_vm2, %v1218_v6, 0.0 }
 0x263   : > { %v1246_v39 = vsel %vm804_vm2, %v1217_v29, 0.0 }
 0x264   : > { %v1196_v41 = vadd.f32 %v1195_v21, %v1194_v58  ;;  %v1247_v52 = vadd.f32 %v1246_v39, %v1245_v50 }
 0x266   : > { %v1197_v53 = vrot.slane %v1196_v41, 4  ;;  %v1249_v18 = vadd.f32 %v1248_v3, %v1247_v52 }
 0x268   : > { %v1198_v47 = vadd.f32 %v1197_v53, %v1196_v41  ;;  %v1250_v59 = vrot.slane %v1249_v18, 4 }
 0x26a   : > { %v1199_v51 = vrot.slane %v1198_v47, 2  ;;  %v1251_v28 = vadd.f32 %v1250_v59, %v1249_v18 }
 0x26c   : > { %v1200_v60 = vadd.f32 %v1199_v51, %v1198_v47  ;;  %v1252_v61 = vrot.slane %v1251_v28, 2 }
 0x26e   : > { %v1201_v49 = vrot.slane %v1200_v60, 1  ;;  %v1253_v2 = vadd.f32 %v1252_v61, %v1251_v28 }
 0x270   : > { %v1254_v45 = vrot.slane %v1253_v2, 1  ;;  %v1202_v62 = vadd.f32 %v1201_v49, %v1200_v60 }
 0x272   : > { %v1255_v4 = vadd.f32 %v1254_v45, %v1253_v2 }
 0x274   : > { %v1257_v33 = vsel %vm1256_vm11, %v1202_v62, %v1255_v4 }
 0x275   : > { %1259 = vst.msk [vmem:[%s257_s14] sm:$0x3] %vm1258_vm12, %v1257_v33 }
 0x276 PF: > { %s15_s19 = sadd.s32 1, %s1618_s19   ;;  %s2380_s15 = smov %s1610_s17 }
 0x277   : > { %p12_p8 = scmp.ge.s32.totalorder %s15_s19, 6   ;;  %s2381_s16 = smov %s1614_s18 }
 0x278   : > { %s2382_s17 = smov %s2385_s20  ;;  %s2383_s18 = smov %s2389_s21 }
 0x279   :  { %14 = sbr.rel (!%p12_p8) target bundleno = 3 (0x3), region = 74 }

// kernel: skip_connection_block.28
= control target key start
LH: loop header
LB: loop body
LE: loop exit
PB: predicated region body
PF: predicated region fallthrough
CT: control target
= control target key end

     0   :  { %s1699_s15 = smov 0   ;;  %s1701_s16 = smov 0   ;;  %s2436_s0 = inlined_call_operand.vmem [shape: f32[2,2,10,18,12], index: 0, kind: input, shape index: {}]   ;;  %s2437_s1 = inlined_call_operand.vmem [shape: f32[108,4], index: 1, kind: input, shape index: {}]   ;;  %s2438_s2 = inlined_call_operand.vmem [shape: f32[1,4], index: 2, kind: input, shape index: {}]   ;;  %s2439_s3 = inlined_call_operand.vmem [shape: f32[2,16,16,4], index: 3, kind: output, shape index: {0}]   ;;  %s2440_s4 = inlined_call_operand.vmem [shape: f32[2,2,2,4], index: 4, kind: output, shape index: {1}]  }
   0x1   :  { %s1703_s17 = smov 0   ;;  %s1705_s18 = smov 0  }
   0x2   :  { %s1707_s19 = smov 0  }
   0x3 LB: > { %s24_s20 = sadd.s32 1, %s1655_s17  ;;  %s27_s21 = sadd.s32 1, %s1659_s18  ;;  %s1663_s19 = sphi %s1707_s19, %s15_s19   ;;  %s1659_s18 = sphi %s1705_s18, %s2444_s18   ;;  %s1655_s17 = sphi %s1703_s17, %s2443_s17   ;;  %s1651_s16 = sphi %s1701_s16, %s2442_s16   ;;  %s1647_s15 = sphi %s1699_s15, %s2441_s15  }
   0x4   : > { %p25_p0 = scmp.ge.s32.totalorder %s24_s20, 2  ;;  %p1420_p1 = scmp.ge.s32.totalorder %s1663_s19, 1 }
   0x5   : > { %p187_p2 = scmp.lt.s32.totalorder %s1663_s19, 5 }
   0x6   : > { %s2446_s20 = smov (%p25_p0, %s24_s20), 0  ;;  %s2448_s21 = smov (!%p25_p0, %s27_s21), %s1659_s18 }
   0x7   : > { %p188_p3 = pnand %p1420_p1, %p187_p2  ;;  %p29_p4 = scmp.ge.s32.totalorder %s2448_s21, 2 }
   0x8   : > { %p230_p5 = scmp.lt.s32.totalorder (!%p188_p3), %s1651_s16, 1  ;;  %p232_p6 = scmp.lt.s32.totalorder (!%p188_p3), %s1647_s15, 1  ;;  %vm401_vm0 = vcmask (!%p188_p3), 1045504   ;;  %vm312_vm1 = vcmask (!%p188_p3), 1046528   ;;  %v940_v22 = vld [vmem:[%s2437_s1] sm:$0xff] (!%p188_p3)  ;;  %v941_v23 = vld [vmem:[%s2437_s1 + $0x8] sm:$0xff] (!%p188_p3) }
   0x9   : > { %s2450_s21 = smov (%p29_p4, %s2448_s21), 0  ;;  %191 = sbr.rel (%p188_p3) target bundleno = 630 (0x276), region = 32 }
   0xa   : > { %s1665_s30 = smov (!%p188_p3), 36   ;;  %s1666_s5 = smov (!%p188_p3), 24   ;;  %v942_v24 = vld [vmem:[%s2437_s1 + $0x10] sm:$0xff] (!%p188_p3)  ;;  %v943_v25 = vld [vmem:[%s2437_s1 + $0x18] sm:$0xff] (!%p188_p3)  ;;  %v1530_v28 = vpack.c.bf16 (!%p188_p3), %v941_v23, %v940_v22  ;;  %v944_v30 = vld [vmem:[%s2437_s1 + $0x20] sm:$0xff] (!%p188_p3)  ;;  %vm1010_vm2 = vcmask (!%p188_p3), 1043456  }
   0xb   : > { %s1667_s6 = smov (!%p188_p3), 12   ;;  %s1668_s11 = smov (!%p188_p3), 48   ;;  %v1534_v29 = vpack.c.bf16 (!%p188_p3), %v943_v25, %v942_v24  ;;  %v945_v31 = vld [vmem:[%s2437_s1 + $0x28] sm:$0xff] (!%p188_p3)  ;;  %v946_v34 = vld [vmem:[%s2437_s1 + $0x30] sm:$0xff] (!%p188_p3)  ;;  %v947_v35 = vld [vmem:[%s2437_s1 + $0x38] sm:$0xff] (!%p188_p3)  ;;  %vm1672_vm3 = vmmov (!%p188_p3), 1  }
   0xc   : > { %1531 = vmatprep.subr.bf16.mxu0 (!%p188_p3), %v1530_v28  ;;  %1560 = vmatprep.subr.bf16.mxu1 (!%p188_p3), %v1530_v28  ;;  %s1669_s28 = smov (!%p188_p3), 60   ;;  %v1538_v33 = vpack.c.bf16 (!%p188_p3), %v945_v31, %v944_v30  ;;  %v1542_v39 = vpack.c.bf16 (!%p188_p3), %v947_v35, %v946_v34  ;;  %v948_v40 = vld [vmem:[%s2437_s1 + $0x40] sm:$0xff] (!%p188_p3)  ;;  %v949_v41 = vld [vmem:[%s2437_s1 + $0x48] sm:$0xff] (!%p188_p3)  ;;  %v950_v45 = vld [vmem:[%s2437_s1 + $0x50] sm:$0xff] (!%p188_p3)  ;;  %s1671_s13 = smov (!%p188_p3), 84   ;;  %vm804_vm5 = vcmask (!%p188_p3), 97280  }
   0xd   : > { %1533 = vmatpush3.bf16.msra.mxu0 (!%p188_p3), %v1530_v28  ;;  %1567 = vmatpush3.bf16.msra.mxu1 (!%p188_p3), %v1530_v28  ;;  %v1546_v44 = vpack.c.bf16 (!%p188_p3), %v949_v41, %v948_v40  ;;  %v951_v46 = vld [vmem:[%s2437_s1 + $0x58] sm:$0xff] (!%p188_p3)  ;;  %v952_v50 = vld [vmem:[%s2437_s1 + $0x60] sm:$0xff] (!%p188_p3)  ;;  %v953_v51 = vld [vmem:[%s2437_s1 + $0x68] sm:$0xf] (!%p188_p3)  ;;  %s1673_s14 = smov (!%p188_p3), 96   ;;  %vm821_vm6 = vcmask (!%p188_p3), 195584  }
   0xe   : > { %1535 = vmatprep.subr.bf16.mxu0 (!%p188_p3), %v1534_v29  ;;  %1561 = vmatprep.subr.bf16.mxu1 (!%p188_p3), %v1534_v29  ;;  %v1550_v49 = vpack.c.bf16 (!%p188_p3), %v951_v46, %v950_v45  ;;  %v1554_v55 = vpack.c.bf16 (!%p188_p3), %v953_v51, %v952_v50  ;;  %vm1555_vm4 = vmpackc.low (!%p188_p3), %vm1010_vm2, %vm1672_vm3  ;;  %vm838_vm7 = vcmask (!%p188_p3), 293888   ;;  %vm855_vm8 = vcmask (!%p188_p3), 392192  }
   0xf   : > { %vm872_vm9 = vcmask (!%p188_p3), 490496   ;;  %vm889_vm10 = vcmask (!%p188_p3), 588800   ;;  %vm906_vm11 = vcmask (!%p188_p3), 687104   ;;  %vm923_vm12 = vcmask (!%p188_p3), 785408  }
  0x10   : > { %s2452_s16 = smov (!%p230_p5, %s1651_s16), 1  ;;  %vm961_vm13 = vcmask 883712   ;;  %vm1159_vm14 = vcmask 31744   ;;  %vm1266_vm15 = vcmask 1040384  }
  0x11   : > { %s1735_s22 = scalar_select %p232_p6, %s1647_s15, 1  ;;  %1537 = vmatpush3.bf16.msra.mxu0 %v1534_v29  ;;  %1568 = vmatpush3.bf16.msra.mxu1 %v1534_v29 }
  0x12   : > { %s1575_s23 = smul.u32 60, %s2452_s16  ;;  %1539 = vmatprep.subr.bf16.mxu0 %v1538_v33  ;;  %1562 = vmatprep.subr.bf16.mxu1 %v1538_v33 }
  0x13   : > { %s1574_s24 = smul.u32 30, %s1735_s22 }
  0x15   : > { %s236_s25 = sadd.s32 %s1575_s23, %s1574_s24  ;;  %s1670_s24 = smov 72   ;;  %1541 = vmatpush3.bf16.msra.mxu0 %v1538_v33  ;;  %1569 = vmatpush3.bf16.msra.mxu1 %v1538_v33 }
  0x16   : > { %s1421_s26 = sshll.u32 %s236_s25, 3  ;;  %1543 = vmatprep.subr.bf16.mxu0 %v1542_v39  ;;  %1563 = vmatprep.subr.bf16.mxu1 %v1542_v39 }
  0x17   : > { %s1742_s29 = scalar_lea.vmem %s2436_s0, %s1421_s26  ;;  %s1426_s26 = sshll.u32 %s2452_s16, 1 }
  0x18   : > { %v1745_v0 = vld [vmem:[%s1742_s29 + $0x20] sm:$0xff]  ;;  %v1748_v1 = vld [vmem:[%s1742_s29 + $0x18] sm:$0xff]  ;;  %v1758_v3 = vld [vmem:[%s1742_s29 + $0x8] sm:$0xff]  ;;  %s255_s27 = sadd.s32 %s1426_s26, %s1735_s22 }
  0x19   : > { %v1751_v2 = vld [vmem:[%s1742_s29] sm:$0xff]  ;;  %494 = vrot.lane.b32.xlu1 %v1745_v0, %s1665_s30  ;;  %492 = vrot.lane.b32.xlu0 %v1748_v1, %s1665_s30  ;;  %v260_v6 = vld [vmem:[%s1742_s29 + $0x10] sm:$0x3]  ;;  %v403_v7 = vrot.slane %v1758_v3, 2  ;;  %v314_v8 = vrot.slane %v1758_v3, 1  ;;  %v318_v15 = vrot.slane %v1748_v1, 1 }
  0x1a   : > { %v402_v4 = vrot.slane %v1751_v2, 2  ;;  %v313_v5 = vrot.slane %v1751_v2, 1  ;;  %v405_v9 = vrot.slane %v260_v6, 2  ;;  %v316_v10 = vrot.slane %v260_v6, 1  ;;  %v263_v17 = vld [vmem:[%s1742_s29 + $0x28] sm:$0x3]  ;;  %1545 = vmatpush3.bf16.msra.mxu0 %v1542_v39  ;;  %1570 = vmatpush3.bf16.msra.mxu1 %v1542_v39 }
  0x1b   : > { %v319_v16 = vrot.slane %v1745_v0, 1  ;;  %v407_v19 = vrot.slane %v1748_v1, 2  ;;  %v408_v20 = vrot.slane %v1745_v0, 2  ;;  %v321_v21 = vrot.slane %v263_v17, 1  ;;  %v1812_v36 = vld [vmem:[%s1742_s29 + $0x30] sm:$0xff]  ;;  %v1816_v38 = vld [vmem:[%s1742_s29 + $0x38] sm:$0xff]  ;;  %1547 = vmatprep.subr.bf16.mxu0 %v1546_v44  ;;  %1564 = vmatprep.subr.bf16.mxu1 %v1546_v44 }
  0x1c   : > { %v404_v11 = vsel %vm401_vm0, %v402_v4, %v403_v7  ;;  %v315_v12 = vsel %vm312_vm1, %v313_v5, %v314_v8  ;;  %v406_v13 = vsel %vm401_vm0, %v403_v7, %v405_v9  ;;  %v317_v14 = vsel %vm312_vm1, %v314_v8, %v316_v10  ;;  %v266_v48 = vld [vmem:[%s1742_s29 + $0x40] sm:$0x3]  ;;  %v1866_v60 = vld [vmem:[%s1742_s29 + $0x48] sm:$0xff]  ;;  %v1869_v61 = vld [vmem:[%s1742_s29 + $0x50] sm:$0xff]  ;;  %s1427_s7 = sshll.u32 %s255_s27, 1 }
  0x1d   : > { %442 = vrot.lane.b32.xlu1 %v404_v11, %s1666_s5  ;;  %353 = vrot.lane.b32.xlu0 %v315_v12, %s1667_s6  ;;  %v320_v18 = vsel %vm312_vm1, %v318_v15, %v319_v16  ;;  %v409_v26 = vsel %vm401_vm0, %v407_v19, %v408_v20  ;;  %v322_v27 = vsel %vm312_vm1, %v319_v16, %v321_v21  ;;  %v410_v32 = vrot.slane %v263_v17, 2  ;;  %v269_v5 = vld [vmem:[%s1742_s29 + $0x58] sm:$0x3]  ;;  %v1941_v31 = vld [vmem:[%s1742_s29 + $0x80] sm:$0xff]  ;;  %s257_s10 = scalar_lea.vmem %s2440_s4, %s1427_s7 }
  0x1e   : > { %v323_v42 = vrot.slane %v1812_v36, 1  ;;  %v324_v43 = vrot.slane %v1816_v38, 1  ;;  %v412_v52 = vrot.slane %v1812_v36, 2  ;;  %v413_v53 = vrot.slane %v1816_v38, 2  ;;  %1549 = vmatpush3.bf16.msra.mxu0 %v1546_v44  ;;  %1571 = vmatpush3.bf16.msra.mxu1 %v1546_v44  ;;  %v1938_v28 = vld [vmem:[%s1742_s29 + $0x78] sm:$0xff] }
  0x1f   : > { %v411_v37 = vsel %vm401_vm0, %v408_v20, %v410_v32  ;;  %v326_v54 = vrot.slane %v266_v48, 1  ;;  %1551 = vmatprep.subr.bf16.mxu0 %v1550_v49  ;;  %1565 = vmatprep.subr.bf16.mxu1 %v1550_v49  ;;  %v415_v58 = vrot.slane %v266_v48, 2  ;;  %v328_v62 = vrot.slane %v1866_v60, 1  ;;  %v275_v41 = vld [vmem:[%s1742_s29 + $0x88] sm:$0x3] }
  0x20   : > { %v325_v47 = vsel %vm312_vm1, %v323_v42, %v324_v43  ;;  %v414_v56 = vsel %vm401_vm0, %v412_v52, %v413_v53  ;;  %v329_v63 = vrot.slane %v1869_v61, 1  ;;  %v417_v6 = vrot.slane %v1866_v60, 2 }
  0x21   : > { %444 = vrot.lane.b32.xlu1 %v406_v13, %s1666_s5  ;;  %355 = vrot.lane.b32.xlu0 %v317_v14, %s1667_s6  ;;  %v327_v57 = vsel %vm312_vm1, %v324_v43, %v326_v54  ;;  %v416_v59 = vsel %vm401_vm0, %v413_v53, %v415_v58  ;;  %v418_v7 = vrot.slane %v1869_v61, 2  ;;  %v331_v8 = vrot.slane %v269_v5, 1  ;;  %v1901_v13 = vld [vmem:[%s1742_s29 + $0x60] sm:$0xff]  ;;  %v1904_v14 = vld [vmem:[%s1742_s29 + $0x68] sm:$0xff] }
  0x22   : > { %1553 = vmatpush3.bf16.msra.mxu0 %v1550_v49  ;;  %1572 = vmatpush3.bf16.msra.mxu1 %v1550_v49  ;;  %v330_v4 = vsel %vm312_vm1, %v328_v62, %v329_v63  ;;  %v420_v11 = vrot.slane %v269_v5, 2  ;;  %v333_v15 = vrot.slane %v1901_v13, 1  ;;  %v334_v16 = vrot.slane %v1904_v14, 1 }
  0x23   : > { %1556 = vmatprep.subr.msk.bf16.mxu0 %vm1555_vm4, %v1554_v55  ;;  %1566 = vmatprep.subr.msk.bf16.mxu1 %vm1555_vm4, %v1554_v55  ;;  %v419_v9 = vsel %vm401_vm0, %v417_v6, %v418_v7  ;;  %v332_v10 = vsel %vm312_vm1, %v329_v63, %v331_v8  ;;  %v422_v19 = vrot.slane %v1901_v13, 2  ;;  %v423_v20 = vrot.slane %v1904_v14, 2  ;;  %v1988_v63 = vld [vmem:[%s1742_s29 + $0x90] sm:$0xff]  ;;  %v1996_v6 = vld [vmem:[%s1742_s29 + $0x98] sm:$0xff] }
  0x24   : > { %v421_v12 = vsel %vm401_vm0, %v418_v7, %v420_v11  ;;  %v335_v17 = vsel %vm312_vm1, %v333_v15, %v334_v16  ;;  %v338_v32 = vrot.slane %v1938_v28, 1  ;;  %v339_v33 = vrot.slane %v1941_v31, 1 }
  0x25   : > { %357 = vrot.lane.b32.xlu1 %v320_v18, %s1667_s6  ;;  %546 = vrot.lane.b32.xlu0 %v320_v18, %s1668_s11  ;;  %v272_v18 = vld [vmem:[%s1742_s29 + $0x70] sm:$0x3]  ;;  %v424_v22 = vsel %vm401_vm0, %v422_v19, %v423_v20  ;;  %v427_v42 = vrot.slane %v1938_v28, 2  ;;  %v428_v43 = vrot.slane %v1941_v31, 2  ;;  %v341_v44 = vrot.slane %v275_v41, 1 }
  0x26   : > { %1559 = vmatpush3.bf16.msk.msra.mxu0 %vm1555_vm4, %v1554_v55  ;;  %1573 = vmatpush3.bf16.msk.msra.mxu1 %vm1555_vm4, %v1554_v55  ;;  %v336_v21 = vrot.slane %v272_v18, 1  ;;  %v425_v24 = vrot.slane %v272_v18, 2  ;;  %v430_v51 = vrot.slane %v275_v41, 2  ;;  %v343_v11 = vrot.slane %v1988_v63, 1 }
  0x27   : > { %v342_v48 = vsel %vm312_vm1, %v339_v33, %v341_v44 }
  0x28   : > { %v337_v23 = vsel %vm312_vm1, %v334_v16, %v336_v21  ;;  %v426_v25 = vsel %vm401_vm0, %v423_v20, %v425_v24  ;;  %v431_v54 = vsel %vm401_vm0, %v428_v43, %v430_v51 }
  0x29   : > { %599 = vrot.lane.b32.xlu1 %v409_v26, %s1669_s28  ;;  %548 = vrot.lane.b32.xlu0 %v322_v27, %s1668_s11 }
  0x2d   : > { %446 = vrot.lane.b32.xlu1 %v409_v26, %s1666_s5  ;;  %359 = vrot.lane.b32.xlu0 %v322_v27, %s1667_s6 }
  0x31   : > { %649 = vrot.lane.b32.xlu1 %v1812_v36, %s1670_s24  ;;  %601 = vrot.lane.b32.xlu0 %v411_v37, %s1669_s28 }
  0x35   : > { %496 = vrot.lane.b32.xlu1 %v1812_v36, %s1665_s30  ;;  %448 = vrot.lane.b32.xlu0 %v411_v37, %s1666_s5  ;;  %v340_v37 = vsel %vm312_vm1, %v338_v32, %v339_v33 }
  0x39   : > { %703 = vrot.lane.b32.xlu1 %v325_v47, %s1671_s13  ;;  %651 = vrot.lane.b32.xlu0 %v1816_v38, %s1670_s24 }
  0x3d   : > { %550 = vrot.lane.b32.xlu1 %v325_v47, %s1668_s11  ;;  %498 = vrot.lane.b32.xlu0 %v1816_v38, %s1665_s30 }
  0x41   : > { %756 = vrot.lane.b32.xlu1 %v414_v56, %s1673_s14  ;;  %705 = vrot.lane.b32.xlu0 %v327_v57, %s1671_s13 }
  0x45   : > { %552 = vrot.lane.b32.xlu1 %v327_v57, %s1668_s11  ;;  %361 = vrot.lane.b32.xlu0 %v325_v47, %s1667_s6  ;;  %v429_v47 = vsel %vm401_vm0, %v427_v42, %v428_v43 }
  0x49   : > { %758 = vrot.lane.b32.xlu1 %v416_v59, %s1673_s14  ;;  %603 = vrot.lane.b32.xlu0 %v414_v56, %s1669_s28 }
  0x4d   : > { %450 = vrot.lane.b32.xlu1 %v414_v56, %s1666_s5  ;;  %363 = vrot.lane.b32.xlu0 %v327_v57, %s1667_s6 }
  0x51   : > { %653 = vrot.lane.b32.xlu1 %v1866_v60, %s1670_s24  ;;  %605 = vrot.lane.b32.xlu0 %v416_v59, %s1669_s28 }
  0x55   : > { %500 = vrot.lane.b32.xlu1 %v1866_v60, %s1665_s30  ;;  %452 = vrot.lane.b32.xlu0 %v416_v59, %s1666_s5 }
  0x59   : > { %707 = vrot.lane.b32.xlu1 %v330_v4, %s1671_s13  ;;  %655 = vrot.lane.b32.xlu0 %v1869_v61, %s1670_s24 }
  0x5d   : > { %554 = vrot.lane.b32.xlu1 %v330_v4, %s1668_s11  ;;  %502 = vrot.lane.b32.xlu0 %v1869_v61, %s1665_s30 }
  0x61   : > { %760 = vrot.lane.b32.xlu1 %v419_v9, %s1673_s14  ;;  %709 = vrot.lane.b32.xlu0 %v332_v10, %s1671_s13 }
  0x65   : > { %556 = vrot.lane.b32.xlu1 %v332_v10, %s1668_s11  ;;  %365 = vrot.lane.b32.xlu0 %v330_v4, %s1667_s6 }
  0x69   : > { %762 = vrot.lane.b32.xlu1 %v421_v12, %s1673_s14  ;;  %607 = vrot.lane.b32.xlu0 %v419_v9, %s1669_s28 }
  0x6d   : > { %454 = vrot.lane.b32.xlu1 %v419_v9, %s1666_s5  ;;  %367 = vrot.lane.b32.xlu0 %v332_v10, %s1667_s6 }
  0x71   : > { %657 = vrot.lane.b32.xlu1 %v1901_v13, %s1670_s24  ;;  %609 = vrot.lane.b32.xlu0 %v421_v12, %s1669_s28 }
  0x75   : > { %504 = vrot.lane.b32.xlu1 %v1901_v13, %s1665_s30  ;;  %456 = vrot.lane.b32.xlu0 %v421_v12, %s1666_s5  ;;  %v344_v12 = vrot.slane %v1996_v6, 1 }
  0x77   : > { %v345_v19 = vsel %vm312_vm1, %v343_v11, %v344_v12 }
  0x79   : > { %711 = vrot.lane.b32.xlu1 %v335_v17, %s1671_s13  ;;  %659 = vrot.lane.b32.xlu0 %v1904_v14, %s1670_s24 }
  0x7d   : > { %558 = vrot.lane.b32.xlu1 %v335_v17, %s1668_s11  ;;  %506 = vrot.lane.b32.xlu0 %v1904_v14, %s1665_s30 }
  0x81   : > { %764 = vrot.lane.b32.xlu1 %v424_v22, %s1673_s14  ;;  %713 = vrot.lane.b32.xlu0 %v337_v23, %s1671_s13 }
  0x85   : > { %560 = vrot.lane.b32.xlu1 %v337_v23, %s1668_s11  ;;  %369 = vrot.lane.b32.xlu0 %v335_v17, %s1667_s6 }
  0x89   : > { %766 = vrot.lane.b32.xlu1 %v426_v25, %s1673_s14  ;;  %611 = vrot.lane.b32.xlu0 %v424_v22, %s1669_s28 }
  0x8b   : > { %v1933_v26 = vpop.permute.xlu1 %494  ;;  %v493_v27 = vpop.permute.xlu0 %492 }
  0x8d   : > { %458 = vrot.lane.b32.xlu1 %v424_v22, %s1666_s5  ;;  %371 = vrot.lane.b32.xlu0 %v337_v23, %s1667_s6  ;;  %v278_v23 = vld [vmem:[%s1742_s29 + $0xa0] sm:$0x3] }
  0x8e   : > { %v435_v43 = vrot.slane %v278_v23, 2 }
  0x8f   : > { %v443_v29 = vpop.permute.xlu1 %442  ;;  %v354_v30 = vpop.permute.xlu0 %353 }
  0x90   : > { %v805_v57 = vsel %vm804_vm5, %v1751_v2, %v354_v30  ;;  %v346_v30 = vrot.slane %v278_v23, 1 }
  0x91   : > { %661 = vrot.lane.b32.xlu1 %v1938_v28, %s1670_s24  ;;  %613 = vrot.lane.b32.xlu0 %v426_v25, %s1669_s28  ;;  %v822_v62 = vsel %vm821_vm6, %v805_v57, %v443_v29  ;;  %v432_v29 = vrot.slane %v1988_v63, 2  ;;  %v2063_v57 = vld [vmem:[%s1742_s29 + $0xa8] sm:$0xff] }
  0x92   : > { %v839_v2 = vsel %vm838_vm7, %v822_v62, %v493_v27 }
  0x93   : > { %v1948_v34 = vpop.permute.xlu1 %444  ;;  %v356_v35 = vpop.permute.xlu0 %355 }
  0x94   : > { %v806_v8 = vsel %vm804_vm5, %v1758_v3, %v356_v35 }
  0x95   : > { %508 = vrot.lane.b32.xlu1 %v1938_v28, %s1665_s30  ;;  %460 = vrot.lane.b32.xlu0 %v426_v25, %s1666_s5  ;;  %v823_v3 = vsel %vm821_vm6, %v806_v8, %v1948_v34 }
  0x96   : > { %v840_v20 = vsel %vm838_vm7, %v823_v3, %v1933_v26  ;;  %v433_v26 = vrot.slane %v1996_v6, 2 }
  0x97   : > { %v1954_v39 = vpop.permute.xlu1 %357  ;;  %v547_v40 = vpop.permute.xlu0 %546 }
  0x98   : > { %v856_v7 = vsel %vm855_vm8, %v839_v2, %v547_v40  ;;  %v347_v40 = vsel %vm312_vm1, %v344_v12, %v346_v30  ;;  %v2072_v2 = vld [vmem:[%s1742_s29 + $0xb0] sm:$0xff] }
  0x99   : > { %715 = vrot.lane.b32.xlu1 %v340_v37, %s1671_s13  ;;  %663 = vrot.lane.b32.xlu0 %v1941_v31, %s1670_s24 }
  0x9b   : > { %v600_v45 = vpop.permute.xlu1 %599  ;;  %v549_v46 = vpop.permute.xlu0 %548 }
  0x9c   : > { %v873_v9 = vsel %vm872_vm9, %v856_v7, %v600_v45  ;;  %v857_v24 = vsel %vm855_vm8, %v840_v20, %v549_v46  ;;  %v436_v46 = vsel %vm401_vm0, %v433_v26, %v435_v43  ;;  %v349_v7 = vrot.slane %v2072_v2, 1 }
  0x9d   : > { %562 = vrot.lane.b32.xlu1 %v340_v37, %s1668_s11  ;;  %510 = vrot.lane.b32.xlu0 %v1941_v31, %s1665_s30 }
  0x9f   : > { %v1967_v49 = vpop.permute.xlu1 %446  ;;  %v1969_v50 = vpop.permute.xlu0 %359 }
  0xa0   : > { %v808_v11 = vsel %vm804_vm5, %v1745_v0, %v1969_v50  ;;  %v281_v0 = vld [vmem:[%s1742_s29 + $0xb8] sm:$0x3] }
  0xa1   : > { %768 = vrot.lane.b32.xlu1 %v429_v47, %s1673_s14  ;;  %717 = vrot.lane.b32.xlu0 %v342_v48, %s1671_s13  ;;  %v351_v20 = vrot.slane %v281_v0, 1 }
  0xa3   : > { %v650_v52 = vpop.permute.xlu1 %649  ;;  %v602_v53 = vpop.permute.xlu0 %601 }
  0xa4   : > { %v890_v10 = vsel %vm889_vm10, %v873_v9, %v650_v52  ;;  %v874_v25 = vsel %vm872_vm9, %v857_v24, %v602_v53  ;;  %v807_v53 = vsel %vm804_vm5, %v1748_v1, %v1954_v39 }
  0xa5   : > { %564 = vrot.lane.b32.xlu1 %v342_v48, %s1668_s11  ;;  %373 = vrot.lane.b32.xlu0 %v340_v37, %s1667_s6  ;;  %v434_v37 = vsel %vm401_vm0, %v432_v29, %v433_v26  ;;  %v352_v29 = vsel %vm312_vm1, %v349_v7, %v351_v20 }
  0xa7   : > { %v1976_v55 = vpop.permute.xlu1 %496  ;;  %v1978_v56 = vpop.permute.xlu0 %448 }
  0xa8   : > { %v825_v12 = vsel %vm821_vm6, %v808_v11, %v1978_v56 }
  0xa9   : > { %770 = vrot.lane.b32.xlu1 %v431_v54, %s1673_s14  ;;  %615 = vrot.lane.b32.xlu0 %v429_v47, %s1669_s28 }
  0xab   : > { %v704_v58 = vpop.permute.xlu1 %703  ;;  %v652_v59 = vpop.permute.xlu0 %651 }
  0xac   : > { %v907_v15 = vsel %vm906_vm11, %v890_v10, %v704_v58  ;;  %v891_v27 = vsel %vm889_vm10, %v874_v25, %v652_v59 }
  0xad   : > { %462 = vrot.lane.b32.xlu1 %v429_v47, %s1666_s5  ;;  %375 = vrot.lane.b32.xlu0 %v342_v48, %s1667_s6 }
  0xaf   : > { %v1991_v4 = vpop.permute.xlu1 %550  ;;  %v1993_v5 = vpop.permute.xlu0 %498 }
  0xb1   : > { %665 = vrot.lane.b32.xlu1 %v1988_v63, %s1670_s24  ;;  %617 = vrot.lane.b32.xlu0 %v431_v54, %s1669_s28 }
  0xb3   : > { %v757_v16 = vpop.permute.xlu1 %756  ;;  %v706_v17 = vpop.permute.xlu0 %705 }
  0xb4   : > { %v924_v18 = vsel %vm923_vm12, %v907_v15, %v757_v16  ;;  %v908_v32 = vsel %vm906_vm11, %v891_v27, %v706_v17  ;;  %v842_v16 = vsel %vm838_vm7, %v825_v12, %v1993_v5  ;;  %v438_v5 = vrot.slane %v2072_v2, 2  ;;  %v284_v12 = vld [vmem:[%s1742_s29 + $0xd0] sm:$0x3] }
  0xb5   : > { %512 = vrot.lane.b32.xlu1 %v1988_v63, %s1665_s30  ;;  %464 = vrot.lane.b32.xlu0 %v431_v54, %s1666_s5  ;;  %v824_v54 = vsel %vm821_vm6, %v807_v53, %v1967_v49 }
  0xb6   : > { %1506 = vmatprep.mubr.msk.f32.mxu0 %vm961_vm13, %v924_v18  ;;  %v841_v58 = vsel %vm838_vm7, %v824_v54, %v1976_v55  ;;  %v348_v55 = vrot.slane %v2063_v57, 1 }
  0xb7   : > { %v2019_v21 = vpop.permute.xlu1 %552  ;;  %v2021_v22 = vpop.permute.xlu0 %361  ;;  %v858_v1 = vsel %vm855_vm8, %v841_v58, %v1991_v4  ;;  %v283_v58 = vld [vmem:[%s1742_s29 + $0xc8] sm:$0xff] }
  0xb8   : > { %v350_v15 = vsel %vm312_vm1, %v348_v55, %v349_v7  ;;  %v859_v50 = vsel %vm855_vm8, %v842_v16, %v2019_v21  ;;  %v595_v16 = vrot.slane %v283_v58, 2 }
  0xb9   : > { %719 = vrot.lane.b32.xlu1 %v345_v19, %s1671_s13  ;;  %667 = vrot.lane.b32.xlu0 %v1996_v6, %s1670_s24 }
  0xbb   : > { %v759_v33 = vpop.permute.xlu1 %758  ;;  %v604_v34 = vpop.permute.xlu0 %603 }
  0xbc   : > { %v925_v35 = vsel %vm923_vm12, %v908_v32, %v759_v33  ;;  %v875_v39 = vsel %vm872_vm9, %v858_v1, %v604_v34  ;;  %v440_v32 = vrot.slane %v281_v0, 2  ;;  %v544_v0 = vrot.slane %v284_v12, 1 }
  0xbd   : > { %566 = vrot.lane.b32.xlu1 %v345_v19, %s1668_s11  ;;  %514 = vrot.lane.b32.xlu0 %v1996_v6, %s1665_s30 }
  0xbe   : > { %1507 = vmatmul.mubr.msk.f32.vlgmr.msra.gmra.mrb[0].mxu0 %vm961_vm13, %v925_v35  ;;  %v441_v35 = vsel %vm401_vm0, %v438_v5, %v440_v32  ;;  %v286_v32 = vld [vmem:[%s1742_s29 + $0xe0] sm:$0xff] }
  0xbf   : > { %v2040_v41 = vpop.permute.xlu1 %450  ;;  %v2042_v42 = vpop.permute.xlu0 %363 }
  0xc1   : > { %772 = vrot.lane.b32.xlu1 %v434_v37, %s1673_s14  ;;  %721 = vrot.lane.b32.xlu0 %v347_v40, %s1671_s13 }
  0xc3   : > { %v654_v44 = vpop.permute.xlu1 %653  ;;  %v606_v45 = vpop.permute.xlu0 %605 }
  0xc4   : > { %v892_v49 = vsel %vm889_vm10, %v875_v39, %v654_v44  ;;  %v876_v18 = vsel %vm872_vm9, %v859_v50, %v606_v45  ;;  %v809_v45 = vsel %vm804_vm5, %v1812_v36, %v2021_v22  ;;  %v542_v39 = vrot.slane %v283_v58, 1 }
  0xc5   : > { %568 = vrot.lane.b32.xlu1 %v347_v40, %s1668_s11  ;;  %377 = vrot.lane.b32.xlu0 %v345_v19, %s1667_s6  ;;  %v437_v19 = vrot.slane %v2063_v57, 2 }
  0xc7   : > { %v2049_v47 = vpop.permute.xlu1 %500  ;;  %v2051_v48 = vpop.permute.xlu0 %452  ;;  %v439_v27 = vsel %vm401_vm0, %v437_v19, %v438_v5  ;;  %v545_v19 = vsel %vm312_vm1, %v542_v39, %v544_v0 }
  0xc9   : > { %774 = vrot.lane.b32.xlu1 %v436_v46, %s1673_s14  ;;  %619 = vrot.lane.b32.xlu0 %v434_v37, %s1669_s28 }
  0xcb   : > { %v708_v51 = vpop.permute.xlu1 %707  ;;  %v656_v52 = vpop.permute.xlu0 %655 }
  0xcc   : > { %v909_v8 = vsel %vm906_vm11, %v892_v49, %v708_v51  ;;  %v893_v56 = vsel %vm889_vm10, %v876_v18, %v656_v52  ;;  %v282_v51 = vld [vmem:[%s1742_s29 + $0xc0] sm:$0xff] }
  0xcd   : > { %466 = vrot.lane.b32.xlu1 %v434_v37, %s1666_s5  ;;  %379 = vrot.lane.b32.xlu0 %v347_v40, %s1667_s6 }
  0xcf   : > { %v2067_v59 = vpop.permute.xlu1 %554  ;;  %v2069_v62 = vpop.permute.xlu0 %502 }
  0xd1   : > { %669 = vrot.lane.b32.xlu1 %v2063_v57, %s1670_s24  ;;  %621 = vrot.lane.b32.xlu0 %v436_v46, %s1669_s28 }
  0xd3   : > { %v761_v9 = vpop.permute.xlu1 %760  ;;  %v710_v10 = vpop.permute.xlu0 %709 }
  0xd4   : > { %v926_v4 = vsel %vm923_vm12, %v909_v8, %v761_v9  ;;  %v910_v23 = vsel %vm906_vm11, %v893_v56, %v710_v10 }
  0xd5   : > { %516 = vrot.lane.b32.xlu1 %v2063_v57, %s1665_s30  ;;  %468 = vrot.lane.b32.xlu0 %v436_v46, %s1666_s5  ;;  %v826_v46 = vsel %vm821_vm6, %v809_v45, %v2040_v41  ;;  %v541_v41 = vrot.slane %v282_v51, 1 }
  0xd6   : > { %1509 = vmatprep.mubr.msk.f32.mxu0 %vm961_vm13, %v926_v4  ;;  %v843_v52 = vsel %vm838_vm7, %v826_v46, %v2049_v47 }
  0xd7   : > { %v2097_v17 = vpop.permute.xlu1 %556  ;;  %v2099_v3 = vpop.permute.xlu0 %365  ;;  %v860_v1 = vsel %vm855_vm8, %v843_v52, %v2067_v59  ;;  %v810_v59 = vsel %vm804_vm5, %v1816_v38, %v2042_v42  ;;  %v543_v9 = vsel %vm312_vm1, %v541_v41, %v542_v39  ;;  %v752_v52 = vrot.slane %v286_v32, 2 }
  0xd8   : > { %v827_v8 = vsel %vm821_vm6, %v810_v59, %v2051_v48 }
  0xd9   : > { %723 = vrot.lane.b32.xlu1 %v350_v15, %s1671_s13  ;;  %671 = vrot.lane.b32.xlu0 %v2072_v2, %s1670_s24  ;;  %v844_v10 = vsel %vm838_vm7, %v827_v8, %v2069_v62 }
  0xda   : > { %v861_v38 = vsel %vm855_vm8, %v844_v10, %v2097_v17 }
  0xdb   : > { %v763_v24 = vpop.permute.xlu1 %762  ;;  %v608_v25 = vpop.permute.xlu0 %607 }
  0xdc   : > { %v927_v21 = vsel %vm923_vm12, %v910_v23, %v763_v24  ;;  %v877_v36 = vsel %vm872_vm9, %v860_v1, %v608_v25  ;;  %v597_v23 = vrot.slane %v284_v12, 2 }
  0xdd   : > { %570 = vrot.lane.b32.xlu1 %v350_v15, %s1668_s11  ;;  %518 = vrot.lane.b32.xlu0 %v2072_v2, %s1665_s30 }
  0xde   : > { %1510 = vmatmul.mubr.msk.f32.gmra.mrb[2].mxu0 %vm961_vm13, %v927_v21  ;;  %v598_v21 = vsel %vm401_vm0, %v595_v16, %v597_v23 }
  0xdf   : > { %v2119_v26 = vpop.permute.xlu1 %454  ;;  %v2121_v30 = vpop.permute.xlu0 %367 }
  0xe1   : > { %776 = vrot.lane.b32.xlu1 %v439_v27, %s1673_s14  ;;  %725 = vrot.lane.b32.xlu0 %v352_v29, %s1671_s13 }
  0xe3   : > { %v658_v33 = vpop.permute.xlu1 %657  ;;  %v610_v34 = vpop.permute.xlu0 %609 }
  0xe4   : > { %v894_v22 = vsel %vm889_vm10, %v877_v36, %v658_v33  ;;  %v878_v42 = vsel %vm872_vm9, %v861_v38, %v610_v34  ;;  %v285_v33 = vld [vmem:[%s1742_s29 + $0xd8] sm:$0xff]  ;;  %v287_v34 = vld [vmem:[%s1742_s29 + $0xe8] sm:$0x3]  ;;  %s1422_s29 = sshll.u32 %s1647_s15, 3 }
  0xe5   : > { %572 = vrot.lane.b32.xlu1 %v352_v29, %s1668_s11  ;;  %381 = vrot.lane.b32.xlu0 %v350_v15, %s1667_s6  ;;  %v594_v15 = vrot.slane %v282_v51, 2  ;;  %v754_v41 = vrot.slane %v287_v34, 2  ;;  %p242_p7 = scmp.lt.s32.totalorder %s1422_s29, 15 }
  0xe7   : > { %v2128_v37 = vpop.permute.xlu1 %504  ;;  %v2130_v40 = vpop.permute.xlu0 %456  ;;  %v596_v17 = vsel %vm401_vm0, %v594_v15, %v595_v16  ;;  %s2454_s29 = smov (!%p242_p7, %s1422_s29), 15 }
  0xe8   : > { %s1423_s15 = sshll.u32 %s2454_s29, 1 }
  0xe9   : > { %778 = vrot.lane.b32.xlu1 %v441_v35, %s1673_s14  ;;  %623 = vrot.lane.b32.xlu0 %v439_v27, %s1669_s28 }
  0xeb   : > { %v712_v43 = vpop.permute.xlu1 %711  ;;  %v660_v44 = vpop.permute.xlu0 %659 }
  0xec   : > { %v911_v47 = vsel %vm906_vm11, %v894_v22, %v712_v43  ;;  %v895_v48 = vsel %vm889_vm10, %v878_v42, %v660_v44  ;;  %v698_v43 = vrot.slane %v285_v33, 1  ;;  %v701_v44 = vrot.slane %v287_v34, 1 }
  0xed   : > { %470 = vrot.lane.b32.xlu1 %v439_v27, %s1666_s5  ;;  %383 = vrot.lane.b32.xlu0 %v352_v29, %s1667_s6 }
  0xef   : > { %v2144_v53 = vpop.permute.xlu1 %558  ;;  %v2146_v54 = vpop.permute.xlu0 %506 }
  0xf1   : > { %673 = vrot.lane.b32.xlu1 %v282_v51, %s1670_s24  ;;  %625 = vrot.lane.b32.xlu0 %v441_v35, %s1669_s28 }
  0xf3   : > { %v765_v49 = vpop.permute.xlu1 %764  ;;  %v714_v55 = vpop.permute.xlu0 %713 }
  0xf4   : > { %v928_v7 = vsel %vm923_vm12, %v911_v47, %v765_v49  ;;  %v912_v62 = vsel %vm906_vm11, %v895_v48, %v714_v55  ;;  %v755_v55 = vsel %vm401_vm0, %v752_v52, %v754_v41 }
  0xf5   : > { %520 = vrot.lane.b32.xlu1 %v282_v51, %s1665_s30  ;;  %472 = vrot.lane.b32.xlu0 %v441_v35, %s1666_s5  ;;  %v699_v35 = vrot.slane %v286_v32, 1  ;;  %v811_v51 = vsel %vm804_vm5, %v1866_v60, %v2099_v3 }
  0xf6   : > { %1512 = vmatprep.mubr.msk.f32.mxu0 %vm961_vm13, %v928_v7  ;;  %v828_v1 = vsel %vm821_vm6, %v811_v51, %v2119_v26 }
  0xf7   : > { %v2168_v4 = vpop.permute.xlu1 %560  ;;  %v2170_v11 = vpop.permute.xlu0 %369  ;;  %v702_v36 = vsel %vm312_vm1, %v699_v35, %v701_v44  ;;  %v700_v22 = vsel %vm312_vm1, %v698_v43, %v699_v35  ;;  %v845_v39 = vsel %vm838_vm7, %v828_v1, %v2128_v37 }
  0xf8   : > { %v862_v60 = vsel %vm855_vm8, %v845_v39, %v2144_v53  ;;  %v812_v53 = vsel %vm804_vm5, %v1869_v61, %v2121_v30  ;;  %v813_v23 = vsel %vm804_vm5, %v1901_v13, %v2170_v11 }
  0xf9   : > { %727 = vrot.lane.b32.xlu1 %v543_v9, %s1671_s13  ;;  %675 = vrot.lane.b32.xlu0 %v283_v58, %s1670_s24  ;;  %v829_v10 = vsel %vm821_vm6, %v812_v53, %v2130_v40 }
  0xfa   : > { %v846_v12 = vsel %vm838_vm7, %v829_v10, %v2146_v54 }
  0xfb   : > { %v767_v50 = vpop.permute.xlu1 %766  ;;  %v612_v18 = vpop.permute.xlu0 %611  ;;  %v863_v48 = vsel %vm855_vm8, %v846_v12, %v2168_v4 }
  0xfc   : > { %v929_v56 = vsel %vm923_vm12, %v912_v62, %v767_v50  ;;  %v879_v3 = vsel %vm872_vm9, %v862_v60, %v612_v18 }
  0xfd   : > { %574 = vrot.lane.b32.xlu1 %v543_v9, %s1668_s11  ;;  %522 = vrot.lane.b32.xlu0 %v283_v58, %s1665_s30  ;;  %v751_v58 = vrot.slane %v285_v33, 2  ;;  %s1424_s30 = sshll.u32 %s2452_s16, 5 }
  0xfe   : > { %1513 = vmatmul.mubr.msk.f32.gmra.mrb[4].mxu0 %vm961_vm13, %v929_v56  ;;  %s246_s5 = sadd.s32 %s1424_s30, %s1423_s15 }
  0xff   : > { %v2186_v5 = vpop.permute.xlu1 %458  ;;  %v2188_v20 = vpop.permute.xlu0 %371  ;;  %v753_v7 = vsel %vm401_vm0, %v751_v58, %v752_v52  ;;  %s1425_s6 = sshll.u32 %s246_s5, 3  ;;  %vm1268_vm0 = vcmask 25600  }
 0x100   : > { %v814_v13 = vsel %vm804_vm5, %v1904_v14, %v2188_v20  ;;  %s2334_s25 = scalar_lea.vmem %s2439_s3, %s1425_s6 }
 0x101   : > { %780 = vrot.lane.b32.xlu1 %v596_v17, %s1673_s14  ;;  %729 = vrot.lane.b32.xlu0 %v545_v19, %s1671_s13 }
 0x103   : > { %v662_v24 = vpop.permute.xlu1 %661  ;;  %v614_v25 = vpop.permute.xlu0 %613 }
 0x104   : > { %v896_v26 = vsel %vm889_vm10, %v879_v3, %v662_v24  ;;  %v880_v15 = vsel %vm872_vm9, %v863_v48, %v614_v25  ;;  %v830_v24 = vsel %vm821_vm6, %v813_v23, %v2186_v5 }
 0x105   : > { %627 = vrot.lane.b32.xlu1 %v596_v17, %s1669_s28  ;;  %576 = vrot.lane.b32.xlu0 %v545_v19, %s1668_s11 }
 0x107   : > { %v509_v27 = vpop.permute.xlu1 %508  ;;  %v2195_v29 = vpop.permute.xlu0 %460 }
 0x108   : > { %v847_v25 = vsel %vm838_vm7, %v830_v24, %v509_v27  ;;  %v831_v11 = vsel %vm821_vm6, %v814_v13, %v2195_v29 }
 0x109   : > { %629 = vrot.lane.b32.xlu1 %v598_v21, %s1669_s28  ;;  %782 = vrot.lane.b32.xlu0 %v598_v21, %s1673_s14 }
 0x10b   : > { %v716_v45 = vpop.permute.xlu1 %715  ;;  %v664_v46 = vpop.permute.xlu0 %663 }
 0x10c   : > { %v913_v59 = vsel %vm906_vm11, %v896_v26, %v716_v45  ;;  %v897_v61 = vsel %vm889_vm10, %v880_v15, %v664_v46 }
 0x10d   : > { %679 = vrot.lane.b32.xlu1 %v286_v32, %s1670_s24  ;;  %677 = vrot.lane.b32.xlu0 %v285_v33, %s1670_s24 }
 0x10f   : > { %v563_v47 = vpop.permute.xlu1 %562  ;;  %v511_v49 = vpop.permute.xlu0 %510 }
 0x110   : > { %v864_v33 = vsel %vm855_vm8, %v847_v25, %v563_v47  ;;  %v848_v5 = vsel %vm838_vm7, %v831_v11, %v511_v49 }
 0x111   : > { %733 = vrot.lane.b32.xlu1 %v702_v36, %s1671_s13  ;;  %731 = vrot.lane.b32.xlu0 %v700_v22, %s1671_s13 }
 0x113   : > { %v769_v37 = vpop.permute.xlu1 %768  ;;  %v718_v8 = vpop.permute.xlu0 %717 }
 0x114   : > { %v930_v9 = vsel %vm923_vm12, %v913_v59, %v769_v37  ;;  %v914_v30 = vsel %vm906_vm11, %v897_v61, %v718_v8 }
 0x115   : > { %786 = vrot.lane.b32.xlu1 %v755_v55, %s1673_s14  ;;  %784 = vrot.lane.b32.xlu0 %v753_v7, %s1673_s14 }
 0x116   : > { %1515 = vmatprep.mubr.msk.f32.mxu0 %vm961_vm13, %v930_v9 }
 0x117   : > { %v565_v38 = vpop.permute.xlu1 %564  ;;  %v374_v42 = vpop.permute.xlu0 %373 }
 0x118   : > { %v865_v52 = vsel %vm855_vm8, %v848_v5, %v565_v38  ;;  %v815_v55 = vsel %vm804_vm5, %v1938_v28, %v374_v42 }
 0x11b   : > { %v771_v16 = vpop.permute.xlu1 %770  ;;  %v616_v0 = vpop.permute.xlu0 %615 }
 0x11c   : > { %v931_v40 = vsel %vm923_vm12, %v914_v30, %v771_v16  ;;  %v881_v34 = vsel %vm872_vm9, %v864_v33, %v616_v0 }
 0x11d   : > { %1516 = vmatmul.mubr.msk.f32.gmra.mrb[6].mxu0 %vm961_vm13, %v931_v40 }
 0x11f   : > { %v463_v62 = vpop.permute.xlu1 %462  ;;  %v376_v50 = vpop.permute.xlu0 %375 }
 0x120   : > { %v832_v7 = vsel %vm821_vm6, %v815_v55, %v463_v62  ;;  %v816_v28 = vsel %vm804_vm5, %v1941_v31, %v376_v50 }
 0x123   : > { %v666_v54 = vpop.permute.xlu1 %665  ;;  %v618_v18 = vpop.permute.xlu0 %617 }
 0x124   : > { %v898_v35 = vsel %vm889_vm10, %v881_v34, %v666_v54  ;;  %v882_v58 = vsel %vm872_vm9, %v865_v52, %v618_v18 }
 0x127   : > { %v513_v56 = vpop.permute.xlu1 %512  ;;  %v465_v17 = vpop.permute.xlu0 %464 }
 0x128   : > { %v849_v59 = vsel %vm838_vm7, %v832_v7, %v513_v56  ;;  %v833_v42 = vsel %vm821_vm6, %v816_v28, %v465_v17 }
 0x12b   : > { %v720_v19 = vpop.permute.xlu1 %719  ;;  %v668_v4 = vpop.permute.xlu0 %667 }
 0x12c   : > { %v915_v43 = vsel %vm906_vm11, %v898_v35, %v720_v19  ;;  %v899_v1 = vsel %vm889_vm10, %v882_v58, %v668_v4 }
 0x12f   : > { %v567_v21 = vpop.permute.xlu1 %566  ;;  %v515_v32 = vpop.permute.xlu0 %514 }
 0x130   : > { %v866_v9 = vsel %vm855_vm8, %v849_v59, %v567_v21  ;;  %v850_v61 = vsel %vm838_vm7, %v833_v42, %v515_v32 }
 0x133   : > { %v773_v44 = vpop.permute.xlu1 %772  ;;  %v722_v45 = vpop.permute.xlu0 %721 }
 0x134   : > { %v932_v46 = vsel %vm923_vm12, %v915_v43, %v773_v44  ;;  %v916_v36 = vsel %vm906_vm11, %v899_v1, %v722_v45 }
 0x135   : > { %1518 = vmatprep.mubr.msk.f32.mxu1 %vm961_vm13, %v932_v46 }
 0x137   : > { %v569_v27 = vpop.permute.xlu1 %568  ;;  %v378_v51 = vpop.permute.xlu0 %377 }
 0x138   : > { %v867_v0 = vsel %vm855_vm8, %v850_v61, %v569_v27  ;;  %v817_v32 = vsel %vm804_vm5, %v1988_v63, %v378_v51  ;;  %v2329_v61 = vld [vmem:[%s2438_s2] ss:$0 sm:$0xff] }
 0x13b   : > { %v775_v22 = vpop.permute.xlu1 %774  ;;  %v620_v41 = vpop.permute.xlu0 %619 }
 0x13c   : > { %v933_v14 = vsel %vm923_vm12, %v916_v36, %v775_v22  ;;  %v883_v53 = vsel %vm872_vm9, %v866_v9, %v620_v41 }
 0x13d   : > { %1519 = vmatmul.mubr.msk.f32.vlgmr.msra.gmra.mrb[0].mxu1 %vm961_vm13, %v933_v14 }
 0x13f   : > { %v467_v20 = vpop.permute.xlu1 %466  ;;  %v380_v29 = vpop.permute.xlu0 %379 }
 0x140   : > { %v834_v33 = vsel %vm821_vm6, %v817_v32, %v467_v20  ;;  %v818_v63 = vsel %vm804_vm5, %v1996_v6, %v380_v29 }
 0x143   : > { %v670_v39 = vpop.permute.xlu1 %669  ;;  %v622_v47 = vpop.permute.xlu0 %621 }
 0x144   : > { %v900_v10 = vsel %vm889_vm10, %v883_v53, %v670_v39  ;;  %v884_v40 = vsel %vm872_vm9, %v867_v0, %v622_v47 }
 0x147   : > { %v517_v49 = vpop.permute.xlu1 %516  ;;  %v469_v60 = vpop.permute.xlu0 %468 }
 0x148   : > { %v851_v34 = vsel %vm838_vm7, %v834_v33, %v517_v49  ;;  %v835_v51 = vsel %vm821_vm6, %v818_v63, %v469_v60 }
 0x14b   : > { %v724_v3 = vpop.permute.xlu1 %723  ;;  %v672_v26 = vpop.permute.xlu0 %671 }
 0x14c   : > { %v917_v12 = vsel %vm906_vm11, %v900_v10, %v724_v3  ;;  %v901_v62 = vsel %vm889_vm10, %v884_v40, %v672_v26 }
 0x14f   : > { %v571_v37 = vpop.permute.xlu1 %570  ;;  %v519_v8 = vpop.permute.xlu0 %518 }
 0x150   : > { %v868_v44 = vsel %vm855_vm8, %v851_v34, %v571_v37  ;;  %v852_v52 = vsel %vm838_vm7, %v835_v51, %v519_v8 }
 0x153   : > { %v777_v38 = vpop.permute.xlu1 %776  ;;  %v726_v48 = vpop.permute.xlu0 %725 }
 0x154   : > { %v934_v15 = vsel %vm923_vm12, %v917_v12, %v777_v38  ;;  %v918_v54 = vsel %vm906_vm11, %v901_v62, %v726_v48 }
 0x155   : > { %1521 = vmatprep.mubr.msk.f32.mxu1 %vm961_vm13, %v934_v15 }
 0x157   : > { %v573_v30 = vpop.permute.xlu1 %572  ;;  %v382_v16 = vpop.permute.xlu0 %381 }
 0x158   : > { %v869_v36 = vsel %vm855_vm8, %v852_v52, %v573_v30  ;;  %v819_v49 = vsel %vm804_vm5, %v2063_v57, %v382_v16 }
 0x15b   : > { %v779_v18 = vpop.permute.xlu1 %778  ;;  %v624_v56 = vpop.permute.xlu0 %623 }
 0x15c   : > { %v935_v31 = vsel %vm923_vm12, %v918_v54, %v779_v18  ;;  %v885_v45 = vsel %vm872_vm9, %v868_v44, %v624_v56 }
 0x15d   : > { %1522 = vmatmul.mubr.msk.f32.gmra.mrb[2].mxu1 %vm961_vm13, %v935_v31 }
 0x15f   : > { %v471_v50 = vpop.permute.xlu1 %470  ;;  %v384_v17 = vpop.permute.xlu0 %383 }
 0x160   : > { %v820_v60 = vsel %vm804_vm5, %v2072_v2, %v384_v17  ;;  %v836_v3 = vsel %vm821_vm6, %v819_v49, %v471_v50 }
 0x163   : > { %v674_v19 = vpop.permute.xlu1 %673  ;;  %v626_v4 = vpop.permute.xlu0 %625 }
 0x164   : > { %v902_v46 = vsel %vm889_vm10, %v885_v45, %v674_v19  ;;  %v886_v22 = vsel %vm872_vm9, %v869_v36, %v626_v4 }
 0x167   : > { %v521_v23 = vpop.permute.xlu1 %520  ;;  %v473_v24 = vpop.permute.xlu0 %472 }
 0x168   : > { %v837_v26 = vsel %vm821_vm6, %v820_v60, %v473_v24  ;;  %v853_v55 = vsel %vm838_vm7, %v836_v3, %v521_v23 }
 0x16b   : > { %v728_v25 = vpop.permute.xlu1 %727  ;;  %v676_v21 = vpop.permute.xlu0 %675 }
 0x16c   : > { %v919_v13 = vsel %vm906_vm11, %v902_v46, %v728_v25  ;;  %v903_v41 = vsel %vm889_vm10, %v886_v22, %v676_v21 }
 0x16f   : > { %v575_v35 = vpop.permute.xlu1 %574  ;;  %v523_v43 = vpop.permute.xlu0 %522 }
 0x170   : > { %v854_v7 = vsel %vm838_vm7, %v837_v26, %v523_v43  ;;  %v870_v8 = vsel %vm855_vm8, %v853_v55, %v575_v35 }
 0x173   : > { %v781_v11 = vpop.permute.xlu1 %780  ;;  %v730_v5 = vpop.permute.xlu0 %729 }
 0x174   : > { %v936_v27 = vsel %vm923_vm12, %v919_v13, %v781_v11  ;;  %v920_v14 = vsel %vm906_vm11, %v903_v41, %v730_v5 }
 0x175   : > { %1524 = vmatprep.mubr.msk.f32.mxu1 %vm961_vm13, %v936_v27 }
 0x177   : > { %v628_v58 = vpop.permute.xlu1 %627  ;;  %v577_v1 = vpop.permute.xlu0 %576 }
 0x178   : > { %v871_v9 = vsel %vm855_vm8, %v854_v7, %v577_v1  ;;  %v887_v57 = vsel %vm872_vm9, %v870_v8, %v628_v58 }
 0x17b   : > { %v630_v20 = vpop.permute.xlu1 %629  ;;  %v783_v39 = vpop.permute.xlu0 %782 }
 0x17c   : > { %v937_v6 = vsel %vm923_vm12, %v920_v14, %v783_v39  ;;  %v888_v2 = vsel %vm872_vm9, %v871_v9, %v630_v20 }
 0x17d   : > { %1525 = vmatmul.mubr.msk.f32.gmra.mrb[4].mxu1 %vm961_vm13, %v937_v6 }
 0x17f   : > { %v680_v29 = vpop.permute.xlu1 %679  ;;  %v678_v47 = vpop.permute.xlu0 %677 }
 0x180   : > { %v905_v53 = vsel %vm889_vm10, %v888_v2, %v680_v29  ;;  %v904_v10 = vsel %vm889_vm10, %v887_v57, %v678_v47 }
 0x183   : > { %v734_v59 = vpop.permute.xlu1 %733  ;;  %v732_v37 = vpop.permute.xlu0 %731 }
 0x184   : > { %v922_v12 = vsel %vm906_vm11, %v905_v53, %v734_v59  ;;  %v921_v38 = vsel %vm906_vm11, %v904_v10, %v732_v37 }
 0x187   : > { %v787_v48 = vpop.permute.xlu1 %786  ;;  %v785_v15 = vpop.permute.xlu0 %784 }
 0x188   : > { %v939_v28 = vsel %vm923_vm12, %v922_v12, %v787_v48  ;;  %v938_v42 = vsel %vm923_vm12, %v921_v38, %v785_v15 }
 0x189   : > { %1527 = vmatprep.mubr.msk.f32.mxu1 %vm961_vm13, %v938_v42 }
 0x18a   : > { %1528 = vmatmul.mubr.msk.f32.gmra.mrb[6].mxu1 %vm961_vm13, %v939_v28 }
 0x191   : > { %v1508_v30 = vpop.f32.mrb[0].mxu0 }
 0x192   : > { %v1086_v16 = vadd.f32 %v1508_v30, %v2329_v61  ;;  %v1080_v0 = vpop.f32.mrb[1].mxu0 }
 0x193   : > { %v1081_v40 = vadd.f32 %v2329_v61, %v1080_v0 }
 0x194   : > { %1161 = vst.msk [vmem:[%s2334_s25 + $0x8] sm:$0xff] %vm1159_vm14, %v1086_v16  ;;  %v1177_v62 = vsel %vm1159_vm14, %v1086_v16, 0.0  ;;  %v1214_v54 = vmul.f32 %v1086_v16, %v1086_v16 }
 0x195   : > { %1160 = vst.msk [vmem:[%s2334_s25] sm:$0xff] %vm1159_vm14, %v1081_v40  ;;  %v1176_v18 = vsel %vm1159_vm14, %v1081_v40, 0.0  ;;  %v1213_v56 = vmul.f32 %v1081_v40, %v1081_v40 }
 0x196   : > { %v1230_v31 = vsel %vm1159_vm14, %v1214_v54, 0.0  ;;  %v1178_v50 = vadd.f32 %v1177_v62, %v1176_v18 }
 0x197   : > { %v1229_v17 = vsel %vm1159_vm14, %v1213_v56, 0.0 }
 0x198   : > { %v1231_v19 = vadd.f32 %v1230_v31, %v1229_v17 }
 0x1b1   : > { %v1511_v4 = vpop.f32.mrb[2].mxu0 }
 0x1b2   : > { %v1096_v23 = vadd.f32 %v1511_v4, %v2329_v61  ;;  %v1090_v24 = vpop.f32.mrb[3].mxu0 }
 0x1b3   : > { %v1091_v25 = vadd.f32 %v2329_v61, %v1090_v24 }
 0x1b4   : > { %1163 = vst.msk [vmem:[%s2334_s25 + $0x18] sm:$0xff] %vm1159_vm14, %v1096_v23  ;;  %v1216_v21 = vmul.f32 %v1096_v23, %v1096_v23  ;;  %v1181_v35 = vsel %vm1159_vm14, %v1096_v23, 0.0 }
 0x1b5   : > { %1162 = vst.msk [vmem:[%s2334_s25 + $0x10] sm:$0xff] %vm1159_vm14, %v1091_v25  ;;  %v1179_v32 = vsel %vm1159_vm14, %v1091_v25, 0.0  ;;  %v1215_v33 = vmul.f32 %v1091_v25, %v1091_v25 }
 0x1b6   : > { %v1180_v34 = vadd.f32 %v1179_v32, %v1178_v50  ;;  %v1234_v46 = vsel %vm1159_vm14, %v1216_v21, 0.0 }
 0x1b7   : > { %v1232_v43 = vsel %vm1159_vm14, %v1215_v33, 0.0 }
 0x1b8   : > { %v1233_v44 = vadd.f32 %v1232_v43, %v1231_v19  ;;  %v1182_v45 = vadd.f32 %v1181_v35, %v1180_v34 }
 0x1ba   : > { %v1235_v13 = vadd.f32 %v1234_v46, %v1233_v44 }
 0x1d1   : > { %v1514_v11 = vpop.f32.mrb[4].mxu0 }
 0x1d2   : > { %v1106_v5 = vadd.f32 %v1514_v11, %v2329_v61  ;;  %v1100_v27 = vpop.f32.mrb[5].mxu0 }
 0x1d3   : > { %v1101_v63 = vadd.f32 %v2329_v61, %v1100_v27 }
 0x1d4   : > { %1165 = vst.msk [vmem:[%s2334_s25 + $0x28] sm:$0xff] %vm1159_vm14, %v1106_v5  ;;  %v1218_v51 = vmul.f32 %v1106_v5, %v1106_v5  ;;  %v1185_v36 = vsel %vm1159_vm14, %v1106_v5, 0.0 }
 0x1d5   : > { %1164 = vst.msk [vmem:[%s2334_s25 + $0x20] sm:$0xff] %vm1159_vm14, %v1101_v63  ;;  %v1183_v52 = vsel %vm1159_vm14, %v1101_v63, 0.0  ;;  %v1217_v58 = vmul.f32 %v1101_v63, %v1101_v63 }
 0x1d6   : > { %v1184_v1 = vadd.f32 %v1183_v52, %v1182_v45  ;;  %v1238_v20 = vsel %vm1159_vm14, %v1218_v51, 0.0 }
 0x1d7   : > { %v1236_v22 = vsel %vm1159_vm14, %v1217_v58, 0.0 }
 0x1d8   : > { %v1237_v41 = vadd.f32 %v1236_v22, %v1235_v13  ;;  %v1186_v14 = vadd.f32 %v1185_v36, %v1184_v1 }
 0x1da   : > { %v1239_v39 = vadd.f32 %v1238_v20, %v1237_v41 }
 0x1f0   : > { %v1517_v6 = vpop.f32.mrb[6].mxu0 }
 0x1f1   : > { %v1116_v29 = vadd.f32 %v1517_v6, %v2329_v61  ;;  %v1110_v47 = vpop.f32.mrb[7].mxu0 }
 0x1f2   : > { %v1111_v49 = vadd.f32 %v2329_v61, %v1110_v47 }
 0x1f3   : > { %1167 = vst.msk [vmem:[%s2334_s25 + $0x38] sm:$0xff] %vm1159_vm14, %v1116_v29  ;;  %v1220_v60 = vmul.f32 %v1116_v29, %v1116_v29  ;;  %v1189_v7 = vsel %vm1159_vm14, %v1116_v29, 0.0 }
 0x1f4   : > { %1166 = vst.msk [vmem:[%s2334_s25 + $0x30] sm:$0xff] %vm1159_vm14, %v1111_v49  ;;  %v1187_v3 = vsel %vm1159_vm14, %v1111_v49, 0.0  ;;  %v1219_v26 = vmul.f32 %v1111_v49, %v1111_v49 }
 0x1f5   : > { %v1188_v55 = vadd.f32 %v1187_v3, %v1186_v14  ;;  %v1242_v9 = vsel %vm1159_vm14, %v1220_v60, 0.0 }
 0x1f6   : > { %v1240_v59 = vsel %vm1159_vm14, %v1219_v26, 0.0 }
 0x1f7   : > { %v1241_v37 = vadd.f32 %v1240_v59, %v1239_v39  ;;  %v1190_v8 = vadd.f32 %v1189_v7, %v1188_v55 }
 0x1f9   : > { %v1243_v57 = vadd.f32 %v1242_v9, %v1241_v37 }
 0x210   : > { %v1520_v2 = vpop.f32.mrb[0].mxu1 }
 0x211   : > { %v1126_v53 = vadd.f32 %v1520_v2, %v2329_v61  ;;  %v1120_v10 = vpop.f32.mrb[1].mxu1 }
 0x212   : > { %v1121_v12 = vadd.f32 %v2329_v61, %v1120_v10 }
 0x213   : > { %1169 = vst.msk [vmem:[%s2334_s25 + $0x48] sm:$0xff] %vm1159_vm14, %v1126_v53  ;;  %v1222_v38 = vmul.f32 %v1126_v53, %v1126_v53  ;;  %v1193_v42 = vsel %vm1159_vm14, %v1126_v53, 0.0 }
 0x214   : > { %1168 = vst.msk [vmem:[%s2334_s25 + $0x40] sm:$0xff] %vm1159_vm14, %v1121_v12  ;;  %v1191_v48 = vsel %vm1159_vm14, %v1121_v12, 0.0  ;;  %v1221_v15 = vmul.f32 %v1121_v12, %v1121_v12 }
 0x215   : > { %v1192_v28 = vadd.f32 %v1191_v48, %v1190_v8  ;;  %v1246_v40 = vsel %vm1159_vm14, %v1222_v38, 0.0 }
 0x216   : > { %v1244_v30 = vsel %vm1159_vm14, %v1221_v15, 0.0 }
 0x217   : > { %v1245_v16 = vadd.f32 %v1244_v30, %v1243_v57  ;;  %v1194_v0 = vadd.f32 %v1193_v42, %v1192_v28 }
 0x219   : > { %v1247_v62 = vadd.f32 %v1246_v40, %v1245_v16 }
 0x230   : > { %v1523_v54 = vpop.f32.mrb[2].mxu1 }
 0x231   : > { %v1136_v18 = vadd.f32 %v1523_v54, %v2329_v61  ;;  %v1130_v56 = vpop.f32.mrb[3].mxu1 }
 0x232   : > { %v1131_v31 = vadd.f32 %v2329_v61, %v1130_v56 }
 0x233   : > { %1171 = vst.msk [vmem:[%s2334_s25 + $0x58] sm:$0xff] %vm1159_vm14, %v1136_v18  ;;  %v1224_v50 = vmul.f32 %v1136_v18, %v1136_v18  ;;  %v1197_v23 = vsel %vm1159_vm14, %v1136_v18, 0.0 }
 0x234   : > { %1170 = vst.msk [vmem:[%s2334_s25 + $0x50] sm:$0xff] %vm1159_vm14, %v1131_v31  ;;  %v1195_v17 = vsel %vm1159_vm14, %v1131_v31, 0.0  ;;  %v1223_v19 = vmul.f32 %v1131_v31, %v1131_v31 }
 0x235   : > { %v1196_v4 = vadd.f32 %v1195_v17, %v1194_v0  ;;  %v1250_v32 = vsel %vm1159_vm14, %v1224_v50, 0.0 }
 0x236   : > { %v1248_v24 = vsel %vm1159_vm14, %v1223_v19, 0.0 }
 0x237   : > { %v1249_v25 = vadd.f32 %v1248_v24, %v1247_v62  ;;  %v1198_v21 = vadd.f32 %v1197_v23, %v1196_v4 }
 0x239   : > { %v1251_v33 = vadd.f32 %v1250_v32, %v1249_v25 }
 0x250   : > { %v1526_v34 = vpop.f32.mrb[4].mxu1 }
 0x251   : > { %v1146_v35 = vadd.f32 %v1526_v34, %v2329_v61  ;;  %v1140_v43 = vpop.f32.mrb[5].mxu1 }
 0x252   : > { %v1141_v44 = vadd.f32 %v2329_v61, %v1140_v43 }
 0x253   : > { %1173 = vst.msk [vmem:[%s2334_s25 + $0x68] sm:$0xff] %vm1159_vm14, %v1146_v35  ;;  %v1226_v45 = vmul.f32 %v1146_v35, %v1146_v35  ;;  %v1201_v5 = vsel %vm1159_vm14, %v1146_v35, 0.0 }
 0x254   : > { %1172 = vst.msk [vmem:[%s2334_s25 + $0x60] sm:$0xff] %vm1159_vm14, %v1141_v44  ;;  %v1199_v46 = vsel %vm1159_vm14, %v1141_v44, 0.0  ;;  %v1225_v13 = vmul.f32 %v1141_v44, %v1141_v44 }
 0x255   : > { %v1200_v11 = vadd.f32 %v1199_v46, %v1198_v21  ;;  %v1254_v52 = vsel %vm1159_vm14, %v1226_v45, 0.0 }
 0x256   : > { %v1252_v27 = vsel %vm1159_vm14, %v1225_v13, 0.0 }
 0x257   : > { %v1253_v63 = vadd.f32 %v1252_v27, %v1251_v33  ;;  %v1202_v51 = vadd.f32 %v1201_v5, %v1200_v11 }
 0x259   : > { %v1255_v58 = vadd.f32 %v1254_v52, %v1253_v63 }
 0x25d   : > { %v1529_v1 = vpop.f32.mrb[6].mxu1 }
 0x25e   : > { %v1156_v36 = vadd.f32 %v1529_v1, %v2329_v61  ;;  %v1150_v22 = vpop.f32.mrb[7].mxu1 }
 0x25f   : > { %v1151_v41 = vadd.f32 %v2329_v61, %v1150_v22 }
 0x260   : > { %1175 = vst.msk [vmem:[%s2334_s25 + $0x78] sm:$0xff] %vm1159_vm14, %v1156_v36  ;;  %v1228_v14 = vmul.f32 %v1156_v36, %v1156_v36  ;;  %v1205_v29 = vsel %vm1159_vm14, %v1156_v36, 0.0 }
 0x261   : > { %1174 = vst.msk [vmem:[%s2334_s25 + $0x70] sm:$0xff] %vm1159_vm14, %v1151_v41  ;;  %v1203_v20 = vsel %vm1159_vm14, %v1151_v41, 0.0  ;;  %v1227_v39 = vmul.f32 %v1151_v41, %v1151_v41 }
 0x262   : > { %v1204_v6 = vadd.f32 %v1203_v20, %v1202_v51  ;;  %v1258_v3 = vsel %vm1159_vm14, %v1228_v14, 0.0 }
 0x263   : > { %v1256_v47 = vsel %vm1159_vm14, %v1227_v39, 0.0 }
 0x264   : > { %v1206_v49 = vadd.f32 %v1205_v29, %v1204_v6  ;;  %v1257_v60 = vadd.f32 %v1256_v47, %v1255_v58 }
 0x266   : > { %v1207_v61 = vrot.slane %v1206_v49, 4  ;;  %v1259_v26 = vadd.f32 %v1258_v3, %v1257_v60 }
 0x268   : > { %v1208_v55 = vadd.f32 %v1207_v61, %v1206_v49  ;;  %v1260_v7 = vrot.slane %v1259_v26, 4 }
 0x26a   : > { %v1209_v59 = vrot.slane %v1208_v55, 2  ;;  %v1261_v37 = vadd.f32 %v1260_v7, %v1259_v26 }
 0x26c   : > { %v1210_v8 = vadd.f32 %v1209_v59, %v1208_v55  ;;  %v1262_v9 = vrot.slane %v1261_v37, 2 }
 0x26e   : > { %v1211_v57 = vrot.slane %v1210_v8, 1  ;;  %v1263_v2 = vadd.f32 %v1262_v9, %v1261_v37 }
 0x270   : > { %v1264_v53 = vrot.slane %v1263_v2, 1  ;;  %v1212_v10 = vadd.f32 %v1211_v57, %v1210_v8 }
 0x272   : > { %v1265_v12 = vadd.f32 %v1264_v53, %v1263_v2 }
 0x274   : > { %v1267_v38 = vsel %vm1266_vm15, %v1212_v10, %v1265_v12 }
 0x275   : > { %1269 = vst.msk [vmem:[%s257_s10] sm:$0x3] %vm1268_vm0, %v1267_v38 }
 0x276 PF: > { %s15_s19 = sadd.s32 1, %s1663_s19   ;;  %s2441_s15 = smov %s1655_s17 }
 0x277   : > { %p12_p8 = scmp.ge.s32.totalorder %s15_s19, 6   ;;  %s2442_s16 = smov %s1659_s18 }
 0x278   : > { %s2443_s17 = smov %s2446_s20  ;;  %s2444_s18 = smov %s2450_s21 }
 0x279   :  { %14 = sbr.rel (!%p12_p8) target bundleno = 3 (0x3), region = 74 }

</bundles_post_ra>
